<compile_context>
chip_gen: v5e
topology: v5e:2x2
jax: 0.10.0
libtpu: 0.0.40
codegen_flags: <defaults>
</compile_context>

<pallas_src>
import jax
import jax.numpy as jnp
from jax.experimental import pallas as pl
from jax.experimental.pallas import tpu as pltpu

_EPS = 1e-5
_OUT_PAD = 128       # lane-dense padded logits width
_OUT_SUBLANES = 8    # sublane-padded output rows (output block = (1, 8, 128))


def _round_up(x, m):
    return (x + m - 1) // m * m


def _fold_conv_bn(w_oihw, bias, gamma, beta, mean, var, eps=_EPS):
    """Fold eval-mode BatchNorm into the conv weights.

    Returns:
      taps:  (KH*KW, Cin, Cout) with taps[i*KW+j, ci, co] = W[co, ci, i, j] * scale[co]
      shift: (1, Cout)          with shift = beta + (bias - mean) * scale
    """
    scale = gamma / jnp.sqrt(var + eps)
    cout, cin, kh, kw = w_oihw.shape
    taps = jnp.transpose(w_oihw, (2, 3, 1, 0)).reshape(kh * kw, cin, cout) * scale
    shift = beta + (bias - mean) * scale
    return taps.astype(jnp.float32), shift.reshape(1, cout).astype(jnp.float32)


@jax.jit
def simple_cnn_forward(params, x_nchw):
    N, cin, H, W = x_nchw.shape
    assert cin == 1 and H % 8 == 0 and W % 8 == 0, "expects 1 channel, H/W divisible by 8"

    # ---- static geometry (stride 1 convs with the PyTorch paddings) -----------
    KH1, KW1, PH1, PW1, C1 = 3, 5, 1, 2, 16
    KH2, KW2, PH2, PW2, C2 = 3, 5, 1, 2, 32
    KH3, KW3, PH3, PW3, C3 = 3, 3, 1, 1, 64
    H1, W1 = H, W                       # conv1 output spatial (== input)
    H2, W2 = H1 // 2, W1 // 2           # conv2 spatial (after pool1)
    H3, W3 = H2 // 2, W2 // 2           # conv3 spatial (after pool2)
    H4, W4 = H3 // 2, W3 // 2           # final pooled spatial (after pool3)

    WP1 = W1 + 2 * PW1                  # padded widths (row pitch in padded-row space)
    WP2 = W2 + 2 * PW2
    WP3 = W3 + 2 * PW3
    # rows needed so every tap slice [off : off + Hk*WPk] stays in bounds
    ROWS1 = _round_up((KH1 - 1) * WP1 + (KW1 - 1) + H1 * WP1, 8)
    ROWS2 = _round_up((KH2 - 1) * WP2 + (KW2 - 1) + H2 * WP2, 8)
    ROWS3 = _round_up((KH3 - 1) * WP3 + (KW3 - 1) + H3 * WP3, 8)

    FCH = params["fc1_w"].shape[0]      # 128
    num_classes = params["fc2_w"].shape[0]
    assert num_classes <= _OUT_PAD

    # ---- parameter prep: BN fold + layout permutes (one-time, host/XLA side) --
    g1, b1, m1, v1 = params["bn1"]
    w1_taps, s1 = _fold_conv_bn(params["conv1_w"], params["conv1_b"], g1, b1, m1, v1)
    w1_taps = w1_taps[:, 0, :]                           # (15, 16)   (Cin == 1)
    g2, b2, m2, v2 = params["bn2"]
    w2_taps, s2 = _fold_conv_bn(params["conv2_w"], params["conv2_b"], g2, b2, m2, v2)
    g3, b3, m3, v3 = params["bn3"]
    w3_taps, s3 = _fold_conv_bn(params["conv3_w"], params["conv3_b"], g3, b3, m3, v3)

    # fc1: permute rows from PyTorch NCHW flatten order (c, h, w) to per-position (h*W4+w, c)
    fc1_w = params["fc1_w"].T.reshape(C3, H4, W4, FCH)
    fc1_w = jnp.transpose(fc1_w, (1, 2, 0, 3)).reshape(H4 * W4, C3, FCH).astype(jnp.float32)
    fc1_b = params["fc1_b"].reshape(1, FCH).astype(jnp.float32)

    # fc2: pad output dim to 128 lanes (zero columns / zero bias beyond num_classes)
    fc2_w = jnp.zeros((FCH, _OUT_PAD), jnp.float32)
    fc2_w = fc2_w.at[:, :num_classes].set(params["fc2_w"].T.astype(jnp.float32))
    fc2_b = jnp.zeros((1, _OUT_PAD), jnp.float32)
    fc2_b = fc2_b.at[0, :num_classes].set(params["fc2_b"].astype(jnp.float32))

    # ---- input: zero-pad spatially, flatten to padded-row space, replicate to C1 lanes
    x = x_nchw[:, 0].astype(jnp.float32)
    xp = jnp.pad(x, ((0, 0), (PH1, PH1), (PW1, PW1)))            # (N, H+2, W+4)
    xr = xp.reshape(N, (H1 + 2 * PH1) * WP1, 1)
    xr = jnp.pad(xr, ((0, 0), (0, ROWS1 - xr.shape[1]), (0, 0)))
    xr = jnp.tile(xr, (1, 1, C1))                                # (N, ROWS1, C1)

    # ---------------------------- fused kernel --------------------------------
    def kernel(x_ref, w1_ref, s1_ref, w2_ref, s2_ref, w3_ref, s3_ref,
               fc1_ref, fb1_ref, fc2_ref, fb2_ref, o_ref,
               act1_ref, pad2_ref, act2_ref, pad3_ref, act3_ref):
        f32 = jnp.float32

        # conv1 + BN + ReLU (Cin = 1 -> lane-broadcast multiply-accumulate per tap)
        acc = jnp.zeros((H1 * WP1, C1), f32)
        for i in range(KH1):
            for j in range(KW1):
                off = i * WP1 + j
                t = i * KW1 + j
                acc = acc + x_ref[0, off:off + H1 * WP1, :] * w1_ref[t:t + 1, :]
        act1_ref[...] = jnp.maximum(acc + s1_ref[...], 0.0)

        # maxpool1 (2x2) fused with scatter into the zero-padded conv2 input
        pad2_ref[...] = jnp.zeros_like(pad2_ref)
        for k in range(H2):
            r0 = act1_ref[(2 * k) * WP1:(2 * k) * WP1 + W1, :]
            r1 = act1_ref[(2 * k + 1) * WP1:(2 * k + 1) * WP1 + W1, :]
            hrow = jnp.maximum(r0, r1)                           # (W1, C1)
            base = (k + PH2) * WP2 + PW2
            for wo in range(W2):
                pad2_ref[base + wo:base + wo + 1, :] = jnp.maximum(
                    hrow[2 * wo:2 * wo + 1, :], hrow[2 * wo + 1:2 * wo + 2, :])

        # conv2 + BN + ReLU (one MXU matmul per tap, f32 accumulate)
        acc = jnp.zeros((H2 * WP2, C2), f32)
        for i in range(KH2):
            for j in range(KW2):
                off = i * WP2 + j
                acc = acc + jnp.dot(pad2_ref[off:off + H2 * WP2, :],
                                    w2_ref[i * KW2 + j],
                                    preferred_element_type=f32)
        act2_ref[...] = jnp.maximum(acc + s2_ref[...], 0.0)

        # maxpool2 fused with scatter into the zero-padded conv3 input
        pad3_ref[...] = jnp.zeros_like(pad3_ref)
        for k in range(H3):
            r0 = act2_ref[(2 * k) * WP2:(2 * k) * WP2 + W2, :]
            r1 = act2_ref[(2 * k + 1) * WP2:(2 * k + 1) * WP2 + W2, :]
            hrow = jnp.maximum(r0, r1)                           # (W2, C2)
            base = (k + PH3) * WP3 + PW3
            for wo in range(W3):
                pad3_ref[base + wo:base + wo + 1, :] = jnp.maximum(
                    hrow[2 * wo:2 * wo + 1, :], hrow[2 * wo + 1:2 * wo + 2, :])

        # conv3 + BN + ReLU
        acc = jnp.zeros((H3 * WP3, C3), f32)
        for i in range(KH3):
            for j in range(KW3):
                off = i * WP3 + j
                acc = acc + jnp.dot(pad3_ref[off:off + H3 * WP3, :],
                                    w3_ref[i * KW3 + j],
                                    preferred_element_type=f32)
        act3_ref[...] = jnp.maximum(acc + s3_ref[...], 0.0)

        # maxpool3 fused directly into FC1 (one (1, C3) row per pooled position)
        h1 = jnp.zeros((1, FCH), f32)
        s_idx = 0
        for k in range(H4):
            r0 = act3_ref[(2 * k) * WP3:(2 * k) * WP3 + W3, :]
            r1 = act3_ref[(2 * k + 1) * WP3:(2 * k + 1) * WP3 + W3, :]
            hrow = jnp.maximum(r0, r1)                           # (W3, C3)
            for wo in range(W4):
                piece = jnp.maximum(hrow[2 * wo:2 * wo + 1, :],
                                    hrow[2 * wo + 1:2 * wo + 2, :])
                h1 = h1 + jnp.dot(piece, fc1_ref[s_idx], preferred_element_type=f32)
                s_idx += 1
        h1 = jnp.maximum(h1 + fb1_ref[...], 0.0)
        # TODO(synk): Dropout(0.6) is the identity in eval/inference mode (no RNG applied).
        logits = jnp.dot(h1, fc2_ref[...], preferred_element_type=f32) + fb2_ref[...]
        o_ref[0] = jnp.broadcast_to(logits, (_OUT_SUBLANES, _OUT_PAD))

    def full(shape):
        return pl.BlockSpec(shape, lambda n: (0,) * len(shape))

    out = pl.pallas_call(
        kernel,
        out_shape=jax.ShapeDtypeStruct((N, _OUT_SUBLANES, _OUT_PAD), jnp.float32),
        grid=(N,),
        in_specs=[
            pl.BlockSpec((1, ROWS1, C1), lambda n: (n, 0, 0)),   # padded input rows
            full((KH1 * KW1, C1)),                               # conv1 taps (BN-folded)
            full((1, C1)),                                       # conv1 shift
            full((KH2 * KW2, C1, C2)),                           # conv2 taps
            full((1, C2)),
            full((KH3 * KW3, C2, C3)),                           # conv3 taps
            full((1, C3)),
            full((H4 * W4, C3, FCH)),                            # fc1 (position-major)
            full((1, FCH)),
            full((FCH, _OUT_PAD)),                               # fc2 (padded to 128)
            full((1, _OUT_PAD)),
        ],
        out_specs=pl.BlockSpec((1, _OUT_SUBLANES, _OUT_PAD), lambda n: (n, 0, 0)),
        scratch_shapes=[
            pltpu.VMEM((H1 * WP1, C1), jnp.float32),   # conv1 activations (padded-row space)
            pltpu.VMEM((ROWS2, C1), jnp.float32),      # zero-padded conv2 input
            pltpu.VMEM((H2 * WP2, C2), jnp.float32),   # conv2 activations
            pltpu.VMEM((ROWS3, C2), jnp.float32),      # zero-padded conv3 input
            pltpu.VMEM((H3 * WP3, C3), jnp.float32),   # conv3 activations
        ],
        compiler_params=pltpu.CompilerParams(dimension_semantics=("parallel",)),
    )(xr, w1_taps, s1, w2_taps, s2, w3_taps, s3, fc1_w, fc1_b, fc2_w, fc2_b)

    return out[:, 0, :num_classes]


# --------------------------------------------------------------------------------
if __name__ == "__main__":
    num_mfcc_coeffs = 16
    fixed_length = 16
    num_classes = 10
    batch = 2

    key = jax.random.PRNGKey(0)
    ks = jax.random.split(key, 12)

    def rnd(k, shape, s=0.1):
        return s * jax.random.normal(k, shape, jnp.float32)

    def bn(c):
        return (jnp.full((c,), 1.05, jnp.float32),   # gamma
                jnp.full((c,), 0.02, jnp.float32),   # beta
                jnp.full((c,), 0.01, jnp.float32),   # running mean
                jnp.full((c,), 0.90, jnp.float32))   # running var

    flattened = 64 * (num_mfcc_coeffs // 8) * (fixed_length // 8)
    params = {
        # PyTorch layouts: Conv2d OIHW, Linear (out_features, in_features)
        "conv1_w": rnd(ks[0], (16, 1, 3, 5)), "conv1_b": rnd(ks[1], (16,)), "bn1": bn(16),
        "conv2_w": rnd(ks[2], (32, 16, 3, 5)), "conv2_b": rnd(ks[3], (32,)), "bn2": bn(32),
        "conv3_w": rnd(ks[4], (64, 32, 3, 3)), "conv3_b": rnd(ks[5], (64,)), "bn3": bn(64),
        "fc1_w": rnd(ks[6], (128, flattened)), "fc1_b": rnd(ks[7], (128,)),
        "fc2_w": rnd(ks[8], (num_classes, 128)), "fc2_b": rnd(ks[9], (num_classes,)),
    }

    x = jax.random.normal(ks[10], (batch, 1, num_mfcc_coeffs, fixed_length), jnp.float32)

    out = simple_cnn_forward(params, x)
    out = jax.block_until_ready(out)
    assert out.shape == (batch, num_classes), out.shape
    assert bool(jnp.all(jnp.isfinite(out)))
    print("KERNEL_OK")
</pallas_src>

<mosaic_0001>
module attributes {stable_mosaic.version = 11 : i64} {
  func.func @kernel(%arg0: i32, %arg1: memref<1x368x16xf32, #tpu.memory_space<vmem>>, %arg2: memref<15x16xf32, #tpu.memory_space<vmem>>, %arg3: memref<1x16xf32, #tpu.memory_space<vmem>>, %arg4: memref<15x16x32xf32, #tpu.memory_space<vmem>>, %arg5: memref<1x32xf32, #tpu.memory_space<vmem>>, %arg6: memref<9x32x64xf32, #tpu.memory_space<vmem>>, %arg7: memref<1x64xf32, #tpu.memory_space<vmem>>, %arg8: memref<4x64x128xf32, #tpu.memory_space<vmem>>, %arg9: memref<1x128xf32, #tpu.memory_space<vmem>>, %arg10: memref<128x128xf32, #tpu.memory_space<vmem>>, %arg11: memref<1x128xf32, #tpu.memory_space<vmem>>, %arg12: memref<1x8x128xf32, #tpu.memory_space<vmem>>, %arg13: memref<320x16xf32, #tpu.memory_space<vmem>>, %arg14: memref<128x16xf32, #tpu.memory_space<vmem>>, %arg15: memref<96x32xf32, #tpu.memory_space<vmem>>, %arg16: memref<40x32xf32, #tpu.memory_space<vmem>>, %arg17: memref<24x64xf32, #tpu.memory_space<vmem>>) attributes {dimension_semantics = [#tpu.dimension_semantics<parallel>], iteration_bounds = array<i64: 2>, scalar_prefetch = 0 : i64, scratch_operands = 5 : i64, tpu.core_type = #tpu.core_type<tc>, window_params = [{transform_indices = @transform_0, window_bounds = array<i64: 1, 368, 16>}, {pipeline_mode = #tpu.pipeline_mode<synchronous>, transform_indices = @transform_1, window_bounds = array<i64: 15, 16>}, {pipeline_mode = #tpu.pipeline_mode<synchronous>, transform_indices = @transform_2, window_bounds = array<i64: 1, 16>}, {pipeline_mode = #tpu.pipeline_mode<synchronous>, transform_indices = @transform_3, window_bounds = array<i64: 15, 16, 32>}, {pipeline_mode = #tpu.pipeline_mode<synchronous>, transform_indices = @transform_4, window_bounds = array<i64: 1, 32>}, {pipeline_mode = #tpu.pipeline_mode<synchronous>, transform_indices = @transform_5, window_bounds = array<i64: 9, 32, 64>}, {pipeline_mode = #tpu.pipeline_mode<synchronous>, transform_indices = @transform_6, window_bounds = array<i64: 1, 64>}, {pipeline_mode = #tpu.pipeline_mode<synchronous>, transform_indices = @transform_7, window_bounds = array<i64: 4, 64, 128>}, {pipeline_mode = #tpu.pipeline_mode<synchronous>, transform_indices = @transform_8, window_bounds = array<i64: 1, 128>}, {pipeline_mode = #tpu.pipeline_mode<synchronous>, transform_indices = @transform_9, window_bounds = array<i64: 128, 128>}, {pipeline_mode = #tpu.pipeline_mode<synchronous>, transform_indices = @transform_10, window_bounds = array<i64: 1, 128>}, {transform_indices = @transform_11, window_bounds = array<i64: 1, 8, 128>}]} {
    %cst = arith.constant 0.000000e+00 : f32
    %0 = vector.broadcast %cst : f32 to vector<320x16xf32>
    %c0 = arith.constant 0 : index
    %c0_0 = arith.constant 0 : index
    %c0_1 = arith.constant 0 : index
    %1 = vector.load %arg1[%c0, %c0_0, %c0_1] : memref<1x368x16xf32, #tpu.memory_space<vmem>>, vector<1x320x16xf32>
    %2 = vector.shape_cast %1 : vector<1x320x16xf32> to vector<320x16xf32>
    %c0_2 = arith.constant 0 : index
    %c0_3 = arith.constant 0 : index
    %3 = vector.load %arg2[%c0_2, %c0_3] : memref<15x16xf32, #tpu.memory_space<vmem>>, vector<1x16xf32>
    %4 = vector.broadcast %3 : vector<1x16xf32> to vector<320x16xf32>
    %5 = arith.mulf %2, %4 : vector<320x16xf32>
    %6 = arith.addf %0, %5 : vector<320x16xf32>
    %c0_4 = arith.constant 0 : index
    %c1 = arith.constant 1 : index
    %c0_5 = arith.constant 0 : index
    %7 = vector.load %arg1[%c0_4, %c1, %c0_5] : memref<1x368x16xf32, #tpu.memory_space<vmem>>, vector<1x320x16xf32>
    %8 = vector.shape_cast %7 : vector<1x320x16xf32> to vector<320x16xf32>
    %c1_6 = arith.constant 1 : index
    %c0_7 = arith.constant 0 : index
    %9 = vector.load %arg2[%c1_6, %c0_7] : memref<15x16xf32, #tpu.memory_space<vmem>>, vector<1x16xf32>
    %10 = vector.broadcast %9 : vector<1x16xf32> to vector<320x16xf32>
    %11 = arith.mulf %8, %10 : vector<320x16xf32>
    %12 = arith.addf %6, %11 : vector<320x16xf32>
    %c0_8 = arith.constant 0 : index
    %c2 = arith.constant 2 : index
    %c0_9 = arith.constant 0 : index
    %13 = vector.load %arg1[%c0_8, %c2, %c0_9] : memref<1x368x16xf32, #tpu.memory_space<vmem>>, vector<1x320x16xf32>
    %14 = vector.shape_cast %13 : vector<1x320x16xf32> to vector<320x16xf32>
    %c2_10 = arith.constant 2 : index
    %c0_11 = arith.constant 0 : index
    %15 = vector.load %arg2[%c2_10, %c0_11] : memref<15x16xf32, #tpu.memory_space<vmem>>, vector<1x16xf32>
    %16 = vector.broadcast %15 : vector<1x16xf32> to vector<320x16xf32>
    %17 = arith.mulf %14, %16 : vector<320x16xf32>
    %18 = arith.addf %12, %17 : vector<320x16xf32>
    %c0_12 = arith.constant 0 : index
    %c3 = arith.constant 3 : index
    %c0_13 = arith.constant 0 : index
    %19 = vector.load %arg1[%c0_12, %c3, %c0_13] : memref<1x368x16xf32, #tpu.memory_space<vmem>>, vector<1x320x16xf32>
    %20 = vector.shape_cast %19 : vector<1x320x16xf32> to vector<320x16xf32>
    %c3_14 = arith.constant 3 : index
    %c0_15 = arith.constant 0 : index
    %21 = vector.load %arg2[%c3_14, %c0_15] : memref<15x16xf32, #tpu.memory_space<vmem>>, vector<1x16xf32>
    %22 = vector.broadcast %21 : vector<1x16xf32> to vector<320x16xf32>
    %23 = arith.mulf %20, %22 : vector<320x16xf32>
    %24 = arith.addf %18, %23 : vector<320x16xf32>
    %c0_16 = arith.constant 0 : index
    %c4 = arith.constant 4 : index
    %c0_17 = arith.constant 0 : index
    %25 = vector.load %arg1[%c0_16, %c4, %c0_17] : memref<1x368x16xf32, #tpu.memory_space<vmem>>, vector<1x320x16xf32>
    %26 = vector.shape_cast %25 : vector<1x320x16xf32> to vector<320x16xf32>
    %c4_18 = arith.constant 4 : index
    %c0_19 = arith.constant 0 : index
    %27 = vector.load %arg2[%c4_18, %c0_19] : memref<15x16xf32, #tpu.memory_space<vmem>>, vector<1x16xf32>
    %28 = vector.broadcast %27 : vector<1x16xf32> to vector<320x16xf32>
    %29 = arith.mulf %26, %28 : vector<320x16xf32>
    %30 = arith.addf %24, %29 : vector<320x16xf32>
    %c0_20 = arith.constant 0 : index
    %c20 = arith.constant 20 : index
    %c0_21 = arith.constant 0 : index
    %31 = vector.load %arg1[%c0_20, %c20, %c0_21] : memref<1x368x16xf32, #tpu.memory_space<vmem>>, vector<1x320x16xf32>
    %32 = vector.shape_cast %31 : vector<1x320x16xf32> to vector<320x16xf32>
    %c5 = arith.constant 5 : index
    %c0_22 = arith.constant 0 : index
    %33 = vector.load %arg2[%c5, %c0_22] : memref<15x16xf32, #tpu.memory_space<vmem>>, vector<1x16xf32>
    %34 = vector.broadcast %33 : vector<1x16xf32> to vector<320x16xf32>
    %35 = arith.mulf %32, %34 : vector<320x16xf32>
    %36 = arith.addf %30, %35 : vector<320x16xf32>
    %c0_23 = arith.constant 0 : index
    %c21 = arith.constant 21 : index
    %c0_24 = arith.constant 0 : index
    %37 = vector.load %arg1[%c0_23, %c21, %c0_24] : memref<1x368x16xf32, #tpu.memory_space<vmem>>, vector<1x320x16xf32>
    %38 = vector.shape_cast %37 : vector<1x320x16xf32> to vector<320x16xf32>
    %c6 = arith.constant 6 : index
    %c0_25 = arith.constant 0 : index
    %39 = vector.load %arg2[%c6, %c0_25] : memref<15x16xf32, #tpu.memory_space<vmem>>, vector<1x16xf32>
    %40 = vector.broadcast %39 : vector<1x16xf32> to vector<320x16xf32>
    %41 = arith.mulf %38, %40 : vector<320x16xf32>
    %42 = arith.addf %36, %41 : vector<320x16xf32>
    %c0_26 = arith.constant 0 : index
    %c22 = arith.constant 22 : index
    %c0_27 = arith.constant 0 : index
    %43 = vector.load %arg1[%c0_26, %c22, %c0_27] : memref<1x368x16xf32, #tpu.memory_space<vmem>>, vector<1x320x16xf32>
    %44 = vector.shape_cast %43 : vector<1x320x16xf32> to vector<320x16xf32>
    %c7 = arith.constant 7 : index
    %c0_28 = arith.constant 0 : index
    %45 = vector.load %arg2[%c7, %c0_28] : memref<15x16xf32, #tpu.memory_space<vmem>>, vector<1x16xf32>
    %46 = vector.broadcast %45 : vector<1x16xf32> to vector<320x16xf32>
    %47 = arith.mulf %44, %46 : vector<320x16xf32>
    %48 = arith.addf %42, %47 : vector<320x16xf32>
    %c0_29 = arith.constant 0 : index
    %c23 = arith.constant 23 : index
    %c0_30 = arith.constant 0 : index
    %49 = vector.load %arg1[%c0_29, %c23, %c0_30] : memref<1x368x16xf32, #tpu.memory_space<vmem>>, vector<1x320x16xf32>
    %50 = vector.shape_cast %49 : vector<1x320x16xf32> to vector<320x16xf32>
    %c8 = arith.constant 8 : index
    %c0_31 = arith.constant 0 : index
    %51 = vector.load %arg2[%c8, %c0_31] : memref<15x16xf32, #tpu.memory_space<vmem>>, vector<1x16xf32>
    %52 = vector.broadcast %51 : vector<1x16xf32> to vector<320x16xf32>
    %53 = arith.mulf %50, %52 : vector<320x16xf32>
    %54 = arith.addf %48, %53 : vector<320x16xf32>
    %c0_32 = arith.constant 0 : index
    %c24 = arith.constant 24 : index
    %c0_33 = arith.constant 0 : index
    %55 = vector.load %arg1[%c0_32, %c24, %c0_33] : memref<1x368x16xf32, #tpu.memory_space<vmem>>, vector<1x320x16xf32>
    %56 = vector.shape_cast %55 : vector<1x320x16xf32> to vector<320x16xf32>
    %c9 = arith.constant 9 : index
    %c0_34 = arith.constant 0 : index
    %57 = vector.load %arg2[%c9, %c0_34] : memref<15x16xf32, #tpu.memory_space<vmem>>, vector<1x16xf32>
    %58 = vector.broadcast %57 : vector<1x16xf32> to vector<320x16xf32>
    %59 = arith.mulf %56, %58 : vector<320x16xf32>
    %60 = arith.addf %54, %59 : vector<320x16xf32>
    %c0_35 = arith.constant 0 : index
    %c40 = arith.constant 40 : index
    %c0_36 = arith.constant 0 : index
    %61 = vector.load %arg1[%c0_35, %c40, %c0_36] : memref<1x368x16xf32, #tpu.memory_space<vmem>>, vector<1x320x16xf32>
    %62 = vector.shape_cast %61 : vector<1x320x16xf32> to vector<320x16xf32>
    %c10 = arith.constant 10 : index
    %c0_37 = arith.constant 0 : index
    %63 = vector.load %arg2[%c10, %c0_37] : memref<15x16xf32, #tpu.memory_space<vmem>>, vector<1x16xf32>
    %64 = vector.broadcast %63 : vector<1x16xf32> to vector<320x16xf32>
    %65 = arith.mulf %62, %64 : vector<320x16xf32>
    %66 = arith.addf %60, %65 : vector<320x16xf32>
    %c0_38 = arith.constant 0 : index
    %c41 = arith.constant 41 : index
    %c0_39 = arith.constant 0 : index
    %67 = vector.load %arg1[%c0_38, %c41, %c0_39] : memref<1x368x16xf32, #tpu.memory_space<vmem>>, vector<1x320x16xf32>
    %68 = vector.shape_cast %67 : vector<1x320x16xf32> to vector<320x16xf32>
    %c11 = arith.constant 11 : index
    %c0_40 = arith.constant 0 : index
    %69 = vector.load %arg2[%c11, %c0_40] : memref<15x16xf32, #tpu.memory_space<vmem>>, vector<1x16xf32>
    %70 = vector.broadcast %69 : vector<1x16xf32> to vector<320x16xf32>
    %71 = arith.mulf %68, %70 : vector<320x16xf32>
    %72 = arith.addf %66, %71 : vector<320x16xf32>
    %c0_41 = arith.constant 0 : index
    %c42 = arith.constant 42 : index
    %c0_42 = arith.constant 0 : index
    %73 = vector.load %arg1[%c0_41, %c42, %c0_42] : memref<1x368x16xf32, #tpu.memory_space<vmem>>, vector<1x320x16xf32>
    %74 = vector.shape_cast %73 : vector<1x320x16xf32> to vector<320x16xf32>
    %c12 = arith.constant 12 : index
    %c0_43 = arith.constant 0 : index
    %75 = vector.load %arg2[%c12, %c0_43] : memref<15x16xf32, #tpu.memory_space<vmem>>, vector<1x16xf32>
    %76 = vector.broadcast %75 : vector<1x16xf32> to vector<320x16xf32>
    %77 = arith.mulf %74, %76 : vector<320x16xf32>
    %78 = arith.addf %72, %77 : vector<320x16xf32>
    %c0_44 = arith.constant 0 : index
    %c43 = arith.constant 43 : index
    %c0_45 = arith.constant 0 : index
    %79 = vector.load %arg1[%c0_44, %c43, %c0_45] : memref<1x368x16xf32, #tpu.memory_space<vmem>>, vector<1x320x16xf32>
    %80 = vector.shape_cast %79 : vector<1x320x16xf32> to vector<320x16xf32>
    %c13 = arith.constant 13 : index
    %c0_46 = arith.constant 0 : index
    %81 = vector.load %arg2[%c13, %c0_46] : memref<15x16xf32, #tpu.memory_space<vmem>>, vector<1x16xf32>
    %82 = vector.broadcast %81 : vector<1x16xf32> to vector<320x16xf32>
    %83 = arith.mulf %80, %82 : vector<320x16xf32>
    %84 = arith.addf %78, %83 : vector<320x16xf32>
    %c0_47 = arith.constant 0 : index
    %c44 = arith.constant 44 : index
    %c0_48 = arith.constant 0 : index
    %85 = vector.load %arg1[%c0_47, %c44, %c0_48] : memref<1x368x16xf32, #tpu.memory_space<vmem>>, vector<1x320x16xf32>
    %86 = vector.shape_cast %85 : vector<1x320x16xf32> to vector<320x16xf32>
    %c14 = arith.constant 14 : index
    %c0_49 = arith.constant 0 : index
    %87 = vector.load %arg2[%c14, %c0_49] : memref<15x16xf32, #tpu.memory_space<vmem>>, vector<1x16xf32>
    %88 = vector.broadcast %87 : vector<1x16xf32> to vector<320x16xf32>
    %89 = arith.mulf %86, %88 : vector<320x16xf32>
    %90 = arith.addf %84, %89 : vector<320x16xf32>
    %c0_50 = arith.constant 0 : index
    %c0_51 = arith.constant 0 : index
    %91 = vector.load %arg3[%c0_50, %c0_51] : memref<1x16xf32, #tpu.memory_space<vmem>>, vector<1x16xf32>
    %92 = vector.broadcast %91 : vector<1x16xf32> to vector<320x16xf32>
    %93 = arith.addf %90, %92 : vector<320x16xf32>
    %cst_52 = arith.constant 0.000000e+00 : f32
    %94 = vector.broadcast %cst_52 : f32 to vector<320x16xf32>
    %95 = arith.maximumf %93, %94 : vector<320x16xf32>
    %c0_53 = arith.constant 0 : index
    %c0_54 = arith.constant 0 : index
    %96 = vector.load %arg13[%c0_53, %c0_54] : memref<320x16xf32, #tpu.memory_space<vmem>>, vector<320x16xf32>
    tpu.vector_store %arg13[%c0_53, %c0_54], %95 {strides = array<i32>} : memref<320x16xf32, #tpu.memory_space<vmem>>, vector<320x16xf32>,
    %cst_55 = arith.constant 0.000000e+00 : f32
    %97 = vector.broadcast %cst_55 : f32 to vector<128x16xf32>
    %c0_56 = arith.constant 0 : index
    %c0_57 = arith.constant 0 : index
    %98 = vector.load %arg14[%c0_56, %c0_57] : memref<128x16xf32, #tpu.memory_space<vmem>>, vector<128x16xf32>
    tpu.vector_store %arg14[%c0_56, %c0_57], %97 {strides = array<i32>} : memref<128x16xf32, #tpu.memory_space<vmem>>, vector<128x16xf32>,
    %c0_58 = arith.constant 0 : index
    %c0_59 = arith.constant 0 : index
    %99 = vector.load %arg13[%c0_58, %c0_59] : memref<320x16xf32, #tpu.memory_space<vmem>>, vector<16x16xf32>
    %c20_60 = arith.constant 20 : index
    %c0_61 = arith.constant 0 : index
    %100 = vector.load %arg13[%c20_60, %c0_61] : memref<320x16xf32, #tpu.memory_space<vmem>>, vector<16x16xf32>
    %101 = arith.maximumf %99, %100 : vector<16x16xf32>
    %102 = vector.extract_strided_slice %101 {offsets = [0, 0], sizes = [1, 16], strides = [1, 1]} : vector<16x16xf32> to vector<1x16xf32>
    %103 = vector.extract_strided_slice %101 {offsets = [1, 0], sizes = [1, 16], strides = [1, 1]} : vector<16x16xf32> to vector<1x16xf32>
    %104 = arith.maximumf %102, %103 : vector<1x16xf32>
    %c14_62 = arith.constant 14 : index
    %c0_63 = arith.constant 0 : index
    %105 = vector.load %arg14[%c14_62, %c0_63] : memref<128x16xf32, #tpu.memory_space<vmem>>, vector<1x16xf32>
    tpu.vector_store %arg14[%c14_62, %c0_63], %104 {strides = array<i32>} : memref<128x16xf32, #tpu.memory_space<vmem>>, vector<1x16xf32>,
    %106 = vector.extract_strided_slice %101 {offsets = [2, 0], sizes = [1, 16], strides = [1, 1]} : vector<16x16xf32> to vector<1x16xf32>
    %107 = vector.extract_strided_slice %101 {offsets = [3, 0], sizes = [1, 16], strides = [1, 1]} : vector<16x16xf32> to vector<1x16xf32>
    %108 = arith.maximumf %106, %107 : vector<1x16xf32>
    %c15 = arith.constant 15 : index
    %c0_64 = arith.constant 0 : index
    %109 = vector.load %arg14[%c15, %c0_64] : memref<128x16xf32, #tpu.memory_space<vmem>>, vector<1x16xf32>
    tpu.vector_store %arg14[%c15, %c0_64], %108 {strides = array<i32>} : memref<128x16xf32, #tpu.memory_space<vmem>>, vector<1x16xf32>,
    %110 = vector.extract_strided_slice %101 {offsets = [4, 0], sizes = [1, 16], strides = [1, 1]} : vector<16x16xf32> to vector<1x16xf32>
    %111 = vector.extract_strided_slice %101 {offsets = [5, 0], sizes = [1, 16], strides = [1, 1]} : vector<16x16xf32> to vector<1x16xf32>
    %112 = arith.maximumf %110, %111 : vector<1x16xf32>
    %c16 = arith.constant 16 : index
    %c0_65 = arith.constant 0 : index
    %113 = vector.load %arg14[%c16, %c0_65] : memref<128x16xf32, #tpu.memory_space<vmem>>, vector<1x16xf32>
    tpu.vector_store %arg14[%c16, %c0_65], %112 {strides = array<i32>} : memref<128x16xf32, #tpu.memory_space<vmem>>, vector<1x16xf32>,
    %114 = vector.extract_strided_slice %101 {offsets = [6, 0], sizes = [1, 16], strides = [1, 1]} : vector<16x16xf32> to vector<1x16xf32>
    %115 = vector.extract_strided_slice %101 {offsets = [7, 0], sizes = [1, 16], strides = [1, 1]} : vector<16x16xf32> to vector<1x16xf32>
    %116 = arith.maximumf %114, %115 : vector<1x16xf32>
    %c17 = arith.constant 17 : index
    %c0_66 = arith.constant 0 : index
    %117 = vector.load %arg14[%c17, %c0_66] : memref<128x16xf32, #tpu.memory_space<vmem>>, vector<1x16xf32>
    tpu.vector_store %arg14[%c17, %c0_66], %116 {strides = array<i32>} : memref<128x16xf32, #tpu.memory_space<vmem>>, vector<1x16xf32>,
    %118 = vector.extract_strided_slice %101 {offsets = [8, 0], sizes = [1, 16], strides = [1, 1]} : vector<16x16xf32> to vector<1x16xf32>
    %119 = vector.extract_strided_slice %101 {offsets = [9, 0], sizes = [1, 16], strides = [1, 1]} : vector<16x16xf32> to vector<1x16xf32>
    %120 = arith.maximumf %118, %119 : vector<1x16xf32>
    %c18 = arith.constant 18 : index
    %c0_67 = arith.constant 0 : index
    %121 = vector.load %arg14[%c18, %c0_67] : memref<128x16xf32, #tpu.memory_space<vmem>>, vector<1x16xf32>
    tpu.vector_store %arg14[%c18, %c0_67], %120 {strides = array<i32>} : memref<128x16xf32, #tpu.memory_space<vmem>>, vector<1x16xf32>,
    %122 = vector.extract_strided_slice %101 {offsets = [10, 0], sizes = [1, 16], strides = [1, 1]} : vector<16x16xf32> to vector<1x16xf32>
    %123 = vector.extract_strided_slice %101 {offsets = [11, 0], sizes = [1, 16], strides = [1, 1]} : vector<16x16xf32> to vector<1x16xf32>
    %124 = arith.maximumf %122, %123 : vector<1x16xf32>
    %c19 = arith.constant 19 : index
    %c0_68 = arith.constant 0 : index
    %125 = vector.load %arg14[%c19, %c0_68] : memref<128x16xf32, #tpu.memory_space<vmem>>, vector<1x16xf32>
    tpu.vector_store %arg14[%c19, %c0_68], %124 {strides = array<i32>} : memref<128x16xf32, #tpu.memory_space<vmem>>, vector<1x16xf32>,
    %126 = vector.extract_strided_slice %101 {offsets = [12, 0], sizes = [1, 16], strides = [1, 1]} : vector<16x16xf32> to vector<1x16xf32>
    %127 = vector.extract_strided_slice %101 {offsets = [13, 0], sizes = [1, 16], strides = [1, 1]} : vector<16x16xf32> to vector<1x16xf32>
    %128 = arith.maximumf %126, %127 : vector<1x16xf32>
    %c20_69 = arith.constant 20 : index
    %c0_70 = arith.constant 0 : index
    %129 = vector.load %arg14[%c20_69, %c0_70] : memref<128x16xf32, #tpu.memory_space<vmem>>, vector<1x16xf32>
    tpu.vector_store %arg14[%c20_69, %c0_70], %128 {strides = array<i32>} : memref<128x16xf32, #tpu.memory_space<vmem>>, vector<1x16xf32>,
    %130 = vector.extract_strided_slice %101 {offsets = [14, 0], sizes = [1, 16], strides = [1, 1]} : vector<16x16xf32> to vector<1x16xf32>
    %131 = vector.extract_strided_slice %101 {offsets = [15, 0], sizes = [1, 16], strides = [1, 1]} : vector<16x16xf32> to vector<1x16xf32>
    %132 = arith.maximumf %130, %131 : vector<1x16xf32>
    %c21_71 = arith.constant 21 : index
    %c0_72 = arith.constant 0 : index
    %133 = vector.load %arg14[%c21_71, %c0_72] : memref<128x16xf32, #tpu.memory_space<vmem>>, vector<1x16xf32>
    tpu.vector_store %arg14[%c21_71, %c0_72], %132 {strides = array<i32>} : memref<128x16xf32, #tpu.memory_space<vmem>>, vector<1x16xf32>,
    %c40_73 = arith.constant 40 : index
    %c0_74 = arith.constant 0 : index
    %134 = vector.load %arg13[%c40_73, %c0_74] : memref<320x16xf32, #tpu.memory_space<vmem>>, vector<16x16xf32>
    %c60 = arith.constant 60 : index
    %c0_75 = arith.constant 0 : index
    %135 = vector.load %arg13[%c60, %c0_75] : memref<320x16xf32, #tpu.memory_space<vmem>>, vector<16x16xf32>
    %136 = arith.maximumf %134, %135 : vector<16x16xf32>
    %137 = vector.extract_strided_slice %136 {offsets = [0, 0], sizes = [1, 16], strides = [1, 1]} : vector<16x16xf32> to vector<1x16xf32>
    %138 = vector.extract_strided_slice %136 {offsets = [1, 0], sizes = [1, 16], strides = [1, 1]} : vector<16x16xf32> to vector<1x16xf32>
    %139 = arith.maximumf %137, %138 : vector<1x16xf32>
    %c26 = arith.constant 26 : index
    %c0_76 = arith.constant 0 : index
    %140 = vector.load %arg14[%c26, %c0_76] : memref<128x16xf32, #tpu.memory_space<vmem>>, vector<1x16xf32>
    tpu.vector_store %arg14[%c26, %c0_76], %139 {strides = array<i32>} : memref<128x16xf32, #tpu.memory_space<vmem>>, vector<1x16xf32>,
    %141 = vector.extract_strided_slice %136 {offsets = [2, 0], sizes = [1, 16], strides = [1, 1]} : vector<16x16xf32> to vector<1x16xf32>
    %142 = vector.extract_strided_slice %136 {offsets = [3, 0], sizes = [1, 16], strides = [1, 1]} : vector<16x16xf32> to vector<1x16xf32>
    %143 = arith.maximumf %141, %142 : vector<1x16xf32>
    %c27 = arith.constant 27 : index
    %c0_77 = arith.constant 0 : index
    %144 = vector.load %arg14[%c27, %c0_77] : memref<128x16xf32, #tpu.memory_space<vmem>>, vector<1x16xf32>
    tpu.vector_store %arg14[%c27, %c0_77], %143 {strides = array<i32>} : memref<128x16xf32, #tpu.memory_space<vmem>>, vector<1x16xf32>,
    %145 = vector.extract_strided_slice %136 {offsets = [4, 0], sizes = [1, 16], strides = [1, 1]} : vector<16x16xf32> to vector<1x16xf32>
    %146 = vector.extract_strided_slice %136 {offsets = [5, 0], sizes = [1, 16], strides = [1, 1]} : vector<16x16xf32> to vector<1x16xf32>
    %147 = arith.maximumf %145, %146 : vector<1x16xf32>
    %c28 = arith.constant 28 : index
    %c0_78 = arith.constant 0 : index
    %148 = vector.load %arg14[%c28, %c0_78] : memref<128x16xf32, #tpu.memory_space<vmem>>, vector<1x16xf32>
    tpu.vector_store %arg14[%c28, %c0_78], %147 {strides = array<i32>} : memref<128x16xf32, #tpu.memory_space<vmem>>, vector<1x16xf32>,
    %149 = vector.extract_strided_slice %136 {offsets = [6, 0], sizes = [1, 16], strides = [1, 1]} : vector<16x16xf32> to vector<1x16xf32>
    %150 = vector.extract_strided_slice %136 {offsets = [7, 0], sizes = [1, 16], strides = [1, 1]} : vector<16x16xf32> to vector<1x16xf32>
    %151 = arith.maximumf %149, %150 : vector<1x16xf32>
    %c29 = arith.constant 29 : index
    %c0_79 = arith.constant 0 : index
    %152 = vector.load %arg14[%c29, %c0_79] : memref<128x16xf32, #tpu.memory_space<vmem>>, vector<1x16xf32>
    tpu.vector_store %arg14[%c29, %c0_79], %151 {strides = array<i32>} : memref<128x16xf32, #tpu.memory_space<vmem>>, vector<1x16xf32>,
    %153 = vector.extract_strided_slice %136 {offsets = [8, 0], sizes = [1, 16], strides = [1, 1]} : vector<16x16xf32> to vector<1x16xf32>
    %154 = vector.extract_strided_slice %136 {offsets = [9, 0], sizes = [1, 16], strides = [1, 1]} : vector<16x16xf32> to vector<1x16xf32>
    %155 = arith.maximumf %153, %154 : vector<1x16xf32>
    %c30 = arith.constant 30 : index
    %c0_80 = arith.constant 0 : index
    %156 = vector.load %arg14[%c30, %c0_80] : memref<128x16xf32, #tpu.memory_space<vmem>>, vector<1x16xf32>
    tpu.vector_store %arg14[%c30, %c0_80], %155 {strides = array<i32>} : memref<128x16xf32, #tpu.memory_space<vmem>>, vector<1x16xf32>,
    %157 = vector.extract_strided_slice %136 {offsets = [10, 0], sizes = [1, 16], strides = [1, 1]} : vector<16x16xf32> to vector<1x16xf32>
    %158 = vector.extract_strided_slice %136 {offsets = [11, 0], sizes = [1, 16], strides = [1, 1]} : vector<16x16xf32> to vector<1x16xf32>
    %159 = arith.maximumf %157, %158 : vector<1x16xf32>
    %c31 = arith.constant 31 : index
    %c0_81 = arith.constant 0 : index
    %160 = vector.load %arg14[%c31, %c0_81] : memref<128x16xf32, #tpu.memory_space<vmem>>, vector<1x16xf32>
    tpu.vector_store %arg14[%c31, %c0_81], %159 {strides = array<i32>} : memref<128x16xf32, #tpu.memory_space<vmem>>, vector<1x16xf32>,
    %161 = vector.extract_strided_slice %136 {offsets = [12, 0], sizes = [1, 16], strides = [1, 1]} : vector<16x16xf32> to vector<1x16xf32>
    %162 = vector.extract_strided_slice %136 {offsets = [13, 0], sizes = [1, 16], strides = [1, 1]} : vector<16x16xf32> to vector<1x16xf32>
    %163 = arith.maximumf %161, %162 : vector<1x16xf32>
    %c32 = arith.constant 32 : index
    %c0_82 = arith.constant 0 : index
    %164 = vector.load %arg14[%c32, %c0_82] : memref<128x16xf32, #tpu.memory_space<vmem>>, vector<1x16xf32>
    tpu.vector_store %arg14[%c32, %c0_82], %163 {strides = array<i32>} : memref<128x16xf32, #tpu.memory_space<vmem>>, vector<1x16xf32>,
    %165 = vector.extract_strided_slice %136 {offsets = [14, 0], sizes = [1, 16], strides = [1, 1]} : vector<16x16xf32> to vector<1x16xf32>
    %166 = vector.extract_strided_slice %136 {offsets = [15, 0], sizes = [1, 16], strides = [1, 1]} : vector<16x16xf32> to vector<1x16xf32>
    %167 = arith.maximumf %165, %166 : vector<1x16xf32>
    %c33 = arith.constant 33 : index
    %c0_83 = arith.constant 0 : index
    %168 = vector.load %arg14[%c33, %c0_83] : memref<128x16xf32, #tpu.memory_space<vmem>>, vector<1x16xf32>
    tpu.vector_store %arg14[%c33, %c0_83], %167 {strides = array<i32>} : memref<128x16xf32, #tpu.memory_space<vmem>>, vector<1x16xf32>,
    %c80 = arith.constant 80 : index
    %c0_84 = arith.constant 0 : index
    %169 = vector.load %arg13[%c80, %c0_84] : memref<320x16xf32, #tpu.memory_space<vmem>>, vector<16x16xf32>
    %c100 = arith.constant 100 : index
    %c0_85 = arith.constant 0 : index
    %170 = vector.load %arg13[%c100, %c0_85] : memref<320x16xf32, #tpu.memory_space<vmem>>, vector<16x16xf32>
    %171 = arith.maximumf %169, %170 : vector<16x16xf32>
    %172 = vector.extract_strided_slice %171 {offsets = [0, 0], sizes = [1, 16], strides = [1, 1]} : vector<16x16xf32> to vector<1x16xf32>
    %173 = vector.extract_strided_slice %171 {offsets = [1, 0], sizes = [1, 16], strides = [1, 1]} : vector<16x16xf32> to vector<1x16xf32>
    %174 = arith.maximumf %172, %173 : vector<1x16xf32>
    %c38 = arith.constant 38 : index
    %c0_86 = arith.constant 0 : index
    %175 = vector.load %arg14[%c38, %c0_86] : memref<128x16xf32, #tpu.memory_space<vmem>>, vector<1x16xf32>
    tpu.vector_store %arg14[%c38, %c0_86], %174 {strides = array<i32>} : memref<128x16xf32, #tpu.memory_space<vmem>>, vector<1x16xf32>,
    %176 = vector.extract_strided_slice %171 {offsets = [2, 0], sizes = [1, 16], strides = [1, 1]} : vector<16x16xf32> to vector<1x16xf32>
    %177 = vector.extract_strided_slice %171 {offsets = [3, 0], sizes = [1, 16], strides = [1, 1]} : vector<16x16xf32> to vector<1x16xf32>
    %178 = arith.maximumf %176, %177 : vector<1x16xf32>
    %c39 = arith.constant 39 : index
    %c0_87 = arith.constant 0 : index
    %179 = vector.load %arg14[%c39, %c0_87] : memref<128x16xf32, #tpu.memory_space<vmem>>, vector<1x16xf32>
    tpu.vector_store %arg14[%c39, %c0_87], %178 {strides = array<i32>} : memref<128x16xf32, #tpu.memory_space<vmem>>, vector<1x16xf32>,
    %180 = vector.extract_strided_slice %171 {offsets = [4, 0], sizes = [1, 16], strides = [1, 1]} : vector<16x16xf32> to vector<1x16xf32>
    %181 = vector.extract_strided_slice %171 {offsets = [5, 0], sizes = [1, 16], strides = [1, 1]} : vector<16x16xf32> to vector<1x16xf32>
    %182 = arith.maximumf %180, %181 : vector<1x16xf32>
    %c40_88 = arith.constant 40 : index
    %c0_89 = arith.constant 0 : index
    %183 = vector.load %arg14[%c40_88, %c0_89] : memref<128x16xf32, #tpu.memory_space<vmem>>, vector<1x16xf32>
    tpu.vector_store %arg14[%c40_88, %c0_89], %182 {strides = array<i32>} : memref<128x16xf32, #tpu.memory_space<vmem>>, vector<1x16xf32>,
    %184 = vector.extract_strided_slice %171 {offsets = [6, 0], sizes = [1, 16], strides = [1, 1]} : vector<16x16xf32> to vector<1x16xf32>
    %185 = vector.extract_strided_slice %171 {offsets = [7, 0], sizes = [1, 16], strides = [1, 1]} : vector<16x16xf32> to vector<1x16xf32>
    %186 = arith.maximumf %184, %185 : vector<1x16xf32>
    %c41_90 = arith.constant 41 : index
    %c0_91 = arith.constant 0 : index
    %187 = vector.load %arg14[%c41_90, %c0_91] : memref<128x16xf32, #tpu.memory_space<vmem>>, vector<1x16xf32>
    tpu.vector_store %arg14[%c41_90, %c0_91], %186 {strides = array<i32>} : memref<128x16xf32, #tpu.memory_space<vmem>>, vector<1x16xf32>,
    %188 = vector.extract_strided_slice %171 {offsets = [8, 0], sizes = [1, 16], strides = [1, 1]} : vector<16x16xf32> to vector<1x16xf32>
    %189 = vector.extract_strided_slice %171 {offsets = [9, 0], sizes = [1, 16], strides = [1, 1]} : vector<16x16xf32> to vector<1x16xf32>
    %190 = arith.maximumf %188, %189 : vector<1x16xf32>
    %c42_92 = arith.constant 42 : index
    %c0_93 = arith.constant 0 : index
    %191 = vector.load %arg14[%c42_92, %c0_93] : memref<128x16xf32, #tpu.memory_space<vmem>>, vector<1x16xf32>
    tpu.vector_store %arg14[%c42_92, %c0_93], %190 {strides = array<i32>} : memref<128x16xf32, #tpu.memory_space<vmem>>, vector<1x16xf32>,
    %192 = vector.extract_strided_slice %171 {offsets = [10, 0], sizes = [1, 16], strides = [1, 1]} : vector<16x16xf32> to vector<1x16xf32>
    %193 = vector.extract_strided_slice %171 {offsets = [11, 0], sizes = [1, 16], strides = [1, 1]} : vector<16x16xf32> to vector<1x16xf32>
    %194 = arith.maximumf %192, %193 : vector<1x16xf32>
    %c43_94 = arith.constant 43 : index
    %c0_95 = arith.constant 0 : index
    %195 = vector.load %arg14[%c43_94, %c0_95] : memref<128x16xf32, #tpu.memory_space<vmem>>, vector<1x16xf32>
    tpu.vector_store %arg14[%c43_94, %c0_95], %194 {strides = array<i32>} : memref<128x16xf32, #tpu.memory_space<vmem>>, vector<1x16xf32>,
    %196 = vector.extract_strided_slice %171 {offsets = [12, 0], sizes = [1, 16], strides = [1, 1]} : vector<16x16xf32> to vector<1x16xf32>
    %197 = vector.extract_strided_slice %171 {offsets = [13, 0], sizes = [1, 16], strides = [1, 1]} : vector<16x16xf32> to vector<1x16xf32>
    %198 = arith.maximumf %196, %197 : vector<1x16xf32>
    %c44_96 = arith.constant 44 : index
    %c0_97 = arith.constant 0 : index
    %199 = vector.load %arg14[%c44_96, %c0_97] : memref<128x16xf32, #tpu.memory_space<vmem>>, vector<1x16xf32>
    tpu.vector_store %arg14[%c44_96, %c0_97], %198 {strides = array<i32>} : memref<128x16xf32, #tpu.memory_space<vmem>>, vector<1x16xf32>,
    %200 = vector.extract_strided_slice %171 {offsets = [14, 0], sizes = [1, 16], strides = [1, 1]} : vector<16x16xf32> to vector<1x16xf32>
    %201 = vector.extract_strided_slice %171 {offsets = [15, 0], sizes = [1, 16], strides = [1, 1]} : vector<16x16xf32> to vector<1x16xf32>
    %202 = arith.maximumf %200, %201 : vector<1x16xf32>
    %c45 = arith.constant 45 : index
    %c0_98 = arith.constant 0 : index
    %203 = vector.load %arg14[%c45, %c0_98] : memref<128x16xf32, #tpu.memory_space<vmem>>, vector<1x16xf32>
    tpu.vector_store %arg14[%c45, %c0_98], %202 {strides = array<i32>} : memref<128x16xf32, #tpu.memory_space<vmem>>, vector<1x16xf32>,
    %c120 = arith.constant 120 : index
    %c0_99 = arith.constant 0 : index
    %204 = vector.load %arg13[%c120, %c0_99] : memref<320x16xf32, #tpu.memory_space<vmem>>, vector<16x16xf32>
    %c140 = arith.constant 140 : index
    %c0_100 = arith.constant 0 : index
    %205 = vector.load %arg13[%c140, %c0_100] : memref<320x16xf32, #tpu.memory_space<vmem>>, vector<16x16xf32>
    %206 = arith.maximumf %204, %205 : vector<16x16xf32>
    %207 = vector.extract_strided_slice %206 {offsets = [0, 0], sizes = [1, 16], strides = [1, 1]} : vector<16x16xf32> to vector<1x16xf32>
    %208 = vector.extract_strided_slice %206 {offsets = [1, 0], sizes = [1, 16], strides = [1, 1]} : vector<16x16xf32> to vector<1x16xf32>
    %209 = arith.maximumf %207, %208 : vector<1x16xf32>
    %c50 = arith.constant 50 : index
    %c0_101 = arith.constant 0 : index
    %210 = vector.load %arg14[%c50, %c0_101] : memref<128x16xf32, #tpu.memory_space<vmem>>, vector<1x16xf32>
    tpu.vector_store %arg14[%c50, %c0_101], %209 {strides = array<i32>} : memref<128x16xf32, #tpu.memory_space<vmem>>, vector<1x16xf32>,
    %211 = vector.extract_strided_slice %206 {offsets = [2, 0], sizes = [1, 16], strides = [1, 1]} : vector<16x16xf32> to vector<1x16xf32>
    %212 = vector.extract_strided_slice %206 {offsets = [3, 0], sizes = [1, 16], strides = [1, 1]} : vector<16x16xf32> to vector<1x16xf32>
    %213 = arith.maximumf %211, %212 : vector<1x16xf32>
    %c51 = arith.constant 51 : index
    %c0_102 = arith.constant 0 : index
    %214 = vector.load %arg14[%c51, %c0_102] : memref<128x16xf32, #tpu.memory_space<vmem>>, vector<1x16xf32>
    tpu.vector_store %arg14[%c51, %c0_102], %213 {strides = array<i32>} : memref<128x16xf32, #tpu.memory_space<vmem>>, vector<1x16xf32>,
    %215 = vector.extract_strided_slice %206 {offsets = [4, 0], sizes = [1, 16], strides = [1, 1]} : vector<16x16xf32> to vector<1x16xf32>
    %216 = vector.extract_strided_slice %206 {offsets = [5, 0], sizes = [1, 16], strides = [1, 1]} : vector<16x16xf32> to vector<1x16xf32>
    %217 = arith.maximumf %215, %216 : vector<1x16xf32>
    %c52 = arith.constant 52 : index
    %c0_103 = arith.constant 0 : index
    %218 = vector.load %arg14[%c52, %c0_103] : memref<128x16xf32, #tpu.memory_space<vmem>>, vector<1x16xf32>
    tpu.vector_store %arg14[%c52, %c0_103], %217 {strides = array<i32>} : memref<128x16xf32, #tpu.memory_space<vmem>>, vector<1x16xf32>,
    %219 = vector.extract_strided_slice %206 {offsets = [6, 0], sizes = [1, 16], strides = [1, 1]} : vector<16x16xf32> to vector<1x16xf32>
    %220 = vector.extract_strided_slice %206 {offsets = [7, 0], sizes = [1, 16], strides = [1, 1]} : vector<16x16xf32> to vector<1x16xf32>
    %221 = arith.maximumf %219, %220 : vector<1x16xf32>
    %c53 = arith.constant 53 : index
    %c0_104 = arith.constant 0 : index
    %222 = vector.load %arg14[%c53, %c0_104] : memref<128x16xf32, #tpu.memory_space<vmem>>, vector<1x16xf32>
    tpu.vector_store %arg14[%c53, %c0_104], %221 {strides = array<i32>} : memref<128x16xf32, #tpu.memory_space<vmem>>, vector<1x16xf32>,
    %223 = vector.extract_strided_slice %206 {offsets = [8, 0], sizes = [1, 16], strides = [1, 1]} : vector<16x16xf32> to vector<1x16xf32>
    %224 = vector.extract_strided_slice %206 {offsets = [9, 0], sizes = [1, 16], strides = [1, 1]} : vector<16x16xf32> to vector<1x16xf32>
    %225 = arith.maximumf %223, %224 : vector<1x16xf32>
    %c54 = arith.constant 54 : index
    %c0_105 = arith.constant 0 : index
    %226 = vector.load %arg14[%c54, %c0_105] : memref<128x16xf32, #tpu.memory_space<vmem>>, vector<1x16xf32>
    tpu.vector_store %arg14[%c54, %c0_105], %225 {strides = array<i32>} : memref<128x16xf32, #tpu.memory_space<vmem>>, vector<1x16xf32>,
    %227 = vector.extract_strided_slice %206 {offsets = [10, 0], sizes = [1, 16], strides = [1, 1]} : vector<16x16xf32> to vector<1x16xf32>
    %228 = vector.extract_strided_slice %206 {offsets = [11, 0], sizes = [1, 16], strides = [1, 1]} : vector<16x16xf32> to vector<1x16xf32>
    %229 = arith.maximumf %227, %228 : vector<1x16xf32>
    %c55 = arith.constant 55 : index
    %c0_106 = arith.constant 0 : index
    %230 = vector.load %arg14[%c55, %c0_106] : memref<128x16xf32, #tpu.memory_space<vmem>>, vector<1x16xf32>
    tpu.vector_store %arg14[%c55, %c0_106], %229 {strides = array<i32>} : memref<128x16xf32, #tpu.memory_space<vmem>>, vector<1x16xf32>,
    %231 = vector.extract_strided_slice %206 {offsets = [12, 0], sizes = [1, 16], strides = [1, 1]} : vector<16x16xf32> to vector<1x16xf32>
    %232 = vector.extract_strided_slice %206 {offsets = [13, 0], sizes = [1, 16], strides = [1, 1]} : vector<16x16xf32> to vector<1x16xf32>
    %233 = arith.maximumf %231, %232 : vector<1x16xf32>
    %c56 = arith.constant 56 : index
    %c0_107 = arith.constant 0 : index
    %234 = vector.load %arg14[%c56, %c0_107] : memref<128x16xf32, #tpu.memory_space<vmem>>, vector<1x16xf32>
    tpu.vector_store %arg14[%c56, %c0_107], %233 {strides = array<i32>} : memref<128x16xf32, #tpu.memory_space<vmem>>, vector<1x16xf32>,
    %235 = vector.extract_strided_slice %206 {offsets = [14, 0], sizes = [1, 16], strides = [1, 1]} : vector<16x16xf32> to vector<1x16xf32>
    %236 = vector.extract_strided_slice %206 {offsets = [15, 0], sizes = [1, 16], strides = [1, 1]} : vector<16x16xf32> to vector<1x16xf32>
    %237 = arith.maximumf %235, %236 : vector<1x16xf32>
    %c57 = arith.constant 57 : index
    %c0_108 = arith.constant 0 : index
    %238 = vector.load %arg14[%c57, %c0_108] : memref<128x16xf32, #tpu.memory_space<vmem>>, vector<1x16xf32>
    tpu.vector_store %arg14[%c57, %c0_108], %237 {strides = array<i32>} : memref<128x16xf32, #tpu.memory_space<vmem>>, vector<1x16xf32>,
    %c160 = arith.constant 160 : index
    %c0_109 = arith.constant 0 : index
    %239 = vector.load %arg13[%c160, %c0_109] : memref<320x16xf32, #tpu.memory_space<vmem>>, vector<16x16xf32>
    %c180 = arith.constant 180 : index
    %c0_110 = arith.constant 0 : index
    %240 = vector.load %arg13[%c180, %c0_110] : memref<320x16xf32, #tpu.memory_space<vmem>>, vector<16x16xf32>
    %241 = arith.maximumf %239, %240 : vector<16x16xf32>
    %242 = vector.extract_strided_slice %241 {offsets = [0, 0], sizes = [1, 16], strides = [1, 1]} : vector<16x16xf32> to vector<1x16xf32>
    %243 = vector.extract_strided_slice %241 {offsets = [1, 0], sizes = [1, 16], strides = [1, 1]} : vector<16x16xf32> to vector<1x16xf32>
    %244 = arith.maximumf %242, %243 : vector<1x16xf32>
    %c62 = arith.constant 62 : index
    %c0_111 = arith.constant 0 : index
    %245 = vector.load %arg14[%c62, %c0_111] : memref<128x16xf32, #tpu.memory_space<vmem>>, vector<1x16xf32>
    tpu.vector_store %arg14[%c62, %c0_111], %244 {strides = array<i32>} : memref<128x16xf32, #tpu.memory_space<vmem>>, vector<1x16xf32>,
    %246 = vector.extract_strided_slice %241 {offsets = [2, 0], sizes = [1, 16], strides = [1, 1]} : vector<16x16xf32> to vector<1x16xf32>
    %247 = vector.extract_strided_slice %241 {offsets = [3, 0], sizes = [1, 16], strides = [1, 1]} : vector<16x16xf32> to vector<1x16xf32>
    %248 = arith.maximumf %246, %247 : vector<1x16xf32>
    %c63 = arith.constant 63 : index
    %c0_112 = arith.constant 0 : index
    %249 = vector.load %arg14[%c63, %c0_112] : memref<128x16xf32, #tpu.memory_space<vmem>>, vector<1x16xf32>
    tpu.vector_store %arg14[%c63, %c0_112], %248 {strides = array<i32>} : memref<128x16xf32, #tpu.memory_space<vmem>>, vector<1x16xf32>,
    %250 = vector.extract_strided_slice %241 {offsets = [4, 0], sizes = [1, 16], strides = [1, 1]} : vector<16x16xf32> to vector<1x16xf32>
    %251 = vector.extract_strided_slice %241 {offsets = [5, 0], sizes = [1, 16], strides = [1, 1]} : vector<16x16xf32> to vector<1x16xf32>
    %252 = arith.maximumf %250, %251 : vector<1x16xf32>
    %c64 = arith.constant 64 : index
    %c0_113 = arith.constant 0 : index
    %253 = vector.load %arg14[%c64, %c0_113] : memref<128x16xf32, #tpu.memory_space<vmem>>, vector<1x16xf32>
    tpu.vector_store %arg14[%c64, %c0_113], %252 {strides = array<i32>} : memref<128x16xf32, #tpu.memory_space<vmem>>, vector<1x16xf32>,
    %254 = vector.extract_strided_slice %241 {offsets = [6, 0], sizes = [1, 16], strides = [1, 1]} : vector<16x16xf32> to vector<1x16xf32>
    %255 = vector.extract_strided_slice %241 {offsets = [7, 0], sizes = [1, 16], strides = [1, 1]} : vector<16x16xf32> to vector<1x16xf32>
    %256 = arith.maximumf %254, %255 : vector<1x16xf32>
    %c65 = arith.constant 65 : index
    %c0_114 = arith.constant 0 : index
    %257 = vector.load %arg14[%c65, %c0_114] : memref<128x16xf32, #tpu.memory_space<vmem>>, vector<1x16xf32>
    tpu.vector_store %arg14[%c65, %c0_114], %256 {strides = array<i32>} : memref<128x16xf32, #tpu.memory_space<vmem>>, vector<1x16xf32>,
    %258 = vector.extract_strided_slice %241 {offsets = [8, 0], sizes = [1, 16], strides = [1, 1]} : vector<16x16xf32> to vector<1x16xf32>
    %259 = vector.extract_strided_slice %241 {offsets = [9, 0], sizes = [1, 16], strides = [1, 1]} : vector<16x16xf32> to vector<1x16xf32>
    %260 = arith.maximumf %258, %259 : vector<1x16xf32>
    %c66 = arith.constant 66 : index
    %c0_115 = arith.constant 0 : index
    %261 = vector.load %arg14[%c66, %c0_115] : memref<128x16xf32, #tpu.memory_space<vmem>>, vector<1x16xf32>
    tpu.vector_store %arg14[%c66, %c0_115], %260 {strides = array<i32>} : memref<128x16xf32, #tpu.memory_space<vmem>>, vector<1x16xf32>,
    %262 = vector.extract_strided_slice %241 {offsets = [10, 0], sizes = [1, 16], strides = [1, 1]} : vector<16x16xf32> to vector<1x16xf32>
    %263 = vector.extract_strided_slice %241 {offsets = [11, 0], sizes = [1, 16], strides = [1, 1]} : vector<16x16xf32> to vector<1x16xf32>
    %264 = arith.maximumf %262, %263 : vector<1x16xf32>
    %c67 = arith.constant 67 : index
    %c0_116 = arith.constant 0 : index
    %265 = vector.load %arg14[%c67, %c0_116] : memref<128x16xf32, #tpu.memory_space<vmem>>, vector<1x16xf32>
    tpu.vector_store %arg14[%c67, %c0_116], %264 {strides = array<i32>} : memref<128x16xf32, #tpu.memory_space<vmem>>, vector<1x16xf32>,
    %266 = vector.extract_strided_slice %241 {offsets = [12, 0], sizes = [1, 16], strides = [1, 1]} : vector<16x16xf32> to vector<1x16xf32>
    %267 = vector.extract_strided_slice %241 {offsets = [13, 0], sizes = [1, 16], strides = [1, 1]} : vector<16x16xf32> to vector<1x16xf32>
    %268 = arith.maximumf %266, %267 : vector<1x16xf32>
    %c68 = arith.constant 68 : index
    %c0_117 = arith.constant 0 : index
    %269 = vector.load %arg14[%c68, %c0_117] : memref<128x16xf32, #tpu.memory_space<vmem>>, vector<1x16xf32>
    tpu.vector_store %arg14[%c68, %c0_117], %268 {strides = array<i32>} : memref<128x16xf32, #tpu.memory_space<vmem>>, vector<1x16xf32>,
    %270 = vector.extract_strided_slice %241 {offsets = [14, 0], sizes = [1, 16], strides = [1, 1]} : vector<16x16xf32> to vector<1x16xf32>
    %271 = vector.extract_strided_slice %241 {offsets = [15, 0], sizes = [1, 16], strides = [1, 1]} : vector<16x16xf32> to vector<1x16xf32>
    %272 = arith.maximumf %270, %271 : vector<1x16xf32>
    %c69 = arith.constant 69 : index
    %c0_118 = arith.constant 0 : index
    %273 = vector.load %arg14[%c69, %c0_118] : memref<128x16xf32, #tpu.memory_space<vmem>>, vector<1x16xf32>
    tpu.vector_store %arg14[%c69, %c0_118], %272 {strides = array<i32>} : memref<128x16xf32, #tpu.memory_space<vmem>>, vector<1x16xf32>,
    %c200 = arith.constant 200 : index
    %c0_119 = arith.constant 0 : index
    %274 = vector.load %arg13[%c200, %c0_119] : memref<320x16xf32, #tpu.memory_space<vmem>>, vector<16x16xf32>
    %c220 = arith.constant 220 : index
    %c0_120 = arith.constant 0 : index
    %275 = vector.load %arg13[%c220, %c0_120] : memref<320x16xf32, #tpu.memory_space<vmem>>, vector<16x16xf32>
    %276 = arith.maximumf %274, %275 : vector<16x16xf32>
    %277 = vector.extract_strided_slice %276 {offsets = [0, 0], sizes = [1, 16], strides = [1, 1]} : vector<16x16xf32> to vector<1x16xf32>
    %278 = vector.extract_strided_slice %276 {offsets = [1, 0], sizes = [1, 16], strides = [1, 1]} : vector<16x16xf32> to vector<1x16xf32>
    %279 = arith.maximumf %277, %278 : vector<1x16xf32>
    %c74 = arith.constant 74 : index
    %c0_121 = arith.constant 0 : index
    %280 = vector.load %arg14[%c74, %c0_121] : memref<128x16xf32, #tpu.memory_space<vmem>>, vector<1x16xf32>
    tpu.vector_store %arg14[%c74, %c0_121], %279 {strides = array<i32>} : memref<128x16xf32, #tpu.memory_space<vmem>>, vector<1x16xf32>,
    %281 = vector.extract_strided_slice %276 {offsets = [2, 0], sizes = [1, 16], strides = [1, 1]} : vector<16x16xf32> to vector<1x16xf32>
    %282 = vector.extract_strided_slice %276 {offsets = [3, 0], sizes = [1, 16], strides = [1, 1]} : vector<16x16xf32> to vector<1x16xf32>
    %283 = arith.maximumf %281, %282 : vector<1x16xf32>
    %c75 = arith.constant 75 : index
    %c0_122 = arith.constant 0 : index
    %284 = vector.load %arg14[%c75, %c0_122] : memref<128x16xf32, #tpu.memory_space<vmem>>, vector<1x16xf32>
    tpu.vector_store %arg14[%c75, %c0_122], %283 {strides = array<i32>} : memref<128x16xf32, #tpu.memory_space<vmem>>, vector<1x16xf32>,
    %285 = vector.extract_strided_slice %276 {offsets = [4, 0], sizes = [1, 16], strides = [1, 1]} : vector<16x16xf32> to vector<1x16xf32>
    %286 = vector.extract_strided_slice %276 {offsets = [5, 0], sizes = [1, 16], strides = [1, 1]} : vector<16x16xf32> to vector<1x16xf32>
    %287 = arith.maximumf %285, %286 : vector<1x16xf32>
    %c76 = arith.constant 76 : index
    %c0_123 = arith.constant 0 : index
    %288 = vector.load %arg14[%c76, %c0_123] : memref<128x16xf32, #tpu.memory_space<vmem>>, vector<1x16xf32>
    tpu.vector_store %arg14[%c76, %c0_123], %287 {strides = array<i32>} : memref<128x16xf32, #tpu.memory_space<vmem>>, vector<1x16xf32>,
    %289 = vector.extract_strided_slice %276 {offsets = [6, 0], sizes = [1, 16], strides = [1, 1]} : vector<16x16xf32> to vector<1x16xf32>
    %290 = vector.extract_strided_slice %276 {offsets = [7, 0], sizes = [1, 16], strides = [1, 1]} : vector<16x16xf32> to vector<1x16xf32>
    %291 = arith.maximumf %289, %290 : vector<1x16xf32>
    %c77 = arith.constant 77 : index
    %c0_124 = arith.constant 0 : index
    %292 = vector.load %arg14[%c77, %c0_124] : memref<128x16xf32, #tpu.memory_space<vmem>>, vector<1x16xf32>
    tpu.vector_store %arg14[%c77, %c0_124], %291 {strides = array<i32>} : memref<128x16xf32, #tpu.memory_space<vmem>>, vector<1x16xf32>,
    %293 = vector.extract_strided_slice %276 {offsets = [8, 0], sizes = [1, 16], strides = [1, 1]} : vector<16x16xf32> to vector<1x16xf32>
    %294 = vector.extract_strided_slice %276 {offsets = [9, 0], sizes = [1, 16], strides = [1, 1]} : vector<16x16xf32> to vector<1x16xf32>
    %295 = arith.maximumf %293, %294 : vector<1x16xf32>
    %c78 = arith.constant 78 : index
    %c0_125 = arith.constant 0 : index
    %296 = vector.load %arg14[%c78, %c0_125] : memref<128x16xf32, #tpu.memory_space<vmem>>, vector<1x16xf32>
    tpu.vector_store %arg14[%c78, %c0_125], %295 {strides = array<i32>} : memref<128x16xf32, #tpu.memory_space<vmem>>, vector<1x16xf32>,
    %297 = vector.extract_strided_slice %276 {offsets = [10, 0], sizes = [1, 16], strides = [1, 1]} : vector<16x16xf32> to vector<1x16xf32>
    %298 = vector.extract_strided_slice %276 {offsets = [11, 0], sizes = [1, 16], strides = [1, 1]} : vector<16x16xf32> to vector<1x16xf32>
    %299 = arith.maximumf %297, %298 : vector<1x16xf32>
    %c79 = arith.constant 79 : index
    %c0_126 = arith.constant 0 : index
    %300 = vector.load %arg14[%c79, %c0_126] : memref<128x16xf32, #tpu.memory_space<vmem>>, vector<1x16xf32>
    tpu.vector_store %arg14[%c79, %c0_126], %299 {strides = array<i32>} : memref<128x16xf32, #tpu.memory_space<vmem>>, vector<1x16xf32>,
    %301 = vector.extract_strided_slice %276 {offsets = [12, 0], sizes = [1, 16], strides = [1, 1]} : vector<16x16xf32> to vector<1x16xf32>
    %302 = vector.extract_strided_slice %276 {offsets = [13, 0], sizes = [1, 16], strides = [1, 1]} : vector<16x16xf32> to vector<1x16xf32>
    %303 = arith.maximumf %301, %302 : vector<1x16xf32>
    %c80_127 = arith.constant 80 : index
    %c0_128 = arith.constant 0 : index
    %304 = vector.load %arg14[%c80_127, %c0_128] : memref<128x16xf32, #tpu.memory_space<vmem>>, vector<1x16xf32>
    tpu.vector_store %arg14[%c80_127, %c0_128], %303 {strides = array<i32>} : memref<128x16xf32, #tpu.memory_space<vmem>>, vector<1x16xf32>,
    %305 = vector.extract_strided_slice %276 {offsets = [14, 0], sizes = [1, 16], strides = [1, 1]} : vector<16x16xf32> to vector<1x16xf32>
    %306 = vector.extract_strided_slice %276 {offsets = [15, 0], sizes = [1, 16], strides = [1, 1]} : vector<16x16xf32> to vector<1x16xf32>
    %307 = arith.maximumf %305, %306 : vector<1x16xf32>
    %c81 = arith.constant 81 : index
    %c0_129 = arith.constant 0 : index
    %308 = vector.load %arg14[%c81, %c0_129] : memref<128x16xf32, #tpu.memory_space<vmem>>, vector<1x16xf32>
    tpu.vector_store %arg14[%c81, %c0_129], %307 {strides = array<i32>} : memref<128x16xf32, #tpu.memory_space<vmem>>, vector<1x16xf32>,
    %c240 = arith.constant 240 : index
    %c0_130 = arith.constant 0 : index
    %309 = vector.load %arg13[%c240, %c0_130] : memref<320x16xf32, #tpu.memory_space<vmem>>, vector<16x16xf32>
    %c260 = arith.constant 260 : index
    %c0_131 = arith.constant 0 : index
    %310 = vector.load %arg13[%c260, %c0_131] : memref<320x16xf32, #tpu.memory_space<vmem>>, vector<16x16xf32>
    %311 = arith.maximumf %309, %310 : vector<16x16xf32>
    %312 = vector.extract_strided_slice %311 {offsets = [0, 0], sizes = [1, 16], strides = [1, 1]} : vector<16x16xf32> to vector<1x16xf32>
    %313 = vector.extract_strided_slice %311 {offsets = [1, 0], sizes = [1, 16], strides = [1, 1]} : vector<16x16xf32> to vector<1x16xf32>
    %314 = arith.maximumf %312, %313 : vector<1x16xf32>
    %c86 = arith.constant 86 : index
    %c0_132 = arith.constant 0 : index
    %315 = vector.load %arg14[%c86, %c0_132] : memref<128x16xf32, #tpu.memory_space<vmem>>, vector<1x16xf32>
    tpu.vector_store %arg14[%c86, %c0_132], %314 {strides = array<i32>} : memref<128x16xf32, #tpu.memory_space<vmem>>, vector<1x16xf32>,
    %316 = vector.extract_strided_slice %311 {offsets = [2, 0], sizes = [1, 16], strides = [1, 1]} : vector<16x16xf32> to vector<1x16xf32>
    %317 = vector.extract_strided_slice %311 {offsets = [3, 0], sizes = [1, 16], strides = [1, 1]} : vector<16x16xf32> to vector<1x16xf32>
    %318 = arith.maximumf %316, %317 : vector<1x16xf32>
    %c87 = arith.constant 87 : index
    %c0_133 = arith.constant 0 : index
    %319 = vector.load %arg14[%c87, %c0_133] : memref<128x16xf32, #tpu.memory_space<vmem>>, vector<1x16xf32>
    tpu.vector_store %arg14[%c87, %c0_133], %318 {strides = array<i32>} : memref<128x16xf32, #tpu.memory_space<vmem>>, vector<1x16xf32>,
    %320 = vector.extract_strided_slice %311 {offsets = [4, 0], sizes = [1, 16], strides = [1, 1]} : vector<16x16xf32> to vector<1x16xf32>
    %321 = vector.extract_strided_slice %311 {offsets = [5, 0], sizes = [1, 16], strides = [1, 1]} : vector<16x16xf32> to vector<1x16xf32>
    %322 = arith.maximumf %320, %321 : vector<1x16xf32>
    %c88 = arith.constant 88 : index
    %c0_134 = arith.constant 0 : index
    %323 = vector.load %arg14[%c88, %c0_134] : memref<128x16xf32, #tpu.memory_space<vmem>>, vector<1x16xf32>
    tpu.vector_store %arg14[%c88, %c0_134], %322 {strides = array<i32>} : memref<128x16xf32, #tpu.memory_space<vmem>>, vector<1x16xf32>,
    %324 = vector.extract_strided_slice %311 {offsets = [6, 0], sizes = [1, 16], strides = [1, 1]} : vector<16x16xf32> to vector<1x16xf32>
    %325 = vector.extract_strided_slice %311 {offsets = [7, 0], sizes = [1, 16], strides = [1, 1]} : vector<16x16xf32> to vector<1x16xf32>
    %326 = arith.maximumf %324, %325 : vector<1x16xf32>
    %c89 = arith.constant 89 : index
    %c0_135 = arith.constant 0 : index
    %327 = vector.load %arg14[%c89, %c0_135] : memref<128x16xf32, #tpu.memory_space<vmem>>, vector<1x16xf32>
    tpu.vector_store %arg14[%c89, %c0_135], %326 {strides = array<i32>} : memref<128x16xf32, #tpu.memory_space<vmem>>, vector<1x16xf32>,
    %328 = vector.extract_strided_slice %311 {offsets = [8, 0], sizes = [1, 16], strides = [1, 1]} : vector<16x16xf32> to vector<1x16xf32>
    %329 = vector.extract_strided_slice %311 {offsets = [9, 0], sizes = [1, 16], strides = [1, 1]} : vector<16x16xf32> to vector<1x16xf32>
    %330 = arith.maximumf %328, %329 : vector<1x16xf32>
    %c90 = arith.constant 90 : index
    %c0_136 = arith.constant 0 : index
    %331 = vector.load %arg14[%c90, %c0_136] : memref<128x16xf32, #tpu.memory_space<vmem>>, vector<1x16xf32>
    tpu.vector_store %arg14[%c90, %c0_136], %330 {strides = array<i32>} : memref<128x16xf32, #tpu.memory_space<vmem>>, vector<1x16xf32>,
    %332 = vector.extract_strided_slice %311 {offsets = [10, 0], sizes = [1, 16], strides = [1, 1]} : vector<16x16xf32> to vector<1x16xf32>
    %333 = vector.extract_strided_slice %311 {offsets = [11, 0], sizes = [1, 16], strides = [1, 1]} : vector<16x16xf32> to vector<1x16xf32>
    %334 = arith.maximumf %332, %333 : vector<1x16xf32>
    %c91 = arith.constant 91 : index
    %c0_137 = arith.constant 0 : index
    %335 = vector.load %arg14[%c91, %c0_137] : memref<128x16xf32, #tpu.memory_space<vmem>>, vector<1x16xf32>
    tpu.vector_store %arg14[%c91, %c0_137], %334 {strides = array<i32>} : memref<128x16xf32, #tpu.memory_space<vmem>>, vector<1x16xf32>,
    %336 = vector.extract_strided_slice %311 {offsets = [12, 0], sizes = [1, 16], strides = [1, 1]} : vector<16x16xf32> to vector<1x16xf32>
    %337 = vector.extract_strided_slice %311 {offsets = [13, 0], sizes = [1, 16], strides = [1, 1]} : vector<16x16xf32> to vector<1x16xf32>
    %338 = arith.maximumf %336, %337 : vector<1x16xf32>
    %c92 = arith.constant 92 : index
    %c0_138 = arith.constant 0 : index
    %339 = vector.load %arg14[%c92, %c0_138] : memref<128x16xf32, #tpu.memory_space<vmem>>, vector<1x16xf32>
    tpu.vector_store %arg14[%c92, %c0_138], %338 {strides = array<i32>} : memref<128x16xf32, #tpu.memory_space<vmem>>, vector<1x16xf32>,
    %340 = vector.extract_strided_slice %311 {offsets = [14, 0], sizes = [1, 16], strides = [1, 1]} : vector<16x16xf32> to vector<1x16xf32>
    %341 = vector.extract_strided_slice %311 {offsets = [15, 0], sizes = [1, 16], strides = [1, 1]} : vector<16x16xf32> to vector<1x16xf32>
    %342 = arith.maximumf %340, %341 : vector<1x16xf32>
    %c93 = arith.constant 93 : index
    %c0_139 = arith.constant 0 : index
    %343 = vector.load %arg14[%c93, %c0_139] : memref<128x16xf32, #tpu.memory_space<vmem>>, vector<1x16xf32>
    tpu.vector_store %arg14[%c93, %c0_139], %342 {strides = array<i32>} : memref<128x16xf32, #tpu.memory_space<vmem>>, vector<1x16xf32>,
    %c280 = arith.constant 280 : index
    %c0_140 = arith.constant 0 : index
    %344 = vector.load %arg13[%c280, %c0_140] : memref<320x16xf32, #tpu.memory_space<vmem>>, vector<16x16xf32>
    %c300 = arith.constant 300 : index
    %c0_141 = arith.constant 0 : index
    %345 = vector.load %arg13[%c300, %c0_141] : memref<320x16xf32, #tpu.memory_space<vmem>>, vector<16x16xf32>
    %346 = arith.maximumf %344, %345 : vector<16x16xf32>
    %347 = vector.extract_strided_slice %346 {offsets = [0, 0], sizes = [1, 16], strides = [1, 1]} : vector<16x16xf32> to vector<1x16xf32>
    %348 = vector.extract_strided_slice %346 {offsets = [1, 0], sizes = [1, 16], strides = [1, 1]} : vector<16x16xf32> to vector<1x16xf32>
    %349 = arith.maximumf %347, %348 : vector<1x16xf32>
    %c98 = arith.constant 98 : index
    %c0_142 = arith.constant 0 : index
    %350 = vector.load %arg14[%c98, %c0_142] : memref<128x16xf32, #tpu.memory_space<vmem>>, vector<1x16xf32>
    tpu.vector_store %arg14[%c98, %c0_142], %349 {strides = array<i32>} : memref<128x16xf32, #tpu.memory_space<vmem>>, vector<1x16xf32>,
    %351 = vector.extract_strided_slice %346 {offsets = [2, 0], sizes = [1, 16], strides = [1, 1]} : vector<16x16xf32> to vector<1x16xf32>
    %352 = vector.extract_strided_slice %346 {offsets = [3, 0], sizes = [1, 16], strides = [1, 1]} : vector<16x16xf32> to vector<1x16xf32>
    %353 = arith.maximumf %351, %352 : vector<1x16xf32>
    %c99 = arith.constant 99 : index
    %c0_143 = arith.constant 0 : index
    %354 = vector.load %arg14[%c99, %c0_143] : memref<128x16xf32, #tpu.memory_space<vmem>>, vector<1x16xf32>
    tpu.vector_store %arg14[%c99, %c0_143], %353 {strides = array<i32>} : memref<128x16xf32, #tpu.memory_space<vmem>>, vector<1x16xf32>,
    %355 = vector.extract_strided_slice %346 {offsets = [4, 0], sizes = [1, 16], strides = [1, 1]} : vector<16x16xf32> to vector<1x16xf32>
    %356 = vector.extract_strided_slice %346 {offsets = [5, 0], sizes = [1, 16], strides = [1, 1]} : vector<16x16xf32> to vector<1x16xf32>
    %357 = arith.maximumf %355, %356 : vector<1x16xf32>
    %c100_144 = arith.constant 100 : index
    %c0_145 = arith.constant 0 : index
    %358 = vector.load %arg14[%c100_144, %c0_145] : memref<128x16xf32, #tpu.memory_space<vmem>>, vector<1x16xf32>
    tpu.vector_store %arg14[%c100_144, %c0_145], %357 {strides = array<i32>} : memref<128x16xf32, #tpu.memory_space<vmem>>, vector<1x16xf32>,
    %359 = vector.extract_strided_slice %346 {offsets = [6, 0], sizes = [1, 16], strides = [1, 1]} : vector<16x16xf32> to vector<1x16xf32>
    %360 = vector.extract_strided_slice %346 {offsets = [7, 0], sizes = [1, 16], strides = [1, 1]} : vector<16x16xf32> to vector<1x16xf32>
    %361 = arith.maximumf %359, %360 : vector<1x16xf32>
    %c101 = arith.constant 101 : index
    %c0_146 = arith.constant 0 : index
    %362 = vector.load %arg14[%c101, %c0_146] : memref<128x16xf32, #tpu.memory_space<vmem>>, vector<1x16xf32>
    tpu.vector_store %arg14[%c101, %c0_146], %361 {strides = array<i32>} : memref<128x16xf32, #tpu.memory_space<vmem>>, vector<1x16xf32>,
    %363 = vector.extract_strided_slice %346 {offsets = [8, 0], sizes = [1, 16], strides = [1, 1]} : vector<16x16xf32> to vector<1x16xf32>
    %364 = vector.extract_strided_slice %346 {offsets = [9, 0], sizes = [1, 16], strides = [1, 1]} : vector<16x16xf32> to vector<1x16xf32>
    %365 = arith.maximumf %363, %364 : vector<1x16xf32>
    %c102 = arith.constant 102 : index
    %c0_147 = arith.constant 0 : index
    %366 = vector.load %arg14[%c102, %c0_147] : memref<128x16xf32, #tpu.memory_space<vmem>>, vector<1x16xf32>
    tpu.vector_store %arg14[%c102, %c0_147], %365 {strides = array<i32>} : memref<128x16xf32, #tpu.memory_space<vmem>>, vector<1x16xf32>,
    %367 = vector.extract_strided_slice %346 {offsets = [10, 0], sizes = [1, 16], strides = [1, 1]} : vector<16x16xf32> to vector<1x16xf32>
    %368 = vector.extract_strided_slice %346 {offsets = [11, 0], sizes = [1, 16], strides = [1, 1]} : vector<16x16xf32> to vector<1x16xf32>
    %369 = arith.maximumf %367, %368 : vector<1x16xf32>
    %c103 = arith.constant 103 : index
    %c0_148 = arith.constant 0 : index
    %370 = vector.load %arg14[%c103, %c0_148] : memref<128x16xf32, #tpu.memory_space<vmem>>, vector<1x16xf32>
    tpu.vector_store %arg14[%c103, %c0_148], %369 {strides = array<i32>} : memref<128x16xf32, #tpu.memory_space<vmem>>, vector<1x16xf32>,
    %371 = vector.extract_strided_slice %346 {offsets = [12, 0], sizes = [1, 16], strides = [1, 1]} : vector<16x16xf32> to vector<1x16xf32>
    %372 = vector.extract_strided_slice %346 {offsets = [13, 0], sizes = [1, 16], strides = [1, 1]} : vector<16x16xf32> to vector<1x16xf32>
    %373 = arith.maximumf %371, %372 : vector<1x16xf32>
    %c104 = arith.constant 104 : index
    %c0_149 = arith.constant 0 : index
    %374 = vector.load %arg14[%c104, %c0_149] : memref<128x16xf32, #tpu.memory_space<vmem>>, vector<1x16xf32>
    tpu.vector_store %arg14[%c104, %c0_149], %373 {strides = array<i32>} : memref<128x16xf32, #tpu.memory_space<vmem>>, vector<1x16xf32>,
    %375 = vector.extract_strided_slice %346 {offsets = [14, 0], sizes = [1, 16], strides = [1, 1]} : vector<16x16xf32> to vector<1x16xf32>
    %376 = vector.extract_strided_slice %346 {offsets = [15, 0], sizes = [1, 16], strides = [1, 1]} : vector<16x16xf32> to vector<1x16xf32>
    %377 = arith.maximumf %375, %376 : vector<1x16xf32>
    %c105 = arith.constant 105 : index
    %c0_150 = arith.constant 0 : index
    %378 = vector.load %arg14[%c105, %c0_150] : memref<128x16xf32, #tpu.memory_space<vmem>>, vector<1x16xf32>
    tpu.vector_store %arg14[%c105, %c0_150], %377 {strides = array<i32>} : memref<128x16xf32, #tpu.memory_space<vmem>>, vector<1x16xf32>,
    %cst_151 = arith.constant 0.000000e+00 : f32
    %379 = vector.broadcast %cst_151 : f32 to vector<96x32xf32>
    %c0_152 = arith.constant 0 : index
    %c0_153 = arith.constant 0 : index
    %380 = vector.load %arg14[%c0_152, %c0_153] : memref<128x16xf32, #tpu.memory_space<vmem>>, vector<96x16xf32>
    %c0_154 = arith.constant 0 : index
    %c0_155 = arith.constant 0 : index
    %c0_156 = arith.constant 0 : index
    %381 = vector.load %arg4[%c0_154, %c0_155, %c0_156] : memref<15x16x32xf32, #tpu.memory_space<vmem>>, vector<1x16x32xf32>
    %382 = vector.shape_cast %381 : vector<1x16x32xf32> to vector<16x32xf32>
    %cst_157 = arith.constant dense<0.000000e+00> : vector<96x32xf32>
    %383 = tpu.matmul %380, %382, %cst_157 {dimension_numbers = #tpu.dot_dimension_numbers<[1], [0], [0], [1], [0, 0, 1, 1], [], []>} : vector<96x16xf32>, vector<16x32xf32>, vector<96x32xf32> -> vector<96x32xf32>
    %384 = arith.addf %379, %383 : vector<96x32xf32>
    %c1_158 = arith.constant 1 : index
    %c0_159 = arith.constant 0 : index
    %385 = vector.load %arg14[%c1_158, %c0_159] : memref<128x16xf32, #tpu.memory_space<vmem>>, vector<96x16xf32>
    %c1_160 = arith.constant 1 : index
    %c0_161 = arith.constant 0 : index
    %c0_162 = arith.constant 0 : index
    %386 = vector.load %arg4[%c1_160, %c0_161, %c0_162] : memref<15x16x32xf32, #tpu.memory_space<vmem>>, vector<1x16x32xf32>
    %387 = vector.shape_cast %386 : vector<1x16x32xf32> to vector<16x32xf32>
    %cst_163 = arith.constant dense<0.000000e+00> : vector<96x32xf32>
    %388 = tpu.matmul %385, %387, %cst_163 {dimension_numbers = #tpu.dot_dimension_numbers<[1], [0], [0], [1], [0, 0, 1, 1], [], []>} : vector<96x16xf32>, vector<16x32xf32>, vector<96x32xf32> -> vector<96x32xf32>
    %389 = arith.addf %384, %388 : vector<96x32xf32>
    %c2_164 = arith.constant 2 : index
    %c0_165 = arith.constant 0 : index
    %390 = vector.load %arg14[%c2_164, %c0_165] : memref<128x16xf32, #tpu.memory_space<vmem>>, vector<96x16xf32>
    %c2_166 = arith.constant 2 : index
    %c0_167 = arith.constant 0 : index
    %c0_168 = arith.constant 0 : index
    %391 = vector.load %arg4[%c2_166, %c0_167, %c0_168] : memref<15x16x32xf32, #tpu.memory_space<vmem>>, vector<1x16x32xf32>
    %392 = vector.shape_cast %391 : vector<1x16x32xf32> to vector<16x32xf32>
    %cst_169 = arith.constant dense<0.000000e+00> : vector<96x32xf32>
    %393 = tpu.matmul %390, %392, %cst_169 {dimension_numbers = #tpu.dot_dimension_numbers<[1], [0], [0], [1], [0, 0, 1, 1], [], []>} : vector<96x16xf32>, vector<16x32xf32>, vector<96x32xf32> -> vector<96x32xf32>
    %394 = arith.addf %389, %393 : vector<96x32xf32>
    %c3_170 = arith.constant 3 : index
    %c0_171 = arith.constant 0 : index
    %395 = vector.load %arg14[%c3_170, %c0_171] : memref<128x16xf32, #tpu.memory_space<vmem>>, vector<96x16xf32>
    %c3_172 = arith.constant 3 : index
    %c0_173 = arith.constant 0 : index
    %c0_174 = arith.constant 0 : index
    %396 = vector.load %arg4[%c3_172, %c0_173, %c0_174] : memref<15x16x32xf32, #tpu.memory_space<vmem>>, vector<1x16x32xf32>
    %397 = vector.shape_cast %396 : vector<1x16x32xf32> to vector<16x32xf32>
    %cst_175 = arith.constant dense<0.000000e+00> : vector<96x32xf32>
    %398 = tpu.matmul %395, %397, %cst_175 {dimension_numbers = #tpu.dot_dimension_numbers<[1], [0], [0], [1], [0, 0, 1, 1], [], []>} : vector<96x16xf32>, vector<16x32xf32>, vector<96x32xf32> -> vector<96x32xf32>
    %399 = arith.addf %394, %398 : vector<96x32xf32>
    %c4_176 = arith.constant 4 : index
    %c0_177 = arith.constant 0 : index
    %400 = vector.load %arg14[%c4_176, %c0_177] : memref<128x16xf32, #tpu.memory_space<vmem>>, vector<96x16xf32>
    %c4_178 = arith.constant 4 : index
    %c0_179 = arith.constant 0 : index
    %c0_180 = arith.constant 0 : index
    %401 = vector.load %arg4[%c4_178, %c0_179, %c0_180] : memref<15x16x32xf32, #tpu.memory_space<vmem>>, vector<1x16x32xf32>
    %402 = vector.shape_cast %401 : vector<1x16x32xf32> to vector<16x32xf32>
    %cst_181 = arith.constant dense<0.000000e+00> : vector<96x32xf32>
    %403 = tpu.matmul %400, %402, %cst_181 {dimension_numbers = #tpu.dot_dimension_numbers<[1], [0], [0], [1], [0, 0, 1, 1], [], []>} : vector<96x16xf32>, vector<16x32xf32>, vector<96x32xf32> -> vector<96x32xf32>
    %404 = arith.addf %399, %403 : vector<96x32xf32>
    %c12_182 = arith.constant 12 : index
    %c0_183 = arith.constant 0 : index
    %405 = vector.load %arg14[%c12_182, %c0_183] : memref<128x16xf32, #tpu.memory_space<vmem>>, vector<96x16xf32>
    %c5_184 = arith.constant 5 : index
    %c0_185 = arith.constant 0 : index
    %c0_186 = arith.constant 0 : index
    %406 = vector.load %arg4[%c5_184, %c0_185, %c0_186] : memref<15x16x32xf32, #tpu.memory_space<vmem>>, vector<1x16x32xf32>
    %407 = vector.shape_cast %406 : vector<1x16x32xf32> to vector<16x32xf32>
    %cst_187 = arith.constant dense<0.000000e+00> : vector<96x32xf32>
    %408 = tpu.matmul %405, %407, %cst_187 {dimension_numbers = #tpu.dot_dimension_numbers<[1], [0], [0], [1], [0, 0, 1, 1], [], []>} : vector<96x16xf32>, vector<16x32xf32>, vector<96x32xf32> -> vector<96x32xf32>
    %409 = arith.addf %404, %408 : vector<96x32xf32>
    %c13_188 = arith.constant 13 : index
    %c0_189 = arith.constant 0 : index
    %410 = vector.load %arg14[%c13_188, %c0_189] : memref<128x16xf32, #tpu.memory_space<vmem>>, vector<96x16xf32>
    %c6_190 = arith.constant 6 : index
    %c0_191 = arith.constant 0 : index
    %c0_192 = arith.constant 0 : index
    %411 = vector.load %arg4[%c6_190, %c0_191, %c0_192] : memref<15x16x32xf32, #tpu.memory_space<vmem>>, vector<1x16x32xf32>
    %412 = vector.shape_cast %411 : vector<1x16x32xf32> to vector<16x32xf32>
    %cst_193 = arith.constant dense<0.000000e+00> : vector<96x32xf32>
    %413 = tpu.matmul %410, %412, %cst_193 {dimension_numbers = #tpu.dot_dimension_numbers<[1], [0], [0], [1], [0, 0, 1, 1], [], []>} : vector<96x16xf32>, vector<16x32xf32>, vector<96x32xf32> -> vector<96x32xf32>
    %414 = arith.addf %409, %413 : vector<96x32xf32>
    %c14_194 = arith.constant 14 : index
    %c0_195 = arith.constant 0 : index
    %415 = vector.load %arg14[%c14_194, %c0_195] : memref<128x16xf32, #tpu.memory_space<vmem>>, vector<96x16xf32>
    %c7_196 = arith.constant 7 : index
    %c0_197 = arith.constant 0 : index
    %c0_198 = arith.constant 0 : index
    %416 = vector.load %arg4[%c7_196, %c0_197, %c0_198] : memref<15x16x32xf32, #tpu.memory_space<vmem>>, vector<1x16x32xf32>
    %417 = vector.shape_cast %416 : vector<1x16x32xf32> to vector<16x32xf32>
    %cst_199 = arith.constant dense<0.000000e+00> : vector<96x32xf32>
    %418 = tpu.matmul %415, %417, %cst_199 {dimension_numbers = #tpu.dot_dimension_numbers<[1], [0], [0], [1], [0, 0, 1, 1], [], []>} : vector<96x16xf32>, vector<16x32xf32>, vector<96x32xf32> -> vector<96x32xf32>
    %419 = arith.addf %414, %418 : vector<96x32xf32>
    %c15_200 = arith.constant 15 : index
    %c0_201 = arith.constant 0 : index
    %420 = vector.load %arg14[%c15_200, %c0_201] : memref<128x16xf32, #tpu.memory_space<vmem>>, vector<96x16xf32>
    %c8_202 = arith.constant 8 : index
    %c0_203 = arith.constant 0 : index
    %c0_204 = arith.constant 0 : index
    %421 = vector.load %arg4[%c8_202, %c0_203, %c0_204] : memref<15x16x32xf32, #tpu.memory_space<vmem>>, vector<1x16x32xf32>
    %422 = vector.shape_cast %421 : vector<1x16x32xf32> to vector<16x32xf32>
    %cst_205 = arith.constant dense<0.000000e+00> : vector<96x32xf32>
    %423 = tpu.matmul %420, %422, %cst_205 {dimension_numbers = #tpu.dot_dimension_numbers<[1], [0], [0], [1], [0, 0, 1, 1], [], []>} : vector<96x16xf32>, vector<16x32xf32>, vector<96x32xf32> -> vector<96x32xf32>
    %424 = arith.addf %419, %423 : vector<96x32xf32>
    %c16_206 = arith.constant 16 : index
    %c0_207 = arith.constant 0 : index
    %425 = vector.load %arg14[%c16_206, %c0_207] : memref<128x16xf32, #tpu.memory_space<vmem>>, vector<96x16xf32>
    %c9_208 = arith.constant 9 : index
    %c0_209 = arith.constant 0 : index
    %c0_210 = arith.constant 0 : index
    %426 = vector.load %arg4[%c9_208, %c0_209, %c0_210] : memref<15x16x32xf32, #tpu.memory_space<vmem>>, vector<1x16x32xf32>
    %427 = vector.shape_cast %426 : vector<1x16x32xf32> to vector<16x32xf32>
    %cst_211 = arith.constant dense<0.000000e+00> : vector<96x32xf32>
    %428 = tpu.matmul %425, %427, %cst_211 {dimension_numbers = #tpu.dot_dimension_numbers<[1], [0], [0], [1], [0, 0, 1, 1], [], []>} : vector<96x16xf32>, vector<16x32xf32>, vector<96x32xf32> -> vector<96x32xf32>
    %429 = arith.addf %424, %428 : vector<96x32xf32>
    %c24_212 = arith.constant 24 : index
    %c0_213 = arith.constant 0 : index
    %430 = vector.load %arg14[%c24_212, %c0_213] : memref<128x16xf32, #tpu.memory_space<vmem>>, vector<96x16xf32>
    %c10_214 = arith.constant 10 : index
    %c0_215 = arith.constant 0 : index
    %c0_216 = arith.constant 0 : index
    %431 = vector.load %arg4[%c10_214, %c0_215, %c0_216] : memref<15x16x32xf32, #tpu.memory_space<vmem>>, vector<1x16x32xf32>
    %432 = vector.shape_cast %431 : vector<1x16x32xf32> to vector<16x32xf32>
    %cst_217 = arith.constant dense<0.000000e+00> : vector<96x32xf32>
    %433 = tpu.matmul %430, %432, %cst_217 {dimension_numbers = #tpu.dot_dimension_numbers<[1], [0], [0], [1], [0, 0, 1, 1], [], []>} : vector<96x16xf32>, vector<16x32xf32>, vector<96x32xf32> -> vector<96x32xf32>
    %434 = arith.addf %429, %433 : vector<96x32xf32>
    %c25 = arith.constant 25 : index
    %c0_218 = arith.constant 0 : index
    %435 = vector.load %arg14[%c25, %c0_218] : memref<128x16xf32, #tpu.memory_space<vmem>>, vector<96x16xf32>
    %c11_219 = arith.constant 11 : index
    %c0_220 = arith.constant 0 : index
    %c0_221 = arith.constant 0 : index
    %436 = vector.load %arg4[%c11_219, %c0_220, %c0_221] : memref<15x16x32xf32, #tpu.memory_space<vmem>>, vector<1x16x32xf32>
    %437 = vector.shape_cast %436 : vector<1x16x32xf32> to vector<16x32xf32>
    %cst_222 = arith.constant dense<0.000000e+00> : vector<96x32xf32>
    %438 = tpu.matmul %435, %437, %cst_222 {dimension_numbers = #tpu.dot_dimension_numbers<[1], [0], [0], [1], [0, 0, 1, 1], [], []>} : vector<96x16xf32>, vector<16x32xf32>, vector<96x32xf32> -> vector<96x32xf32>
    %439 = arith.addf %434, %438 : vector<96x32xf32>
    %c26_223 = arith.constant 26 : index
    %c0_224 = arith.constant 0 : index
    %440 = vector.load %arg14[%c26_223, %c0_224] : memref<128x16xf32, #tpu.memory_space<vmem>>, vector<96x16xf32>
    %c12_225 = arith.constant 12 : index
    %c0_226 = arith.constant 0 : index
    %c0_227 = arith.constant 0 : index
    %441 = vector.load %arg4[%c12_225, %c0_226, %c0_227] : memref<15x16x32xf32, #tpu.memory_space<vmem>>, vector<1x16x32xf32>
    %442 = vector.shape_cast %441 : vector<1x16x32xf32> to vector<16x32xf32>
    %cst_228 = arith.constant dense<0.000000e+00> : vector<96x32xf32>
    %443 = tpu.matmul %440, %442, %cst_228 {dimension_numbers = #tpu.dot_dimension_numbers<[1], [0], [0], [1], [0, 0, 1, 1], [], []>} : vector<96x16xf32>, vector<16x32xf32>, vector<96x32xf32> -> vector<96x32xf32>
    %444 = arith.addf %439, %443 : vector<96x32xf32>
    %c27_229 = arith.constant 27 : index
    %c0_230 = arith.constant 0 : index
    %445 = vector.load %arg14[%c27_229, %c0_230] : memref<128x16xf32, #tpu.memory_space<vmem>>, vector<96x16xf32>
    %c13_231 = arith.constant 13 : index
    %c0_232 = arith.constant 0 : index
    %c0_233 = arith.constant 0 : index
    %446 = vector.load %arg4[%c13_231, %c0_232, %c0_233] : memref<15x16x32xf32, #tpu.memory_space<vmem>>, vector<1x16x32xf32>
    %447 = vector.shape_cast %446 : vector<1x16x32xf32> to vector<16x32xf32>
    %cst_234 = arith.constant dense<0.000000e+00> : vector<96x32xf32>
    %448 = tpu.matmul %445, %447, %cst_234 {dimension_numbers = #tpu.dot_dimension_numbers<[1], [0], [0], [1], [0, 0, 1, 1], [], []>} : vector<96x16xf32>, vector<16x32xf32>, vector<96x32xf32> -> vector<96x32xf32>
    %449 = arith.addf %444, %448 : vector<96x32xf32>
    %c28_235 = arith.constant 28 : index
    %c0_236 = arith.constant 0 : index
    %450 = vector.load %arg14[%c28_235, %c0_236] : memref<128x16xf32, #tpu.memory_space<vmem>>, vector<96x16xf32>
    %c14_237 = arith.constant 14 : index
    %c0_238 = arith.constant 0 : index
    %c0_239 = arith.constant 0 : index
    %451 = vector.load %arg4[%c14_237, %c0_238, %c0_239] : memref<15x16x32xf32, #tpu.memory_space<vmem>>, vector<1x16x32xf32>
    %452 = vector.shape_cast %451 : vector<1x16x32xf32> to vector<16x32xf32>
    %cst_240 = arith.constant dense<0.000000e+00> : vector<96x32xf32>
    %453 = tpu.matmul %450, %452, %cst_240 {dimension_numbers = #tpu.dot_dimension_numbers<[1], [0], [0], [1], [0, 0, 1, 1], [], []>} : vector<96x16xf32>, vector<16x32xf32>, vector<96x32xf32> -> vector<96x32xf32>
    %454 = arith.addf %449, %453 : vector<96x32xf32>
    %c0_241 = arith.constant 0 : index
    %c0_242 = arith.constant 0 : index
    %455 = vector.load %arg5[%c0_241, %c0_242] : memref<1x32xf32, #tpu.memory_space<vmem>>, vector<1x32xf32>
    %456 = vector.broadcast %455 : vector<1x32xf32> to vector<96x32xf32>
    %457 = arith.addf %454, %456 : vector<96x32xf32>
    %cst_243 = arith.constant 0.000000e+00 : f32
    %458 = vector.broadcast %cst_243 : f32 to vector<96x32xf32>
    %459 = arith.maximumf %457, %458 : vector<96x32xf32>
    %c0_244 = arith.constant 0 : index
    %c0_245 = arith.constant 0 : index
    %460 = vector.load %arg15[%c0_244, %c0_245] : memref<96x32xf32, #tpu.memory_space<vmem>>, vector<96x32xf32>
    tpu.vector_store %arg15[%c0_244, %c0_245], %459 {strides = array<i32>} : memref<96x32xf32, #tpu.memory_space<vmem>>, vector<96x32xf32>,
    %cst_246 = arith.constant 0.000000e+00 : f32
    %461 = vector.broadcast %cst_246 : f32 to vector<40x32xf32>
    %c0_247 = arith.constant 0 : index
    %c0_248 = arith.constant 0 : index
    %462 = vector.load %arg16[%c0_247, %c0_248] : memref<40x32xf32, #tpu.memory_space<vmem>>, vector<40x32xf32>
    tpu.vector_store %arg16[%c0_247, %c0_248], %461 {strides = array<i32>} : memref<40x32xf32, #tpu.memory_space<vmem>>, vector<40x32xf32>,
    %c0_249 = arith.constant 0 : index
    %c0_250 = arith.constant 0 : index
    %463 = vector.load %arg15[%c0_249, %c0_250] : memref<96x32xf32, #tpu.memory_space<vmem>>, vector<8x32xf32>
    %c12_251 = arith.constant 12 : index
    %c0_252 = arith.constant 0 : index
    %464 = vector.load %arg15[%c12_251, %c0_252] : memref<96x32xf32, #tpu.memory_space<vmem>>, vector<8x32xf32>
    %465 = arith.maximumf %463, %464 : vector<8x32xf32>
    %466 = vector.extract_strided_slice %465 {offsets = [0, 0], sizes = [1, 32], strides = [1, 1]} : vector<8x32xf32> to vector<1x32xf32>
    %467 = vector.extract_strided_slice %465 {offsets = [1, 0], sizes = [1, 32], strides = [1, 1]} : vector<8x32xf32> to vector<1x32xf32>
    %468 = arith.maximumf %466, %467 : vector<1x32xf32>
    %c7_253 = arith.constant 7 : index
    %c0_254 = arith.constant 0 : index
    %469 = vector.load %arg16[%c7_253, %c0_254] : memref<40x32xf32, #tpu.memory_space<vmem>>, vector<1x32xf32>
    tpu.vector_store %arg16[%c7_253, %c0_254], %468 {strides = array<i32>} : memref<40x32xf32, #tpu.memory_space<vmem>>, vector<1x32xf32>,
    %470 = vector.extract_strided_slice %465 {offsets = [2, 0], sizes = [1, 32], strides = [1, 1]} : vector<8x32xf32> to vector<1x32xf32>
    %471 = vector.extract_strided_slice %465 {offsets = [3, 0], sizes = [1, 32], strides = [1, 1]} : vector<8x32xf32> to vector<1x32xf32>
    %472 = arith.maximumf %470, %471 : vector<1x32xf32>
    %c8_255 = arith.constant 8 : index
    %c0_256 = arith.constant 0 : index
    %473 = vector.load %arg16[%c8_255, %c0_256] : memref<40x32xf32, #tpu.memory_space<vmem>>, vector<1x32xf32>
    tpu.vector_store %arg16[%c8_255, %c0_256], %472 {strides = array<i32>} : memref<40x32xf32, #tpu.memory_space<vmem>>, vector<1x32xf32>,
    %474 = vector.extract_strided_slice %465 {offsets = [4, 0], sizes = [1, 32], strides = [1, 1]} : vector<8x32xf32> to vector<1x32xf32>
    %475 = vector.extract_strided_slice %465 {offsets = [5, 0], sizes = [1, 32], strides = [1, 1]} : vector<8x32xf32> to vector<1x32xf32>
    %476 = arith.maximumf %474, %475 : vector<1x32xf32>
    %c9_257 = arith.constant 9 : index
    %c0_258 = arith.constant 0 : index
    %477 = vector.load %arg16[%c9_257, %c0_258] : memref<40x32xf32, #tpu.memory_space<vmem>>, vector<1x32xf32>
    tpu.vector_store %arg16[%c9_257, %c0_258], %476 {strides = array<i32>} : memref<40x32xf32, #tpu.memory_space<vmem>>, vector<1x32xf32>,
    %478 = vector.extract_strided_slice %465 {offsets = [6, 0], sizes = [1, 32], strides = [1, 1]} : vector<8x32xf32> to vector<1x32xf32>
    %479 = vector.extract_strided_slice %465 {offsets = [7, 0], sizes = [1, 32], strides = [1, 1]} : vector<8x32xf32> to vector<1x32xf32>
    %480 = arith.maximumf %478, %479 : vector<1x32xf32>
    %c10_259 = arith.constant 10 : index
    %c0_260 = arith.constant 0 : index
    %481 = vector.load %arg16[%c10_259, %c0_260] : memref<40x32xf32, #tpu.memory_space<vmem>>, vector<1x32xf32>
    tpu.vector_store %arg16[%c10_259, %c0_260], %480 {strides = array<i32>} : memref<40x32xf32, #tpu.memory_space<vmem>>, vector<1x32xf32>,
    %c24_261 = arith.constant 24 : index
    %c0_262 = arith.constant 0 : index
    %482 = vector.load %arg15[%c24_261, %c0_262] : memref<96x32xf32, #tpu.memory_space<vmem>>, vector<8x32xf32>
    %c36 = arith.constant 36 : index
    %c0_263 = arith.constant 0 : index
    %483 = vector.load %arg15[%c36, %c0_263] : memref<96x32xf32, #tpu.memory_space<vmem>>, vector<8x32xf32>
    %484 = arith.maximumf %482, %483 : vector<8x32xf32>
    %485 = vector.extract_strided_slice %484 {offsets = [0, 0], sizes = [1, 32], strides = [1, 1]} : vector<8x32xf32> to vector<1x32xf32>
    %486 = vector.extract_strided_slice %484 {offsets = [1, 0], sizes = [1, 32], strides = [1, 1]} : vector<8x32xf32> to vector<1x32xf32>
    %487 = arith.maximumf %485, %486 : vector<1x32xf32>
    %c13_264 = arith.constant 13 : index
    %c0_265 = arith.constant 0 : index
    %488 = vector.load %arg16[%c13_264, %c0_265] : memref<40x32xf32, #tpu.memory_space<vmem>>, vector<1x32xf32>
    tpu.vector_store %arg16[%c13_264, %c0_265], %487 {strides = array<i32>} : memref<40x32xf32, #tpu.memory_space<vmem>>, vector<1x32xf32>,
    %489 = vector.extract_strided_slice %484 {offsets = [2, 0], sizes = [1, 32], strides = [1, 1]} : vector<8x32xf32> to vector<1x32xf32>
    %490 = vector.extract_strided_slice %484 {offsets = [3, 0], sizes = [1, 32], strides = [1, 1]} : vector<8x32xf32> to vector<1x32xf32>
    %491 = arith.maximumf %489, %490 : vector<1x32xf32>
    %c14_266 = arith.constant 14 : index
    %c0_267 = arith.constant 0 : index
    %492 = vector.load %arg16[%c14_266, %c0_267] : memref<40x32xf32, #tpu.memory_space<vmem>>, vector<1x32xf32>
    tpu.vector_store %arg16[%c14_266, %c0_267], %491 {strides = array<i32>} : memref<40x32xf32, #tpu.memory_space<vmem>>, vector<1x32xf32>,
    %493 = vector.extract_strided_slice %484 {offsets = [4, 0], sizes = [1, 32], strides = [1, 1]} : vector<8x32xf32> to vector<1x32xf32>
    %494 = vector.extract_strided_slice %484 {offsets = [5, 0], sizes = [1, 32], strides = [1, 1]} : vector<8x32xf32> to vector<1x32xf32>
    %495 = arith.maximumf %493, %494 : vector<1x32xf32>
    %c15_268 = arith.constant 15 : index
    %c0_269 = arith.constant 0 : index
    %496 = vector.load %arg16[%c15_268, %c0_269] : memref<40x32xf32, #tpu.memory_space<vmem>>, vector<1x32xf32>
    tpu.vector_store %arg16[%c15_268, %c0_269], %495 {strides = array<i32>} : memref<40x32xf32, #tpu.memory_space<vmem>>, vector<1x32xf32>,
    %497 = vector.extract_strided_slice %484 {offsets = [6, 0], sizes = [1, 32], strides = [1, 1]} : vector<8x32xf32> to vector<1x32xf32>
    %498 = vector.extract_strided_slice %484 {offsets = [7, 0], sizes = [1, 32], strides = [1, 1]} : vector<8x32xf32> to vector<1x32xf32>
    %499 = arith.maximumf %497, %498 : vector<1x32xf32>
    %c16_270 = arith.constant 16 : index
    %c0_271 = arith.constant 0 : index
    %500 = vector.load %arg16[%c16_270, %c0_271] : memref<40x32xf32, #tpu.memory_space<vmem>>, vector<1x32xf32>
    tpu.vector_store %arg16[%c16_270, %c0_271], %499 {strides = array<i32>} : memref<40x32xf32, #tpu.memory_space<vmem>>, vector<1x32xf32>,
    %c48 = arith.constant 48 : index
    %c0_272 = arith.constant 0 : index
    %501 = vector.load %arg15[%c48, %c0_272] : memref<96x32xf32, #tpu.memory_space<vmem>>, vector<8x32xf32>
    %c60_273 = arith.constant 60 : index
    %c0_274 = arith.constant 0 : index
    %502 = vector.load %arg15[%c60_273, %c0_274] : memref<96x32xf32, #tpu.memory_space<vmem>>, vector<8x32xf32>
    %503 = arith.maximumf %501, %502 : vector<8x32xf32>
    %504 = vector.extract_strided_slice %503 {offsets = [0, 0], sizes = [1, 32], strides = [1, 1]} : vector<8x32xf32> to vector<1x32xf32>
    %505 = vector.extract_strided_slice %503 {offsets = [1, 0], sizes = [1, 32], strides = [1, 1]} : vector<8x32xf32> to vector<1x32xf32>
    %506 = arith.maximumf %504, %505 : vector<1x32xf32>
    %c19_275 = arith.constant 19 : index
    %c0_276 = arith.constant 0 : index
    %507 = vector.load %arg16[%c19_275, %c0_276] : memref<40x32xf32, #tpu.memory_space<vmem>>, vector<1x32xf32>
    tpu.vector_store %arg16[%c19_275, %c0_276], %506 {strides = array<i32>} : memref<40x32xf32, #tpu.memory_space<vmem>>, vector<1x32xf32>,
    %508 = vector.extract_strided_slice %503 {offsets = [2, 0], sizes = [1, 32], strides = [1, 1]} : vector<8x32xf32> to vector<1x32xf32>
    %509 = vector.extract_strided_slice %503 {offsets = [3, 0], sizes = [1, 32], strides = [1, 1]} : vector<8x32xf32> to vector<1x32xf32>
    %510 = arith.maximumf %508, %509 : vector<1x32xf32>
    %c20_277 = arith.constant 20 : index
    %c0_278 = arith.constant 0 : index
    %511 = vector.load %arg16[%c20_277, %c0_278] : memref<40x32xf32, #tpu.memory_space<vmem>>, vector<1x32xf32>
    tpu.vector_store %arg16[%c20_277, %c0_278], %510 {strides = array<i32>} : memref<40x32xf32, #tpu.memory_space<vmem>>, vector<1x32xf32>,
    %512 = vector.extract_strided_slice %503 {offsets = [4, 0], sizes = [1, 32], strides = [1, 1]} : vector<8x32xf32> to vector<1x32xf32>
    %513 = vector.extract_strided_slice %503 {offsets = [5, 0], sizes = [1, 32], strides = [1, 1]} : vector<8x32xf32> to vector<1x32xf32>
    %514 = arith.maximumf %512, %513 : vector<1x32xf32>
    %c21_279 = arith.constant 21 : index
    %c0_280 = arith.constant 0 : index
    %515 = vector.load %arg16[%c21_279, %c0_280] : memref<40x32xf32, #tpu.memory_space<vmem>>, vector<1x32xf32>
    tpu.vector_store %arg16[%c21_279, %c0_280], %514 {strides = array<i32>} : memref<40x32xf32, #tpu.memory_space<vmem>>, vector<1x32xf32>,
    %516 = vector.extract_strided_slice %503 {offsets = [6, 0], sizes = [1, 32], strides = [1, 1]} : vector<8x32xf32> to vector<1x32xf32>
    %517 = vector.extract_strided_slice %503 {offsets = [7, 0], sizes = [1, 32], strides = [1, 1]} : vector<8x32xf32> to vector<1x32xf32>
    %518 = arith.maximumf %516, %517 : vector<1x32xf32>
    %c22_281 = arith.constant 22 : index
    %c0_282 = arith.constant 0 : index
    %519 = vector.load %arg16[%c22_281, %c0_282] : memref<40x32xf32, #tpu.memory_space<vmem>>, vector<1x32xf32>
    tpu.vector_store %arg16[%c22_281, %c0_282], %518 {strides = array<i32>} : memref<40x32xf32, #tpu.memory_space<vmem>>, vector<1x32xf32>,
    %c72 = arith.constant 72 : index
    %c0_283 = arith.constant 0 : index
    %520 = vector.load %arg15[%c72, %c0_283] : memref<96x32xf32, #tpu.memory_space<vmem>>, vector<8x32xf32>
    %c84 = arith.constant 84 : index
    %c0_284 = arith.constant 0 : index
    %521 = vector.load %arg15[%c84, %c0_284] : memref<96x32xf32, #tpu.memory_space<vmem>>, vector<8x32xf32>
    %522 = arith.maximumf %520, %521 : vector<8x32xf32>
    %523 = vector.extract_strided_slice %522 {offsets = [0, 0], sizes = [1, 32], strides = [1, 1]} : vector<8x32xf32> to vector<1x32xf32>
    %524 = vector.extract_strided_slice %522 {offsets = [1, 0], sizes = [1, 32], strides = [1, 1]} : vector<8x32xf32> to vector<1x32xf32>
    %525 = arith.maximumf %523, %524 : vector<1x32xf32>
    %c25_285 = arith.constant 25 : index
    %c0_286 = arith.constant 0 : index
    %526 = vector.load %arg16[%c25_285, %c0_286] : memref<40x32xf32, #tpu.memory_space<vmem>>, vector<1x32xf32>
    tpu.vector_store %arg16[%c25_285, %c0_286], %525 {strides = array<i32>} : memref<40x32xf32, #tpu.memory_space<vmem>>, vector<1x32xf32>,
    %527 = vector.extract_strided_slice %522 {offsets = [2, 0], sizes = [1, 32], strides = [1, 1]} : vector<8x32xf32> to vector<1x32xf32>
    %528 = vector.extract_strided_slice %522 {offsets = [3, 0], sizes = [1, 32], strides = [1, 1]} : vector<8x32xf32> to vector<1x32xf32>
    %529 = arith.maximumf %527, %528 : vector<1x32xf32>
    %c26_287 = arith.constant 26 : index
    %c0_288 = arith.constant 0 : index
    %530 = vector.load %arg16[%c26_287, %c0_288] : memref<40x32xf32, #tpu.memory_space<vmem>>, vector<1x32xf32>
    tpu.vector_store %arg16[%c26_287, %c0_288], %529 {strides = array<i32>} : memref<40x32xf32, #tpu.memory_space<vmem>>, vector<1x32xf32>,
    %531 = vector.extract_strided_slice %522 {offsets = [4, 0], sizes = [1, 32], strides = [1, 1]} : vector<8x32xf32> to vector<1x32xf32>
    %532 = vector.extract_strided_slice %522 {offsets = [5, 0], sizes = [1, 32], strides = [1, 1]} : vector<8x32xf32> to vector<1x32xf32>
    %533 = arith.maximumf %531, %532 : vector<1x32xf32>
    %c27_289 = arith.constant 27 : index
    %c0_290 = arith.constant 0 : index
    %534 = vector.load %arg16[%c27_289, %c0_290] : memref<40x32xf32, #tpu.memory_space<vmem>>, vector<1x32xf32>
    tpu.vector_store %arg16[%c27_289, %c0_290], %533 {strides = array<i32>} : memref<40x32xf32, #tpu.memory_space<vmem>>, vector<1x32xf32>,
    %535 = vector.extract_strided_slice %522 {offsets = [6, 0], sizes = [1, 32], strides = [1, 1]} : vector<8x32xf32> to vector<1x32xf32>
    %536 = vector.extract_strided_slice %522 {offsets = [7, 0], sizes = [1, 32], strides = [1, 1]} : vector<8x32xf32> to vector<1x32xf32>
    %537 = arith.maximumf %535, %536 : vector<1x32xf32>
    %c28_291 = arith.constant 28 : index
    %c0_292 = arith.constant 0 : index
    %538 = vector.load %arg16[%c28_291, %c0_292] : memref<40x32xf32, #tpu.memory_space<vmem>>, vector<1x32xf32>
    tpu.vector_store %arg16[%c28_291, %c0_292], %537 {strides = array<i32>} : memref<40x32xf32, #tpu.memory_space<vmem>>, vector<1x32xf32>,
    %cst_293 = arith.constant 0.000000e+00 : f32
    %539 = vector.broadcast %cst_293 : f32 to vector<24x64xf32>
    %c0_294 = arith.constant 0 : index
    %c0_295 = arith.constant 0 : index
    %540 = vector.load %arg16[%c0_294, %c0_295] : memref<40x32xf32, #tpu.memory_space<vmem>>, vector<24x32xf32>
    %c0_296 = arith.constant 0 : index
    %c0_297 = arith.constant 0 : index
    %c0_298 = arith.constant 0 : index
    %541 = vector.load %arg6[%c0_296, %c0_297, %c0_298] : memref<9x32x64xf32, #tpu.memory_space<vmem>>, vector<1x32x64xf32>
    %542 = vector.shape_cast %541 : vector<1x32x64xf32> to vector<32x64xf32>
    %cst_299 = arith.constant dense<0.000000e+00> : vector<24x64xf32>
    %543 = tpu.matmul %540, %542, %cst_299 {dimension_numbers = #tpu.dot_dimension_numbers<[1], [0], [0], [1], [0, 0, 1, 1], [], []>} : vector<24x32xf32>, vector<32x64xf32>, vector<24x64xf32> -> vector<24x64xf32>
    %544 = arith.addf %539, %543 : vector<24x64xf32>
    %c1_300 = arith.constant 1 : index
    %c0_301 = arith.constant 0 : index
    %545 = vector.load %arg16[%c1_300, %c0_301] : memref<40x32xf32, #tpu.memory_space<vmem>>, vector<24x32xf32>
    %c1_302 = arith.constant 1 : index
    %c0_303 = arith.constant 0 : index
    %c0_304 = arith.constant 0 : index
    %546 = vector.load %arg6[%c1_302, %c0_303, %c0_304] : memref<9x32x64xf32, #tpu.memory_space<vmem>>, vector<1x32x64xf32>
    %547 = vector.shape_cast %546 : vector<1x32x64xf32> to vector<32x64xf32>
    %cst_305 = arith.constant dense<0.000000e+00> : vector<24x64xf32>
    %548 = tpu.matmul %545, %547, %cst_305 {dimension_numbers = #tpu.dot_dimension_numbers<[1], [0], [0], [1], [0, 0, 1, 1], [], []>} : vector<24x32xf32>, vector<32x64xf32>, vector<24x64xf32> -> vector<24x64xf32>
    %549 = arith.addf %544, %548 : vector<24x64xf32>
    %c2_306 = arith.constant 2 : index
    %c0_307 = arith.constant 0 : index
    %550 = vector.load %arg16[%c2_306, %c0_307] : memref<40x32xf32, #tpu.memory_space<vmem>>, vector<24x32xf32>
    %c2_308 = arith.constant 2 : index
    %c0_309 = arith.constant 0 : index
    %c0_310 = arith.constant 0 : index
    %551 = vector.load %arg6[%c2_308, %c0_309, %c0_310] : memref<9x32x64xf32, #tpu.memory_space<vmem>>, vector<1x32x64xf32>
    %552 = vector.shape_cast %551 : vector<1x32x64xf32> to vector<32x64xf32>
    %cst_311 = arith.constant dense<0.000000e+00> : vector<24x64xf32>
    %553 = tpu.matmul %550, %552, %cst_311 {dimension_numbers = #tpu.dot_dimension_numbers<[1], [0], [0], [1], [0, 0, 1, 1], [], []>} : vector<24x32xf32>, vector<32x64xf32>, vector<24x64xf32> -> vector<24x64xf32>
    %554 = arith.addf %549, %553 : vector<24x64xf32>
    %c6_312 = arith.constant 6 : index
    %c0_313 = arith.constant 0 : index
    %555 = vector.load %arg16[%c6_312, %c0_313] : memref<40x32xf32, #tpu.memory_space<vmem>>, vector<24x32xf32>
    %c3_314 = arith.constant 3 : index
    %c0_315 = arith.constant 0 : index
    %c0_316 = arith.constant 0 : index
    %556 = vector.load %arg6[%c3_314, %c0_315, %c0_316] : memref<9x32x64xf32, #tpu.memory_space<vmem>>, vector<1x32x64xf32>
    %557 = vector.shape_cast %556 : vector<1x32x64xf32> to vector<32x64xf32>
    %cst_317 = arith.constant dense<0.000000e+00> : vector<24x64xf32>
    %558 = tpu.matmul %555, %557, %cst_317 {dimension_numbers = #tpu.dot_dimension_numbers<[1], [0], [0], [1], [0, 0, 1, 1], [], []>} : vector<24x32xf32>, vector<32x64xf32>, vector<24x64xf32> -> vector<24x64xf32>
    %559 = arith.addf %554, %558 : vector<24x64xf32>
    %c7_318 = arith.constant 7 : index
    %c0_319 = arith.constant 0 : index
    %560 = vector.load %arg16[%c7_318, %c0_319] : memref<40x32xf32, #tpu.memory_space<vmem>>, vector<24x32xf32>
    %c4_320 = arith.constant 4 : index
    %c0_321 = arith.constant 0 : index
    %c0_322 = arith.constant 0 : index
    %561 = vector.load %arg6[%c4_320, %c0_321, %c0_322] : memref<9x32x64xf32, #tpu.memory_space<vmem>>, vector<1x32x64xf32>
    %562 = vector.shape_cast %561 : vector<1x32x64xf32> to vector<32x64xf32>
    %cst_323 = arith.constant dense<0.000000e+00> : vector<24x64xf32>
    %563 = tpu.matmul %560, %562, %cst_323 {dimension_numbers = #tpu.dot_dimension_numbers<[1], [0], [0], [1], [0, 0, 1, 1], [], []>} : vector<24x32xf32>, vector<32x64xf32>, vector<24x64xf32> -> vector<24x64xf32>
    %564 = arith.addf %559, %563 : vector<24x64xf32>
    %c8_324 = arith.constant 8 : index
    %c0_325 = arith.constant 0 : index
    %565 = vector.load %arg16[%c8_324, %c0_325] : memref<40x32xf32, #tpu.memory_space<vmem>>, vector<24x32xf32>
    %c5_326 = arith.constant 5 : index
    %c0_327 = arith.constant 0 : index
    %c0_328 = arith.constant 0 : index
    %566 = vector.load %arg6[%c5_326, %c0_327, %c0_328] : memref<9x32x64xf32, #tpu.memory_space<vmem>>, vector<1x32x64xf32>
    %567 = vector.shape_cast %566 : vector<1x32x64xf32> to vector<32x64xf32>
    %cst_329 = arith.constant dense<0.000000e+00> : vector<24x64xf32>
    %568 = tpu.matmul %565, %567, %cst_329 {dimension_numbers = #tpu.dot_dimension_numbers<[1], [0], [0], [1], [0, 0, 1, 1], [], []>} : vector<24x32xf32>, vector<32x64xf32>, vector<24x64xf32> -> vector<24x64xf32>
    %569 = arith.addf %564, %568 : vector<24x64xf32>
    %c12_330 = arith.constant 12 : index
    %c0_331 = arith.constant 0 : index
    %570 = vector.load %arg16[%c12_330, %c0_331] : memref<40x32xf32, #tpu.memory_space<vmem>>, vector<24x32xf32>
    %c6_332 = arith.constant 6 : index
    %c0_333 = arith.constant 0 : index
    %c0_334 = arith.constant 0 : index
    %571 = vector.load %arg6[%c6_332, %c0_333, %c0_334] : memref<9x32x64xf32, #tpu.memory_space<vmem>>, vector<1x32x64xf32>
    %572 = vector.shape_cast %571 : vector<1x32x64xf32> to vector<32x64xf32>
    %cst_335 = arith.constant dense<0.000000e+00> : vector<24x64xf32>
    %573 = tpu.matmul %570, %572, %cst_335 {dimension_numbers = #tpu.dot_dimension_numbers<[1], [0], [0], [1], [0, 0, 1, 1], [], []>} : vector<24x32xf32>, vector<32x64xf32>, vector<24x64xf32> -> vector<24x64xf32>
    %574 = arith.addf %569, %573 : vector<24x64xf32>
    %c13_336 = arith.constant 13 : index
    %c0_337 = arith.constant 0 : index
    %575 = vector.load %arg16[%c13_336, %c0_337] : memref<40x32xf32, #tpu.memory_space<vmem>>, vector<24x32xf32>
    %c7_338 = arith.constant 7 : index
    %c0_339 = arith.constant 0 : index
    %c0_340 = arith.constant 0 : index
    %576 = vector.load %arg6[%c7_338, %c0_339, %c0_340] : memref<9x32x64xf32, #tpu.memory_space<vmem>>, vector<1x32x64xf32>
    %577 = vector.shape_cast %576 : vector<1x32x64xf32> to vector<32x64xf32>
    %cst_341 = arith.constant dense<0.000000e+00> : vector<24x64xf32>
    %578 = tpu.matmul %575, %577, %cst_341 {dimension_numbers = #tpu.dot_dimension_numbers<[1], [0], [0], [1], [0, 0, 1, 1], [], []>} : vector<24x32xf32>, vector<32x64xf32>, vector<24x64xf32> -> vector<24x64xf32>
    %579 = arith.addf %574, %578 : vector<24x64xf32>
    %c14_342 = arith.constant 14 : index
    %c0_343 = arith.constant 0 : index
    %580 = vector.load %arg16[%c14_342, %c0_343] : memref<40x32xf32, #tpu.memory_space<vmem>>, vector<24x32xf32>
    %c8_344 = arith.constant 8 : index
    %c0_345 = arith.constant 0 : index
    %c0_346 = arith.constant 0 : index
    %581 = vector.load %arg6[%c8_344, %c0_345, %c0_346] : memref<9x32x64xf32, #tpu.memory_space<vmem>>, vector<1x32x64xf32>
    %582 = vector.shape_cast %581 : vector<1x32x64xf32> to vector<32x64xf32>
    %cst_347 = arith.constant dense<0.000000e+00> : vector<24x64xf32>
    %583 = tpu.matmul %580, %582, %cst_347 {dimension_numbers = #tpu.dot_dimension_numbers<[1], [0], [0], [1], [0, 0, 1, 1], [], []>} : vector<24x32xf32>, vector<32x64xf32>, vector<24x64xf32> -> vector<24x64xf32>
    %584 = arith.addf %579, %583 : vector<24x64xf32>
    %c0_348 = arith.constant 0 : index
    %c0_349 = arith.constant 0 : index
    %585 = vector.load %arg7[%c0_348, %c0_349] : memref<1x64xf32, #tpu.memory_space<vmem>>, vector<1x64xf32>
    %586 = vector.broadcast %585 : vector<1x64xf32> to vector<24x64xf32>
    %587 = arith.addf %584, %586 : vector<24x64xf32>
    %cst_350 = arith.constant 0.000000e+00 : f32
    %588 = vector.broadcast %cst_350 : f32 to vector<24x64xf32>
    %589 = arith.maximumf %587, %588 : vector<24x64xf32>
    %c0_351 = arith.constant 0 : index
    %c0_352 = arith.constant 0 : index
    %590 = vector.load %arg17[%c0_351, %c0_352] : memref<24x64xf32, #tpu.memory_space<vmem>>, vector<24x64xf32>
    tpu.vector_store %arg17[%c0_351, %c0_352], %589 {strides = array<i32>} : memref<24x64xf32, #tpu.memory_space<vmem>>, vector<24x64xf32>,
    %cst_353 = arith.constant 0.000000e+00 : f32
    %591 = vector.broadcast %cst_353 : f32 to vector<1x128xf32>
    %c0_354 = arith.constant 0 : index
    %c0_355 = arith.constant 0 : index
    %592 = vector.load %arg17[%c0_354, %c0_355] : memref<24x64xf32, #tpu.memory_space<vmem>>, vector<4x64xf32>
    %c6_356 = arith.constant 6 : index
    %c0_357 = arith.constant 0 : index
    %593 = vector.load %arg17[%c6_356, %c0_357] : memref<24x64xf32, #tpu.memory_space<vmem>>, vector<4x64xf32>
    %594 = arith.maximumf %592, %593 : vector<4x64xf32>
    %595 = vector.extract_strided_slice %594 {offsets = [0, 0], sizes = [1, 64], strides = [1, 1]} : vector<4x64xf32> to vector<1x64xf32>
    %596 = vector.extract_strided_slice %594 {offsets = [1, 0], sizes = [1, 64], strides = [1, 1]} : vector<4x64xf32> to vector<1x64xf32>
    %597 = arith.maximumf %595, %596 : vector<1x64xf32>
    %c0_358 = arith.constant 0 : index
    %c0_359 = arith.constant 0 : index
    %c0_360 = arith.constant 0 : index
    %598 = vector.load %arg8[%c0_358, %c0_359, %c0_360] : memref<4x64x128xf32, #tpu.memory_space<vmem>>, vector<1x64x128xf32>
    %599 = vector.shape_cast %598 : vector<1x64x128xf32> to vector<64x128xf32>
    %cst_361 = arith.constant dense<0.000000e+00> : vector<1x128xf32>
    %600 = tpu.matmul %597, %599, %cst_361 {dimension_numbers = #tpu.dot_dimension_numbers<[1], [0], [0], [1], [0, 0, 1, 1], [], []>} : vector<1x64xf32>, vector<64x128xf32>, vector<1x128xf32> -> vector<1x128xf32>
    %601 = arith.addf %591, %600 : vector<1x128xf32>
    %602 = vector.extract_strided_slice %594 {offsets = [2, 0], sizes = [1, 64], strides = [1, 1]} : vector<4x64xf32> to vector<1x64xf32>
    %603 = vector.extract_strided_slice %594 {offsets = [3, 0], sizes = [1, 64], strides = [1, 1]} : vector<4x64xf32> to vector<1x64xf32>
    %604 = arith.maximumf %602, %603 : vector<1x64xf32>
    %c1_362 = arith.constant 1 : index
    %c0_363 = arith.constant 0 : index
    %c0_364 = arith.constant 0 : index
    %605 = vector.load %arg8[%c1_362, %c0_363, %c0_364] : memref<4x64x128xf32, #tpu.memory_space<vmem>>, vector<1x64x128xf32>
    %606 = vector.shape_cast %605 : vector<1x64x128xf32> to vector<64x128xf32>
    %cst_365 = arith.constant dense<0.000000e+00> : vector<1x128xf32>
    %607 = tpu.matmul %604, %606, %cst_365 {dimension_numbers = #tpu.dot_dimension_numbers<[1], [0], [0], [1], [0, 0, 1, 1], [], []>} : vector<1x64xf32>, vector<64x128xf32>, vector<1x128xf32> -> vector<1x128xf32>
    %608 = arith.addf %601, %607 : vector<1x128xf32>
    %c12_366 = arith.constant 12 : index
    %c0_367 = arith.constant 0 : index
    %609 = vector.load %arg17[%c12_366, %c0_367] : memref<24x64xf32, #tpu.memory_space<vmem>>, vector<4x64xf32>
    %c18_368 = arith.constant 18 : index
    %c0_369 = arith.constant 0 : index
    %610 = vector.load %arg17[%c18_368, %c0_369] : memref<24x64xf32, #tpu.memory_space<vmem>>, vector<4x64xf32>
    %611 = arith.maximumf %609, %610 : vector<4x64xf32>
    %612 = vector.extract_strided_slice %611 {offsets = [0, 0], sizes = [1, 64], strides = [1, 1]} : vector<4x64xf32> to vector<1x64xf32>
    %613 = vector.extract_strided_slice %611 {offsets = [1, 0], sizes = [1, 64], strides = [1, 1]} : vector<4x64xf32> to vector<1x64xf32>
    %614 = arith.maximumf %612, %613 : vector<1x64xf32>
    %c2_370 = arith.constant 2 : index
    %c0_371 = arith.constant 0 : index
    %c0_372 = arith.constant 0 : index
    %615 = vector.load %arg8[%c2_370, %c0_371, %c0_372] : memref<4x64x128xf32, #tpu.memory_space<vmem>>, vector<1x64x128xf32>
    %616 = vector.shape_cast %615 : vector<1x64x128xf32> to vector<64x128xf32>
    %cst_373 = arith.constant dense<0.000000e+00> : vector<1x128xf32>
    %617 = tpu.matmul %614, %616, %cst_373 {dimension_numbers = #tpu.dot_dimension_numbers<[1], [0], [0], [1], [0, 0, 1, 1], [], []>} : vector<1x64xf32>, vector<64x128xf32>, vector<1x128xf32> -> vector<1x128xf32>
    %618 = arith.addf %608, %617 : vector<1x128xf32>
    %619 = vector.extract_strided_slice %611 {offsets = [2, 0], sizes = [1, 64], strides = [1, 1]} : vector<4x64xf32> to vector<1x64xf32>
    %620 = vector.extract_strided_slice %611 {offsets = [3, 0], sizes = [1, 64], strides = [1, 1]} : vector<4x64xf32> to vector<1x64xf32>
    %621 = arith.maximumf %619, %620 : vector<1x64xf32>
    %c3_374 = arith.constant 3 : index
    %c0_375 = arith.constant 0 : index
    %c0_376 = arith.constant 0 : index
    %622 = vector.load %arg8[%c3_374, %c0_375, %c0_376] : memref<4x64x128xf32, #tpu.memory_space<vmem>>, vector<1x64x128xf32>
    %623 = vector.shape_cast %622 : vector<1x64x128xf32> to vector<64x128xf32>
    %cst_377 = arith.constant dense<0.000000e+00> : vector<1x128xf32>
    %624 = tpu.matmul %621, %623, %cst_377 {dimension_numbers = #tpu.dot_dimension_numbers<[1], [0], [0], [1], [0, 0, 1, 1], [], []>} : vector<1x64xf32>, vector<64x128xf32>, vector<1x128xf32> -> vector<1x128xf32>
    %625 = arith.addf %618, %624 : vector<1x128xf32>
    %c0_378 = arith.constant 0 : index
    %c0_379 = arith.constant 0 : index
    %626 = vector.load %arg9[%c0_378, %c0_379] : memref<1x128xf32, #tpu.memory_space<vmem>>, vector<1x128xf32>
    %627 = arith.addf %625, %626 : vector<1x128xf32>
    %cst_380 = arith.constant 0.000000e+00 : f32
    %628 = vector.broadcast %cst_380 : f32 to vector<1x128xf32>
    %629 = arith.maximumf %627, %628 : vector<1x128xf32>
    %c0_381 = arith.constant 0 : index
    %c0_382 = arith.constant 0 : index
    %630 = vector.load %arg10[%c0_381, %c0_382] : memref<128x128xf32, #tpu.memory_space<vmem>>, vector<128x128xf32>
    %cst_383 = arith.constant dense<0.000000e+00> : vector<1x128xf32>
    %631 = tpu.matmul %629, %630, %cst_383 {dimension_numbers = #tpu.dot_dimension_numbers<[1], [0], [0], [1], [0, 0, 1, 1], [], []>} : vector<1x128xf32>, vector<128x128xf32>, vector<1x128xf32> -> vector<1x128xf32>
    %c0_384 = arith.constant 0 : index
    %c0_385 = arith.constant 0 : index
    %632 = vector.load %arg11[%c0_384, %c0_385] : memref<1x128xf32, #tpu.memory_space<vmem>>, vector<1x128xf32>
    %633 = arith.addf %631, %632 : vector<1x128xf32>
    %634 = vector.shape_cast %633 : vector<1x128xf32> to vector<1x128xf32>
    %635 = vector.broadcast %634 : vector<1x128xf32> to vector<8x128xf32>
    %c0_386 = arith.constant 0 : index
    %c0_387 = arith.constant 0 : index
    %c0_388 = arith.constant 0 : index
    %636 = vector.load %arg12[%c0_386, %c0_387, %c0_388] : memref<1x8x128xf32, #tpu.memory_space<vmem>>, vector<1x8x128xf32>
    %637 = vector.shape_cast %636 : vector<1x8x128xf32> to vector<8x128xf32>
    %638 = vector.shape_cast %635 : vector<8x128xf32> to vector<1x8x128xf32>
    tpu.vector_store %arg12[%c0_386, %c0_387, %c0_388], %638 {strides = array<i32>} : memref<1x8x128xf32, #tpu.memory_space<vmem>>, vector<1x8x128xf32>,
    return
  }
  func.func @transform_0(%arg0: i32) -> (i32, i32, i32) {
    %c0_i32 = arith.constant 0 : i32
    %c0_i32_0 = arith.constant 0 : i32
    %c0_i32_1 = arith.constant 0 : i32
    return %arg0, %c0_i32, %c0_i32_0 : i32, i32, i32
  }
  func.func @transform_1(%arg0: i32) -> (i32, i32) {
    %c0_i32 = arith.constant 0 : i32
    %c0_i32_0 = arith.constant 0 : i32
    %c0_i32_1 = arith.constant 0 : i32
    return %c0_i32, %c0_i32_0 : i32, i32
  }
  func.func @transform_2(%arg0: i32) -> (i32, i32) {
    %c0_i32 = arith.constant 0 : i32
    %c0_i32_0 = arith.constant 0 : i32
    %c0_i32_1 = arith.constant 0 : i32
    return %c0_i32, %c0_i32_0 : i32, i32
  }
  func.func @transform_3(%arg0: i32) -> (i32, i32, i32) {
    %c0_i32 = arith.constant 0 : i32
    %c0_i32_0 = arith.constant 0 : i32
    %c0_i32_1 = arith.constant 0 : i32
    %c0_i32_2 = arith.constant 0 : i32
    return %c0_i32, %c0_i32_0, %c0_i32_1 : i32, i32, i32
  }
  func.func @transform_4(%arg0: i32) -> (i32, i32) {
    %c0_i32 = arith.constant 0 : i32
    %c0_i32_0 = arith.constant 0 : i32
    %c0_i32_1 = arith.constant 0 : i32
    return %c0_i32, %c0_i32_0 : i32, i32
  }
  func.func @transform_5(%arg0: i32) -> (i32, i32, i32) {
    %c0_i32 = arith.constant 0 : i32
    %c0_i32_0 = arith.constant 0 : i32
    %c0_i32_1 = arith.constant 0 : i32
    %c0_i32_2 = arith.constant 0 : i32
    return %c0_i32, %c0_i32_0, %c0_i32_1 : i32, i32, i32
  }
  func.func @transform_6(%arg0: i32) -> (i32, i32) {
    %c0_i32 = arith.constant 0 : i32
    %c0_i32_0 = arith.constant 0 : i32
    %c0_i32_1 = arith.constant 0 : i32
    return %c0_i32, %c0_i32_0 : i32, i32
  }
  func.func @transform_7(%arg0: i32) -> (i32, i32, i32) {
    %c0_i32 = arith.constant 0 : i32
    %c0_i32_0 = arith.constant 0 : i32
    %c0_i32_1 = arith.constant 0 : i32
    %c0_i32_2 = arith.constant 0 : i32
    return %c0_i32, %c0_i32_0, %c0_i32_1 : i32, i32, i32
  }
  func.func @transform_8(%arg0: i32) -> (i32, i32) {
    %c0_i32 = arith.constant 0 : i32
    %c0_i32_0 = arith.constant 0 : i32
    %c0_i32_1 = arith.constant 0 : i32
    return %c0_i32, %c0_i32_0 : i32, i32
  }
  func.func @transform_9(%arg0: i32) -> (i32, i32) {
    %c0_i32 = arith.constant 0 : i32
    %c0_i32_0 = arith.constant 0 : i32
    %c0_i32_1 = arith.constant 0 : i32
    return %c0_i32, %c0_i32_0 : i32, i32
  }
  func.func @transform_10(%arg0: i32) -> (i32, i32) {
    %c0_i32 = arith.constant 0 : i32
    %c0_i32_0 = arith.constant 0 : i32
    %c0_i32_1 = arith.constant 0 : i32
    return %c0_i32, %c0_i32_0 : i32, i32
  }
  func.func @transform_11(%arg0: i32) -> (i32, i32, i32) {
    %c0_i32 = arith.constant 0 : i32
    %c0_i32_0 = arith.constant 0 : i32
    %c0_i32_1 = arith.constant 0 : i32
    return %arg0, %c0_i32, %c0_i32_0 : i32, i32, i32
  }
}

</mosaic_0001>

<bundles_post_ra>
// kernel: simple_cnn_forward.1
= control target key start
LH: loop header
LB: loop body
LE: loop exit
PB: predicated region body
PF: predicated region fallthrough
CT: control target
= control target key end

     0   :  { %s5226_s17 = smov 0   ;;  %s8525_s0 = inlined_call_operand.vmem [shape: f32[2,368,16], index: 0, kind: input, shape index: {}]   ;;  %s8526_s1 = inlined_call_operand.vmem [shape: f32[15,16], index: 1, kind: input, shape index: {}]   ;;  %s8527_s2 = inlined_call_operand.vmem [shape: f32[1,16], index: 2, kind: input, shape index: {}]   ;;  %s8528_s3 = inlined_call_operand.vmem [shape: f32[15,16,32], index: 3, kind: input, shape index: {}]   ;;  %s8529_s4 = inlined_call_operand.vmem [shape: f32[1,32], index: 4, kind: input, shape index: {}]   ;;  %s8530_s5 = inlined_call_operand.vmem [shape: f32[9,32,64], index: 5, kind: input, shape index: {}]   ;;  %s8531_s6 = inlined_call_operand.vmem [shape: f32[1,64], index: 6, kind: input, shape index: {}]   ;;  %s8532_s7 = inlined_call_operand.vmem [shape: f32[4,64,128], index: 7, kind: input, shape index: {}]   ;;  %s8533_s8 = inlined_call_operand.vmem [shape: f32[1,128], index: 8, kind: input, shape index: {}]   ;;  %s8534_s9 = inlined_call_operand.vmem [shape: f32[128,128], index: 9, kind: input, shape index: {}]   ;;  %s8535_s10 = inlined_call_operand.vmem [shape: f32[1,128], index: 10, kind: input, shape index: {}]   ;;  %s8536_s11 = inlined_call_operand.vmem [shape: f32[2,8,128], index: 11, kind: output, shape index: {}]  }
   0x1 LB: > { %s4749_s18 = sadd.s32 4294967295, %s5163_s17   ;;  %p4753_p0 = scmp.ge.s32.totalorder %s5163_s17, 1  ;;  %s5163_s17 = sphi %s5226_s17, %s21_s17  }
   0x2   : > { %p337_p1 = scmp.lt.s32.totalorder %s5163_s17, 3 }
   0x4   : > { %p338_p2 = pnand %p4753_p0, %p337_p1 }
   0x6   : > { %341 = sbr.rel (%p338_p2) target bundleno = 1315 (0x523), region = 64 }
   0xb   : > { %v4757_v0 = vld [vmem:[%s8528_s3 + $0x18] sm:$0xff]  ;;  %v2294_v1 = vld [vmem:[%s8528_s3 + $0x8] sm:$0xff]  ;;  %v4756_v2 = vld [vmem:[%s8528_s3 + $0x10] sm:$0xff]  ;;  %vm2044_vm0 = vcmask 130048   ;;  %p376_p3 = scmp.lt.s32.totalorder %s4749_s18, 1  ;;  %v8537_v4 = vmov 0.0  }
   0xc   : > { %2360 = vmatpush.msra.mxu0 %v4757_v0  ;;  %2449 = vmatpush.msra.mxu1 %v2294_v1  ;;  %v2293_v3 = vld [vmem:[%s8528_s3] sm:$0xff]  ;;  %2085 = vst.msk [vmem:[#allocation3] sm:$0xff] %vm2044_vm0, %v8537_v4  ;;  %vm2111_vm1 = vcmask 122880   ;;  %vm2113_vm2 = vcmask 124930   ;;  %vm2115_vm3 = vcmask 126980   ;;  %vm2117_vm4 = vcmask 129030  }
   0xd   : > { %2086 = vst.msk [vmem:[#allocation3 + $0x8] sm:$0xff] %vm2044_vm0, %v8537_v4  ;;  %5053 = vmatpush.msra.mxu2 %v4757_v0  ;;  %s8752_s18 = smov (!%p376_p3, %s4749_s18), 1  ;;  %v5262_v5 = vld [vmem:[%s8526_s1] ss:$0 sm:$0xff]  ;;  %v5278_v8 = vld [vmem:[%s8526_s1 + $0x1] ss:$0 sm:$0xff] }
   0xe   : > { %2361 = vmatpush.msra.mxu0 %v4756_v2  ;;  %2450 = vmatpush.msra.mxu1 %v2293_v3  ;;  %2087 = vst.msk [vmem:[#allocation3 + $0x10] sm:$0xff] %vm2044_vm0, %v8537_v4  ;;  %s5055_s27 = smul.u32 368, %s8752_s18  ;;  %v5298_v15 = vld [vmem:[%s8526_s1 + $0x2] ss:$0 sm:$0xff]  ;;  %v5328_v28 = vld [vmem:[%s8526_s1 + $0x3] ss:$0 sm:$0xff] }
   0xf   : > { %2088 = vst.msk [vmem:[#allocation3 + $0x18] sm:$0xff] %vm2044_vm0, %v8537_v4  ;;  %5054 = vmatpush.msra.mxu2 %v4756_v2  ;;  %v5372_v53 = vld [vmem:[%s8526_s1 + $0x4] ss:$0 sm:$0xff]  ;;  %vm4024_vm5 = vcmask 261120   ;;  %vm4049_vm6 = vcmask 253952   ;;  %vm4051_vm7 = vcmask 256002  }
  0x10   : > { %2089 = vst.msk [vmem:[#allocation3 + $0x20] sm:$0xff] %vm2044_vm0, %v8537_v4  ;;  %s5269_s13 = scalar_lea.vmem %s8525_s0, %s5055_s27  ;;  %vm4053_vm8 = vcmask 258052   ;;  %vm4055_vm9 = vcmask 260102   ;;  %vm4507_vm10 = vcmask 523264   ;;  %s4755_s30 = sshll.u32 %s8752_s18, 3 }
  0x11   : > { %2090 = vst.msk [vmem:[#allocation3 + $0x28] sm:$0xff] %vm2044_vm0, %v8537_v4  ;;  %v385_v6 = vld [vmem:[%s5269_s13] sm:$0xff]  ;;  %v387_v7 = vld [vmem:[%s5269_s13 + $0x10] sm:$0xff]  ;;  %v5283_v10 = vld [vmem:[%s5269_s13 + $0x18] sm:$0xff]  ;;  %s384_s15 = scalar_lea.vmem %s8536_s11, %s4755_s30 }
  0x12   : > { %2091 = vst.msk [vmem:[#allocation3 + $0x30] sm:$0xff] %vm2044_vm0, %v8537_v4  ;;  %v5286_v11 = vld [vmem:[%s5269_s13 + $0x28] sm:$0xff]  ;;  %v5292_v13 = vld [vmem:[%s5269_s13 + $0x38] sm:$0xff]  ;;  %v427_v14 = vmul.f32 %v5262_v5, %v385_v6  ;;  %v5305_v17 = vld [vmem:[%s5269_s13 + $0x40] sm:$0xff]  ;;  %v429_v18 = vmul.f32 %v5262_v5, %v387_v7  ;;  %v430_v19 = vmul.f32 %v5262_v5, %v5283_v10 }
  0x13   : > { %2092 = vst.msk [vmem:[#allocation3 + $0x38] sm:$0xff] %vm2044_vm0, %v8537_v4  ;;  %v2281_v9 = vld [vmem:[#allocation3] sm:$0xff]  ;;  %v386_v16 = vld [vmem:[%s5269_s13 + $0x8] sm:$0xff]  ;;  %v432_v20 = vmul.f32 %v5262_v5, %v5286_v11  ;;  %v434_v22 = vmul.f32 %v5262_v5, %v5292_v13  ;;  %v435_v23 = vmul.f32 %v5262_v5, %v5305_v17  ;;  %v509_v24 = vld [vmem:[%s5269_s13 + $0x11] sm:$0xff] }
  0x14   : > { %v2295_v12 = vld [vmem:[#allocation3 + $0x1] sm:$0xff]  ;;  %2093 = vst.msk [vmem:[#allocation3 + $0x40] sm:$0xff] %vm2044_vm0, %v8537_v4  ;;  %4770 = vmatmul.msk.f32.vlgmr.msra.gmra.mxu1 %vm2044_vm0, %v2281_v9  ;;  %v510_v25 = vld [vmem:[%s5269_s13 + $0x19] sm:$0xff]  ;;  %v5322_v26 = vld [vmem:[%s5269_s13 + $0x29] sm:$0xff]  ;;  %v551_v31 = vmul.f32 %v5278_v8, %v509_v24  ;;  %v428_v48 = vmul.f32 %v5262_v5, %v386_v16 }
  0x15   : > { %4758 = vmatmul.msk.f32.vlgmr.msra.gmra.mxu0 %vm2044_vm0, %v2295_v12  ;;  %2094 = vst.msk [vmem:[#allocation3 + $0x48] sm:$0xff] %vm2044_vm0, %v8537_v4  ;;  %v507_v21 = vld [vmem:[%s5269_s13 + $0x1] sm:$0xff]  ;;  %v5333_v29 = vld [vmem:[%s5269_s13 + $0x39] sm:$0xff]  ;;  %v552_v32 = vmul.f32 %v5278_v8, %v510_v25  ;;  %v554_v33 = vmul.f32 %v5278_v8, %v5322_v26  ;;  %v508_v35 = vld [vmem:[%s5269_s13 + $0x9] sm:$0xff] }
  0x16   : > { %2095 = vst.msk [vmem:[#allocation3 + $0x50] sm:$0xff] %vm2044_vm0, %v8537_v4  ;;  %v549_v27 = vmul.f32 %v5278_v8, %v507_v21  ;;  %v5336_v30 = vld [vmem:[%s5269_s13 + $0x41] sm:$0xff]  ;;  %v556_v36 = vmul.f32 %v5278_v8, %v5333_v29  ;;  %v631_v39 = vld [vmem:[%s5269_s13 + $0x12] sm:$0xff]  ;;  %v591_v41 = vadd.f32 %v551_v31, %v429_v18  ;;  %v5355_v44 = vld [vmem:[%s5269_s13 + $0x2a] sm:$0xff]  ;;  %v550_v61 = vmul.f32 %v5278_v8, %v508_v35 }
  0x17   : > { %2096 = vst.msk [vmem:[#allocation3 + $0x58] sm:$0xff] %vm2044_vm0, %v8537_v4  ;;  %v629_v34 = vld [vmem:[%s5269_s13 + $0x2] sm:$0xff]  ;;  %v557_v37 = vmul.f32 %v5278_v8, %v5336_v30  ;;  %v632_v40 = vld [vmem:[%s5269_s13 + $0x1a] sm:$0xff]  ;;  %v592_v42 = vadd.f32 %v552_v32, %v430_v19  ;;  %v594_v43 = vadd.f32 %v554_v33, %v432_v20  ;;  %v673_v51 = vmul.f32 %v5298_v15, %v631_v39  ;;  %v5386_v60 = vld [vmem:[%s5269_s13 + $0x2b] sm:$0xff] }
  0x18   : > { %2097 = vst.msk [vmem:[#allocation3 + $0x60] sm:$0xff] %vm2044_vm0, %v8537_v4  ;;  %v589_v38 = vadd.f32 %v549_v27, %v427_v14  ;;  %v5358_v45 = vld [vmem:[%s5269_s13 + $0x3a] sm:$0xff]  ;;  %v5361_v46 = vld [vmem:[%s5269_s13 + $0x42] sm:$0xff]  ;;  %v671_v47 = vmul.f32 %v5298_v15, %v629_v34  ;;  %v596_v49 = vadd.f32 %v556_v36, %v434_v22  ;;  %v674_v54 = vmul.f32 %v5298_v15, %v632_v40  ;;  %v630_v14 = vld [vmem:[%s5269_s13 + $0xa] sm:$0xff] }
  0x19   : > { %2098 = vst.msk [vmem:[#allocation3 + $0x68] sm:$0xff] %vm2044_vm0, %v8537_v4  ;;  %v597_v50 = vadd.f32 %v557_v37, %v435_v23  ;;  %v751_v52 = vld [vmem:[%s5269_s13 + $0x3] sm:$0xff]  ;;  %v676_v55 = vmul.f32 %v5298_v15, %v5355_v44  ;;  %v678_v56 = vmul.f32 %v5298_v15, %v5358_v45  ;;  %v679_v57 = vmul.f32 %v5298_v15, %v5361_v46  ;;  %v753_v58 = vld [vmem:[%s5269_s13 + $0x13] sm:$0xff]  ;;  %v754_v59 = vld [vmem:[%s5269_s13 + $0x1b] sm:$0xff] }
  0x1a   : > { %2099 = vst.msk [vmem:[#allocation3 + $0x70] sm:$0xff] %vm2044_vm0, %v8537_v4  ;;  %v711_v62 = vadd.f32 %v671_v47, %v589_v38  ;;  %v713_v63 = vadd.f32 %v673_v51, %v591_v41  ;;  %v5390_v0 = vld [vmem:[%s5269_s13 + $0x3b] sm:$0xff]  ;;  %v5393_v1 = vld [vmem:[%s5269_s13 + $0x43] sm:$0xff]  ;;  %v793_v2 = vmul.f32 %v5328_v28, %v751_v52  ;;  %v714_v6 = vadd.f32 %v674_v54, %v592_v42  ;;  %v752_v38 = vld [vmem:[%s5269_s13 + $0xb] sm:$0xff] }
  0x1b   : > { %2100 = vst.msk [vmem:[#allocation3 + $0x78] sm:$0xff] %vm2044_vm0, %v8537_v4  ;;  %v873_v3 = vld [vmem:[%s5269_s13 + $0x4] sm:$0xff]  ;;  %v716_v7 = vadd.f32 %v676_v55, %v594_v43  ;;  %v718_v9 = vadd.f32 %v678_v56, %v596_v49  ;;  %v719_v12 = vadd.f32 %v679_v57, %v597_v50  ;;  %v795_v16 = vmul.f32 %v5328_v28, %v753_v58  ;;  %v875_v20 = vld [vmem:[%s5269_s13 + $0x14] sm:$0xff]  ;;  %v5413_v25 = vld [vmem:[%s5269_s13 + $0x1c] sm:$0xff] }
  0x1c   : > { %v796_v18 = vmul.f32 %v5328_v28, %v754_v59  ;;  %v798_v19 = vmul.f32 %v5328_v28, %v5386_v60  ;;  %v5406_v21 = vld [vmem:[%s8526_s1 + $0x5] ss:$0 sm:$0xff]  ;;  %v800_v22 = vmul.f32 %v5328_v28, %v5390_v0  ;;  %v801_v23 = vmul.f32 %v5328_v28, %v5393_v1  ;;  %v5416_v27 = vld [vmem:[%s5269_s13 + $0x3c] sm:$0xff]  ;;  %v5428_v42 = vld [vmem:[%s5269_s13 + $0x2c] sm:$0xff] }
  0x1d   : > { %v833_v24 = vadd.f32 %v793_v2, %v711_v62  ;;  %v5419_v31 = vld [vmem:[%s5269_s13 + $0x44] sm:$0xff]  ;;  %v915_v32 = vmul.f32 %v5372_v53, %v873_v3  ;;  %v590_v33 = vadd.f32 %v550_v61, %v428_v48  ;;  %v835_v34 = vadd.f32 %v795_v16, %v713_v63  ;;  %v1079_v51 = vld [vmem:[%s5269_s13 + $0x15] sm:$0xff]  ;;  %v1082_v58 = vld [vmem:[%s5269_s13 + $0x2d] sm:$0xff] }
  0x1e   : > { %v836_v35 = vadd.f32 %v796_v18, %v714_v6  ;;  %v838_v36 = vadd.f32 %v798_v19, %v716_v7  ;;  %v672_v37 = vmul.f32 %v5298_v15, %v630_v14  ;;  %v840_v39 = vadd.f32 %v800_v22, %v718_v9  ;;  %v5425_v41 = vld [vmem:[%s5269_s13 + $0x24] sm:$0xff]  ;;  %v1201_v59 = vld [vmem:[%s5269_s13 + $0x16] sm:$0xff]  ;;  %v1204_v16 = vld [vmem:[%s5269_s13 + $0x2e] sm:$0xff] }
  0x1f   : > { %v841_v40 = vadd.f32 %v801_v23, %v719_v12  ;;  %8602 = vst [vmem:[#allocation7_spill] sm:$0xff] %v5425_v41  ;;  %v917_v43 = vmul.f32 %v5372_v53, %v875_v20  ;;  %v918_v47 = vmul.f32 %v5372_v53, %v5413_v25  ;;  %v920_v48 = vmul.f32 %v5372_v53, %v5428_v42  ;;  %v5443_v52 = vld [vmem:[%s8526_s1 + $0x6] ss:$0 sm:$0xff]  ;;  %v5457_v6 = vld [vmem:[%s8526_s1 + $0x7] ss:$0 sm:$0xff]  ;;  %v1323_v18 = vld [vmem:[%s5269_s13 + $0x17] sm:$0xff] }
  0x20   : > { %v922_v49 = vmul.f32 %v5372_v53, %v5416_v27  ;;  %v923_v50 = vmul.f32 %v5372_v53, %v5419_v31  ;;  %v955_v54 = vadd.f32 %v915_v32, %v833_v24  ;;  %v999_v56 = vmul.f32 %v5406_v21, %v875_v20  ;;  %v1081_v57 = vld [vmem:[%s5269_s13 + $0x25] sm:$0xff]  ;;  %v5655_v4 = vld [vmem:[%s5269_s13 + $0xf8] sm:$0xff] }
  0x21   : > { %v957_v55 = vadd.f32 %v917_v43, %v835_v34  ;;  %v958_v61 = vadd.f32 %v918_v47, %v836_v35  ;;  %v960_v62 = vadd.f32 %v920_v48, %v838_v36  ;;  %v1203_v3 = vld [vmem:[%s5269_s13 + $0x26] sm:$0xff]  ;;  %v712_v7 = vadd.f32 %v672_v37, %v590_v33 }
  0x22   : > { %v5449_v63 = vadd.f32 %v922_v49, %v840_v39  ;;  %v5451_v2 = vadd.f32 %v923_v50, %v841_v40  ;;  %v1001_v9 = vmul.f32 %v5406_v21, %v5425_v41  ;;  %v1002_v12 = vmul.f32 %v5406_v21, %v5428_v42  ;;  %v5473_v24 = vld [vmem:[%s8526_s1 + $0x8] ss:$0 sm:$0xff]  ;;  %v5481_v36 = vld [vmem:[%s8526_s1 + $0x9] ss:$0 sm:$0xff]  ;;  %v1326_v40 = vld [vmem:[%s5269_s13 + $0x2f] sm:$0xff] }
  0x23   : > { %v1004_v14 = vmul.f32 %v5406_v21, %v5416_v27  ;;  %v794_v19 = vmul.f32 %v5328_v28, %v752_v38  ;;  %v1039_v20 = vadd.f32 %v999_v56, %v955_v54  ;;  %v1121_v22 = vmul.f32 %v5443_v52, %v1079_v51  ;;  %v1325_v35 = vld [vmem:[%s5269_s13 + $0x27] sm:$0xff]  ;;  %v5495_v51 = vld [vmem:[%s5269_s13 + $0x30] sm:$0xff] }
  0x24   : > { %8603 = vst [vmem:[#allocation8_spill] sm:$0xff] %v5449_v63  ;;  %v1123_v23 = vmul.f32 %v5443_v52, %v1081_v57  ;;  %v1041_v32 = vadd.f32 %v1001_v9, %v957_v55  ;;  %v1042_v33 = vadd.f32 %v1002_v12, %v958_v61  ;;  %v1124_v37 = vmul.f32 %v5443_v52, %v1082_v58  ;;  %v874_v43 = vld [vmem:[%s5269_s13 + $0xc] sm:$0xff]  ;;  %v5492_v50 = vld [vmem:[%s8526_s1 + $0xa] ss:$0 sm:$0xff]  ;;  %v5501_v58 = vld [vmem:[%s8526_s1 + $0xb] ss:$0 sm:$0xff] }
  0x25   : > { %8604 = vst [vmem:[#allocation9_spill] sm:$0xff] %v5451_v2  ;;  %v5475_v34 = vadd.f32 %v1004_v14, %v960_v62  ;;  %v1161_v38 = vadd.f32 %v1121_v22, %v1039_v20  ;;  %v1243_v39 = vmul.f32 %v5457_v6, %v1201_v59  ;;  %v1245_v48 = vmul.f32 %v5457_v6, %v1203_v3  ;;  %v5665_v41 = vld [vmem:[%s5269_s13 + $0x10a] sm:$0xff] }
  0x26   : > { %v1163_v47 = vadd.f32 %v1123_v23, %v1041_v32  ;;  %v1246_v49 = vmul.f32 %v5457_v6, %v1204_v16  ;;  %8605 = vst [vmem:[#allocation10_spill] sm:$0xff] %v5495_v51  ;;  %v834_v54 = vadd.f32 %v794_v19, %v712_v7  ;;  %v1164_v55 = vadd.f32 %v1124_v37, %v1042_v33  ;;  %v5513_v16 = vld [vmem:[%s8526_s1 + $0xc] ss:$0 sm:$0xff] }
  0x27   : > { %v1283_v56 = vadd.f32 %v1243_v39, %v1161_v38  ;;  %v1365_v57 = vmul.f32 %v5473_v24, %v1323_v18  ;;  %v1367_v61 = vmul.f32 %v5473_v24, %v1325_v35  ;;  %v1368_v62 = vmul.f32 %v5473_v24, %v1326_v40  ;;  %8606 = vst [vmem:[#allocation11_spill] sm:$0xff] %v5513_v16  ;;  %v5528_v35 = vld [vmem:[%s8526_s1 + $0xd] ss:$0 sm:$0xff] }
  0x28   : > { %v1285_v59 = vadd.f32 %v1245_v48, %v1163_v47  ;;  %v1450_v3 = vmul.f32 %v5481_v36, %v5283_v10  ;;  %v916_v9 = vmul.f32 %v5372_v53, %v874_v43  ;;  %v1286_v7 = vadd.f32 %v1246_v49, %v1164_v55  ;;  %8607 = vst [vmem:[#allocation12_spill] sm:$0xff] %v5528_v35 }
  0x29   : > { %v1405_v12 = vadd.f32 %v1365_v57, %v1283_v56  ;;  %v1452_v14 = vmul.f32 %v5481_v36, %v5286_v11  ;;  %v1453_v19 = vmul.f32 %v5481_v36, %v5495_v51  ;;  %v1534_v20 = vmul.f32 %v5492_v50, %v5286_v11  ;;  %v1084_v56 = vld [vmem:[%s5269_s13 + $0x3d] sm:$0xff]  ;;  %8615 = vst [vmem:[#allocation20_spill] sm:$0xff] %v5665_v41 }
  0x2a   : > { %v1407_v18 = vadd.f32 %v1367_v61, %v1285_v59  ;;  %v1536_v10 = vmul.f32 %v5492_v50, %v5292_v13  ;;  %v1408_v22 = vadd.f32 %v1368_v62, %v1286_v7  ;;  %v1537_v32 = vmul.f32 %v5492_v50, %v5305_v17  ;;  %v411_v61 = vld [vmem:[%s5269_s13 + $0xd0] sm:$0xff] }
  0x2b   : > { %v1490_v23 = vadd.f32 %v1450_v3, %v1405_v12  ;;  %v1621_v33 = vmul.f32 %v5501_v58, %v5322_v26  ;;  %v1623_v11 = vmul.f32 %v5501_v58, %v5333_v29  ;;  %v1624_v39 = vmul.f32 %v5501_v58, %v5336_v30  ;;  %v5539_v26 = vld [vmem:[%s8526_s1 + $0xe] ss:$0 sm:$0xff] }
  0x2c   : > { %v1492_v37 = vadd.f32 %v1452_v14, %v1407_v18  ;;  %v1493_v38 = vadd.f32 %v1453_v19, %v1408_v22  ;;  %v1708_v17 = vmul.f32 %v5513_v16, %v5355_v44  ;;  %8608 = vst [vmem:[#allocation13_spill] sm:$0xff] %v5539_v26  ;;  %v956_v40 = vadd.f32 %v916_v9, %v834_v54  ;;  %v5565_v3 = vld [vmem:[%s5269_s13 + $0xe8] sm:$0xff]  ;;  %v415_v9 = vld [vmem:[%s5269_s13 + $0xf0] sm:$0xff]  ;;  %v5575_v14 = vld [vmem:[%s8527_s2] ss:$0 sm:$0xff] }
  0x2d   : > { %v1574_v13 = vadd.f32 %v1534_v20, %v1490_v23  ;;  %v1000_v29 = vmul.f32 %v5406_v21, %v5413_v25  ;;  %v1710_v47 = vmul.f32 %v5513_v16, %v5358_v45  ;;  %v1711_v44 = vmul.f32 %v5513_v16, %v5361_v46  ;;  %v413_v46 = vld [vmem:[%s5269_s13 + $0xe0] sm:$0xff]  ;;  %8611 = vst [vmem:[#allocation16_spill] sm:$0xff] %v5575_v14 }
  0x2e   : > { %v1576_v43 = vadd.f32 %v1536_v10, %v1492_v37  ;;  %v1577_v48 = vadd.f32 %v1537_v32, %v1493_v38  ;;  %v1795_v49 = vmul.f32 %v5528_v35, %v5386_v60  ;;  %v1797_v54 = vmul.f32 %v5528_v35, %v5390_v0  ;;  %v5578_v18 = vld [vmem:[%s5269_s13 + $0x100] sm:$0xff]  ;;  %v5585_v10 = vld [vmem:[%s5269_s13 + $0x118] sm:$0xff]  ;;  %v536_v38 = vld [vmem:[%s5269_s13 + $0xe9] sm:$0xff] }
  0x2f   : > { %v1661_v30 = vadd.f32 %v1621_v33, %v1574_v13  ;;  %v1798_v45 = vmul.f32 %v5528_v35, %v5393_v1  ;;  %v1880_v59 = vmul.f32 %v5539_v26, %v5428_v42  ;;  %v5560_v60 = vmul.f32 %v5406_v21, %v5419_v31  ;;  %v535_v23 = vld [vmem:[%s5269_s13 + $0xe1] sm:$0xff]  ;;  %v537_v13 = vld [vmem:[%s5269_s13 + $0xf1] sm:$0xff] }
  0x30   : > { %v1663_v55 = vadd.f32 %v1623_v11, %v1576_v43  ;;  %v1664_v25 = vadd.f32 %v1624_v39, %v1577_v48  ;;  %v1882_v0 = vmul.f32 %v5539_v26, %v5416_v27  ;;  %v5568_v7 = vadd.f32 %v1000_v29, %v956_v40  ;;  %v533_v27 = vld [vmem:[%s5269_s13 + $0xd1] sm:$0xff]  ;;  %v539_v39 = vld [vmem:[%s5269_s13 + $0x101] sm:$0xff] }
  0x31   : > { %v1748_v57 = vadd.f32 %v1708_v17, %v1661_v30  ;;  %8609 = vst [vmem:[#allocation14_spill] sm:$0xff] %v5560_v60  ;;  %v1883_v12 = vmul.f32 %v5539_v26, %v5419_v31  ;;  %v5582_v19 = vmul.f32 %v5443_v52, %v1084_v56  ;;  %v453_v22 = vmul.f32 %v5262_v5, %v411_v61  ;;  %v5597_v40 = vld [vmem:[%s5269_s13 + $0x128] sm:$0xff]  ;;  %v1206_v48 = vld [vmem:[%s5269_s13 + $0x3e] sm:$0xff] }
  0x32   : > { %v1750_v62 = vadd.f32 %v1710_v47, %v1663_v55  ;;  %8610 = vst [vmem:[#allocation15_spill] sm:$0xff] %v5568_v7  ;;  %v1751_v1 = vadd.f32 %v1711_v44, %v1664_v25  ;;  %v455_v31 = vmul.f32 %v5262_v5, %v413_v46  ;;  %v456_v37 = vmul.f32 %v5262_v5, %v5565_v3  ;;  %v5614_v25 = vld [vmem:[%s5269_s13 + $0x109] sm:$0xff] }
  0x33   : > { %v1835_v42 = vadd.f32 %v1795_v49, %v1748_v57  ;;  %v457_v11 = vmul.f32 %v5262_v5, %v415_v9  ;;  %v459_v29 = vmul.f32 %v5262_v5, %v5578_v18  ;;  %v462_v43 = vmul.f32 %v5262_v5, %v5585_v10  ;;  %v5607_v49 = vld [vmem:[%s5269_s13 + $0x108] sm:$0xff]  ;;  %v5617_v57 = vld [vmem:[%s5269_s13 + $0x119] sm:$0xff]  ;;  %v5627_v9 = vld [vmem:[%s5269_s13 + $0x130] sm:$0xff] }
  0x34   : > { %v1837_v20 = vadd.f32 %v1797_v54, %v1750_v62  ;;  %v1838_v32 = vadd.f32 %v1798_v45, %v1751_v1  ;;  %v575_v47 = vmul.f32 %v5278_v8, %v533_v27  ;;  %v464_v55 = vmul.f32 %v5262_v5, %v5597_v40  ;;  %v5620_v45 = vld [vmem:[%s5269_s13 + $0x129] sm:$0xff]  ;;  %v5630_v1 = vld [vmem:[%s5269_s13 + $0x131] sm:$0xff] }
  0x35   : > { %v1920_v33 = vadd.f32 %v1880_v59, %v1835_v42  ;;  %v577_v54 = vmul.f32 %v5278_v8, %v535_v23  ;;  %8612 = vst [vmem:[#allocation17_spill] sm:$0xff] %v5620_v45  ;;  %v578_v59 = vmul.f32 %v5278_v8, %v536_v38  ;;  %v579_v61 = vmul.f32 %v5278_v8, %v537_v13  ;;  %v657_v38 = vld [vmem:[%s5269_s13 + $0xe2] sm:$0xff] }
  0x36   : > { %v1922_v17 = vadd.f32 %v1882_v0, %v1837_v20  ;;  %v1923_v30 = vadd.f32 %v1883_v12, %v1838_v32  ;;  %v581_v46 = vmul.f32 %v5278_v8, %v539_v39  ;;  %8613 = vst [vmem:[#allocation18_spill] sm:$0xff] %v5630_v1  ;;  %v584_v42 = vmul.f32 %v5278_v8, %v5617_v57  ;;  %v783_v35 = vld [vmem:[%s5269_s13 + $0x103] sm:$0xff] }
  0x37   : > { %v1964_v44 = vadd.f32 %v5575_v14, %v1920_v33  ;;  %v586_v12 = vmul.f32 %v5278_v8, %v5620_v45  ;;  %v5637_v27 = vmul.f32 %v5457_v6, %v1206_v48  ;;  %v465_v23 = vmul.f32 %v5262_v5, %v5627_v9  ;;  %v655_v33 = vld [vmem:[%s5269_s13 + $0xd2] sm:$0xff] }
  0x38   : > { %v1966_v56 = vadd.f32 %v5575_v14, %v1922_v17  ;;  %v1967_v62 = vadd.f32 %v5575_v14, %v1923_v30  ;;  %v587_v32 = vmul.f32 %v5278_v8, %v5630_v1  ;;  %v460_v39 = vmul.f32 %v5262_v5, %v5607_v49  ;;  %v658_v30 = vld [vmem:[%s5269_s13 + $0xea] sm:$0xff]  ;;  %v5709_v1 = vld [vmem:[%s5269_s13 + $0xfa] sm:$0xff] }
  0x39   : > { %v2004_v0 = vmax.f32 %v1964_v44, 0.0  ;;  %8614 = vst [vmem:[#allocation19_spill] sm:$0xff] %v5637_v27  ;;  %v582_v17 = vmul.f32 %v5278_v8, %v5614_v25  ;;  %v615_v48 = vadd.f32 %v575_v47, %v453_v22  ;;  %v659_v44 = vld [vmem:[%s5269_s13 + $0xf2] sm:$0xff]  ;;  %v618_v2 = vadd.f32 %v578_v59, %v456_v37  ;;  %v5670_v37 = vld [vmem:[%s5269_s13 + $0x11a] sm:$0xff] }
  0x3a   : > { %v2006_v20 = vmax.f32 %v1966_v56, 0.0  ;;  %v2007_v13 = vmax.f32 %v1967_v62, 0.0  ;;  %v661_v56 = vld [vmem:[%s5269_s13 + $0x102] sm:$0xff]  ;;  %v5658_v62 = vld [vmem:[%s5269_s13 + $0x110] sm:$0xff]  ;;  %v619_v60 = vadd.f32 %v579_v61, %v457_v11  ;;  %v624_v63 = vadd.f32 %v584_v42, %v462_v43  ;;  %v5662_v22 = vld [vmem:[%s5269_s13 + $0xf9] sm:$0xff]  ;;  %8616 = vst [vmem:[#allocation21_spill] sm:$0xff] %v5670_v37 }
  0x3b   : > { %2045 = vst.msk [vmem:[#allocation2] sm:$0xff] %vm2044_vm0, %v2004_v0  ;;  %v617_v0 = vadd.f32 %v577_v54, %v455_v31  ;;  %v621_v47 = vadd.f32 %v581_v46, %v459_v29  ;;  %v626_v7 = vadd.f32 %v586_v12, %v464_v55  ;;  %v699_v27 = vmul.f32 %v5298_v15, %v657_v38  ;;  %v5673_v11 = vld [vmem:[%s5269_s13 + $0x12a] sm:$0xff]  ;;  %v5688_v46 = vld [vmem:[%s5269_s13 + $0x132] sm:$0xff] }
  0x3c   : > { %2047 = vst.msk [vmem:[#allocation2 + $0x10] sm:$0xff] %vm2044_vm0, %v2006_v20  ;;  %v697_v20 = vmul.f32 %v5298_v15, %v655_v33  ;;  %v627_v31 = vadd.f32 %v587_v32, %v465_v23  ;;  %v700_v43 = vmul.f32 %v5298_v15, %v658_v30  ;;  %v701_v54 = vmul.f32 %v5298_v15, %v659_v44  ;;  %v5685_v61 = vld [vmem:[%s5269_s13 + $0x111] sm:$0xff]  ;;  %v779_v32 = vld [vmem:[%s5269_s13 + $0xe3] sm:$0xff] }
  0x3d   : > { %2048 = vst.msk [vmem:[#allocation2 + $0x18] sm:$0xff] %vm2044_vm0, %v2007_v13  ;;  %v703_v29 = vmul.f32 %v5298_v15, %v661_v56  ;;  %v458_v55 = vmul.f32 %v5262_v5, %v5655_v4  ;;  %v5682_v59 = vmul.f32 %v5262_v5, %v5658_v62  ;;  %v706_v42 = vmul.f32 %v5298_v15, %v5670_v37  ;;  %v777_v23 = vld [vmem:[%s5269_s13 + $0xd3] sm:$0xff]  ;;  %v780_v30 = vld [vmem:[%s5269_s13 + $0xeb] sm:$0xff] }
  0x3e   : > { %8617 = vst [vmem:[#allocation22_spill] sm:$0xff] %v5673_v11  ;;  %v708_v12 = vmul.f32 %v5298_v15, %v5673_v11  ;;  %v580_v33 = vmul.f32 %v5278_v8, %v5662_v22  ;;  %v622_v5 = vadd.f32 %v582_v17, %v460_v39  ;;  %v704_v38 = vmul.f32 %v5298_v15, %v5665_v41  ;;  %v781_v44 = vld [vmem:[%s5269_s13 + $0xf3] sm:$0xff]  ;;  %v5706_v11 = vld [vmem:[%s5269_s13 + $0x10b] sm:$0xff] }
  0x3f   : > { %8618 = vst [vmem:[#allocation23_spill] sm:$0xff] %v5688_v46  ;;  %v709_v13 = vmul.f32 %v5298_v15, %v5688_v46  ;;  %v737_v56 = vadd.f32 %v697_v20, %v615_v48  ;;  %v739_v51 = vadd.f32 %v699_v27, %v617_v0  ;;  %v740_v14 = vadd.f32 %v700_v43, %v618_v2  ;;  %v5712_v46 = vld [vmem:[%s5269_s13 + $0x11b] sm:$0xff]  ;;  %v5721_v0 = vld [vmem:[%s5269_s13 + $0x12b] sm:$0xff] }
  0x40   : > { %v741_v26 = vadd.f32 %v701_v54, %v619_v60  ;;  %8619 = vst [vmem:[#allocation24_spill] sm:$0xff] %v5706_v11  ;;  %v743_v17 = vadd.f32 %v703_v29, %v621_v47  ;;  %v746_v37 = vadd.f32 %v706_v42, %v624_v63  ;;  %v748_v41 = vadd.f32 %v708_v12, %v626_v7  ;;  %v5724_v47 = vld [vmem:[%s5269_s13 + $0x133] sm:$0xff] }
  0x41   : > { %v749_v16 = vadd.f32 %v709_v13, %v627_v31  ;;  %8620 = vst [vmem:[#allocation25_spill] sm:$0xff] %v5712_v46  ;;  %v819_v45 = vmul.f32 %v5328_v28, %v777_v23  ;;  %v821_v27 = vmul.f32 %v5328_v28, %v779_v32  ;;  %v822_v2 = vmul.f32 %v5328_v28, %v780_v30  ;;  %v899_v32 = vld [vmem:[%s5269_s13 + $0xd4] sm:$0xff] }
  0x42   : > { %v2101_v39 = vld [vmem:[#allocation2] sm:$0xff]  ;;  %v823_v60 = vmul.f32 %v5328_v28, %v781_v44  ;;  %v583_v63 = vmul.f32 %v5278_v8, %v5685_v61  ;;  %v744_v7 = vadd.f32 %v704_v38, %v622_v5  ;;  %8621 = vst [vmem:[#allocation26_spill] sm:$0xff] %v5721_v0  ;;  %v825_v20 = vmul.f32 %v5328_v28, %v783_v35  ;;  %v902_v38 = vld [vmem:[%s5269_s13 + $0xec] sm:$0xff] }
  0x43   : > { %8622 = vst [vmem:[#allocation27_spill] sm:$0xff] %v5724_v47  ;;  %v826_v31 = vmul.f32 %v5328_v28, %v5706_v11  ;;  %v828_v54 = vmul.f32 %v5328_v28, %v5712_v46  ;;  %v830_v8 = vmul.f32 %v5328_v28, %v5721_v0  ;;  %v831_v29 = vmul.f32 %v5328_v28, %v5724_v47  ;;  %v901_v5 = vld [vmem:[%s5269_s13 + $0xe4] sm:$0xff]  ;;  %v5743_v46 = vld [vmem:[%s5269_s13 + $0x10c] sm:$0xff] }
  0x44   : > { %v2103_v48 = vld [vmem:[#allocation2 + $0x14] sm:$0xff]  ;;  %v620_v42 = vadd.f32 %v580_v33, %v458_v55  ;;  %v702_v35 = vmul.f32 %v5298_v15, %v5709_v1  ;;  %v859_v12 = vadd.f32 %v819_v45, %v737_v56  ;;  %v861_v23 = vadd.f32 %v821_v27, %v739_v51  ;;  %v905_v0 = vld [vmem:[%s5269_s13 + $0x104] sm:$0xff] }
  0x45   : > { %v2105_v43 = vmax.f32 %v2101_v39, %v2103_v48  ;;  %v862_v30 = vadd.f32 %v822_v2, %v740_v14  ;;  %v863_v44 = vadd.f32 %v823_v60, %v741_v26  ;;  %v865_v39 = vadd.f32 %v825_v20, %v743_v17  ;;  %v903_v48 = vld [vmem:[%s5269_s13 + $0xf4] sm:$0xff]  ;;  %v5759_v2 = vld [vmem:[%s5269_s13 + $0x11c] sm:$0xff]  ;;  %v5762_v60 = vld [vmem:[%s5269_s13 + $0x12c] sm:$0xff] }
  0x46   : > { %v5746_v55 = vld [vmem:[%s5269_s13 + $0xfb] sm:$0xff]  ;;  %v866_v33 = vadd.f32 %v826_v31, %v744_v7  ;;  %v868_v47 = vadd.f32 %v828_v54, %v746_v37  ;;  %v870_v45 = vadd.f32 %v830_v8, %v748_v41  ;;  %v5748_v51 = vadd.f32 %v831_v29, %v749_v16  ;;  %v5753_v27 = vld [vmem:[%s5269_s13 + $0x112] sm:$0xff] }
  0x47   : > { %v2108_v13 = vrot.slane %v2105_v43, 1  ;;  %8623 = vst [vmem:[#allocation28_spill] sm:$0xff] %v5746_v55  ;;  %v941_v26 = vmul.f32 %v5372_v53, %v899_v32  ;;  %v943_v14 = vmul.f32 %v5372_v53, %v901_v5  ;;  %v944_v17 = vmul.f32 %v5372_v53, %v902_v38  ;;  %v5782_v29 = vld [vmem:[%s5269_s13 + $0xfc] sm:$0xff] }
  0x48   : > { %8624 = vst [vmem:[#allocation29_spill] sm:$0xff] %v5748_v51  ;;  %v945_v41 = vmul.f32 %v5372_v53, %v903_v48  ;;  %v947_v16 = vmul.f32 %v5372_v53, %v905_v0  ;;  %v948_v37 = vmul.f32 %v5372_v53, %v5743_v46  ;;  %v742_v7 = vadd.f32 %v702_v35, %v620_v42  ;;  %v5785_v42 = vld [vmem:[%s5269_s13 + $0x114] sm:$0xff] }
  0x49   : > { %v5750_v56 = vmax.f32 %v2105_v43, %v2108_v13  ;;  %v824_v20 = vmul.f32 %v5328_v28, %v5746_v55  ;;  %v950_v31 = vmul.f32 %v5372_v53, %v5759_v2  ;;  %v952_v43 = vmul.f32 %v5372_v53, %v5762_v60 }
  0x4a   : > { %v623_v54 = vadd.f32 %v583_v63, %v5682_v59  ;;  %v705_v8 = vmul.f32 %v5298_v15, %v5753_v27  ;;  %v981_v35 = vadd.f32 %v941_v26, %v859_v12  ;;  %v983_v32 = vadd.f32 %v943_v14, %v861_v23  ;;  %v5794_v12 = vld [vmem:[%s5269_s13 + $0x113] sm:$0xff]  ;;  %v1108_v14 = vld [vmem:[%s5269_s13 + $0xfd] sm:$0xff] }
  0x4b   : > { %8625 = vst [vmem:[#allocation30_spill] sm:$0xff] %v5750_v56  ;;  %v984_v38 = vadd.f32 %v944_v17, %v862_v30  ;;  %v985_v13 = vadd.f32 %v945_v41, %v863_v44  ;;  %v987_v51 = vadd.f32 %v947_v16, %v865_v39  ;;  %v988_v11 = vadd.f32 %v948_v37, %v866_v33  ;;  %v1105_v39 = vld [vmem:[%s5269_s13 + $0xe5] sm:$0xff]  ;;  %v1107_v26 = vld [vmem:[%s5269_s13 + $0xf5] sm:$0xff] }
  0x4c   : > { %2112 = vst.msk [vmem:[#allocation3 + $0xe] sm:$0x1] %vm2111_vm1, %v5750_v56  ;;  %v990_v59 = vadd.f32 %v950_v31, %v868_v47  ;;  %v5789_v63 = vadd.f32 %v952_v43, %v870_v45  ;;  %v1025_v15 = vmul.f32 %v5406_v21, %v901_v5  ;;  %v1027_v55 = vmul.f32 %v5406_v21, %v903_v48  ;;  %v1109_v17 = vld [vmem:[%s5269_s13 + $0x105] sm:$0xff] }
  0x4d   : > { %2114 = vst.msk [vmem:[#allocation3 + $0xd] sm:$0x4] %vm2113_vm2, %v5750_v56  ;;  %v864_v23 = vadd.f32 %v824_v20, %v742_v7  ;;  %v1028_v30 = vmul.f32 %v5406_v21, %v5782_v29  ;;  %v1029_v44 = vmul.f32 %v5406_v21, %v905_v0  ;;  %v1031_v47 = vmul.f32 %v5406_v21, %v5785_v42  ;;  %v1111_v7 = vld [vmem:[%s5269_s13 + $0x115] sm:$0xff]  ;;  %v1112_v20 = vld [vmem:[%s5269_s13 + $0x11d] sm:$0xff] }
  0x4e   : > { %2116 = vst.msk [vmem:[#allocation3 + $0xc] sm:$0x10] %vm2115_vm3, %v5750_v56  ;;  %v946_v33 = vmul.f32 %v5372_v53, %v5782_v29  ;;  %v1032_v5 = vmul.f32 %v5406_v21, %v5759_v2  ;;  %v1034_v48 = vmul.f32 %v5406_v21, %v5762_v60  ;;  %v1065_v45 = vadd.f32 %v1025_v15, %v981_v35 }
  0x4f   : > { %8626 = vst [vmem:[#allocation31_spill] sm:$0xff] %v5789_v63  ;;  %v745_v0 = vadd.f32 %v705_v8, %v623_v54  ;;  %v1067_v41 = vadd.f32 %v1027_v55, %v983_v32  ;;  %v1068_v16 = vadd.f32 %v1028_v30, %v984_v38  ;;  %v1069_v37 = vadd.f32 %v1029_v44, %v985_v13  ;;  %v1227_v8 = vld [vmem:[%s5269_s13 + $0xe6] sm:$0xff]  ;;  %v1229_v32 = vld [vmem:[%s5269_s13 + $0xf6] sm:$0xff]  ;;  %v1230_v30 = vld [vmem:[%s5269_s13 + $0xfe] sm:$0xff] }
  0x50   : > { %v1071_v31 = vadd.f32 %v1031_v47, %v987_v51  ;;  %v1072_v43 = vadd.f32 %v1032_v5, %v988_v11  ;;  %v5813_v63 = vadd.f32 %v1034_v48, %v990_v59  ;;  %v1147_v56 = vmul.f32 %v5443_v52, %v1105_v39  ;;  %v1233_v48 = vld [vmem:[%s5269_s13 + $0x116] sm:$0xff] }
  0x51   : > { %v827_v35 = vmul.f32 %v5328_v28, %v5794_v12  ;;  %v1149_v15 = vmul.f32 %v5443_v52, %v1107_v26  ;;  %v1150_v54 = vmul.f32 %v5443_v52, %v1108_v14  ;;  %v1151_v55 = vmul.f32 %v5443_v52, %v1109_v17  ;;  %v1231_v28 = vld [vmem:[%s5269_s13 + $0x106] sm:$0xff] }
  0x52   : > { %v986_v38 = vadd.f32 %v946_v33, %v864_v23  ;;  %v1153_v11 = vmul.f32 %v5443_v52, %v1111_v7  ;;  %v1154_v13 = vmul.f32 %v5443_v52, %v1112_v20  ;;  %v1187_v59 = vadd.f32 %v1147_v56, %v1065_v45  ;;  %v1234_v23 = vld [vmem:[%s5269_s13 + $0x11e] sm:$0xff] }
  0x53   : > { %v1030_v44 = vmul.f32 %v5406_v21, %v5743_v46  ;;  %v1189_v47 = vadd.f32 %v1149_v15, %v1067_v41  ;;  %v1190_v39 = vadd.f32 %v1150_v54, %v1068_v16  ;;  %v1191_v5 = vadd.f32 %v1151_v55, %v1069_v37  ;;  %v1110_v21 = vld [vmem:[%s5269_s13 + $0x10d] sm:$0xff]  ;;  %v1351_v7 = vld [vmem:[%s5269_s13 + $0xf7] sm:$0xff] }
  0x54   : > { %v5834_v33 = vadd.f32 %v5582_v19, %v5475_v34  ;;  %v1193_v56 = vadd.f32 %v1153_v11, %v1071_v31  ;;  %v1194_v45 = vadd.f32 %v1154_v13, %v1072_v43  ;;  %v1269_v26 = vmul.f32 %v5457_v6, %v1227_v8  ;;  %v1349_v37 = vld [vmem:[%s5269_s13 + $0xe7] sm:$0xff]  ;;  %v1352_v31 = vld [vmem:[%s5269_s13 + $0xff] sm:$0xff] }
  0x55   : > { %v2296_v51 = vld [vmem:[#allocation3 + $0x9] sm:$0xff]  ;;  %v5837_v14 = vadd.f32 %v827_v35, %v745_v0  ;;  %v1271_v17 = vmul.f32 %v5457_v6, %v1229_v32  ;;  %v1272_v41 = vmul.f32 %v5457_v6, %v1230_v30  ;;  %v1273_v16 = vmul.f32 %v5457_v6, %v1231_v28  ;;  %v1355_v35 = vld [vmem:[%s5269_s13 + $0x117] sm:$0xff]  ;;  %v1356_v32 = vld [vmem:[%s5269_s13 + $0x11f] sm:$0xff] }
  0x56   : > { %4759 = vmatmul.msk.f32.gmra.mxu0 %vm2044_vm0, %v2296_v51  ;;  %v5847_v34 = vmul.f32 %v5372_v53, %v5785_v42  ;;  %v1275_v19 = vmul.f32 %v5457_v6, %v1233_v48  ;;  %v1276_v20 = vmul.f32 %v5457_v6, %v1234_v23  ;;  %v1309_v0 = vadd.f32 %v1269_v26, %v1187_v59  ;;  %v1353_v43 = vld [vmem:[%s5269_s13 + $0x107] sm:$0xff] }
  0x57   : > { %v5854_v15 = vadd.f32 %v1030_v44, %v986_v38  ;;  %v1311_v54 = vadd.f32 %v1271_v17, %v1189_v47  ;;  %v1312_v55 = vadd.f32 %v1272_v41, %v1190_v39  ;;  %v1313_v8 = vadd.f32 %v1273_v16, %v1191_v5  ;;  %v5866_v44 = vld [vmem:[%s5269_s13 + $0x120] sm:$0xff] }
  0x58   : > { %v5858_v51 = vmul.f32 %v5443_v52, %v1110_v21  ;;  %v1315_v53 = vadd.f32 %v1275_v19, %v1193_v56  ;;  %v1316_v11 = vadd.f32 %v1276_v20, %v1194_v45  ;;  %v1391_v13 = vmul.f32 %v5473_v24, %v1349_v37 }
  0x59   : > { %v1393_v30 = vmul.f32 %v5473_v24, %v1351_v7  ;;  %v1394_v59 = vmul.f32 %v5473_v24, %v1352_v31  ;;  %v1395_v28 = vmul.f32 %v5473_v24, %v1353_v43  ;;  %v1397_v38 = vmul.f32 %v5473_v24, %v1355_v35 }
  0x5a   : > { %v1398_v47 = vmul.f32 %v5473_v24, %v1356_v32  ;;  %v1431_v39 = vadd.f32 %v1391_v13, %v1309_v0  ;;  %v1476_v5 = vmul.f32 %v5481_v36, %v5565_v3  ;;  %v1478_v48 = vmul.f32 %v5481_v36, %v5655_v4 }
  0x5b   : > { %v1433_v23 = vadd.f32 %v1393_v30, %v1311_v54  ;;  %v1434_v56 = vadd.f32 %v1394_v59, %v1312_v55  ;;  %v1435_v45 = vadd.f32 %v1395_v28, %v1313_v8  ;;  %v1437_v26 = vadd.f32 %v1397_v38, %v1315_v53  ;;  %v8627_v38 = vld [vmem:[#allocation17_spill] sm:$0xff] }
  0x5c   : > { %v1438_v21 = vadd.f32 %v1398_v47, %v1316_v11  ;;  %v1479_v17 = vmul.f32 %v5481_v36, %v5578_v18  ;;  %v1480_v41 = vmul.f32 %v5481_v36, %v5607_v49  ;;  %v1482_v16 = vmul.f32 %v5481_v36, %v5585_v10  ;;  %v8628_v47 = vld [vmem:[#allocation18_spill] sm:$0xff] }
  0x5d   : > { %v1483_v3 = vmul.f32 %v5481_v36, %v5866_v44  ;;  %v1516_v37 = vadd.f32 %v1476_v5, %v1431_v39  ;;  %v1518_v7 = vadd.f32 %v1478_v48, %v1433_v23  ;;  %v1560_v19 = vmul.f32 %v5492_v50, %v5655_v4  ;;  %v8629_v48 = vld [vmem:[#allocation11_spill] sm:$0xff] }
  0x5e   : > { %v1519_v20 = vadd.f32 %v1479_v17, %v1434_v56  ;;  %v1520_v0 = vadd.f32 %v1480_v41, %v1435_v45  ;;  %v1522_v31 = vadd.f32 %v1482_v16, %v1437_v26  ;;  %v1562_v18 = vmul.f32 %v5492_v50, %v5607_v49  ;;  %v8630_v26 = vld [vmem:[#allocation20_spill] sm:$0xff]  ;;  %v8631_v17 = vld [vmem:[#allocation21_spill] sm:$0xff]  ;;  %v8632_v16 = vld [vmem:[#allocation22_spill] sm:$0xff] }
  0x5f   : > { %v1523_v43 = vadd.f32 %v1483_v3, %v1438_v21  ;;  %v1563_v35 = vmul.f32 %v5492_v50, %v5658_v62  ;;  %v1564_v54 = vmul.f32 %v5492_v50, %v5585_v10  ;;  %v1566_v55 = vmul.f32 %v5492_v50, %v5597_v40 }
  0x60   : > { %v1567_v8 = vmul.f32 %v5492_v50, %v5627_v9  ;;  %v1600_v4 = vadd.f32 %v1560_v19, %v1516_v37  ;;  %v1602_v32 = vadd.f32 %v1562_v18, %v1518_v7  ;;  %v1647_v53 = vmul.f32 %v5501_v58, %v5662_v22  ;;  %v8633_v37 = vld [vmem:[#allocation23_spill] sm:$0xff] }
  0x61   : > { %v1603_v11 = vadd.f32 %v1563_v35, %v1519_v20  ;;  %v1604_v49 = vadd.f32 %v1564_v54, %v1520_v0  ;;  %v1606_v13 = vadd.f32 %v1566_v55, %v1522_v31  ;;  %v1649_v30 = vmul.f32 %v5501_v58, %v5614_v25  ;;  %v8634_v20 = vld [vmem:[#allocation28_spill] sm:$0xff] }
  0x62   : > { %v1607_v59 = vadd.f32 %v1567_v8, %v1523_v43  ;;  %v1650_v10 = vmul.f32 %v5501_v58, %v5685_v61  ;;  %v1651_v28 = vmul.f32 %v5501_v58, %v5617_v57  ;;  %v1653_v9 = vmul.f32 %v5501_v58, %v8627_v38  ;;  %v8635_v0 = vld [vmem:[#allocation12_spill] sm:$0xff] }
  0x63   : > { %v1654_v39 = vmul.f32 %v5501_v58, %v8628_v47  ;;  %v1687_v22 = vadd.f32 %v1647_v53, %v1600_v4  ;;  %v1689_v5 = vadd.f32 %v1649_v30, %v1602_v32  ;;  %v1734_v23 = vmul.f32 %v8629_v48, %v5709_v1  ;;  %v8636_v54 = vld [vmem:[#allocation24_spill] sm:$0xff]  ;;  %v8637_v4 = vld [vmem:[#allocation25_spill] sm:$0xff]  ;;  %v8638_v53 = vld [vmem:[#allocation26_spill] sm:$0xff] }
  0x64   : > { %v1690_v56 = vadd.f32 %v1650_v10, %v1603_v11  ;;  %v1691_v25 = vadd.f32 %v1651_v28, %v1604_v49  ;;  %v1693_v45 = vadd.f32 %v1653_v9, %v1606_v13  ;;  %v1736_v61 = vmul.f32 %v8629_v48, %v8630_v26  ;;  %v5928_v49 = vld [vmem:[%s5269_s13 + $0x134] sm:$0xff]  ;;  %v8639_v13 = vld [vmem:[#allocation27_spill] sm:$0xff] }
  0x65   : > { %v1694_v21 = vadd.f32 %v1654_v39, %v1607_v59  ;;  %v1737_v57 = vmul.f32 %v8629_v48, %v5753_v27  ;;  %v1738_v41 = vmul.f32 %v8629_v48, %v8631_v17  ;;  %v1740_v3 = vmul.f32 %v8629_v48, %v8632_v16  ;;  %v8640_v28 = vld [vmem:[#allocation13_spill] sm:$0xff]  ;;  %v8641_v17 = vld [vmem:[#allocation30_spill] sm:$0xff]  ;;  %v8643_v16 = vld [vmem:[#allocation16_spill] sm:$0xff] }
  0x66   : > { %v1741_v1 = vmul.f32 %v8629_v48, %v8633_v37  ;;  %v1774_v7 = vadd.f32 %v1734_v23, %v1687_v22  ;;  %v1776_v19 = vadd.f32 %v1736_v61, %v1689_v5  ;;  %v1821_v31 = vmul.f32 %v8635_v0, %v8634_v20  ;;  %v5937_v22 = vld [vmem:[%s5269_s13 + $0x20] sm:$0xff]  ;;  %2118 = vst.msk [vmem:[#allocation3 + $0xb] sm:$0x40] %vm2117_vm4, %v8641_v17  ;;  %v5965_v20 = vld [vmem:[%s5269_s13 + $0x31] sm:$0xff] }
  0x67   : > { %v1777_v18 = vadd.f32 %v1737_v57, %v1690_v56  ;;  %v1778_v43 = vadd.f32 %v1738_v41, %v1691_v25  ;;  %v1780_v35 = vadd.f32 %v1740_v3, %v1693_v45  ;;  %v1823_v27 = vmul.f32 %v8635_v0, %v8636_v54 }
  0x68   : > { %v1781_v55 = vadd.f32 %v1741_v1, %v1694_v21  ;;  %v1824_v8 = vmul.f32 %v8635_v0, %v5794_v12  ;;  %v1825_v32 = vmul.f32 %v8635_v0, %v8637_v4  ;;  %v1827_v11 = vmul.f32 %v8635_v0, %v8638_v53  ;;  %v2282_v1 = vld [vmem:[#allocation3 + $0x8] sm:$0xff]  ;;  %v5984_v53 = vld [vmem:[%s8526_s1 + $0x1] ss:$0 sm:$0xff] }
  0x69   : > { %v1828_v30 = vmul.f32 %v8635_v0, %v8639_v13  ;;  %v1861_v59 = vadd.f32 %v1821_v31, %v1774_v7  ;;  %v1863_v10 = vadd.f32 %v1823_v27, %v1776_v19  ;;  %v1906_v38 = vmul.f32 %v8640_v28, %v5782_v29  ;;  %v8644_v7 = vld [vmem:[#allocation10_spill] sm:$0xff]  ;;  %4771 = vmatmul.msk.f32.gmra.mxu1 %vm2044_vm0, %v2282_v1  ;;  %v5977_v27 = vld [vmem:[%s5269_s13 + $0x49] sm:$0xff] }
  0x6a   : > { %v1864_v9 = vadd.f32 %v1824_v8, %v1777_v18  ;;  %v1865_v47 = vadd.f32 %v1825_v32, %v1778_v43  ;;  %v1867_v12 = vadd.f32 %v1827_v11, %v1780_v35  ;;  %v1908_v39 = vmul.f32 %v8640_v28, %v5743_v46  ;;  %v5948_v46 = vld [vmem:[%s5269_s13 + $0x48] sm:$0xff]  ;;  %8645 = vst [vmem:[#allocation18_spill] sm:$0xff] %v5984_v53  ;;  %v5988_v13 = vld [vmem:[%s5269_s13 + $0x32] sm:$0xff] }
  0x6b   : > { %v1868_v5 = vadd.f32 %v1828_v30, %v1781_v55  ;;  %v1909_v23 = vmul.f32 %v8640_v28, %v5785_v42  ;;  %v1910_v56 = vmul.f32 %v8640_v28, %v5759_v2  ;;  %v1912_v25 = vmul.f32 %v8640_v28, %v5762_v60  ;;  %v5955_v2 = vld [vmem:[%s8526_s1] ss:$0 sm:$0xff]  ;;  %v511_v42 = vld [vmem:[%s5269_s13 + $0x21] sm:$0xff]  ;;  %v5991_v30 = vld [vmem:[%s5269_s13 + $0x4a] sm:$0xff] }
  0x6c   : > { %v1913_v29 = vmul.f32 %v8640_v28, %v5928_v49  ;;  %v1946_v45 = vadd.f32 %v1906_v38, %v1861_v59  ;;  %v1948_v26 = vadd.f32 %v1908_v39, %v1863_v10  ;;  %8642 = vst [vmem:[#allocation17_spill] sm:$0xff] %v5955_v2  ;;  %v431_v60 = vmul.f32 %v5955_v2, %v5937_v22  ;;  %v4783_v35 = vld [vmem:[%s8528_s3 + $0x28] sm:$0xff] }
  0x6d   : > { %v1949_v61 = vadd.f32 %v1909_v23, %v1864_v9  ;;  %v1950_v21 = vadd.f32 %v1910_v56, %v1865_v47  ;;  %v1952_v57 = vadd.f32 %v1912_v25, %v1867_v12  ;;  %v433_v19 = vmul.f32 %v5955_v2, %v8644_v7  ;;  %v633_v55 = vld [vmem:[%s5269_s13 + $0x22] sm:$0xff]  ;;  %2553 = vmatpush.msrb.mxu2 %v4783_v35  ;;  %v1114_v10 = vld [vmem:[%s5269_s13 + $0x12d] sm:$0xff] }
  0x6e   : > { %v1953_v41 = vadd.f32 %v1913_v29, %v1868_v5  ;;  %v1990_v3 = vadd.f32 %v8643_v16, %v1946_v45  ;;  %v1992_v37 = vadd.f32 %v8643_v16, %v1948_v26  ;;  %v436_v54 = vmul.f32 %v5955_v2, %v5948_v46  ;;  %v755_v59 = vld [vmem:[%s5269_s13 + $0x23] sm:$0xff]  ;;  %v1232_v39 = vld [vmem:[%s5269_s13 + $0x10e] sm:$0xff]  ;;  %v6004_v25 = vld [vmem:[%s8526_s1 + $0x2] ss:$0 sm:$0xff] }
  0x6f   : > { %v1993_v31 = vadd.f32 %v8643_v16, %v1949_v61  ;;  %v1994_v18 = vadd.f32 %v8643_v16, %v1950_v21  ;;  %v1996_v43 = vadd.f32 %v8643_v16, %v1952_v57  ;;  %v553_v11 = vmul.f32 %v5984_v53, %v511_v42  ;;  %8646 = vst [vmem:[#allocation11_spill] sm:$0xff] %v6004_v25  ;;  %v6013_v21 = vld [vmem:[%s5269_s13 + $0x33] sm:$0xff]  ;;  %v6018_v57 = vld [vmem:[%s8526_s1 + $0x3] ss:$0 sm:$0xff] }
  0x70   : > { %v1997_v8 = vadd.f32 %v8643_v16, %v1953_v41  ;;  %v2030_v4 = vmax.f32 %v1990_v3, 0.0  ;;  %v2032_v32 = vmax.f32 %v1992_v37, 0.0  ;;  %v555_v12 = vmul.f32 %v5984_v53, %v5965_v20  ;;  %8647 = vst [vmem:[#allocation20_spill] sm:$0xff] %v6018_v57  ;;  %v8648_v42 = vld [vmem:[#allocation19_spill] sm:$0xff] }
  0x71   : > { %v2033_v38 = vmax.f32 %v1993_v31, 0.0  ;;  %v2034_v9 = vmax.f32 %v1994_v18, 0.0  ;;  %v2036_v47 = vmax.f32 %v1996_v43, 0.0  ;;  %v558_v23 = vmul.f32 %v5984_v53, %v5977_v27  ;;  %v1080_v31 = vld [vmem:[%s5269_s13 + $0x1d] sm:$0xff] }
  0x72   : > { %v2037_v5 = vmax.f32 %v1997_v8, 0.0  ;;  %2071 = vst.msk [vmem:[#allocation2 + $0xd0] sm:$0xff] %vm2044_vm0, %v2030_v4  ;;  %v593_v56 = vadd.f32 %v553_v11, %v431_v60  ;;  %v675_v29 = vmul.f32 %v6004_v25, %v633_v55  ;;  %v595_v45 = vadd.f32 %v555_v12, %v433_v19  ;;  %v6022_v60 = vld [vmem:[%s5269_s13 + $0x34] sm:$0xff]  ;;  %v6031_v19 = vld [vmem:[%s5269_s13 + $0x4b] sm:$0xff]  ;;  %v6037_v18 = vld [vmem:[%s8526_s1 + $0x4] ss:$0 sm:$0xff] }
  0x73   : > { %2073 = vst.msk [vmem:[#allocation2 + $0xe0] sm:$0xff] %vm2044_vm0, %v2032_v32  ;;  %v677_v26 = vmul.f32 %v6004_v25, %v5988_v13  ;;  %v680_v61 = vmul.f32 %v6004_v25, %v5991_v30  ;;  %v797_v17 = vmul.f32 %v6018_v57, %v755_v59  ;;  %v6026_v41 = vadd.f32 %v8648_v42, %v5834_v33  ;;  %v1083_v8 = vld [vmem:[%s5269_s13 + $0x35] sm:$0xff]  ;;  %v1202_v59 = vld [vmem:[%s5269_s13 + $0x1e] sm:$0xff] }
  0x74   : > { %v1156_v3 = vmul.f32 %v5443_v52, %v1114_v10  ;;  %2074 = vst.msk [vmem:[#allocation2 + $0xe8] sm:$0xff] %vm2044_vm0, %v2033_v38  ;;  %v598_v37 = vadd.f32 %v558_v23, %v436_v54  ;;  %v715_v1 = vadd.f32 %v675_v29, %v593_v56  ;;  %v6041_v43 = vmul.f32 %v6037_v18, %v5928_v49  ;;  %v8651_v54 = vld [vmem:[#allocation7_spill] sm:$0xff]  ;;  %v6069_v38 = vld [vmem:[%s5269_s13 + $0x4c] sm:$0xff] }
  0x75   : > { %8649 = vst [vmem:[#allocation21_spill] sm:$0xff] %v6037_v18  ;;  %v1192_v33 = vadd.f32 %v5858_v51, %v5854_v15  ;;  %v1274_v35 = vmul.f32 %v5457_v6, %v1232_v39  ;;  %v919_v55 = vmul.f32 %v6037_v18, %v8651_v54  ;;  %v6052_v4 = vadd.f32 %v5847_v34, %v5837_v14  ;;  %v6060_v51 = vld [vmem:[%s8526_s1 + $0x5] ss:$0 sm:$0xff] }
  0x76   : > { %8650 = vst [vmem:[#allocation22_spill] sm:$0xff] %v6041_v43  ;;  %v799_v32 = vmul.f32 %v6018_v57, %v6013_v21  ;;  %v837_v15 = vadd.f32 %v797_v17, %v715_v1  ;;  %v1003_v11 = vmul.f32 %v6060_v51, %v6022_v60  ;;  %v717_v14 = vadd.f32 %v677_v26, %v595_v45  ;;  %v1324_v56 = vld [vmem:[%s5269_s13 + $0x1f] sm:$0xff] }
  0x77   : > { %2075 = vst.msk [vmem:[#allocation2 + $0xf0] sm:$0xff] %vm2044_vm0, %v2034_v9  ;;  %v720_v34 = vadd.f32 %v680_v61, %v598_v37  ;;  %v802_v10 = vmul.f32 %v6018_v57, %v6031_v19  ;;  %v1122_v9 = vmul.f32 %v5443_v52, %v1080_v31  ;;  %v6075_v12 = vmul.f32 %v6060_v51, %v5928_v49  ;;  %v8654_v61 = vld [vmem:[#allocation15_spill] sm:$0xff]  ;;  %v1327_v49 = vld [vmem:[%s5269_s13 + $0x37] sm:$0xff]  ;;  %v1086_v37 = vld [vmem:[%s5269_s13 + $0x4d] sm:$0xff] }
  0x78   : > { %2077 = vst.msk [vmem:[#allocation2 + $0x100] sm:$0xff] %vm2044_vm0, %v2036_v47  ;;  %v1205_v47 = vld [vmem:[%s5269_s13 + $0x36] sm:$0xff]  ;;  %v6078_v39 = vadd.f32 %v1156_v3, %v5813_v63  ;;  %v1125_v23 = vmul.f32 %v5443_v52, %v1083_v8  ;;  %v6082_v29 = vadd.f32 %v1274_v35, %v1192_v33  ;;  %v1006_v26 = vmul.f32 %v6060_v51, %v6069_v38  ;;  %v1085_v54 = vld [vmem:[%s5269_s13 + $0x45] sm:$0xff] }
  0x79   : > { %8652 = vst [vmem:[#allocation23_spill] sm:$0xff] %v6060_v51  ;;  %v2216_v45 = vld [vmem:[#allocation2 + $0xd0] sm:$0xff]  ;;  %v1162_v17 = vadd.f32 %v1122_v9, %v8654_v61  ;;  %v1244_v42 = vmul.f32 %v5457_v6, %v1202_v59  ;;  %v921_v63 = vmul.f32 %v6037_v18, %v6022_v60  ;;  %v924_v3 = vmul.f32 %v6037_v18, %v6069_v38 }
  0x7a   : > { %2078 = vst.msk [vmem:[#allocation2 + $0x108] sm:$0xff] %vm2044_vm0, %v2037_v5  ;;  %v959_v5 = vadd.f32 %v919_v55, %v837_v15  ;;  %v1247_v1 = vmul.f32 %v5457_v6, %v1205_v47  ;;  %v839_v33 = vadd.f32 %v799_v32, %v717_v14  ;;  %v842_v35 = vadd.f32 %v802_v10, %v720_v34  ;;  %v6104_v6 = vld [vmem:[%s8526_s1 + $0x6] ss:$0 sm:$0xff] }
  0x7b   : > { %8653 = vst [vmem:[#allocation28_spill] sm:$0xff] %v6078_v39  ;;  %v2218_v31 = vld [vmem:[#allocation2 + $0xe4] sm:$0xff]  ;;  %v1284_v55 = vadd.f32 %v1244_v42, %v1162_v17  ;;  %v1366_v8 = vmul.f32 %v5473_v24, %v1324_v56  ;;  %v1369_v61 = vmul.f32 %v5473_v24, %v1327_v49  ;;  %v1451_v39 = vmul.f32 %v5481_v36, %v5937_v22 }
  0x7c   : > { %v1043_v52 = vadd.f32 %v1003_v11, %v959_v5  ;;  %v2220_v15 = vmax.f32 %v2216_v45, %v2218_v31  ;;  %v8655_v11 = vld [vmem:[#allocation8_spill] sm:$0xff]  ;;  %v1128_v32 = vmul.f32 %v6104_v6, %v1086_v37  ;;  %v1535_v34 = vmul.f32 %v5492_v50, %v8644_v7 }
  0x7d   : > { %v1046_v5 = vadd.f32 %v1006_v26, %v8655_v11  ;;  %v1406_v14 = vadd.f32 %v1366_v8, %v1284_v55  ;;  %v6110_v22 = vmul.f32 %v6104_v6, %v1085_v54  ;;  %v961_v26 = vadd.f32 %v921_v63, %v839_v33  ;;  %v6117_v49 = vld [vmem:[%s5269_s13 + $0x124] sm:$0xff]  ;;  %v1354_v54 = vld [vmem:[%s5269_s13 + $0x10f] sm:$0xff] }
  0x7e   : > { %v2237_v59 = vld [vmem:[#allocation2 + $0xf0] sm:$0xff]  ;;  %v1165_v9 = vadd.f32 %v1125_v23, %v1043_v52  ;;  %v2230_v10 = vrot.slane %v2220_v15, 1  ;;  %v5090_v23 = vld [vmem:[%s5269_s13 + $0x38] sm:$0xff]  ;;  %v1622_v42 = vmul.f32 %v5501_v58, %v5965_v20  ;;  %v1113_v7 = vld [vmem:[%s5269_s13 + $0x125] sm:$0xff]  ;;  %v6120_v37 = vadd.f32 %v924_v3, %v842_v35 }
  0x7f   : > { %v1454_v56 = vmul.f32 %v5090_v23, %v5481_v36  ;;  %v1491_v17 = vadd.f32 %v1451_v39, %v1406_v14  ;;  %v6125_v36 = vadd.f32 %v1128_v32, %v1046_v5  ;;  %v1709_v20 = vmul.f32 %v8629_v48, %v5988_v13  ;;  %v1235_v35 = vld [vmem:[%s5269_s13 + $0x126] sm:$0xff] }
  0x80   : > { %v1287_v47 = vadd.f32 %v1247_v1, %v1165_v9  ;;  %v2232_v52 = vmax.f32 %v2220_v15, %v2230_v10  ;;  %v1538_v1 = vmul.f32 %v5492_v50, %v5948_v46  ;;  %v1625_v3 = vmul.f32 %v5501_v58, %v5977_v27  ;;  %v1208_v27 = vld [vmem:[%s5269_s13 + $0x4e] sm:$0xff] }
  0x81   : > { %v2239_v24 = vld [vmem:[#allocation2 + $0x104] sm:$0xff]  ;;  %v1575_v39 = vadd.f32 %v1535_v34, %v1491_v17  ;;  %v1033_v33 = vmul.f32 %v6060_v51, %v6117_v49  ;;  %v1155_v50 = vmul.f32 %v6104_v6, %v1113_v7  ;;  %v1796_v13 = vmul.f32 %v8635_v0, %v6013_v21 }
  0x82   : > { %v2241_v45 = vmax.f32 %v2237_v59, %v2239_v24  ;;  %v1409_v31 = vadd.f32 %v1369_v61, %v1287_v47  ;;  %2236 = vst.msk [vmem:[#allocation3 + $0x4b] sm:$0x40] %vm2117_vm4, %v2232_v52  ;;  %v6142_v59 = vld [vmem:[%s8526_s1 + $0x8] ss:$0 sm:$0xff]  ;;  %v1712_v61 = vmul.f32 %v8629_v48, %v5991_v30  ;;  %v6153_v21 = vld [vmem:[%s8526_s1 + $0x9] ss:$0 sm:$0xff]  ;;  %v1881_v14 = vmul.f32 %v8640_v28, %v6022_v60 }
  0x83   : > { %2233 = vst.msk [vmem:[#allocation3 + $0x4e] sm:$0x1] %vm2111_vm1, %v2232_v52  ;;  %v1662_v15 = vadd.f32 %v1622_v42, %v1575_v39  ;;  %v1396_v58 = vmul.f32 %v6142_v59, %v1354_v54  ;;  %v1073_v11 = vadd.f32 %v1033_v33, %v6052_v4  ;;  %v1481_v5 = vmul.f32 %v6153_v21, %v5658_v62  ;;  %v6163_v48 = vld [vmem:[%s8526_s1 + $0x7] ss:$0 sm:$0xff]  ;;  %v424_v24 = vld [vmem:[%s5269_s13 + $0x138] sm:$0xff] }
  0x84   : > { %v2244_v55 = vrot.slane %v2241_v45, 1  ;;  %v1494_v63 = vadd.f32 %v1454_v56, %v1409_v31  ;;  %2234 = vst.msk [vmem:[#allocation3 + $0x4d] sm:$0x4] %vm2113_vm2, %v2232_v52  ;;  %v1277_v30 = vmul.f32 %v6163_v48, %v1235_v35  ;;  %v1357_v4 = vld [vmem:[%s5269_s13 + $0x127] sm:$0xff]  ;;  %v1799_v10 = vmul.f32 %v8635_v0, %v6031_v19  ;;  %v546_v19 = vld [vmem:[%s5269_s13 + $0x139] sm:$0xff] }
  0x85   : > { %v1749_v32 = vadd.f32 %v1709_v20, %v1662_v15  ;;  %v1436_v34 = vadd.f32 %v1396_v58, %v6082_v29  ;;  %v543_v28 = vld [vmem:[%s5269_s13 + $0x121] sm:$0xff]  ;;  %v1195_v60 = vadd.f32 %v1155_v50, %v1073_v11  ;;  %v6176_v47 = vld [vmem:[%s8526_s1 + $0xa] ss:$0 sm:$0xff]  ;;  %v8656_v29 = vld [vmem:[#allocation14_spill] sm:$0xff]  ;;  %2235 = vst.msk [vmem:[#allocation3 + $0x4c] sm:$0x10] %vm2115_vm3, %v2232_v52  ;;  %v1484_v54 = vmul.f32 %v6153_v21, %v5597_v40 }
  0x86   : > { %v2246_v8 = vmax.f32 %v2241_v45, %v2244_v55  ;;  %v1578_v9 = vadd.f32 %v1538_v1, %v1494_v63  ;;  %v1565_v23 = vmul.f32 %v6176_v47, %v5866_v44  ;;  %v6182_v56 = vadd.f32 %v8656_v29, %v961_v26  ;;  %v665_v17 = vld [vmem:[%s5269_s13 + $0x122] sm:$0xff]  ;;  %v6193_v31 = vld [vmem:[%s8526_s1 + $0xe] ss:$0 sm:$0xff]  ;;  %v6205_v20 = vld [vmem:[%s8526_s1 + $0xb] ss:$0 sm:$0xff] }
  0x87   : > { %v6185_v45 = vmul.f32 %v6163_v48, %v1208_v27  ;;  %v1836_v0 = vadd.f32 %v1796_v13, %v1749_v32  ;;  %v1521_v42 = vadd.f32 %v1481_v5, %v1436_v34  ;;  %8657 = vst [vmem:[#allocation12_spill] sm:$0xff] %v6193_v31  ;;  %v1884_v1 = vmul.f32 %v6193_v31, %v6069_v38  ;;  %v6214_v33 = vld [vmem:[%s8526_s1 + $0xc] ss:$0 sm:$0xff]  ;;  %v668_v58 = vld [vmem:[%s5269_s13 + $0x13a] sm:$0xff]  ;;  %v787_v5 = vld [vmem:[%s5269_s13 + $0x123] sm:$0xff] }
  0x88   : > { %2247 = vst.msk [vmem:[#allocation3 + $0x56] sm:$0x1] %vm2111_vm1, %v2246_v8  ;;  %v1665_v62 = vadd.f32 %v1625_v3, %v1578_v9  ;;  %v1399_v26 = vmul.f32 %v6142_v59, %v1357_v4  ;;  %v1317_v39 = vadd.f32 %v1277_v30, %v1195_v60  ;;  %v1568_v52 = vmul.f32 %v6176_v47, %v424_v24  ;;  %v6232_v34 = vld [vmem:[%s8527_s2] ss:$0 sm:$0xff] }
  0x89   : > { %2248 = vst.msk [vmem:[#allocation3 + $0x55] sm:$0x4] %vm2113_vm2, %v2246_v8  ;;  %v1921_v55 = vadd.f32 %v1881_v14, %v1836_v0  ;;  %v1652_v38 = vmul.f32 %v6205_v20, %v543_v28  ;;  %v1605_v3 = vadd.f32 %v1565_v23, %v1521_v42  ;;  %v6209_v40 = vmul.f32 %v6205_v20, %v546_v19  ;;  %v6250_v42 = vld [vmem:[%s5269_s13 + $0x60] sm:$0xff] }
  0x8a   : > { %2249 = vst.msk [vmem:[#allocation3 + $0x54] sm:$0x10] %vm2115_vm3, %v2246_v8  ;;  %v1752_v7 = vadd.f32 %v1712_v61, %v1665_v62  ;;  %v1739_v50 = vmul.f32 %v6214_v33, %v665_v17  ;;  %v466_v15 = vmul.f32 %v5955_v2, %v424_v24  ;;  %v585_v13 = vmul.f32 %v5984_v53, %v543_v28  ;;  %v912_v28 = vld [vmem:[%s5269_s13 + $0x13c] sm:$0xff] }
  0x8b   : > { %2250 = vst.msk [vmem:[#allocation3 + $0x53] sm:$0x40] %vm2117_vm4, %v2246_v8  ;;  %v1965_v35 = vadd.f32 %v8643_v16, %v1921_v55  ;;  %v463_v8 = vmul.f32 %v5955_v2, %v5866_v44  ;;  %v588_v9 = vmul.f32 %v5984_v53, %v546_v19  ;;  %v707_v61 = vmul.f32 %v6004_v25, %v665_v17  ;;  %v790_v16 = vld [vmem:[%s5269_s13 + $0x13b] sm:$0xff]  ;;  %v6244_v19 = vld [vmem:[%s5269_s13 + $0x50] sm:$0xff] }
  0x8c   : > { %v1839_v63 = vadd.f32 %v1799_v10, %v1752_v7  ;;  %v710_v11 = vmul.f32 %v6004_v25, %v668_v58  ;;  %v829_v44 = vmul.f32 %v6018_v57, %v787_v5  ;;  %v1439_v30 = vadd.f32 %v1399_v26, %v1317_v39  ;;  %8658 = vst [vmem:[#allocation24_spill] sm:$0xff] %v6232_v34  ;;  %v6247_v17 = vld [vmem:[%s5269_s13 + $0x58] sm:$0xff]  ;;  %v6255_v26 = vld [vmem:[%s8526_s1 + $0xd] ss:$0 sm:$0xff] }
  0x8d   : > { %v2005_v32 = vmax.f32 %v1965_v35, 0.0  ;;  %v625_v14 = vadd.f32 %v585_v13, %v463_v8  ;;  %v628_v10 = vadd.f32 %v588_v9, %v466_v15  ;;  %v832_v24 = vmul.f32 %v6018_v57, %v790_v16  ;;  %v6264_v35 = vld [vmem:[%s5269_s13 + $0x51] sm:$0xff]  ;;  %v8659_v15 = vld [vmem:[#allocation31_spill] sm:$0xff] }
  0x8e   : > { %v1924_v27 = vadd.f32 %v1884_v1, %v1839_v63  ;;  %v1742_v60 = vmul.f32 %v6214_v33, %v668_v58  ;;  %v951_v29 = vmul.f32 %v6037_v18, %v6117_v49  ;;  %v1036_v0 = vmul.f32 %v6060_v51, %v912_v28  ;;  %v6261_v63 = vld [vmem:[%s5269_s13 + $0x68] sm:$0xff]  ;;  %v6270_v9 = vld [vmem:[%s5269_s13 + $0x70] sm:$0xff] }
  0x8f   : > { %2046 = vst.msk [vmem:[#allocation2 + $0x8] sm:$0xff] %vm2044_vm0, %v2005_v32  ;;  %v747_v23 = vadd.f32 %v707_v61, %v625_v14  ;;  %v750_v1 = vadd.f32 %v710_v11, %v628_v10  ;;  %v1826_v55 = vmul.f32 %v6255_v26, %v787_v5  ;;  %v1911_v39 = vmul.f32 %v6193_v31, %v6117_v49  ;;  %v6273_v61 = vld [vmem:[%s5269_s13 + $0x59] sm:$0xff]  ;;  %v6276_v11 = vld [vmem:[%s5269_s13 + $0x61] sm:$0xff] }
  0x90   : > { %v1968_v62 = vadd.f32 %v6232_v34, %v1924_v27  ;;  %v6267_v13 = vadd.f32 %v1036_v0, %v8659_v15  ;;  %v1524_v58 = vadd.f32 %v1484_v54, %v1439_v30  ;;  %v1692_v27 = vadd.f32 %v1652_v38, %v1605_v3  ;;  %v6290_v30 = vld [vmem:[%s5269_s13 + $0x69] sm:$0xff] }
  0x91   : > { %v2305_v4 = vld [vmem:[#allocation3 + $0x51] sm:$0xff]  ;;  %v869_v8 = vadd.f32 %v829_v44, %v747_v23  ;;  %v6279_v49 = vadd.f32 %v832_v24, %v750_v1  ;;  %v437_v5 = vmul.f32 %v5955_v2, %v6244_v19  ;;  %v438_v32 = vmul.f32 %v5955_v2, %v6247_v17  ;;  %v6312_v1 = vld [vmem:[%s5269_s13 + $0x5a] sm:$0xff] }
  0x92   : > { %4768 = vmatmul.msk.f32.vlgmr.msra.gmra.mxu2 %vm2044_vm0, %v2305_v4  ;;  %v2008_v7 = vmax.f32 %v1968_v62, 0.0  ;;  %8660 = vst [vmem:[#allocation25_spill] sm:$0xff] %v6267_v13  ;;  %v439_v54 = vmul.f32 %v5955_v2, %v6250_v42  ;;  %v1608_v3 = vadd.f32 %v1568_v52, %v1524_v58  ;;  %v1779_v14 = vadd.f32 %v1739_v50, %v1692_v27  ;;  %v6293_v4 = vld [vmem:[%s5269_s13 + $0x71] sm:$0xff] }
  0x93   : > { %8661 = vst [vmem:[#allocation26_spill] sm:$0xff] %v6279_v49  ;;  %v991_v38 = vadd.f32 %v951_v29, %v869_v8  ;;  %v440_v44 = vmul.f32 %v5955_v2, %v6261_v63  ;;  %v441_v62 = vmul.f32 %v5955_v2, %v6270_v9  ;;  %v559_v10 = vmul.f32 %v5984_v53, %v6264_v35 }
  0x94   : > { %2049 = vst.msk [vmem:[#allocation2 + $0x20] sm:$0xff] %vm2044_vm0, %v2008_v7  ;;  %v560_v24 = vmul.f32 %v5984_v53, %v6273_v61  ;;  %v561_v52 = vmul.f32 %v5984_v53, %v6276_v11  ;;  %v1695_v23 = vadd.f32 %v6209_v40, %v1608_v3  ;;  %v1829_v29 = vmul.f32 %v6255_v26, %v790_v16  ;;  %v6309_v7 = vld [vmem:[%s5269_s13 + $0x52] sm:$0xff] }
  0x95   : > { %v6304_v50 = vadd.f32 %v6075_v12, %v991_v38  ;;  %v1866_v0 = vadd.f32 %v1826_v55, %v1779_v14  ;;  %v562_v8 = vmul.f32 %v5984_v53, %v6290_v30  ;;  %v563_v15 = vmul.f32 %v5984_v53, %v6293_v4  ;;  %v6319_v12 = vld [vmem:[%s5269_s13 + $0x62] sm:$0xff]  ;;  %v6322_v38 = vld [vmem:[%s5269_s13 + $0x6a] sm:$0xff] }
  0x96   : > { %v599_v58 = vadd.f32 %v559_v10, %v437_v5  ;;  %v600_v27 = vadd.f32 %v560_v24, %v438_v32  ;;  %v2102_v40 = vld [vmem:[#allocation2 + $0x8] sm:$0xff]  ;;  %v1782_v16 = vadd.f32 %v1742_v60, %v1695_v23  ;;  %v1914_v55 = vmul.f32 %v6193_v31, %v912_v28 }
  0x97   : > { %8662 = vst [vmem:[#allocation27_spill] sm:$0xff] %v6304_v50  ;;  %v1951_v3 = vadd.f32 %v1911_v39, %v1866_v0  ;;  %v601_v14 = vadd.f32 %v561_v52, %v439_v54  ;;  %v6326_v50 = vld [vmem:[%s5269_s13 + $0x72] sm:$0xff]  ;;  %v602_v49 = vadd.f32 %v562_v8, %v440_v44  ;;  %v603_v43 = vadd.f32 %v563_v15, %v441_v62  ;;  %v6341_v44 = vld [vmem:[%s5269_s13 + $0x5b] sm:$0xff]  ;;  %v6346_v8 = vld [vmem:[%s5269_s13 + $0x63] sm:$0xff] }
  0x98   : > { %v681_v5 = vmul.f32 %v6004_v25, %v6309_v7  ;;  %v682_v32 = vmul.f32 %v6004_v25, %v6312_v1  ;;  %v1869_v24 = vadd.f32 %v1829_v29, %v1782_v16  ;;  %v683_v28 = vmul.f32 %v6004_v25, %v6319_v12  ;;  %v6338_v54 = vld [vmem:[%s5269_s13 + $0x53] sm:$0xff]  ;;  %v6349_v29 = vld [vmem:[%s5269_s13 + $0x6b] sm:$0xff] }
  0x99   : > { %v1995_v60 = vadd.f32 %v6232_v34, %v1951_v3  ;;  %v684_v39 = vmul.f32 %v6004_v25, %v6322_v38  ;;  %v685_v52 = vmul.f32 %v6004_v25, %v6326_v50  ;;  %v6352_v15 = vld [vmem:[%s5269_s13 + $0x73] sm:$0xff] }
  0x9a   : > { %v721_v23 = vadd.f32 %v681_v5, %v599_v58  ;;  %v722_v0 = vadd.f32 %v682_v32, %v600_v27  ;;  %v1954_v16 = vadd.f32 %v1914_v55, %v1869_v24  ;;  %v723_v13 = vadd.f32 %v683_v28, %v601_v14  ;;  %v4782_v55 = vld [vmem:[%s8528_s3 + $0x20] sm:$0xff]  ;;  %v6376_v28 = vld [vmem:[%s5269_s13 + $0x54] sm:$0xff] }
  0x9b   : > { %v2104_v10 = vld [vmem:[#allocation2 + $0x1c] sm:$0xff]  ;;  %v2035_v3 = vmax.f32 %v1995_v60, 0.0  ;;  %v724_v53 = vadd.f32 %v684_v39, %v602_v49  ;;  %v725_v31 = vadd.f32 %v685_v52, %v603_v43  ;;  %v804_v58 = vmul.f32 %v6018_v57, %v6341_v44  ;;  %v6373_v32 = vld [vmem:[%s5269_s13 + $0x64] sm:$0xff]  ;;  %2554 = vmatpush.msrb.mxu2 %v4782_v55 }
  0x9c   : > { %v2106_v62 = vmax.f32 %v2102_v40, %v2104_v10  ;;  %v803_v40 = vmul.f32 %v6018_v57, %v6338_v54  ;;  %v1998_v27 = vadd.f32 %v6232_v34, %v1954_v16  ;;  %v4797_v43 = vld [vmem:[%s8528_s3 + $0x38] sm:$0xff]  ;;  %v805_v49 = vmul.f32 %v6018_v57, %v6346_v8  ;;  %8663 = vst [vmem:[#allocation13_spill] sm:$0xff] %v6373_v32 }
  0x9d   : > { %2076 = vst.msk [vmem:[#allocation2 + $0xf8] sm:$0xff] %vm2044_vm0, %v2035_v3  ;;  %v806_v14 = vmul.f32 %v6018_v57, %v6349_v29  ;;  %v807_v5 = vmul.f32 %v6018_v57, %v6352_v15  ;;  %2669 = vmatpush.msra.mxu3 %v4797_v43  ;;  %v844_v60 = vadd.f32 %v804_v58, %v722_v0  ;;  %v6379_v39 = vld [vmem:[%s5269_s13 + $0x5c] sm:$0xff]  ;;  %v6394_v0 = vld [vmem:[%s5269_s13 + $0x74] sm:$0xff] }
  0x9e   : > { %v2120_v2 = vrot.slane %v2106_v62, 1  ;;  %v843_v24 = vadd.f32 %v803_v40, %v721_v23  ;;  %8664 = vst [vmem:[#allocation30_spill] sm:$0xff] %v6379_v39  ;;  %v6383_v52 = vadd.f32 %v6110_v22, %v6182_v56  ;;  %v6387_v16 = vadd.f32 %v6185_v45, %v6125_v36  ;;  %v1087_v58 = vld [vmem:[%s5269_s13 + $0x55] sm:$0xff] }
  0x9f   : > { %v2038_v3 = vmax.f32 %v1998_v27, 0.0  ;;  %v846_v23 = vadd.f32 %v806_v14, %v724_v53  ;;  %8666 = vst [vmem:[#allocation10_spill] sm:$0xff] %v6394_v0  ;;  %v925_v22 = vmul.f32 %v6037_v18, %v6376_v28  ;;  %v926_v56 = vmul.f32 %v6037_v18, %v6379_v39  ;;  %v1088_v27 = vld [vmem:[%s5269_s13 + $0x5d] sm:$0xff]  ;;  %v1089_v14 = vld [vmem:[%s5269_s13 + $0x65] sm:$0xff] }
  0xa0   : > { %v2122_v10 = vmax.f32 %v2106_v62, %v2120_v2  ;;  %v845_v2 = vadd.f32 %v805_v49, %v723_v13  ;;  %v6390_v62 = vld [vmem:[%s5269_s13 + $0x6c] sm:$0xff]  ;;  %v927_v36 = vmul.f32 %v6037_v18, %v6373_v32  ;;  %v847_v45 = vadd.f32 %v807_v5, %v725_v31 }
  0xa1   : > { %8665 = vst [vmem:[#allocation16_spill] sm:$0xff] %v6390_v62  ;;  %v1007_v13 = vmul.f32 %v6060_v51, %v6376_v28  ;;  %v1008_v53 = vmul.f32 %v6060_v51, %v6379_v39  ;;  %v1009_v40 = vmul.f32 %v6060_v51, %v6373_v32  ;;  %v928_v55 = vmul.f32 %v6037_v18, %v6390_v62  ;;  %v1090_v5 = vld [vmem:[%s5269_s13 + $0x6d] sm:$0xff] }
  0xa2   : > { %2123 = vst.msk [vmem:[#allocation3 + $0x12] sm:$0x1] %vm2111_vm1, %v2122_v10  ;;  %v965_v43 = vadd.f32 %v925_v22, %v843_v24  ;;  %v966_v31 = vadd.f32 %v926_v56, %v844_v60  ;;  %v967_v49 = vadd.f32 %v927_v36, %v845_v2  ;;  %v929_v57 = vmul.f32 %v6037_v18, %v6394_v0  ;;  %v8667_v32 = vld [vmem:[#allocation9_spill] sm:$0xff]  ;;  %v1207_v22 = vld [vmem:[%s5269_s13 + $0x46] sm:$0xff] }
  0xa3   : > { %2124 = vst.msk [vmem:[#allocation3 + $0x11] sm:$0x4] %vm2113_vm2, %v2122_v10  ;;  %v1010_v25 = vmul.f32 %v6060_v51, %v6390_v62  ;;  %v1011_v34 = vmul.f32 %v6060_v51, %v6394_v0  ;;  %v1047_v24 = vadd.f32 %v1007_v13, %v8667_v32  ;;  %v1091_v60 = vld [vmem:[%s5269_s13 + $0x75] sm:$0xff]  ;;  %v1048_v2 = vadd.f32 %v1008_v53, %v6120_v37  ;;  %v1210_v62 = vld [vmem:[%s5269_s13 + $0x5e] sm:$0xff] }
  0xa4   : > { %2125 = vst.msk [vmem:[#allocation3 + $0x10] sm:$0x10] %vm2115_vm3, %v2122_v10  ;;  %v1129_v56 = vmul.f32 %v6104_v6, %v1087_v58  ;;  %v1130_v36 = vmul.f32 %v6104_v6, %v1088_v27  ;;  %v1209_v18 = vld [vmem:[%s5269_s13 + $0x56] sm:$0xff]  ;;  %v1131_v32 = vmul.f32 %v6104_v6, %v1089_v14  ;;  %v1132_v13 = vmul.f32 %v6104_v6, %v1090_v5  ;;  %v1328_v58 = vld [vmem:[%s5269_s13 + $0x3f] sm:$0xff]  ;;  %v1329_v14 = vld [vmem:[%s5269_s13 + $0x47] sm:$0xff] }
  0xa5   : > { %2126 = vst.msk [vmem:[#allocation3 + $0xf] sm:$0x40] %vm2117_vm4, %v2122_v10  ;;  %v1049_v10 = vadd.f32 %v1009_v40, %v965_v43  ;;  %v1050_v39 = vadd.f32 %v1010_v25, %v966_v31  ;;  %v1051_v51 = vadd.f32 %v1011_v34, %v967_v49  ;;  %v1133_v0 = vmul.f32 %v6104_v6, %v1091_v60  ;;  %v1212_v43 = vld [vmem:[%s5269_s13 + $0x6e] sm:$0xff]  ;;  %v1213_v34 = vld [vmem:[%s5269_s13 + $0x76] sm:$0xff] }
  0xa6   : > { %2079 = vst.msk [vmem:[#allocation2 + $0x110] sm:$0xff] %vm2044_vm0, %v2038_v3  ;;  %v1211_v3 = vld [vmem:[%s5269_s13 + $0x66] sm:$0xff]  ;;  %v1169_v37 = vadd.f32 %v1129_v56, %v1047_v24  ;;  %v1170_v53 = vadd.f32 %v1130_v36, %v1048_v2  ;;  %v1249_v40 = vmul.f32 %v6163_v48, %v1207_v22  ;;  %v6438_v27 = vadd.f32 %v928_v55, %v846_v23  ;;  %v1330_v22 = vld [vmem:[%s5269_s13 + $0x4f] sm:$0xff]  ;;  %v1331_v56 = vld [vmem:[%s5269_s13 + $0x57] sm:$0xff] }
  0xa7   : > { %v1171_v25 = vadd.f32 %v1131_v32, %v1049_v10  ;;  %v1251_v31 = vmul.f32 %v6163_v48, %v1209_v18  ;;  %v1252_v49 = vmul.f32 %v6163_v48, %v1210_v62  ;;  %v6445_v5 = vadd.f32 %v929_v57, %v847_v45  ;;  %v1332_v23 = vld [vmem:[%s5269_s13 + $0x5f] sm:$0xff] }
  0xa8   : > { %v6447_v60 = vadd.f32 %v1132_v13, %v1050_v39  ;;  %v6449_v24 = vadd.f32 %v1133_v0, %v1051_v51  ;;  %v1253_v2 = vmul.f32 %v6163_v48, %v1211_v3  ;;  %v2238_v55 = vld [vmem:[#allocation2 + $0xf8] sm:$0xff]  ;;  %v1289_v10 = vadd.f32 %v1249_v40, %v6383_v52 }
  0xa9   : > { %v1291_v36 = vadd.f32 %v1251_v31, %v1169_v37  ;;  %v1292_v32 = vadd.f32 %v1252_v49, %v1170_v53  ;;  %v1370_v18 = vmul.f32 %v6142_v59, %v1328_v58  ;;  %v6458_v39 = vmul.f32 %v6163_v48, %v1212_v43  ;;  %v5100_v43 = vld [vmem:[%s5269_s13 + $0x40] sm:$0xff] }
  0xaa   : > { %v6461_v51 = vmul.f32 %v6163_v48, %v1213_v34  ;;  %v6463_v0 = vadd.f32 %v1253_v2, %v1171_v25  ;;  %v1371_v45 = vmul.f32 %v6142_v59, %v1329_v14  ;;  %v1372_v13 = vmul.f32 %v6142_v59, %v1330_v22 }
  0xab   : > { %v1373_v3 = vmul.f32 %v6142_v59, %v1331_v56  ;;  %v1374_v37 = vmul.f32 %v6142_v59, %v1332_v23  ;;  %v1410_v40 = vadd.f32 %v1370_v18, %v6026_v41  ;;  %v1455_v25 = vmul.f32 %v5100_v43, %v6153_v21 }
  0xac   : > { %v2297_v62 = vld [vmem:[#allocation3 + $0x11] sm:$0xff]  ;;  %v1411_v58 = vadd.f32 %v1371_v45, %v1289_v10  ;;  %v1412_v34 = vadd.f32 %v1372_v13, %v6387_v16  ;;  %v1456_v14 = vmul.f32 %v6153_v21, %v5948_v46  ;;  %v1457_v22 = vmul.f32 %v6153_v21, %v6244_v19 }
  0xad   : > { %v2283_v57 = vld [vmem:[#allocation3 + $0x10] sm:$0xff]  ;;  %4760 = vmatmul.msk.f32.gmra.mxu0 %vm2044_vm0, %v2297_v62  ;;  %v1413_v31 = vadd.f32 %v1373_v3, %v1291_v36  ;;  %v1414_v49 = vadd.f32 %v1374_v37, %v1292_v32  ;;  %v1458_v56 = vmul.f32 %v6153_v21, %v6247_v17  ;;  %v1459_v41 = vmul.f32 %v6153_v21, %v6250_v42 }
  0xae   : > { %v2240_v52 = vld [vmem:[#allocation2 + $0x10c] sm:$0xff]  ;;  %4772 = vmatmul.msk.f32.gmra.mxu1 %vm2044_vm0, %v2283_v57  ;;  %v1495_v23 = vadd.f32 %v1455_v25, %v1410_v40  ;;  %v1539_v16 = vmul.f32 %v6176_v47, %v6244_v19  ;;  %v1540_v10 = vmul.f32 %v6176_v47, %v6247_v17  ;;  %v1497_v46 = vadd.f32 %v1457_v22, %v1412_v34 }
  0xaf   : > { %v2242_v53 = vmax.f32 %v2238_v55, %v2240_v52  ;;  %v1496_v55 = vadd.f32 %v1456_v14, %v1411_v58  ;;  %v1498_v32 = vadd.f32 %v1458_v56, %v1413_v31  ;;  %v1499_v18 = vadd.f32 %v1459_v41, %v1414_v49 }
  0xb0   : > { %v1541_v62 = vmul.f32 %v6176_v47, %v6250_v42  ;;  %v1542_v57 = vmul.f32 %v6176_v47, %v6261_v63  ;;  %v1543_v45 = vmul.f32 %v6176_v47, %v6270_v9  ;;  %v1579_v52 = vadd.f32 %v1539_v16, %v1495_v23 }
  0xb1   : > { %v2252_v2 = vrot.slane %v2242_v53, 1  ;;  %v1580_v19 = vadd.f32 %v1540_v10, %v1496_v55  ;;  %v1626_v17 = vmul.f32 %v6205_v20, %v6264_v35  ;;  %v1627_v13 = vmul.f32 %v6205_v20, %v6273_v61  ;;  %v6530_v10 = vld [vmem:[%s5269_s13 + $0x78] sm:$0xff] }
  0xb2   : > { %v1628_v3 = vmul.f32 %v6205_v20, %v6276_v11  ;;  %v1581_v42 = vadd.f32 %v1541_v62, %v1497_v46  ;;  %v1582_v37 = vadd.f32 %v1542_v57, %v1498_v32  ;;  %v1629_v40 = vmul.f32 %v6205_v20, %v6290_v30  ;;  %v8669_v46 = vld [vmem:[#allocation30_spill] sm:$0xff]  ;;  %v8670_v32 = vld [vmem:[#allocation13_spill] sm:$0xff]  ;;  %v8671_v57 = vld [vmem:[#allocation16_spill] sm:$0xff] }
  0xb3   : > { %v2254_v36 = vmax.f32 %v2242_v53, %v2252_v2  ;;  %v1583_v53 = vadd.f32 %v1543_v45, %v1499_v18  ;;  %v1630_v58 = vmul.f32 %v6205_v20, %v6293_v4  ;;  %v1666_v35 = vadd.f32 %v1626_v17, %v1579_v52  ;;  %v6547_v17 = vld [vmem:[%s5269_s13 + $0x79] sm:$0xff] }
  0xb4   : > { %v1667_v43 = vadd.f32 %v1627_v13, %v1580_v19  ;;  %v1713_v61 = vmul.f32 %v6214_v33, %v6309_v7  ;;  %v1668_v11 = vadd.f32 %v1628_v3, %v1581_v42  ;;  %v1669_v25 = vadd.f32 %v1629_v40, %v1582_v37  ;;  %v6550_v13 = vld [vmem:[%s5269_s13 + $0x89] sm:$0xff] }
  0xb5   : > { %2255 = vst.msk [vmem:[#allocation3 + $0x5a] sm:$0x1] %vm2111_vm1, %v2254_v36  ;;  %v1714_v34 = vmul.f32 %v6214_v33, %v6312_v1  ;;  %v1715_v30 = vmul.f32 %v6214_v33, %v6319_v12  ;;  %v1670_v31 = vadd.f32 %v1630_v58, %v1583_v53  ;;  %v1716_v4 = vmul.f32 %v6214_v33, %v6322_v38  ;;  %v8673_v53 = vld [vmem:[#allocation17_spill] sm:$0xff] }
  0xb6   : > { %2256 = vst.msk [vmem:[#allocation3 + $0x59] sm:$0x4] %vm2113_vm2, %v2254_v36  ;;  %v1717_v49 = vmul.f32 %v6214_v33, %v6326_v50  ;;  %v1753_v7 = vadd.f32 %v1713_v61, %v1666_v35  ;;  %v1800_v22 = vmul.f32 %v6255_v26, %v6338_v54  ;;  %v1801_v1 = vmul.f32 %v6255_v26, %v6341_v44  ;;  %v8668_v54 = vld [vmem:[#allocation12_spill] sm:$0xff]  ;;  %v6557_v35 = vld [vmem:[%s5269_s13 + $0x91] sm:$0xff] }
  0xb7   : > { %2257 = vst.msk [vmem:[#allocation3 + $0x58] sm:$0x10] %vm2115_vm3, %v2254_v36  ;;  %v1754_v14 = vadd.f32 %v1714_v34, %v1667_v43  ;;  %v1755_v2 = vadd.f32 %v1715_v30, %v1668_v11  ;;  %v1756_v12 = vadd.f32 %v1716_v4, %v1669_v25  ;;  %v1802_v41 = vmul.f32 %v6255_v26, %v6346_v8  ;;  %v6533_v44 = vld [vmem:[%s5269_s13 + $0x88] sm:$0xff]  ;;  %v8675_v4 = vld [vmem:[#allocation18_spill] sm:$0xff] }
  0xb8   : > { %2258 = vst.msk [vmem:[#allocation3 + $0x57] sm:$0x40] %vm2117_vm4, %v2254_v36  ;;  %v1757_v56 = vadd.f32 %v1717_v49, %v1670_v31  ;;  %v1803_v38 = vmul.f32 %v6255_v26, %v6349_v29  ;;  %v1804_v50 = vmul.f32 %v6255_v26, %v6352_v15  ;;  %v1840_v23 = vadd.f32 %v1800_v22, %v1753_v7  ;;  %v6540_v15 = vld [vmem:[%s5269_s13 + $0x90] sm:$0xff]  ;;  %v8674_v11 = vld [vmem:[#allocation24_spill] sm:$0xff] }
  0xb9   : > { %v1841_v55 = vadd.f32 %v1801_v1, %v1754_v14  ;;  %v1885_v16 = vmul.f32 %v8668_v54, %v6376_v28  ;;  %v1842_v36 = vadd.f32 %v1802_v41, %v1755_v2  ;;  %v1886_v29 = vmul.f32 %v8668_v54, %v8669_v46  ;;  %v8672_v28 = vld [vmem:[#allocation10_spill] sm:$0xff]  ;;  %v6573_v2 = vld [vmem:[%s5269_s13 + $0x8a] sm:$0xff] }
  0xba   : > { %v1843_v8 = vadd.f32 %v1803_v38, %v1756_v12  ;;  %v1887_v18 = vmul.f32 %v8668_v54, %v8670_v32  ;;  %v1844_v62 = vadd.f32 %v1804_v50, %v1757_v56  ;;  %v1888_v45 = vmul.f32 %v8668_v54, %v8671_v57  ;;  %v6570_v14 = vld [vmem:[%s5269_s13 + $0x7a] sm:$0xff]  ;;  %v6576_v22 = vld [vmem:[%s5269_s13 + $0x92] sm:$0xff]  ;;  %v2604_v46 = vld [vmem:[#allocation3 + $0x3] sm:$0xff] }
  0xbb   : > { %v1889_v52 = vmul.f32 %v8668_v54, %v8672_v28  ;;  %v1925_v19 = vadd.f32 %v1885_v16, %v1840_v23  ;;  %v1926_v42 = vadd.f32 %v1886_v29, %v1841_v55  ;;  %v442_v40 = vmul.f32 %v8673_v53, %v6530_v10  ;;  %v6583_v38 = vld [vmem:[%s5269_s13 + $0x7b] sm:$0xff]  ;;  %v6586_v50 = vld [vmem:[%s5269_s13 + $0x8b] sm:$0xff]  ;;  %v6589_v23 = vld [vmem:[%s5269_s13 + $0x93] sm:$0xff] }
  0xbc   : > { %v1927_v37 = vadd.f32 %v1887_v18, %v1842_v36  ;;  %v444_v58 = vmul.f32 %v8673_v53, %v6533_v44  ;;  %v1928_v43 = vadd.f32 %v1888_v45, %v1843_v8  ;;  %v445_v34 = vmul.f32 %v8673_v53, %v6540_v15  ;;  %v4839_v36 = vld [vmem:[%s8528_s3 + $0x68] sm:$0xff]  ;;  %v4796_v8 = vld [vmem:[%s8528_s3 + $0x30] sm:$0xff]  ;;  %v4825_v57 = vld [vmem:[%s8528_s3 + $0x58] sm:$0xff] }
  0xbd   : > { %v1929_v61 = vadd.f32 %v1889_v52, %v1844_v62  ;;  %v1969_v25 = vadd.f32 %v8674_v11, %v1925_v19  ;;  %v1970_v30 = vadd.f32 %v8674_v11, %v1926_v42  ;;  %v564_v49 = vmul.f32 %v8675_v4, %v6547_v17  ;;  %3017 = vmatpush.msra.mxu2 %v4839_v36  ;;  %v8676_v28 = vld [vmem:[#allocation11_spill] sm:$0xff]  ;;  %v6604_v19 = vld [vmem:[%s5269_s13 + $0x8c] sm:$0xff] }
  0xbe   : > { %v1971_v31 = vadd.f32 %v8674_v11, %v1927_v37  ;;  %v566_v7 = vmul.f32 %v8675_v4, %v6550_v13  ;;  %v1972_v1 = vadd.f32 %v8674_v11, %v1928_v43  ;;  %v567_v41 = vmul.f32 %v8675_v4, %v6557_v35  ;;  %2670 = vmatpush.msra.mxu3 %v4796_v8  ;;  %v8677_v53 = vld [vmem:[#allocation20_spill] sm:$0xff]  ;;  %v1092_v4 = vld [vmem:[%s5269_s13 + $0x7d] sm:$0xff] }
  0xbf   : > { %v2306_v3 = vld [vmem:[#allocation3 + $0x59] sm:$0xff]  ;;  %v1973_v12 = vadd.f32 %v8674_v11, %v1929_v61  ;;  %v2009_v56 = vmax.f32 %v1969_v25, 0.0  ;;  %v2010_v55 = vmax.f32 %v1970_v30, 0.0  ;;  %v604_v29 = vadd.f32 %v564_v49, %v442_v40  ;;  %4798 = vmatmul.msk.f32.vlgmr.msra.gmra.mxu3 %vm2044_vm0, %v2604_v46  ;;  %2901 = vmatpush.msrb.mxu1 %v4825_v57  ;;  %v8678_v30 = vld [vmem:[#allocation21_spill] sm:$0xff]  ;;  %v1333_v36 = vld [vmem:[%s5269_s13 + $0x67] sm:$0xff] }
  0xc0   : > { %4769 = vmatmul.msk.f32.gmra.mxu2 %vm2044_vm0, %v2306_v3  ;;  %v2011_v16 = vmax.f32 %v1971_v31, 0.0  ;;  %v606_v32 = vadd.f32 %v566_v7, %v444_v58  ;;  %v2012_v18 = vmax.f32 %v1972_v1, 0.0  ;;  %v607_v45 = vadd.f32 %v567_v41, %v445_v34  ;;  %v2488_v3 = vld [vmem:[#allocation3 + $0x2] sm:$0xff]  ;;  %v6623_v34 = vld [vmem:[%s5269_s13 + $0x94] sm:$0xff] }
  0xc1   : > { %v2013_v62 = vmax.f32 %v1973_v12, 0.0  ;;  %2050 = vst.msk [vmem:[#allocation2 + $0x28] sm:$0xff] %vm2044_vm0, %v2009_v56  ;;  %v686_v52 = vmul.f32 %v8676_v28, %v6570_v14  ;;  %v688_v42 = vmul.f32 %v8676_v28, %v6573_v2  ;;  %v689_v37 = vmul.f32 %v8676_v28, %v6576_v22  ;;  %v6615_v58 = vld [vmem:[%s5269_s13 + $0x7c] sm:$0xff] }
  0xc2   : > { %2051 = vst.msk [vmem:[#allocation2 + $0x30] sm:$0xff] %vm2044_vm0, %v2010_v55  ;;  %v808_v40 = vmul.f32 %v8677_v53, %v6583_v38  ;;  %v810_v61 = vmul.f32 %v8677_v53, %v6586_v50  ;;  %v811_v25 = vmul.f32 %v8677_v53, %v6589_v23  ;;  %v930_v31 = vmul.f32 %v8678_v30, %v6615_v58  ;;  %v1214_v56 = vld [vmem:[%s5269_s13 + $0x7e] sm:$0xff] }
  0xc3   : > { %2052 = vst.msk [vmem:[#allocation2 + $0x38] sm:$0xff] %vm2044_vm0, %v2011_v16  ;;  %v726_v43 = vadd.f32 %v686_v52, %v604_v29  ;;  %v6630_v49 = vadd.f32 %v6458_v39, %v6447_v60  ;;  %v728_v7 = vadd.f32 %v688_v42, %v606_v32  ;;  %v729_v1 = vadd.f32 %v689_v37, %v607_v45  ;;  %v8679_v55 = vld [vmem:[#allocation23_spill] sm:$0xff]  ;;  %v1094_v16 = vld [vmem:[%s5269_s13 + $0x8d] sm:$0xff] }
  0xc4   : > { %2053 = vst.msk [vmem:[#allocation2 + $0x40] sm:$0xff] %vm2044_vm0, %v2012_v18  ;;  %v932_v12 = vmul.f32 %v8678_v30, %v6604_v19  ;;  %v1012_v60 = vmul.f32 %v8679_v55, %v6615_v58  ;;  %v1014_v39 = vmul.f32 %v8679_v55, %v6604_v19  ;;  %v1295_v8 = vadd.f32 %v6461_v51, %v6449_v24  ;;  %v1335_v18 = vld [vmem:[%s5269_s13 + $0x77] sm:$0xff]  ;;  %v1216_v52 = vld [vmem:[%s5269_s13 + $0x8e] sm:$0xff]  ;;  %v6659_v42 = vld [vmem:[%s5269_s13 + $0x80] sm:$0xff] }
  0xc5   : > { %2054 = vst.msk [vmem:[#allocation2 + $0x48] sm:$0xff] %vm2044_vm0, %v2013_v62  ;;  %v848_v41 = vadd.f32 %v808_v40, %v726_v43  ;;  %v850_v46 = vadd.f32 %v810_v61, %v728_v7  ;;  %v6648_v29 = vmul.f32 %v8678_v30, %v6623_v34  ;;  %v1134_v32 = vmul.f32 %v6104_v6, %v1092_v4  ;;  %v1336_v62 = vld [vmem:[%s5269_s13 + $0x7f] sm:$0xff] }
  0xc6   : > { %v6653_v57 = vadd.f32 %v811_v25, %v729_v1  ;;  %v1052_v28 = vadd.f32 %v1012_v60, %v6438_v27  ;;  %v6665_v51 = vmul.f32 %v8679_v55, %v6623_v34  ;;  %v1136_v37 = vmul.f32 %v6104_v6, %v1094_v16 }
  0xc7   : > { %v970_v45 = vadd.f32 %v930_v31, %v848_v41  ;;  %v6661_v24 = vadd.f32 %v932_v12, %v850_v46  ;;  %v1375_v53 = vmul.f32 %v6142_v59, %v1333_v36  ;;  %v1377_v27 = vmul.f32 %v6142_v59, %v1335_v18 }
  0xc8   : > { %4784 = vmatmul.msk.f32.vlgmr.msrb.gmra.mxu2 %vm2044_vm0, %v2488_v3  ;;  %v1256_v3 = vmul.f32 %v6163_v48, %v1214_v56  ;;  %v2127_v40 = vld [vmem:[#allocation2 + $0x28] sm:$0xff]  ;;  %v1174_v61 = vadd.f32 %v1134_v32, %v1052_v28  ;;  %v1378_v25 = vmul.f32 %v6142_v59, %v1336_v62  ;;  %v6672_v31 = vmul.f32 %v6163_v48, %v1216_v52 }
  0xc9   : > { %v1054_v43 = vadd.f32 %v1014_v39, %v970_v45  ;;  %v2128_v30 = vld [vmem:[#allocation2 + $0x30] sm:$0xff]  ;;  %v1415_v4 = vadd.f32 %v1375_v53, %v6463_v0  ;;  %v1460_v7 = vmul.f32 %v6153_v21, %v6261_v63  ;;  %v1462_v6 = vmul.f32 %v6153_v21, %v6530_v10 }
  0xca   : > { %v1296_v12 = vadd.f32 %v1256_v3, %v1174_v61  ;;  %v1417_v56 = vadd.f32 %v1377_v27, %v1295_v8  ;;  %v1463_v41 = vmul.f32 %v6153_v21, %v6659_v42  ;;  %v1544_v59 = vmul.f32 %v6176_v47, %v6530_v10  ;;  %v6702_v27 = vld [vmem:[%s5269_s13 + $0x98] sm:$0xff] }
  0xcb   : > { %v2129_v1 = vld [vmem:[#allocation2 + $0x3c] sm:$0xff]  ;;  %v6683_v39 = vadd.f32 %v1136_v37, %v1054_v43  ;;  %v1500_v0 = vadd.f32 %v1460_v7, %v1415_v4  ;;  %v1546_v63 = vmul.f32 %v6176_v47, %v6533_v44  ;;  %v1547_v8 = vmul.f32 %v6176_v47, %v6540_v15 }
  0xcc   : > { %v2130_v55 = vld [vmem:[#allocation2 + $0x44] sm:$0xff]  ;;  %v2131_v60 = vmax.f32 %v2127_v40, %v2129_v1  ;;  %v1418_v36 = vadd.f32 %v1378_v25, %v1296_v12  ;;  %v1502_v46 = vadd.f32 %v1462_v6, %v1417_v56  ;;  %v1631_v10 = vmul.f32 %v6205_v20, %v6547_v17  ;;  %v6715_v4 = vld [vmem:[%s5269_s13 + $0x99] sm:$0xff] }
  0xcd   : > { %v2132_v16 = vmax.f32 %v2128_v30, %v2130_v55  ;;  %v1584_v21 = vadd.f32 %v1544_v59, %v1500_v0  ;;  %v1633_v18 = vmul.f32 %v6205_v20, %v6550_v13  ;;  %v1634_v52 = vmul.f32 %v6205_v20, %v6557_v35  ;;  %v6712_v30 = vld [vmem:[%s5269_s13 + $0x81] sm:$0xff] }
  0xce   : > { %v2134_v32 = vrot.slane %v2131_v60, 1  ;;  %v1503_v45 = vadd.f32 %v1463_v41, %v1418_v36  ;;  %v1586_v28 = vadd.f32 %v1546_v63, %v1502_v46  ;;  %v1718_v53 = vmul.f32 %v6214_v33, %v6570_v14  ;;  %v6723_v1 = vld [vmem:[%s5269_s13 + $0x82] sm:$0xff] }
  0xcf   : > { %v2142_v62 = vrot.slane %v2132_v16, 1  ;;  %v1671_v37 = vadd.f32 %v1631_v10, %v1584_v21  ;;  %v1720_v40 = vmul.f32 %v6214_v33, %v6573_v2  ;;  %v1721_v61 = vmul.f32 %v6214_v33, %v6576_v22  ;;  %v6754_v0 = vld [vmem:[%s5269_s13 + $0x9b] sm:$0xff] }
  0xd0   : > { %v2136_v3 = vmax.f32 %v2131_v60, %v2134_v32  ;;  %v1587_v43 = vadd.f32 %v1547_v8, %v1503_v45  ;;  %v1673_v13 = vadd.f32 %v1633_v18, %v1586_v28  ;;  %v1805_v14 = vmul.f32 %v6255_v26, %v6583_v38  ;;  %v6747_v60 = vld [vmem:[%s8526_s1 + $0x1] ss:$0 sm:$0xff]  ;;  %v6760_v36 = vld [vmem:[%s8526_s1 + $0x2] ss:$0 sm:$0xff]  ;;  %v6769_v32 = vld [vmem:[%s8526_s1 + $0x3] ss:$0 sm:$0xff] }
  0xd1   : > { %v2144_v17 = vmax.f32 %v2132_v16, %v2142_v62  ;;  %v1758_v35 = vadd.f32 %v1718_v53, %v1671_v37  ;;  %v1807_v2 = vmul.f32 %v6255_v26, %v6586_v50  ;;  %v1808_v25 = vmul.f32 %v6255_v26, %v6589_v23  ;;  %v6726_v50 = vld [vmem:[%s5269_s13 + $0x9a] sm:$0xff]  ;;  %v6729_v23 = vld [vmem:[%s5269_s13 + $0x83] sm:$0xff]  ;;  %8681 = vst [vmem:[#allocation7_spill] sm:$0xff] %v6747_v60  ;;  %v2605_v62 = vld [vmem:[#allocation3 + $0xb] sm:$0xff] }
  0xd2   : > { %2137 = vst.msk [vmem:[#allocation3 + $0x1a] sm:$0x1] %vm2111_vm1, %v2136_v3  ;;  %v1674_v22 = vadd.f32 %v1634_v52, %v1587_v43  ;;  %v1760_v7 = vadd.f32 %v1720_v40, %v1673_v13  ;;  %v1890_v6 = vmul.f32 %v8668_v54, %v6615_v58  ;;  %v1892_v38 = vmul.f32 %v8668_v54, %v6604_v19  ;;  %v6737_v58 = vld [vmem:[%s8526_s1] ss:$0 sm:$0xff]  ;;  %v2489_v16 = vld [vmem:[#allocation3 + $0xa] sm:$0xff] }
  0xd3   : > { %2138 = vst.msk [vmem:[#allocation3 + $0x19] sm:$0x4] %vm2113_vm2, %v2136_v3  ;;  %v1845_v12 = vadd.f32 %v1805_v14, %v1758_v35  ;;  %v1893_v56 = vmul.f32 %v8668_v54, %v6623_v34  ;;  %v443_v19 = vmul.f32 %v6737_v58, %v6659_v42  ;;  %v446_v41 = vmul.f32 %v6737_v58, %v6702_v27  ;;  %v6776_v28 = vld [vmem:[%s5269_s13 + $0x84] sm:$0xff]  ;;  %v6779_v52 = vld [vmem:[%s5269_s13 + $0x9c] sm:$0xff] }
  0xd4   : > { %2139 = vst.msk [vmem:[#allocation3 + $0x18] sm:$0x10] %vm2115_vm3, %v2136_v3  ;;  %v1761_v59 = vadd.f32 %v1721_v61, %v1674_v22  ;;  %v1847_v55 = vadd.f32 %v1807_v2, %v1760_v7  ;;  %v565_v54 = vmul.f32 %v6747_v60, %v6712_v30  ;;  %v568_v34 = vmul.f32 %v6747_v60, %v6715_v4  ;;  %v6791_v61 = vld [vmem:[%s8526_s1 + $0x4] ss:$0 sm:$0xff]  ;;  %v1093_v14 = vld [vmem:[%s5269_s13 + $0x85] sm:$0xff] }
  0xd5   : > { %8680 = vst [vmem:[#allocation19_spill] sm:$0xff] %v6737_v58  ;;  %v1930_v63 = vadd.f32 %v1890_v6, %v1845_v12  ;;  %v687_v46 = vmul.f32 %v6760_v36, %v6723_v1  ;;  %v690_v8 = vmul.f32 %v6760_v36, %v6726_v50  ;;  %v809_v21 = vmul.f32 %v6769_v32, %v6729_v23  ;;  %v6801_v22 = vld [vmem:[%s8526_s1 + $0x5] ss:$0 sm:$0xff]  ;;  %v1096_v6 = vld [vmem:[%s5269_s13 + $0x9d] sm:$0xff] }
  0xd6   : > { %2140 = vst.msk [vmem:[#allocation3 + $0x17] sm:$0x40] %vm2117_vm4, %v2136_v3  ;;  %v1848_v10 = vadd.f32 %v1808_v25, %v1761_v59  ;;  %v1932_v18 = vadd.f32 %v1892_v38, %v1847_v55  ;;  %4785 = vmatmul.msk.f32.gmra.mxu2 %vm2044_vm0, %v2489_v16  ;;  %v605_v45 = vadd.f32 %v565_v54, %v443_v19  ;;  %v1215_v59 = vld [vmem:[%s5269_s13 + $0x86] sm:$0xff]  ;;  %v1218_v16 = vld [vmem:[%s5269_s13 + $0x9e] sm:$0xff] }
  0xd7   : > { %2145 = vst.msk [vmem:[#allocation3 + $0x1e] sm:$0x1] %vm2111_vm1, %v2144_v17  ;;  %v1974_v3 = vadd.f32 %v8674_v11, %v1930_v63  ;;  %4799 = vmatmul.msk.f32.gmra.mxu3 %vm2044_vm0, %v2605_v62  ;;  %v608_v37 = vadd.f32 %v568_v34, %v446_v41  ;;  %v812_v53 = vmul.f32 %v6769_v32, %v6754_v0  ;;  %v1095_v41 = vld [vmem:[%s5269_s13 + $0x95] sm:$0xff] }
  0xd8   : > { %8682 = vst [vmem:[#allocation15_spill] sm:$0xff] %v6760_v36  ;;  %v1933_v40 = vadd.f32 %v1893_v56, %v1848_v10  ;;  %v1976_v43 = vadd.f32 %v8674_v11, %v1932_v18  ;;  %v727_v13 = vadd.f32 %v687_v46, %v605_v45  ;;  %v931_v35 = vmul.f32 %v6791_v61, %v6776_v28  ;;  %v1334_v46 = vld [vmem:[%s5269_s13 + $0x6f] sm:$0xff]  ;;  %v1337_v10 = vld [vmem:[%s5269_s13 + $0x87] sm:$0xff] }
  0xd9   : > { %8683 = vst [vmem:[#allocation8_spill] sm:$0xff] %v6769_v32  ;;  %v2014_v2 = vmax.f32 %v1974_v3, 0.0  ;;  %v730_v25 = vadd.f32 %v690_v8, %v608_v37  ;;  %v1013_v7 = vmul.f32 %v6801_v22, %v6776_v28  ;;  %v1016_v19 = vmul.f32 %v6801_v22, %v6779_v52 }
  0xda   : > { %2146 = vst.msk [vmem:[#allocation3 + $0x1d] sm:$0x4] %vm2113_vm2, %v2144_v17  ;;  %v1977_v38 = vadd.f32 %v8674_v11, %v1933_v40  ;;  %v2016_v12 = vmax.f32 %v1976_v43, 0.0  ;;  %v849_v56 = vadd.f32 %v809_v21, %v727_v13  ;;  %v6813_v55 = vadd.f32 %v6648_v29, %v6653_v57  ;;  %v6820_v11 = vld [vmem:[%s8526_s1 + $0x6] ss:$0 sm:$0xff] }
  0xdb   : > { %2147 = vst.msk [vmem:[#allocation3 + $0x1c] sm:$0x10] %vm2115_vm3, %v2144_v17  ;;  %v852_v54 = vadd.f32 %v812_v53, %v730_v25  ;;  %v1053_v34 = vadd.f32 %v1013_v7, %v6445_v5  ;;  %v1135_v63 = vmul.f32 %v6820_v11, %v1093_v14  ;;  %v1056_v29 = vadd.f32 %v1016_v19, %v6661_v24  ;;  %v6902_v19 = vld [vmem:[%s5269_s13 + $0xa1] sm:$0xff] }
  0xdc   : > { %2148 = vst.msk [vmem:[#allocation3 + $0x1b] sm:$0x40] %vm2117_vm4, %v2144_v17  ;;  %v934_v17 = vmul.f32 %v6791_v61, %v6779_v52  ;;  %v2017_v8 = vmax.f32 %v1977_v38, 0.0  ;;  %v971_v21 = vadd.f32 %v931_v35, %v849_v56  ;;  %v1138_v57 = vmul.f32 %v6820_v11, %v1096_v6  ;;  %v6884_v38 = vld [vmem:[%s5269_s13 + $0xa8] sm:$0xff] }
  0xdd   : > { %8684 = vst [vmem:[#allocation14_spill] sm:$0xff] %v6791_v61  ;;  %v6831_v5 = vadd.f32 %v6672_v31, %v6683_v39  ;;  %v6834_v62 = vmul.f32 %v6820_v11, %v1095_v41  ;;  %v1175_v45 = vadd.f32 %v1135_v63, %v1053_v34  ;;  %v1257_v3 = vmul.f32 %v6163_v48, %v1215_v59  ;;  %v6847_v31 = vld [vmem:[%s8526_s1 + $0x8] ss:$0 sm:$0xff]  ;;  %v6919_v34 = vld [vmem:[%s5269_s13 + $0xb1] sm:$0xff] }
  0xde   : > { %8685 = vst [vmem:[#allocation31_spill] sm:$0xff] %v6801_v22  ;;  %v6839_v24 = vadd.f32 %v934_v17, %v852_v54  ;;  %v6842_v53 = vmul.f32 %v6163_v48, %v1218_v16  ;;  %v1376_v39 = vmul.f32 %v6847_v31, %v1334_v46  ;;  %v1379_v43 = vmul.f32 %v6847_v31, %v1337_v10  ;;  %v6855_v48 = vld [vmem:[%s8526_s1 + $0x9] ss:$0 sm:$0xff]  ;;  %v6928_v46 = vld [vmem:[%s5269_s13 + $0xb9] sm:$0xff] }
  0xdf   : > { %2055 = vst.msk [vmem:[#allocation2 + $0x50] sm:$0xff] %vm2044_vm0, %v2014_v2  ;;  %v1297_v40 = vadd.f32 %v1257_v3, %v1175_v45  ;;  %v1461_v13 = vmul.f32 %v6855_v48, %v6270_v9  ;;  %v1464_v35 = vmul.f32 %v6855_v48, %v6533_v44  ;;  %v6862_v14 = vadd.f32 %v6665_v51, %v971_v21  ;;  %v6872_v9 = vld [vmem:[%s8526_s1 + $0xa] ss:$0 sm:$0xff] }
  0xe0   : > { %8686 = vst [vmem:[#allocation9_spill] sm:$0xff] %v6820_v11  ;;  %v6864_v2 = vadd.f32 %v1138_v57, %v1056_v29  ;;  %v1416_v25 = vadd.f32 %v1376_v39, %v6630_v49  ;;  %v1545_v17 = vmul.f32 %v6176_v47, %v6659_v42  ;;  %v1548_v44 = vmul.f32 %v6872_v9, %v6702_v27  ;;  %v6881_v49 = vld [vmem:[%s5269_s13 + $0xa0] sm:$0xff]  ;;  %v6887_v47 = vld [vmem:[%s5269_s13 + $0xb0] sm:$0xff] }
  0xe1   : > { %2057 = vst.msk [vmem:[#allocation2 + $0x60] sm:$0xff] %vm2044_vm0, %v2016_v12  ;;  %v2284_v18 = vld [vmem:[#allocation3 + $0x18] sm:$0xff]  ;;  %v1419_v7 = vadd.f32 %v1379_v43, %v1297_v40  ;;  %v1632_v51 = vmul.f32 %v6205_v20, %v6712_v30  ;;  %v1635_v6 = vmul.f32 %v6205_v20, %v6715_v4  ;;  %v1719_v12 = vmul.f32 %v6214_v33, %v6723_v1  ;;  %v6899_v4 = vld [vmem:[%s5269_s13 + $0xc0] sm:$0xff] }
  0xe2   : > { %v2298_v37 = vld [vmem:[#allocation3 + $0x19] sm:$0xff]  ;;  %4773 = vmatmul.msk.f32.gmra.mxu1 %vm2044_vm0, %v2284_v18  ;;  %2058 = vst.msk [vmem:[#allocation2 + $0x68] sm:$0xff] %vm2044_vm0, %v2017_v8  ;;  %v1501_v42 = vadd.f32 %v1461_v13, %v1416_v25  ;;  %v1722_v56 = vmul.f32 %v6214_v33, %v6726_v50  ;;  %v1806_v30 = vmul.f32 %v6255_v26, %v6729_v23  ;;  %v6909_v33 = vld [vmem:[%s8526_s1 + $0xe] ss:$0 sm:$0xff] }
  0xe3   : > { %4761 = vmatmul.msk.f32.gmra.mxu0 %vm2044_vm0, %v2298_v37  ;;  %v6896_v20 = vld [vmem:[%s5269_s13 + $0xb8] sm:$0xff]  ;;  %v1504_v59 = vadd.f32 %v1464_v35, %v1419_v7  ;;  %v1809_v54 = vmul.f32 %v6255_v26, %v6754_v0  ;;  %v1891_v1 = vmul.f32 %v6909_v33, %v6776_v28  ;;  %v1894_v50 = vmul.f32 %v6909_v33, %v6779_v52  ;;  %v6916_v23 = vld [vmem:[%s5269_s13 + $0xa9] sm:$0xff]  ;;  %v6931_v28 = vld [vmem:[%s5269_s13 + $0xc1] sm:$0xff] }
  0xe4   : > { %v1585_v63 = vadd.f32 %v1545_v17, %v1501_v42  ;;  %v447_v26 = vmul.f32 %v6737_v58, %v6881_v49  ;;  %v448_v0 = vmul.f32 %v6737_v58, %v6884_v38  ;;  %v449_v16 = vmul.f32 %v6737_v58, %v6887_v47  ;;  %v6944_v37 = vld [vmem:[%s5269_s13 + $0xa2] sm:$0xff]  ;;  %v6951_v35 = vld [vmem:[%s5269_s13 + $0xaa] sm:$0xff]  ;;  %v6954_v25 = vld [vmem:[%s5269_s13 + $0xb2] sm:$0xff] }
  0xe5   : > { %v1588_v8 = vadd.f32 %v1548_v44, %v1504_v59  ;;  %v450_v21 = vmul.f32 %v6737_v58, %v6896_v20  ;;  %v451_v29 = vmul.f32 %v6737_v58, %v6899_v4  ;;  %v569_v57 = vmul.f32 %v6747_v60, %v6902_v19  ;;  %v6957_v42 = vld [vmem:[%s5269_s13 + $0xba] sm:$0xff] }
  0xe6   : > { %v2149_v41 = vld [vmem:[#allocation2 + $0x50] sm:$0xff]  ;;  %v1672_v18 = vadd.f32 %v1632_v51, %v1585_v63  ;;  %v570_v45 = vmul.f32 %v6747_v60, %v6916_v23  ;;  %v571_v3 = vmul.f32 %v6747_v60, %v6919_v34  ;;  %v572_v40 = vmul.f32 %v6747_v60, %v6928_v46 }
  0xe7   : > { %v1675_v39 = vadd.f32 %v1635_v6, %v1588_v8  ;;  %v573_v43 = vmul.f32 %v6747_v60, %v6931_v28  ;;  %v609_v13 = vadd.f32 %v569_v57, %v447_v26  ;;  %v6960_v6 = vld [vmem:[%s5269_s13 + $0xc2] sm:$0xff]  ;;  %v691_v26 = vmul.f32 %v6760_v36, %v6944_v37 }
  0xe8   : > { %v1759_v7 = vadd.f32 %v1719_v12, %v1672_v18  ;;  %v610_v44 = vadd.f32 %v570_v45, %v448_v0  ;;  %v611_v51 = vadd.f32 %v571_v3, %v449_v16  ;;  %v612_v59 = vadd.f32 %v572_v40, %v450_v21  ;;  %v6969_v0 = vld [vmem:[%s5269_s13 + $0xa3] sm:$0xff]  ;;  %v6972_v16 = vld [vmem:[%s5269_s13 + $0xb3] sm:$0xff]  ;;  %v6982_v45 = vld [vmem:[%s5269_s13 + $0xbb] sm:$0xff] }
  0xe9   : > { %v2151_v52 = vld [vmem:[#allocation2 + $0x64] sm:$0xff]  ;;  %v613_v63 = vadd.f32 %v573_v43, %v451_v29  ;;  %v692_v57 = vmul.f32 %v6760_v36, %v6951_v35  ;;  %v693_v12 = vmul.f32 %v6760_v36, %v6954_v25  ;;  %v2490_v18 = vld [vmem:[#allocation3 + $0x12] sm:$0xff]  ;;  %v694_v21 = vmul.f32 %v6760_v36, %v6957_v42 }
  0xea   : > { %v2153_v10 = vmax.f32 %v2149_v41, %v2151_v52  ;;  %v1762_v41 = vadd.f32 %v1722_v56, %v1675_v39  ;;  %v1846_v8 = vadd.f32 %v1806_v30, %v1759_v7  ;;  %v695_v29 = vmul.f32 %v6760_v36, %v6960_v6  ;;  %4786 = vmatmul.msk.f32.gmra.mxu2 %vm2044_vm0, %v2490_v18  ;;  %v2606_v39 = vld [vmem:[#allocation3 + $0x13] sm:$0xff]  ;;  %v7032_v36 = vld [vmem:[%s5269_s13 + $0xc4] sm:$0xff] }
  0xeb   : > { %v731_v30 = vadd.f32 %v691_v26, %v609_v13  ;;  %v732_v40 = vadd.f32 %v692_v57, %v610_v44  ;;  %v733_v43 = vadd.f32 %v693_v12, %v611_v51  ;;  %4800 = vmatmul.msk.f32.gmra.mxu3 %vm2044_vm0, %v2606_v39  ;;  %v813_v51 = vmul.f32 %v6769_v32, %v6969_v0  ;;  %v7017_v12 = vld [vmem:[%s5269_s13 + $0xb4] sm:$0xff]  ;;  %v7022_v39 = vld [vmem:[%s5269_s13 + $0xac] sm:$0xff] }
  0xec   : > { %v2156_v17 = vrot.slane %v2153_v10, 1  ;;  %v1849_v56 = vadd.f32 %v1809_v54, %v1762_v41  ;;  %v1931_v3 = vadd.f32 %v1891_v1, %v1846_v8  ;;  %v4811_v54 = vld [vmem:[%s8528_s3 + $0x48] sm:$0xff]  ;;  %v734_v1 = vadd.f32 %v694_v21, %v612_v59  ;;  %v6998_v41 = vld [vmem:[%s8527_s2] ss:$0 sm:$0xff]  ;;  %8688 = vst [vmem:[#allocation30_spill] sm:$0xff] %v7017_v12 }
  0xed   : > { %2785 = vmatpush.msrb.mxu0 %v4811_v54  ;;  %v735_v7 = vadd.f32 %v695_v29, %v613_v63  ;;  %8687 = vst [vmem:[#allocation12_spill] sm:$0xff] %v6998_v41  ;;  %v815_v59 = vmul.f32 %v6769_v32, %v6972_v16  ;;  %v7008_v63 = vld [vmem:[%s5269_s13 + $0xa4] sm:$0xff]  ;;  %v816_v8 = vmul.f32 %v6769_v32, %v6982_v45 }
  0xee   : > { %v2158_v52 = vmax.f32 %v2153_v10, %v2156_v17  ;;  %v6979_v10 = vld [vmem:[%s5269_s13 + $0xab] sm:$0xff]  ;;  %v6990_v17 = vld [vmem:[%s5269_s13 + $0xc3] sm:$0xff]  ;;  %v1934_v13 = vadd.f32 %v1894_v50, %v1849_v56  ;;  %v1975_v44 = vadd.f32 %v6998_v41, %v1931_v3  ;;  %v935_v56 = vmul.f32 %v6791_v61, %v7008_v63  ;;  %8690 = vst [vmem:[#allocation16_spill] sm:$0xff] %v7032_v36 }
  0xef   : > { %v814_v50 = vmul.f32 %v6769_v32, %v6979_v10  ;;  %v817_v57 = vmul.f32 %v6769_v32, %v6990_v17  ;;  %v853_v21 = vadd.f32 %v813_v51, %v731_v30  ;;  %v855_v3 = vadd.f32 %v815_v59, %v733_v43  ;;  %v7029_v32 = vld [vmem:[%s5269_s13 + $0xbc] sm:$0xff]  ;;  %v1098_v59 = vld [vmem:[%s5269_s13 + $0xad] sm:$0xff] }
  0xf0   : > { %2159 = vst.msk [vmem:[#allocation3 + $0x26] sm:$0x1] %vm2111_vm1, %v2158_v52  ;;  %v1978_v26 = vadd.f32 %v6998_v41, %v1934_v13  ;;  %v2015_v18 = vmax.f32 %v1975_v44, 0.0  ;;  %v936_v44 = vmul.f32 %v6791_v61, %v7022_v39  ;;  %v856_v30 = vadd.f32 %v816_v8, %v734_v1  ;;  %v7060_v41 = vld [vmem:[%s5269_s13 + $0xd4] sm:$0xff] }
  0xf1   : > { %2160 = vst.msk [vmem:[#allocation3 + $0x25] sm:$0x4] %vm2113_vm2, %v2158_v52  ;;  %v854_v29 = vadd.f32 %v814_v50, %v732_v40  ;;  %v857_v13 = vadd.f32 %v817_v57, %v735_v7  ;;  %v937_v40 = vmul.f32 %v6791_v61, %v7017_v12  ;;  %v1017_v7 = vmul.f32 %v6801_v22, %v7008_v63  ;;  %v1097_v50 = vld [vmem:[%s5269_s13 + $0xa5] sm:$0xff] }
  0xf2   : > { %2161 = vst.msk [vmem:[#allocation3 + $0x24] sm:$0x10] %vm2115_vm3, %v2158_v52  ;;  %v2018_v54 = vmax.f32 %v1978_v26, 0.0  ;;  %v1018_v51 = vmul.f32 %v6801_v22, %v7022_v39  ;;  %v1019_v1 = vmul.f32 %v6801_v22, %v7017_v12  ;;  %v938_v8 = vmul.f32 %v6791_v61, %v7029_v32  ;;  %v1219_v12 = vld [vmem:[%s5269_s13 + $0xa6] sm:$0xff] }
  0xf3   : > { %2162 = vst.msk [vmem:[#allocation3 + $0x23] sm:$0x40] %vm2117_vm4, %v2158_v52  ;;  %v7026_v52 = vadd.f32 %v6834_v62, %v6862_v14  ;;  %v939_v62 = vmul.f32 %v6791_v61, %v7032_v36  ;;  %v975_v14 = vadd.f32 %v935_v56, %v853_v21  ;;  %v976_v43 = vadd.f32 %v936_v44, %v854_v29  ;;  %v1099_v21 = vld [vmem:[%s5269_s13 + $0xb5] sm:$0xff]  ;;  %v1100_v29 = vld [vmem:[%s5269_s13 + $0xbd] sm:$0xff] }
  0xf4   : > { %8689 = vst [vmem:[#allocation13_spill] sm:$0xff] %v7029_v32  ;;  %v977_v57 = vadd.f32 %v937_v40, %v855_v3  ;;  %v1021_v44 = vmul.f32 %v6801_v22, %v7032_v36  ;;  %v1023_v61 = vmul.f32 %v7060_v41, %v6801_v22  ;;  %v1057_v3 = vadd.f32 %v1017_v7, %v6813_v55  ;;  %v1101_v40 = vld [vmem:[%s5269_s13 + $0xc5] sm:$0xff]  ;;  %v1220_v7 = vld [vmem:[%s5269_s13 + $0xae] sm:$0xff] }
  0xf5   : > { %2056 = vst.msk [vmem:[#allocation2 + $0x58] sm:$0xff] %vm2044_vm0, %v2015_v18  ;;  %v979_v56 = vadd.f32 %v939_v62, %v857_v13  ;;  %v1020_v18 = vmul.f32 %v6801_v22, %v7029_v32  ;;  %v1058_v13 = vadd.f32 %v1018_v51, %v6839_v24  ;;  %v1103_v62 = vld [vmem:[%s5269_s13 + $0xd5] sm:$0xff]  ;;  %v1059_v60 = vadd.f32 %v1019_v1, %v975_v14 }
  0xf6   : > { %2059 = vst.msk [vmem:[#allocation2 + $0x70] sm:$0xff] %vm2044_vm0, %v2018_v54  ;;  %v1139_v58 = vmul.f32 %v6820_v11, %v1097_v50  ;;  %v1140_v36 = vmul.f32 %v6820_v11, %v1098_v59  ;;  %v1217_v32 = vld [vmem:[%s5269_s13 + $0x96] sm:$0xff]  ;;  %v1141_v55 = vmul.f32 %v6820_v11, %v1099_v21  ;;  %v1142_v24 = vmul.f32 %v6820_v11, %v1100_v29 }
  0xf7   : > { %8691 = vst [vmem:[#allocation10_spill] sm:$0xff] %v7060_v41  ;;  %v1061_v41 = vadd.f32 %v1021_v44, %v977_v57  ;;  %v1063_v22 = vadd.f32 %v1023_v61, %v979_v56  ;;  %v1221_v51 = vld [vmem:[%s5269_s13 + $0xb6] sm:$0xff]  ;;  %v1143_v14 = vmul.f32 %v6820_v11, %v1101_v40  ;;  %v1300_v59 = vadd.f32 %v6842_v53, %v6864_v2  ;;  %v1222_v56 = vld [vmem:[%s5269_s13 + $0xbe] sm:$0xff] }
  0xf8   : > { %v2285_v26 = vld [vmem:[#allocation3 + $0x20] sm:$0xff]  ;;  %v1179_v1 = vadd.f32 %v1139_v58, %v1057_v3  ;;  %v1180_v50 = vadd.f32 %v1140_v36, %v1058_v13  ;;  %v1181_v61 = vadd.f32 %v1141_v55, %v1059_v60  ;;  %v1338_v29 = vld [vmem:[%s5269_s13 + $0x8f] sm:$0xff]  ;;  %v1339_v3 = vld [vmem:[%s5269_s13 + $0x97] sm:$0xff] }
  0xf9   : > { %v2299_v54 = vld [vmem:[#allocation3 + $0x21] sm:$0xff]  ;;  %4774 = vmatmul.msk.f32.gmra.mxu1 %vm2044_vm0, %v2285_v26  ;;  %v1060_v26 = vadd.f32 %v1020_v18, %v976_v43  ;;  %v1145_v43 = vmul.f32 %v6820_v11, %v1103_v62  ;;  %v7098_v40 = vadd.f32 %v1143_v14, %v1061_v41  ;;  %v1342_v11 = vld [vmem:[%s5269_s13 + $0xaf] sm:$0xff] }
  0xfa   : > { %4762 = vmatmul.msk.f32.gmra.mxu0 %vm2044_vm0, %v2299_v54  ;;  %v7085_v18 = vld [vmem:[%s8526_s1 + $0x7] ss:$0 sm:$0xff]  ;;  %v7090_v54 = vadd.f32 %v938_v8, %v856_v30 }
  0xfb   : > { %v1259_v21 = vmul.f32 %v7085_v18, %v1217_v32  ;;  %v1261_v58 = vmul.f32 %v7085_v18, %v1219_v12  ;;  %v7092_v53 = vadd.f32 %v1142_v24, %v1060_v26  ;;  %v1223_v60 = vld [vmem:[%s5269_s13 + $0xc6] sm:$0xff]  ;;  %v1262_v2 = vmul.f32 %v7085_v18, %v1220_v7 }
  0xfc   : > { %v2150_v57 = vld [vmem:[#allocation2 + $0x58] sm:$0xff]  ;;  %v1263_v44 = vmul.f32 %v7085_v18, %v1221_v51  ;;  %v7100_v62 = vadd.f32 %v1145_v43, %v1063_v22  ;;  %v1341_v55 = vld [vmem:[%s5269_s13 + $0xa7] sm:$0xff]  ;;  %v7107_v30 = vmul.f32 %v7085_v18, %v1222_v56  ;;  %v1380_v24 = vmul.f32 %v6847_v31, %v1338_v29 }
  0xfd   : > { %v2152_v36 = vld [vmem:[#allocation2 + $0x6c] sm:$0xff]  ;;  %v1299_v32 = vadd.f32 %v1259_v21, %v7026_v52  ;;  %v1340_v12 = vld [vmem:[%s5269_s13 + $0x9f] sm:$0xff]  ;;  %v1301_v8 = vadd.f32 %v1261_v58, %v1179_v1  ;;  %v1302_v26 = vadd.f32 %v1262_v2, %v1180_v50  ;;  %v7111_v51 = vmul.f32 %v7085_v18, %v1223_v60 }
  0xfe   : > { %v2154_v13 = vmax.f32 %v2150_v57, %v2152_v36  ;;  %v7113_v41 = vadd.f32 %v1263_v44, %v1181_v61  ;;  %v1381_v22 = vmul.f32 %v6847_v31, %v1339_v3  ;;  %v1382_v52 = vmul.f32 %v6847_v31, %v1340_v12 }
  0xff   : > { %v1383_v14 = vmul.f32 %v6847_v31, %v1341_v55  ;;  %v1384_v43 = vmul.f32 %v6847_v31, %v1342_v11  ;;  %v1420_v57 = vadd.f32 %v1380_v24, %v6831_v5  ;;  %v1465_v56 = vmul.f32 %v6855_v48, %v6540_v15 }
 0x100   : > { %v2164_v7 = vrot.slane %v2154_v13, 1  ;;  %v1421_v50 = vadd.f32 %v1381_v22, %v1299_v32  ;;  %v1466_v21 = vmul.f32 %v6855_v48, %v6702_v27  ;;  %v1422_v61 = vadd.f32 %v1382_v52, %v1300_v59 }
 0x101   : > { %v1423_v58 = vadd.f32 %v1383_v14, %v1301_v8  ;;  %v1424_v29 = vadd.f32 %v1384_v43, %v1302_v26  ;;  %v1467_v36 = vmul.f32 %v6855_v48, %v6881_v49  ;;  %v1468_v11 = vmul.f32 %v6855_v48, %v6884_v38 }
 0x102   : > { %v2166_v1 = vmax.f32 %v2154_v13, %v2164_v7  ;;  %v1469_v5 = vmul.f32 %v6855_v48, %v6887_v47  ;;  %v1505_v60 = vadd.f32 %v1465_v56, %v1420_v57  ;;  %v1506_v2 = vadd.f32 %v1466_v21, %v1421_v50  ;;  %v7162_v57 = vld [vmem:[%s8526_s1 + $0xc] ss:$0 sm:$0xff] }
 0x103   : > { %v1507_v15 = vadd.f32 %v1467_v36, %v1422_v61  ;;  %v1549_v27 = vmul.f32 %v6872_v9, %v6881_v49  ;;  %v1550_v59 = vmul.f32 %v6872_v9, %v6884_v38  ;;  %v1551_v44 = vmul.f32 %v6872_v9, %v6887_v47  ;;  %v7147_v38 = vld [vmem:[%s8526_s1 + $0xb] ss:$0 sm:$0xff] }
 0x104   : > { %2167 = vst.msk [vmem:[#allocation3 + $0x2a] sm:$0x1] %vm2111_vm1, %v2166_v1  ;;  %v1508_v3 = vadd.f32 %v1468_v11, %v1423_v58  ;;  %v1509_v13 = vadd.f32 %v1469_v5, %v1424_v29  ;;  %v1552_v32 = vmul.f32 %v6872_v9, %v6896_v20  ;;  %v1553_v12 = vmul.f32 %v6872_v9, %v6899_v4  ;;  %v7177_v29 = vld [vmem:[%s8526_s1 + $0xd] ss:$0 sm:$0xff] }
 0x105   : > { %2168 = vst.msk [vmem:[#allocation3 + $0x29] sm:$0x4] %vm2113_vm2, %v2166_v1  ;;  %v1589_v55 = vadd.f32 %v1549_v27, %v1505_v60  ;;  %v1590_v49 = vadd.f32 %v1550_v59, %v1506_v2  ;;  %v1591_v8 = vadd.f32 %v1551_v44, %v1507_v15  ;;  %v1636_v47 = vmul.f32 %v7147_v38, %v6902_v19  ;;  %v7192_v27 = vld [vmem:[%s5269_s13 + $0xc8] sm:$0xff]  ;;  %v7199_v59 = vld [vmem:[%s5269_s13 + $0xd8] sm:$0xff] }
 0x106   : > { %2169 = vst.msk [vmem:[#allocation3 + $0x28] sm:$0x10] %vm2115_vm3, %v2166_v1  ;;  %v1592_v26 = vadd.f32 %v1552_v32, %v1508_v3  ;;  %v1593_v24 = vadd.f32 %v1553_v12, %v1509_v13  ;;  %v1637_v7 = vmul.f32 %v7147_v38, %v6916_v23  ;;  %v1638_v22 = vmul.f32 %v7147_v38, %v6919_v34  ;;  %v7202_v44 = vld [vmem:[%s5269_s13 + $0xc9] sm:$0xff]  ;;  %v8692_v13 = vld [vmem:[#allocation30_spill] sm:$0xff] }
 0x107   : > { %2170 = vst.msk [vmem:[#allocation3 + $0x27] sm:$0x40] %vm2117_vm4, %v2166_v1  ;;  %v1639_v52 = vmul.f32 %v7147_v38, %v6928_v46  ;;  %v1640_v14 = vmul.f32 %v7147_v38, %v6931_v28  ;;  %v1676_v43 = vadd.f32 %v1636_v47, %v1589_v55  ;;  %v1723_v19 = vmul.f32 %v7162_v57, %v6944_v37  ;;  %v8693_v32 = vld [vmem:[#allocation13_spill] sm:$0xff]  ;;  %v7209_v55 = vld [vmem:[%s5269_s13 + $0xd9] sm:$0xff] }
 0x108   : > { %v1677_v1 = vadd.f32 %v1637_v7, %v1590_v49  ;;  %v1678_v23 = vadd.f32 %v1638_v22, %v1591_v8  ;;  %v1724_v34 = vmul.f32 %v7162_v57, %v6951_v35  ;;  %v1725_v46 = vmul.f32 %v7162_v57, %v6954_v25  ;;  %v8694_v49 = vld [vmem:[#allocation16_spill] sm:$0xff] }
 0x109   : > { %v1679_v50 = vadd.f32 %v1639_v52, %v1592_v26  ;;  %v1680_v56 = vadd.f32 %v1640_v14, %v1593_v24  ;;  %v1726_v28 = vmul.f32 %v7162_v57, %v6957_v42  ;;  %v1727_v21 = vmul.f32 %v7162_v57, %v6960_v6  ;;  %v8695_v26 = vld [vmem:[#allocation19_spill] sm:$0xff]  ;;  %v7216_v7 = vld [vmem:[%s5269_s13 + $0xca] sm:$0xff] }
 0x10a   : > { %v1763_v61 = vadd.f32 %v1723_v19, %v1676_v43  ;;  %v1764_v58 = vadd.f32 %v1724_v34, %v1677_v1  ;;  %v1765_v37 = vadd.f32 %v1725_v46, %v1678_v23  ;;  %v1810_v35 = vmul.f32 %v7177_v29, %v6969_v0  ;;  %v8696_v43 = vld [vmem:[#allocation7_spill] sm:$0xff]  ;;  %v8697_v23 = vld [vmem:[#allocation12_spill] sm:$0xff] }
 0x10b   : > { %v1766_v25 = vadd.f32 %v1726_v28, %v1679_v50  ;;  %v1767_v36 = vadd.f32 %v1727_v21, %v1680_v56  ;;  %v1811_v42 = vmul.f32 %v7177_v29, %v6979_v10  ;;  %v1812_v6 = vmul.f32 %v7177_v29, %v6972_v16  ;;  %v7227_v56 = vld [vmem:[%s5269_s13 + $0xda] sm:$0xff] }
 0x10c   : > { %v1813_v60 = vmul.f32 %v7177_v29, %v6982_v45  ;;  %v1814_v2 = vmul.f32 %v7177_v29, %v6990_v17  ;;  %v1850_v0 = vadd.f32 %v1810_v35, %v1763_v61  ;;  %v1895_v15 = vmul.f32 %v6909_v33, %v7008_v63  ;;  %v7234_v35 = vld [vmem:[%s5269_s13 + $0xcb] sm:$0xff] }
 0x10d   : > { %v1851_v16 = vadd.f32 %v1811_v42, %v1764_v58  ;;  %v1852_v10 = vadd.f32 %v1812_v6, %v1765_v37  ;;  %v1896_v45 = vmul.f32 %v6909_v33, %v7022_v39  ;;  %v1897_v63 = vmul.f32 %v6909_v33, %v8692_v13  ;;  %v8698_v58 = vld [vmem:[#allocation15_spill] sm:$0xff]  ;;  %v8699_v13 = vld [vmem:[#allocation8_spill] sm:$0xff] }
 0x10e   : > { %v2300_v11 = vld [vmem:[#allocation3 + $0x29] sm:$0xff]  ;;  %v1853_v17 = vadd.f32 %v1813_v60, %v1766_v25  ;;  %v1854_v3 = vadd.f32 %v1814_v2, %v1767_v36  ;;  %v1898_v12 = vmul.f32 %v6909_v33, %v8693_v32  ;;  %v1899_v8 = vmul.f32 %v6909_v33, %v8694_v49  ;;  %v7237_v25 = vld [vmem:[%s5269_s13 + $0xdb] sm:$0xff] }
 0x10f   : > { %v2286_v5 = vld [vmem:[#allocation3 + $0x28] sm:$0xff]  ;;  %4763 = vmatmul.msk.f32.gmra.mxu0 %vm2044_vm0, %v2300_v11  ;;  %v1935_v47 = vadd.f32 %v1895_v15, %v1850_v0  ;;  %v1936_v39 = vadd.f32 %v1896_v45, %v1851_v16  ;;  %v452_v24 = vmul.f32 %v8695_v26, %v7192_v27  ;;  %v1937_v22 = vadd.f32 %v1897_v63, %v1852_v10  ;;  %v2491_v11 = vld [vmem:[#allocation3 + $0x1a] sm:$0xff] }
 0x110   : > { %4775 = vmatmul.msk.f32.gmra.mxu1 %vm2044_vm0, %v2286_v5  ;;  %v1938_v52 = vadd.f32 %v1898_v12, %v1853_v17  ;;  %v454_v14 = vmul.f32 %v8695_v26, %v7199_v59  ;;  %v574_v19 = vmul.f32 %v8696_v43, %v7202_v44  ;;  %v1939_v1 = vadd.f32 %v1899_v8, %v1854_v3  ;;  %v7241_v60 = vld [vmem:[%s5269_s13 + $0xcc] sm:$0xff]  ;;  %v7244_v2 = vld [vmem:[%s5269_s13 + $0xdc] sm:$0xff] }
 0x111   : > { %v1979_v34 = vadd.f32 %v8697_v23, %v1935_v47  ;;  %v1980_v46 = vadd.f32 %v8697_v23, %v1936_v39  ;;  %v576_v50 = vmul.f32 %v8696_v43, %v7209_v55  ;;  %v1981_v28 = vadd.f32 %v8697_v23, %v1937_v22  ;;  %4787 = vmatmul.msk.f32.gmra.mxu2 %vm2044_vm0, %v2491_v11  ;;  %v2607_v16 = vld [vmem:[#allocation3 + $0x1b] sm:$0xff]  ;;  %v1102_v17 = vld [vmem:[%s5269_s13 + $0xcd] sm:$0xff] }
 0x112   : > { %v1982_v21 = vadd.f32 %v8697_v23, %v1938_v52  ;;  %v614_v61 = vadd.f32 %v574_v19, %v452_v24  ;;  %v696_v37 = vmul.f32 %v8698_v58, %v7216_v7  ;;  %v1983_v36 = vadd.f32 %v8697_v23, %v1939_v1  ;;  %4801 = vmatmul.msk.f32.gmra.mxu3 %vm2044_vm0, %v2607_v16  ;;  %v8700_v12 = vld [vmem:[#allocation14_spill] sm:$0xff]  ;;  %v1224_v8 = vld [vmem:[%s5269_s13 + $0xce] sm:$0xff]  ;;  %v8701_v24 = vld [vmem:[#allocation31_spill] sm:$0xff] }
 0x113   : > { %v2019_v42 = vmax.f32 %v1979_v34, 0.0  ;;  %v2020_v6 = vmax.f32 %v1980_v46, 0.0  ;;  %v616_v5 = vadd.f32 %v576_v50, %v454_v14  ;;  %v2021_v0 = vmax.f32 %v1981_v28, 0.0  ;;  %v1104_v52 = vld [vmem:[%s5269_s13 + $0xdd] sm:$0xff]  ;;  %v1345_v43 = vld [vmem:[%s5269_s13 + $0xc7] sm:$0xff]  ;;  %v8702_v1 = vld [vmem:[#allocation9_spill] sm:$0xff] }
 0x114   : > { %v2022_v15 = vmax.f32 %v1982_v21, 0.0  ;;  %v698_v10 = vmul.f32 %v8698_v58, %v7227_v56  ;;  %v736_v45 = vadd.f32 %v696_v37, %v614_v61  ;;  %v2023_v3 = vmax.f32 %v1983_v36, 0.0  ;;  %v1343_v14 = vld [vmem:[%s5269_s13 + $0xb7] sm:$0xff]  ;;  %v1346_v46 = vld [vmem:[%s5269_s13 + $0xcf] sm:$0xff] }
 0x115   : > { %2060 = vst.msk [vmem:[#allocation2 + $0x78] sm:$0xff] %vm2044_vm0, %v2019_v42  ;;  %v818_v63 = vmul.f32 %v8699_v13, %v7234_v35  ;;  %v820_v32 = vmul.f32 %v8699_v13, %v7237_v25  ;;  %v940_v49 = vmul.f32 %v8700_v12, %v7241_v60  ;;  %v7261_v47 = vadd.f32 %v7107_v30, %v7092_v53  ;;  %v7280_v28 = vld [vmem:[%s5269_s13 + $0xec] sm:$0xff] }
 0x116   : > { %2061 = vst.msk [vmem:[#allocation2 + $0x80] sm:$0xff] %vm2044_vm0, %v2020_v6  ;;  %v738_v39 = vadd.f32 %v698_v10, %v616_v5  ;;  %v942_v26 = vmul.f32 %v8700_v12, %v7244_v2  ;;  %v1022_v22 = vmul.f32 %v8701_v24, %v7241_v60  ;;  %v1305_v19 = vadd.f32 %v7111_v51, %v7098_v40  ;;  %v1106_v58 = vld [vmem:[%s5269_s13 + $0xed] sm:$0xff]  ;;  %v1226_v5 = vld [vmem:[%s5269_s13 + $0xde] sm:$0xff] }
 0x117   : > { %2062 = vst.msk [vmem:[#allocation2 + $0x88] sm:$0xff] %vm2044_vm0, %v2021_v0  ;;  %v858_v53 = vadd.f32 %v818_v63, %v736_v45  ;;  %v1024_v30 = vmul.f32 %v8701_v24, %v7244_v2  ;;  %v1144_v34 = vmul.f32 %v8702_v1, %v1102_v17  ;;  %v1026_v21 = vmul.f32 %v7280_v28, %v8701_v24  ;;  %v7302_v13 = vld [vmem:[%s5269_s13 + $0xd0] sm:$0xff] }
 0x118   : > { %2063 = vst.msk [vmem:[#allocation2 + $0x90] sm:$0xff] %vm2044_vm0, %v2022_v15  ;;  %v860_v50 = vadd.f32 %v820_v32, %v738_v39  ;;  %v1062_v40 = vadd.f32 %v1022_v22, %v7090_v54  ;;  %v1266_v51 = vmul.f32 %v7085_v18, %v1224_v8  ;;  %v1146_v37 = vmul.f32 %v8702_v1, %v1104_v52  ;;  %v7316_v22 = vld [vmem:[%s5269_s13 + $0xe0] sm:$0xff] }
 0x119   : > { %2064 = vst.msk [vmem:[#allocation2 + $0x98] sm:$0xff] %vm2044_vm0, %v2023_v3  ;;  %v980_v61 = vadd.f32 %v940_v49, %v858_v53  ;;  %v1385_v36 = vmul.f32 %v6847_v31, %v1343_v14  ;;  %v1387_v42 = vmul.f32 %v6847_v31, %v1345_v43  ;;  %v1388_v0 = vmul.f32 %v6847_v31, %v1346_v46 }
 0x11a   : > { %v982_v6 = vadd.f32 %v942_v26, %v860_v50  ;;  %v1184_v11 = vadd.f32 %v1144_v34, %v1062_v40  ;;  %v1470_v54 = vmul.f32 %v6855_v48, %v6896_v20  ;;  %v1472_v45 = vmul.f32 %v6855_v48, %v7192_v27 }
 0x11b   : > { %v1064_v15 = vadd.f32 %v1024_v30, %v980_v61  ;;  %v1425_v16 = vadd.f32 %v1385_v36, %v7113_v41  ;;  %v1427_v10 = vadd.f32 %v1387_v42, %v1305_v19  ;;  %v7299_v17 = vmul.f32 %v8702_v1, %v1106_v58  ;;  %v5122_v42 = vld [vmem:[%s5269_s13 + $0xe2] sm:$0xff] }
 0x11c   : > { %v1306_v3 = vadd.f32 %v1266_v51, %v1184_v11  ;;  %v1473_v63 = vmul.f32 %v7302_v13, %v6855_v48  ;;  %v1554_v20 = vmul.f32 %v6872_v9, %v7192_v27  ;;  %v2171_v32 = vld [vmem:[#allocation2 + $0x78] sm:$0xff]  ;;  %v7309_v41 = vmul.f32 %v7085_v18, %v1226_v5 }
 0x11d   : > { %v1510_v12 = vadd.f32 %v1470_v54, %v1425_v16  ;;  %v1512_v49 = vadd.f32 %v1472_v45, %v1427_v10  ;;  %v1556_v8 = vmul.f32 %v6872_v9, %v7199_v59  ;;  %v2172_v39 = vld [vmem:[#allocation2 + $0x80] sm:$0xff]  ;;  %v7313_v26 = vadd.f32 %v1026_v21, %v982_v6 }
 0x11e   : > { %v1428_v24 = vadd.f32 %v1388_v0, %v1306_v3  ;;  %v1557_v52 = vmul.f32 %v7316_v22, %v6872_v9  ;;  %v1641_v27 = vmul.f32 %v7147_v38, %v7202_v44  ;;  %v7322_v43 = vadd.f32 %v1146_v37, %v1064_v15  ;;  %v5121_v21 = vld [vmem:[%s5269_s13 + $0xe1] sm:$0xff]  ;;  %v1225_v15 = vld [vmem:[%s5269_s13 + $0xd6] sm:$0xff] }
 0x11f   : > { %v2173_v14 = vld [vmem:[#allocation2 + $0x8c] sm:$0xff]  ;;  %v1594_v19 = vadd.f32 %v1554_v20, %v1510_v12  ;;  %v1596_v53 = vadd.f32 %v1556_v8, %v1512_v49  ;;  %v1643_v30 = vmul.f32 %v7147_v38, %v7209_v55  ;;  %v1644_v40 = vmul.f32 %v5121_v21, %v7147_v38  ;;  %v1344_v16 = vld [vmem:[%s5269_s13 + $0xbf] sm:$0xff]  ;;  %v1347_v20 = vld [vmem:[%s5269_s13 + $0xd7] sm:$0xff] }
 0x120   : > { %v2174_v34 = vld [vmem:[#allocation2 + $0x94] sm:$0xff]  ;;  %v2175_v46 = vmax.f32 %v2171_v32, %v2173_v14  ;;  %v1513_v50 = vadd.f32 %v1473_v63, %v1428_v24  ;;  %v1728_v44 = vmul.f32 %v7162_v57, %v7216_v7  ;;  %v1730_v37 = vmul.f32 %v7162_v57, %v7227_v56  ;;  %v5123_v45 = vld [vmem:[%s5269_s13 + $0xe3] sm:$0xff] }
 0x121   : > { %v2176_v51 = vmax.f32 %v2172_v39, %v2174_v34  ;;  %v1681_v61 = vadd.f32 %v1641_v27, %v1594_v19  ;;  %v1683_v58 = vadd.f32 %v1643_v30, %v1596_v53  ;;  %v1731_v6 = vmul.f32 %v5122_v42, %v7162_v57  ;;  %v5124_v8 = vld [vmem:[%s5269_s13 + $0xe4] sm:$0xff] }
 0x122   : > { %v2178_v36 = vrot.slane %v2175_v46, 1  ;;  %v1597_v55 = vadd.f32 %v1557_v52, %v1513_v50  ;;  %v1815_v11 = vmul.f32 %v7177_v29, %v7234_v35  ;;  %v1817_v7 = vmul.f32 %v7177_v29, %v7237_v25  ;;  %v2492_v14 = vld [vmem:[#allocation3 + $0x22] sm:$0xff] }
 0x123   : > { %v2186_v5 = vrot.slane %v2176_v51, 1  ;;  %v1768_v0 = vadd.f32 %v1728_v44, %v1681_v61  ;;  %v1770_v54 = vadd.f32 %v1730_v37, %v1683_v58  ;;  %v1818_v3 = vmul.f32 %v5123_v45, %v7177_v29  ;;  %4788 = vmatmul.msk.f32.gmra.mxu2 %vm2044_vm0, %v2492_v14  ;;  %v2608_v30 = vld [vmem:[#allocation3 + $0x23] sm:$0xff]  ;;  %v5126_v37 = vld [vmem:[%s5269_s13 + $0xd1] sm:$0xff] }
 0x124   : > { %v2180_v10 = vmax.f32 %v2175_v46, %v2178_v36  ;;  %v1684_v56 = vadd.f32 %v1644_v40, %v1597_v55  ;;  %v1900_v63 = vmul.f32 %v6909_v33, %v7241_v60  ;;  %v1902_v49 = vmul.f32 %v6909_v33, %v7244_v2  ;;  %4802 = vmatmul.msk.f32.gmra.mxu3 %vm2044_vm0, %v2608_v30  ;;  %v5125_v58 = vld [vmem:[%s5269_s13 + $0xe8] sm:$0xff] }
 0x125   : > { %v2188_v32 = vmax.f32 %v2176_v51, %v2186_v5  ;;  %v1855_v35 = vadd.f32 %v1815_v11, %v1768_v0  ;;  %v1857_v12 = vadd.f32 %v1817_v7, %v1770_v54  ;;  %v1903_v39 = vmul.f32 %v5124_v8, %v6909_v33  ;;  %v1228_v5 = vld [vmem:[%s5269_s13 + $0xee] sm:$0xff]  ;;  %v1348_v0 = vld [vmem:[%s5269_s13 + $0xdf] sm:$0xff] }
 0x126   : > { %2181 = vst.msk [vmem:[#allocation3 + $0x32] sm:$0x1] %vm2111_vm1, %v2180_v10  ;;  %v1771_v25 = vadd.f32 %v1731_v6, %v1684_v56  ;;  %v1267_v24 = vmul.f32 %v7085_v18, %v1225_v15  ;;  %v1386_v52 = vmul.f32 %v6847_v31, %v1344_v16  ;;  %v1389_v19 = vmul.f32 %v6847_v31, %v1347_v20  ;;  %v1350_v54 = vld [vmem:[%s5269_s13 + $0xef] sm:$0xff] }
 0x127   : > { %2182 = vst.msk [vmem:[#allocation3 + $0x31] sm:$0x4] %vm2113_vm2, %v2180_v10  ;;  %v1940_v60 = vadd.f32 %v1900_v63, %v1855_v35  ;;  %v1942_v27 = vadd.f32 %v1902_v49, %v1857_v12  ;;  %v1471_v2 = vmul.f32 %v6855_v48, %v6899_v4  ;;  %v1474_v4 = vmul.f32 %v6855_v48, %v7199_v59  ;;  %v5128_v16 = vld [vmem:[%s5269_s13 + $0xd2] sm:$0xff]  ;;  %v5129_v56 = vld [vmem:[%s5269_s13 + $0xea] sm:$0xff] }
 0x128   : > { %2183 = vst.msk [vmem:[#allocation3 + $0x30] sm:$0x10] %vm2115_vm3, %v2180_v10  ;;  %v1858_v53 = vadd.f32 %v1818_v3, %v1771_v25  ;;  %v1307_v34 = vadd.f32 %v1267_v24, %v7100_v62  ;;  %v1426_v46 = vadd.f32 %v1386_v52, %v7261_v47  ;;  %v1555_v47 = vmul.f32 %v7302_v13, %v6872_v9  ;;  %v5127_v13 = vld [vmem:[%s5269_s13 + $0xe9] sm:$0xff] }
 0x129   : > { %2184 = vst.msk [vmem:[#allocation3 + $0x2f] sm:$0x40] %vm2117_vm4, %v2180_v10  ;;  %v1984_v50 = vadd.f32 %v8697_v23, %v1940_v60  ;;  %v1986_v21 = vadd.f32 %v8697_v23, %v1942_v27  ;;  %v1558_v59 = vmul.f32 %v5125_v58, %v6872_v9  ;;  %v1642_v36 = vmul.f32 %v5126_v37, %v7147_v38  ;;  %v1236_v60 = vld [vmem:[%s5269_s13 + $0x12e] sm:$0xff]  ;;  %v1238_v27 = vld [vmem:[%s5269_s13 + $0x13e] sm:$0xff] }
 0x12a   : > { %2189 = vst.msk [vmem:[#allocation3 + $0x36] sm:$0x1] %vm2111_vm1, %v2188_v32  ;;  %v1943_v40 = vadd.f32 %v1903_v39, %v1858_v53  ;;  %v1429_v44 = vadd.f32 %v1389_v19, %v1307_v34  ;;  %v1511_v62 = vadd.f32 %v1471_v2, %v1426_v46  ;;  %v1645_v11 = vmul.f32 %v5127_v13, %v7147_v38  ;;  %v8703_v39 = vld [vmem:[#allocation10_spill] sm:$0xff]  ;;  %v5132_v2 = vld [vmem:[%s5269_s13 + $0xf0] sm:$0xff] }
 0x12b   : > { %2190 = vst.msk [vmem:[#allocation3 + $0x35] sm:$0x4] %vm2113_vm2, %v2188_v32  ;;  %v2024_v51 = vmax.f32 %v1984_v50, 0.0  ;;  %v2026_v61 = vmax.f32 %v1986_v21, 0.0  ;;  %v1188_v7 = vadd.f32 %v7299_v17, %v7313_v26  ;;  %v1308_v15 = vadd.f32 %v7309_v41, %v7322_v43  ;;  %v1116_v17 = vld [vmem:[%s5269_s13 + $0x13d] sm:$0xff]  ;;  %v5131_v41 = vld [vmem:[%s5269_s13 + $0xeb] sm:$0xff] }
 0x12c   : > { %2191 = vst.msk [vmem:[#allocation3 + $0x34] sm:$0x10] %vm2115_vm3, %v2188_v32  ;;  %v1987_v55 = vadd.f32 %v8697_v23, %v1943_v40  ;;  %v1514_v42 = vadd.f32 %v1474_v4, %v1429_v44  ;;  %v1595_v6 = vadd.f32 %v1555_v47, %v1511_v62  ;;  %v1729_v10 = vmul.f32 %v5128_v16, %v7162_v57  ;;  %v5133_v44 = vld [vmem:[%s5269_s13 + $0x100] sm:$0xff]  ;;  %v2493_v58 = vld [vmem:[#allocation3 + $0x2a] sm:$0xff] }
 0x12d   : > { %2192 = vst.msk [vmem:[#allocation3 + $0x33] sm:$0x40] %vm2117_vm4, %v2188_v32  ;;  %v1732_v45 = vmul.f32 %v5129_v56, %v7162_v57  ;;  %v5130_v32 = vld [vmem:[%s5269_s13 + $0xd3] sm:$0xff]  ;;  %v1819_v26 = vmul.f32 %v5131_v41, %v7177_v29  ;;  %v1270_v43 = vmul.f32 %v7085_v18, %v1228_v5  ;;  %v1390_v12 = vmul.f32 %v6847_v31, %v1348_v0  ;;  %v2609_v37 = vld [vmem:[#allocation3 + $0x2b] sm:$0xff] }
 0x12e   : > { %v2027_v3 = vmax.f32 %v1987_v55, 0.0  ;;  %2065 = vst.msk [vmem:[#allocation2 + $0xa0] sm:$0xff] %vm2044_vm0, %v2024_v51  ;;  %v1598_v63 = vadd.f32 %v1558_v59, %v1514_v42  ;;  %v1682_v20 = vadd.f32 %v1642_v36, %v1595_v6  ;;  %v1816_v35 = vmul.f32 %v5130_v32, %v7177_v29  ;;  %4789 = vmatmul.msk.f32.gmra.mxu2 %vm2044_vm0, %v2493_v58  ;;  %v5135_v55 = vld [vmem:[%s5269_s13 + $0x101] sm:$0xff]  ;;  %v5136_v6 = vld [vmem:[%s5269_s13 + $0xf2] sm:$0xff] }
 0x12f   : > { %2067 = vst.msk [vmem:[#allocation2 + $0xb0] sm:$0xff] %vm2044_vm0, %v2026_v61  ;;  %v1392_v49 = vmul.f32 %v6847_v31, %v1350_v54  ;;  %v1901_v24 = vmul.f32 %v8703_v39, %v6909_v33  ;;  %v1475_v52 = vmul.f32 %v7316_v22, %v6855_v48  ;;  %v1310_v14 = vadd.f32 %v1270_v43, %v1188_v7  ;;  %v5137_v7 = vld [vmem:[%s5269_s13 + $0x102] sm:$0xff]  ;;  %v8706_v43 = vld [vmem:[#allocation22_spill] sm:$0xff] }
 0x130   : > { %2068 = vst.msk [vmem:[#allocation2 + $0xb8] sm:$0xff] %vm2044_vm0, %v2027_v3  ;;  %v1685_v25 = vadd.f32 %v1645_v11, %v1598_v63  ;;  %v1769_v8 = vadd.f32 %v1729_v10, %v1682_v20  ;;  %v1430_v19 = vadd.f32 %v1390_v12, %v1308_v15  ;;  %v1477_v53 = vmul.f32 %v5132_v2, %v6855_v48  ;;  %v5134_v48 = vld [vmem:[%s5269_s13 + $0xf1] sm:$0xff]  ;;  %v5139_v63 = vld [vmem:[%s5269_s13 + $0x103] sm:$0xff] }
 0x131   : > { %v1559_v31 = vmul.f32 %v5132_v2, %v6872_v9  ;;  %v1158_v30 = vmul.f32 %v8702_v1, %v1116_v17  ;;  %v1904_v21 = vmul.f32 %v7280_v28, %v6909_v33  ;;  %v1432_v4 = vadd.f32 %v1392_v49, %v1310_v14  ;;  %v8704_v11 = vld [vmem:[#allocation25_spill] sm:$0xff]  ;;  %4803 = vmatmul.msk.f32.gmra.mxu3 %vm2044_vm0, %v2609_v37  ;;  %v7436_v32 = vld [vmem:[%s5269_s13 + $0x144] sm:$0xff] }
 0x132   : > { %v2287_v34 = vld [vmem:[#allocation3 + $0x30] sm:$0xff]  ;;  %v1772_v46 = vadd.f32 %v1732_v45, %v1685_v25  ;;  %v1856_v50 = vadd.f32 %v1816_v35, %v1769_v8  ;;  %v1515_v40 = vadd.f32 %v1475_v52, %v1430_v19  ;;  %v1561_v62 = vmul.f32 %v5133_v44, %v6872_v9  ;;  %v7455_v19 = vld [vmem:[%s8526_s1 + $0x6] ss:$0 sm:$0xff] }
 0x133   : > { %v2301_v22 = vld [vmem:[#allocation3 + $0x31] sm:$0xff]  ;;  %4776 = vmatmul.msk.f32.gmra.mxu1 %vm2044_vm0, %v2287_v34  ;;  %v1646_v47 = vmul.f32 %v5134_v48, %v7147_v38  ;;  %v1278_v1 = vmul.f32 %v7085_v18, %v1236_v60  ;;  %v1280_v51 = vmul.f32 %v7085_v18, %v1238_v27  ;;  %v1517_v9 = vadd.f32 %v1477_v53, %v1432_v4  ;;  %v1117_v60 = vld [vmem:[%s5269_s13 + $0x145] sm:$0xff] }
 0x134   : > { %4764 = vmatmul.msk.f32.gmra.mxu0 %vm2044_vm0, %v2301_v22  ;;  %v1859_v28 = vadd.f32 %v1819_v26, %v1772_v46  ;;  %v1941_v61 = vadd.f32 %v1901_v24, %v1856_v50  ;;  %v1599_v36 = vadd.f32 %v1559_v31, %v1515_v40  ;;  %v1648_v42 = vmul.f32 %v5135_v55, %v7147_v38  ;;  %v5138_v45 = vld [vmem:[%s5269_s13 + $0xf3] sm:$0xff]  ;;  %v7446_v24 = vld [vmem:[%s8526_s1 + $0x5] ss:$0 sm:$0xff]  ;;  %v1239_v50 = vld [vmem:[%s5269_s13 + $0x146] sm:$0xff] }
 0x135   : > { %v2193_v59 = vld [vmem:[#allocation2 + $0xa0] sm:$0xff]  ;;  %v1733_v13 = vmul.f32 %v5136_v6, %v7162_v57  ;;  %v1198_v5 = vadd.f32 %v1158_v30, %v8704_v11  ;;  %v1735_v15 = vmul.f32 %v5137_v7, %v7162_v57  ;;  %v1601_v10 = vadd.f32 %v1561_v62, %v1517_v9  ;;  %v8705_v26 = vld [vmem:[#allocation29_spill] sm:$0xff] }
 0x136   : > { %v1944_v0 = vadd.f32 %v1904_v21, %v1859_v28  ;;  %v1985_v54 = vadd.f32 %v8697_v23, %v1941_v61  ;;  %v1686_v56 = vadd.f32 %v1646_v47, %v1599_v36  ;;  %v1820_v3 = vmul.f32 %v5138_v45, %v7177_v29  ;;  %v5140_v8 = vld [vmem:[%s5269_s13 + $0xf4] sm:$0xff]  ;;  %v5143_v30 = vld [vmem:[%s5269_s13 + $0x104] sm:$0xff] }
 0x137   : > { %v2195_v16 = vld [vmem:[#allocation2 + $0xb4] sm:$0xff]  ;;  %v1822_v20 = vmul.f32 %v5139_v63, %v7177_v29  ;;  %v993_v12 = vadd.f32 %v8706_v43, %v8705_v26  ;;  %v1688_v49 = vadd.f32 %v1648_v42, %v1601_v10  ;;  %v1905_v39 = vmul.f32 %v5140_v8, %v6909_v33  ;;  %v8707_v21 = vld [vmem:[#allocation28_spill] sm:$0xff]  ;;  %v1360_v58 = vld [vmem:[%s5269_s13 + $0x13f] sm:$0xff] }
 0x138   : > { %v2197_v35 = vmax.f32 %v2193_v59, %v2195_v16  ;;  %v1988_v17 = vadd.f32 %v8697_v23, %v1944_v0  ;;  %v2025_v41 = vmax.f32 %v1985_v54, 0.0  ;;  %v1773_v25 = vadd.f32 %v1733_v13, %v1686_v56  ;;  %v2494_v47 = vld [vmem:[#allocation3 + $0x32] sm:$0xff]  ;;  %v4810_v55 = vld [vmem:[%s8528_s3 + $0x40] sm:$0xff]  ;;  %v7492_v54 = vld [vmem:[%s5269_s13 + $0x148] sm:$0xff] }
 0x139   : > { %v1037_v52 = vmul.f32 %v7446_v24, %v7436_v32  ;;  %v1159_v2 = vmul.f32 %v7455_v19, %v1117_v60  ;;  %v1775_v53 = vadd.f32 %v1735_v15, %v1688_v49  ;;  %v1907_v34 = vmul.f32 %v5143_v30, %v6909_v33  ;;  %v1358_v61 = vld [vmem:[%s5269_s13 + $0x12f] sm:$0xff]  ;;  %4790 = vmatmul.msk.f32.gmra.mxu2 %vm2044_vm0, %v2494_v47  ;;  %v4838_v33 = vld [vmem:[%s8528_s3 + $0x60] sm:$0xff]  ;;  %v7502_v56 = vld [vmem:[%s8526_s1 + $0x9] ss:$0 sm:$0xff] }
 0x13a   : > { %v2200_v27 = vrot.slane %v2197_v35, 1  ;;  %v2028_v14 = vmax.f32 %v1988_v17, 0.0  ;;  %2066 = vst.msk [vmem:[#allocation2 + $0xa8] sm:$0xff] %vm2044_vm0, %v2025_v41  ;;  %v1860_v31 = vadd.f32 %v1820_v3, %v1773_v25  ;;  %v1318_v22 = vadd.f32 %v1278_v1, %v8707_v21  ;;  %v2610_v1 = vld [vmem:[#allocation3 + $0x33] sm:$0xff]  ;;  %3018 = vmatpush.msra.mxu2 %v4838_v33  ;;  %v1361_v6 = vld [vmem:[%s5269_s13 + $0x147] sm:$0xff]  ;;  %2786 = vmatpush.msrb.mxu0 %v4810_v55 }
 0x13b   : > { %v1077_v46 = vadd.f32 %v1037_v52, %v993_v12  ;;  %v1320_v4 = vadd.f32 %v1280_v51, %v1198_v5  ;;  %v1281_v44 = vmul.f32 %v7085_v18, %v1239_v50  ;;  %v1862_v62 = vadd.f32 %v1822_v20, %v1775_v53  ;;  %v4824_v18 = vld [vmem:[%s8528_s3 + $0x50] sm:$0xff]  ;;  %v7477_v51 = vld [vmem:[%s8526_s1 + $0x8] ss:$0 sm:$0xff]  ;;  %4804 = vmatmul.msk.f32.gmra.mxu3 %vm2044_vm0, %v2610_v1  ;;  %v1445_v0 = vld [vmem:[%s5269_s13 + $0x140] sm:$0xff] }
 0x13c   : > { %v2202_v40 = vmax.f32 %v2197_v35, %v2200_v27  ;;  %2069 = vst.msk [vmem:[#allocation2 + $0xc0] sm:$0xff] %vm2044_vm0, %v2028_v14  ;;  %v1945_v48 = vadd.f32 %v1905_v39, %v1860_v31  ;;  %v1400_v59 = vmul.f32 %v7477_v51, %v1358_v61  ;;  %v1402_v37 = vmul.f32 %v7477_v51, %v1360_v58  ;;  %v7497_v10 = vld [vmem:[%s5269_s13 + $0x150] sm:$0xff]  ;;  %v1530_v20 = vld [vmem:[%s5269_s13 + $0x158] sm:$0xff]  ;;  %v7513_v17 = vld [vmem:[%s8526_s1 + $0xa] ss:$0 sm:$0xff] }
 0x13d   : > { %v1199_v28 = vadd.f32 %v1159_v2, %v1077_v46  ;;  %v1947_v9 = vadd.f32 %v1907_v34, %v1862_v62  ;;  %2902 = vmatpush.msrb.mxu1 %v4824_v18  ;;  %v1403_v13 = vmul.f32 %v7477_v51, %v1361_v6  ;;  %v5146_v45 = vld [vmem:[%s5269_s13 + $0x130] sm:$0xff]  ;;  %v1487_v63 = vmul.f32 %v7502_v56, %v1445_v0  ;;  %v1614_v39 = vld [vmem:[%s5269_s13 + $0x141] sm:$0xff]  ;;  %v1617_v14 = vld [vmem:[%s5269_s13 + $0x159] sm:$0xff] }
 0x13e   : > { %2203 = vst.msk [vmem:[#allocation3 + $0x3e] sm:$0x1] %vm2111_vm1, %v2202_v40  ;;  %v1989_v36 = vadd.f32 %v8697_v23, %v1945_v48  ;;  %v1440_v11 = vadd.f32 %v1400_v59, %v1318_v22  ;;  %v1442_v5 = vadd.f32 %v1402_v37, %v1320_v4  ;;  %v1485_v3 = vmul.f32 %v5146_v45, %v7502_v56  ;;  %v1616_v52 = vld [vmem:[%s5269_s13 + $0x151] sm:$0xff]  ;;  %v1701_v46 = vld [vmem:[%s5269_s13 + $0x142] sm:$0xff] }
 0x13f   : > { %2204 = vst.msk [vmem:[#allocation3 + $0x3d] sm:$0x4] %vm2113_vm2, %v2202_v40  ;;  %v1321_v42 = vadd.f32 %v1281_v44, %v1199_v28  ;;  %v1991_v15 = vadd.f32 %v8697_v23, %v1947_v9  ;;  %v1488_v23 = vmul.f32 %v7502_v56, %v7492_v54  ;;  %v1569_v41 = vmul.f32 %v7513_v17, %v1445_v0  ;;  %v1703_v50 = vld [vmem:[%s5269_s13 + $0x152] sm:$0xff]  ;;  %v1788_v61 = vld [vmem:[%s5269_s13 + $0x143] sm:$0xff]  ;;  %v1791_v59 = vld [vmem:[%s5269_s13 + $0x15b] sm:$0xff] }
 0x140   : > { %2205 = vst.msk [vmem:[#allocation3 + $0x3c] sm:$0x10] %vm2115_vm3, %v2202_v40  ;;  %v2029_v16 = vmax.f32 %v1989_v36, 0.0  ;;  %v1571_v26 = vmul.f32 %v7513_v17, %v7497_v10  ;;  %v1525_v49 = vadd.f32 %v1485_v3, %v1440_v11  ;;  %v1527_v25 = vadd.f32 %v1487_v63, %v1442_v5  ;;  %v1790_v58 = vld [vmem:[%s5269_s13 + $0x153] sm:$0xff]  ;;  %v7548_v5 = vld [vmem:[%s8526_s1 + $0xe] ss:$0 sm:$0xff] }
 0x141   : > { %2206 = vst.msk [vmem:[#allocation3 + $0x3b] sm:$0x40] %vm2117_vm4, %v2202_v40  ;;  %v2194_v7 = vld [vmem:[#allocation2 + $0xa8] sm:$0xff]  ;;  %v1443_v35 = vadd.f32 %v1403_v13, %v1321_v42  ;;  %v2031_v12 = vmax.f32 %v1991_v15, 0.0  ;;  %v1572_v8 = vmul.f32 %v7513_v17, %v1530_v20  ;;  %v1656_v2 = vmul.f32 %v7147_v38, %v1614_v39  ;;  %v1704_v40 = vld [vmem:[%s5269_s13 + $0x15a] sm:$0xff] }
 0x142   : > { %2070 = vst.msk [vmem:[#allocation2 + $0xc8] sm:$0xff] %vm2044_vm0, %v2029_v16  ;;  %v1658_v53 = vmul.f32 %v7147_v38, %v1616_v52  ;;  %v1609_v31 = vadd.f32 %v1569_v41, %v1525_v49  ;;  %v1611_v30 = vadd.f32 %v1571_v26, %v1527_v25  ;;  %v1659_v34 = vmul.f32 %v7147_v38, %v1617_v14  ;;  %v1875_v6 = vld [vmem:[%s5269_s13 + $0x154] sm:$0xff] }
 0x143   : > { %v2196_v43 = vld [vmem:[#allocation2 + $0xbc] sm:$0xff]  ;;  %v1528_v27 = vadd.f32 %v1488_v23, %v1443_v35  ;;  %2072 = vst.msk [vmem:[#allocation2 + $0xd8] sm:$0xff] %vm2044_vm0, %v2031_v12  ;;  %v1743_v44 = vmul.f32 %v7162_v57, %v1701_v46  ;;  %v1745_v62 = vmul.f32 %v7162_v57, %v1703_v50  ;;  %v1746_v38 = vmul.f32 %v7162_v57, %v1704_v40 }
 0x144   : > { %v2198_v60 = vmax.f32 %v2194_v7, %v2196_v43  ;;  %v1696_v47 = vadd.f32 %v1656_v2, %v1609_v31  ;;  %v1698_v28 = vadd.f32 %v1658_v53, %v1611_v30  ;;  %v1830_v37 = vmul.f32 %v7177_v29, %v1788_v61  ;;  %v1876_v57 = vld [vmem:[%s5269_s13 + $0x15c] sm:$0xff] }
 0x145   : > { %v1612_v4 = vadd.f32 %v1572_v8, %v1528_v27  ;;  %v1832_v9 = vmul.f32 %v7177_v29, %v1790_v58  ;;  %v1833_v42 = vmul.f32 %v7177_v29, %v1791_v59  ;;  %v1915_v0 = vmul.f32 %v7548_v5, %v7436_v32  ;;  %v7560_v32 = vld [vmem:[%s8527_s2] ss:$0 sm:$0xff]  ;;  %v4895_v58 = vld [vmem:[%s8528_s3 + $0xa8] sm:$0xff] }
 0x146   : > { %v2288_v21 = vld [vmem:[#allocation3 + $0x38] sm:$0xff]  ;;  %v2208_v22 = vrot.slane %v2198_v60, 1  ;;  %v1783_v36 = vadd.f32 %v1743_v44, %v1696_v47  ;;  %v1785_v55 = vadd.f32 %v1745_v62, %v1698_v28  ;;  %v1917_v7 = vmul.f32 %v7548_v5, %v1875_v6  ;;  %3481 = vmatpush.msrb.mxu2 %v4895_v58 }
 0x147   : > { %v2302_v48 = vld [vmem:[#allocation3 + $0x39] sm:$0xff]  ;;  %4777 = vmatmul.msk.f32.gmra.mxu1 %vm2044_vm0, %v2288_v21  ;;  %v1699_v18 = vadd.f32 %v1659_v34, %v1612_v4  ;;  %v1918_v15 = vmul.f32 %v7548_v5, %v1876_v57  ;;  %v2720_v4 = vld [vmem:[#allocation3 + $0x4] sm:$0xff] }
 0x148   : > { %4765 = vmatmul.msk.f32.gmra.mxu0 %vm2044_vm0, %v2302_v48  ;;  %v2210_v33 = vmax.f32 %v2198_v60, %v2208_v22  ;;  %v2495_v1 = vld [vmem:[#allocation3 + $0x3a] sm:$0xff]  ;;  %v1870_v29 = vadd.f32 %v1830_v37, %v1783_v36  ;;  %v1872_v16 = vadd.f32 %v1832_v9, %v1785_v55  ;;  %v7589_v22 = vld [vmem:[#allocation3 + $0x50] sm:$0xff] }
 0x149   : > { %4791 = vmatmul.msk.f32.gmra.mxu2 %vm2044_vm0, %v2495_v1  ;;  %v2215_v13 = vld [vmem:[#allocation2 + $0xc8] sm:$0xff]  ;;  %v1786_v11 = vadd.f32 %v1746_v38, %v1699_v18  ;;  %v2498_v44 = vld [vmem:[#allocation3 + $0x52] sm:$0xff]  ;;  %v2499_v61 = vld [vmem:[#allocation3 + $0x5a] sm:$0xff] }
 0x14a   : > { %2211 = vst.msk [vmem:[#allocation3 + $0x42] sm:$0x1] %vm2111_vm1, %v2210_v33  ;;  %v2217_v45 = vld [vmem:[#allocation2 + $0xdc] sm:$0xff]  ;;  %v1955_v20 = vadd.f32 %v1915_v0, %v1870_v29  ;;  %v1957_v35 = vadd.f32 %v1917_v7, %v1872_v16  ;;  %v2614_v47 = vld [vmem:[#allocation3 + $0x53] sm:$0xff]  ;;  %v4867_v1 = vld [vmem:[%s8528_s3 + $0x88] sm:$0xff] }
 0x14b   : > { %2212 = vst.msk [vmem:[#allocation3 + $0x41] sm:$0x4] %vm2113_vm2, %v2210_v33  ;;  %v1873_v3 = vadd.f32 %v1833_v42, %v1786_v11  ;;  %v2219_v63 = vmax.f32 %v2215_v13, %v2217_v45  ;;  %v4853_v48 = vld [vmem:[%s8528_s3 + $0x78] sm:$0xff]  ;;  %v2721_v38 = vld [vmem:[#allocation3 + $0xc] sm:$0xff]  ;;  %3249 = vmatpush.msra.mxu0 %v4867_v1  ;;  %v5150_v42 = vld [vmem:[%s8526_s1 + $0x4] ss:$0 sm:$0xff] }
 0x14c   : > { %2213 = vst.msk [vmem:[#allocation3 + $0x40] sm:$0x10] %vm2115_vm3, %v2210_v33  ;;  %v1999_v26 = vadd.f32 %v7560_v32, %v1955_v20  ;;  %v2001_v43 = vadd.f32 %v7560_v32, %v1957_v35  ;;  %3133 = vmatpush.msrb.mxu3 %v4853_v48  ;;  %v7603_v28 = vld [vmem:[#allocation3 + $0x58] sm:$0xff]  ;;  %v2952_v9 = vld [vmem:[#allocation3 + $0xd] sm:$0xff]  ;;  %v1531_v48 = vld [vmem:[%s5269_s13 + $0x160] sm:$0xff] }
 0x14d   : > { %2214 = vst.msk [vmem:[#allocation3 + $0x3f] sm:$0x40] %vm2117_vm4, %v2210_v33  ;;  %v1958_v23 = vadd.f32 %v1918_v15, %v1873_v3  ;;  %v2222_v41 = vrot.slane %v2219_v63, 1  ;;  %v4852_v33 = vld [vmem:[%s8528_s3 + $0x70] sm:$0xff]  ;;  %v4881_v18 = vld [vmem:[%s8528_s3 + $0x98] sm:$0xff]  ;;  %v7638_v15 = vpop.f32.mrf.mxu2  ;;  %v1618_v1 = vld [vmem:[%s5269_s13 + $0x161] sm:$0xff] }
 0x14e   : > { %v2039_v8 = vmax.f32 %v1999_v26, 0.0  ;;  %v2041_v27 = vmax.f32 %v2001_v43, 0.0  ;;  %3134 = vmatpush.msrb.mxu3 %v4852_v33  ;;  %3365 = vmatpush.msra.mxu1 %v4881_v18  ;;  %v2722_v37 = vld [vmem:[#allocation3 + $0x14] sm:$0xff]  ;;  %v5151_v6 = vld [vmem:[%s5269_s13 + $0x13c] sm:$0xff]  ;;  %v7634_v7 = vld [vmem:[%s5269_s13 + $0x14c] sm:$0xff]  ;;  %v7647_v26 = vpop.f32.mrf.mxu0 }
 0x14f   : > { %v2224_v12 = vmax.f32 %v2219_v63, %v2222_v41  ;;  %v2002_v25 = vadd.f32 %v7560_v32, %v1958_v23  ;;  %v3068_v36 = vld [vmem:[#allocation3 + $0xe] sm:$0xff]  ;;  %v954_v57 = vmul.f32 %v5151_v6, %v5150_v42  ;;  %v2723_v13 = vld [vmem:[#allocation3 + $0x1c] sm:$0xff]  ;;  %v1038_v45 = vmul.f32 %v7446_v24, %v7634_v7  ;;  %v5152_v24 = vld [vmem:[%s8526_s1 + $0x7] ss:$0 sm:$0xff] }
 0x150   : > { %2080 = vst.msk [vmem:[#allocation2 + $0x118] sm:$0xff] %vm2044_vm0, %v2039_v8  ;;  %v1115_v55 = vld [vmem:[%s5269_s13 + $0x135] sm:$0xff]  ;;  %v1118_v3 = vld [vmem:[%s5269_s13 + $0x14d] sm:$0xff]  ;;  %v8709_v63 = vld [vmem:[#allocation27_spill] sm:$0xff] }
 0x151   : > { %v2611_v49 = vld [vmem:[#allocation3 + $0x3b] sm:$0xff]  ;;  %2225 = vst.msk [vmem:[#allocation3 + $0x4a] sm:$0x1] %vm2111_vm1, %v2224_v12  ;;  %v2042_v14 = vmax.f32 %v2002_v25, 0.0  ;;  %v1157_v11 = vmul.f32 %v7455_v19, %v1115_v55  ;;  %v1160_v41 = vmul.f32 %v7455_v19, %v1118_v3  ;;  %v1362_v19 = vld [vmem:[%s5269_s13 + $0x14f] sm:$0xff]  ;;  %v2955_v42 = vld [vmem:[#allocation3 + $0x25] sm:$0xff] }
 0x152   : > { %4805 = vmatmul.msk.f32.gmra.mxu3 %vm2044_vm0, %v2611_v49  ;;  %2226 = vst.msk [vmem:[#allocation3 + $0x49] sm:$0x4] %vm2113_vm2, %v2224_v12  ;;  %v2953_v0 = vld [vmem:[#allocation3 + $0x15] sm:$0xff]  ;;  %v7651_v49 = vpop.f32.mrf.mxu1  ;;  %v1615_v33 = vld [vmem:[%s5269_s13 + $0x149] sm:$0xff] }
 0x153   : > { %2227 = vst.msk [vmem:[#allocation3 + $0x48] sm:$0x10] %vm2115_vm3, %v2224_v12  ;;  %v8708_v29 = vld [vmem:[#allocation26_spill] sm:$0xff]  ;;  %v1197_v20 = vadd.f32 %v1157_v11, %v8709_v63  ;;  %v5156_v63 = vld [vmem:[%s8526_s1 + $0xd] ss:$0 sm:$0xff] }
 0x154   : > { %v2303_v39 = vld [vmem:[#allocation3 + $0x41] sm:$0xff]  ;;  %2228 = vst.msk [vmem:[#allocation3 + $0x47] sm:$0x40] %vm2117_vm4, %v2224_v12  ;;  %v994_v16 = vadd.f32 %v954_v57, %v8708_v29  ;;  %v3069_v35 = vld [vmem:[#allocation3 + $0x16] sm:$0xff]  ;;  %v1240_v12 = vld [vmem:[%s5269_s13 + $0x14e] sm:$0xff] }
 0x155   : > { %v7567_v52 = vld [vmem:[#allocation3 + $0x40] sm:$0xff]  ;;  %4766 = vmatmul.msk.f32.gmra.mxu0 %vm2044_vm0, %v2303_v39  ;;  %2082 = vst.msk [vmem:[#allocation2 + $0x128] sm:$0xff] %vm2044_vm0, %v2041_v27  ;;  %v1237_v43 = vld [vmem:[%s5269_s13 + $0x136] sm:$0xff]  ;;  %v1282_v39 = vmul.f32 %v5152_v24, %v1240_v12  ;;  %v5155_v57 = vld [vmem:[%s8526_s1 + $0xc] ss:$0 sm:$0xff] }
 0x156   : > { %v2496_v60 = vld [vmem:[#allocation3 + $0x42] sm:$0xff]  ;;  %4778 = vmatmul.msk.f32.gmra.mxu1 %vm2044_vm0, %v7567_v52  ;;  %2083 = vst.msk [vmem:[#allocation2 + $0x130] sm:$0xff] %vm2044_vm0, %v2042_v14  ;;  %v1078_v23 = vadd.f32 %v1038_v45, %v994_v16  ;;  %v1279_v8 = vmul.f32 %v5152_v24, %v1237_v43  ;;  %v1359_v27 = vld [vmem:[%s5269_s13 + $0x137] sm:$0xff]  ;;  %v1789_v29 = vld [vmem:[%s5269_s13 + $0x14b] sm:$0xff]  ;;  %v1916_v24 = vmul.f32 %v7548_v5, %v7634_v7 }
 0x157   : > { %4792 = vmatmul.msk.f32.gmra.mxu2 %vm2044_vm0, %v2496_v60  ;;  %v2259_v34 = vld [vmem:[#allocation2 + $0x118] sm:$0xff]  ;;  %v2724_v60 = vld [vmem:[#allocation3 + $0x24] sm:$0xff] }
 0x158   : > { %v2612_v2 = vld [vmem:[#allocation3 + $0x43] sm:$0xff]  ;;  %v1200_v25 = vadd.f32 %v1160_v41, %v1078_v23  ;;  %v7702_v23 = vpop.f32.mrf.mxu3 }
 0x159   : > { %v2954_v14 = vld [vmem:[#allocation3 + $0x1d] sm:$0xff]  ;;  %v3071_v12 = vld [vmem:[#allocation3 + $0x26] sm:$0xff] }
 0x15a   : > { %4806 = vmatmul.msk.f32.gmra.mxu3 %vm2044_vm0, %v2612_v2  ;;  %v1319_v2 = vadd.f32 %v1279_v8, %v1197_v20  ;;  %v7686_v55 = vpop.f32.mrf.mxu1  ;;  %v1792_v16 = vld [vmem:[%s5269_s13 + $0x163] sm:$0xff]  ;;  %v1831_v20 = vmul.f32 %v5156_v63, %v1789_v29 }
 0x15b   : > { %v7580_v53 = vld [vmem:[#allocation3 + $0x49] sm:$0xff] }
 0x15c   : > { %v7582_v31 = vld [vmem:[#allocation3 + $0x48] sm:$0xff] }
 0x15d   : > { %v2497_v30 = vld [vmem:[#allocation3 + $0x4a] sm:$0xff]  ;;  %4767 = vmatmul.msk.f32.gmra.mxu0 %vm2044_vm0, %v7580_v53 }
 0x15e   : > { %4779 = vmatmul.msk.f32.gmra.mxu1 %vm2044_vm0, %v7582_v31  ;;  %v2613_v46 = vld [vmem:[#allocation3 + $0x4b] sm:$0xff] }
 0x15f   : > { %4793 = vmatmul.msk.f32.gmra.mxu2 %vm2044_vm0, %v2497_v30  ;;  %v2261_v50 = vld [vmem:[#allocation2 + $0x12c] sm:$0xff]  ;;  %v1322_v30 = vadd.f32 %v1282_v39, %v1200_v25  ;;  %v1877_v43 = vld [vmem:[%s5269_s13 + $0x164] sm:$0xff] }
 0x160   : > { %v2263_v21 = vmax.f32 %v2259_v34, %v2261_v50  ;;  %v1401_v34 = vmul.f32 %v7477_v51, %v1359_v27  ;;  %v7663_v50 = vpop.f32.mrf.mxu2  ;;  %v1919_v8 = vmul.f32 %v7548_v5, %v1877_v43  ;;  %v7708_v27 = vld [vmem:[#allocation3 + $0x34] sm:$0xff]  ;;  %v3075_v29 = vld [vmem:[#allocation3 + $0x46] sm:$0xff] }
 0x161   : > { %v3076_v43 = vld [vmem:[#allocation3 + $0x4e] sm:$0xff] }
 0x162   : > { %4807 = vmatmul.msk.f32.gmra.mxu3 %vm2044_vm0, %v2613_v46  ;;  %v2266_v40 = vrot.slane %v2263_v21, 1  ;;  %v1404_v46 = vmul.f32 %v7477_v51, %v1362_v19  ;;  %v3070_v51 = vld [vmem:[#allocation3 + $0x1e] sm:$0xff]  ;;  %v7719_v5 = vpop.f32.mrf.mxu1 }
 0x163   : > { %8710 = vst [vmem:[#allocation17_spill] sm:$0xff] %v7719_v5  ;;  %v3764_v5 = vld [vmem:[#allocation3 + $0x1b] sm:$0xff] }
 0x164   : > { %v2268_v62 = vmax.f32 %v2263_v21, %v2266_v40  ;;  %v1441_v21 = vadd.f32 %v1401_v34, %v1319_v2  ;;  %v5153_v40 = vld [vmem:[%s5269_s13 + $0x138] sm:$0xff] }
 0x165   : > { %4812 = vmatmul.msk.f32.vlgmr.msrb.gmra.mxu0 %vm2044_vm0, %v2720_v4  ;;  %v1444_v4 = vadd.f32 %v1404_v46, %v1322_v30 }
 0x166   : > { %4780 = vmatmul.msk.f32.gmra.mxu1 %vm2044_vm0, %v7589_v22  ;;  %2269 = vst.msk [vmem:[#allocation3 + $0x62] sm:$0x1] %vm2111_vm1, %v2268_v62 }
 0x167   : > { %4794 = vmatmul.msk.f32.gmra.mxu2 %vm2044_vm0, %v2498_v44  ;;  %2270 = vst.msk [vmem:[#allocation3 + $0x61] sm:$0x4] %vm2113_vm2, %v2268_v62  ;;  %v1486_v44 = vmul.f32 %v5153_v40, %v7502_v56  ;;  %v7725_v40 = vpop.f32.mrf.mxu3 }
 0x168   : > { %2271 = vst.msk [vmem:[#allocation3 + $0x60] sm:$0x10] %vm2115_vm3, %v2268_v62  ;;  %v7696_v45 = vpop.f32.mrf.mxu2 }
 0x169   : > { %2272 = vst.msk [vmem:[#allocation3 + $0x5f] sm:$0x40] %vm2117_vm4, %v2268_v62  ;;  %v1489_v62 = vmul.f32 %v7502_v56, %v7497_v10 }
 0x16a   : > { %4808 = vmatmul.msk.f32.gmra.mxu3 %vm2044_vm0, %v2614_v47  ;;  %v1526_v47 = vadd.f32 %v1486_v44, %v1441_v21  ;;  %8711 = vst [vmem:[#allocation24_spill] sm:$0xff] %v7725_v40  ;;  %v2957_v44 = vld [vmem:[#allocation3 + $0x35] sm:$0xff]  ;;  %v3650_v40 = vld [vmem:[#allocation3 + $0x2a] sm:$0xff] }
 0x16b   : > { %v1529_v58 = vadd.f32 %v1489_v62, %v1444_v4  ;;  %v3072_v4 = vld [vmem:[#allocation3 + $0x2e] sm:$0xff]  ;;  %v4894_v62 = vld [vmem:[%s8528_s3 + $0xa0] sm:$0xff] }
 0x16c   : > { %3482 = vmatpush.msrb.mxu2 %v4894_v62 }
 0x16d   : > { %4813 = vmatmul.msk.f32.gmra.mxu0 %vm2044_vm0, %v2721_v38  ;;  %v2615_v59 = vld [vmem:[#allocation3 + $0x5b] sm:$0xff] }
 0x16e   : > { %4781 = vmatmul.msk.f32.gmra.mxu1 %vm2044_vm0, %v7603_v28 }
 0x16f   : > { %4795 = vmatmul.msk.f32.gmra.mxu2 %vm2044_vm0, %v2499_v61  ;;  %v1573_v61 = vmul.f32 %v7513_v17, %v1531_v48  ;;  %v4866_v48 = vld [vmem:[%s8528_s3 + $0x80] sm:$0xff] }
 0x170   : > { %v7721_v7 = vpop.f32.mrf.mxu2  ;;  %3250 = vmatpush.msra.mxu0 %v4866_v48  ;;  %v3185_v48 = vld [vmem:[#allocation3 + $0x17] sm:$0xff] }
 0x172   : > { %4809 = vmatmul.msk.f32.gmra.mxu3 %vm2044_vm0, %v2615_v59  ;;  %v5154_v59 = vld [vmem:[%s8526_s1 + $0xb] ss:$0 sm:$0xff] }
 0x173   : > { %v1657_v10 = vmul.f32 %v5154_v59, %v1615_v33  ;;  %v1660_v56 = vmul.f32 %v5154_v59, %v1618_v1  ;;  %v3073_v33 = vld [vmem:[#allocation3 + $0x36] sm:$0xff]  ;;  %v7751_v59 = vld [vmem:[#allocation3 + $0x44] sm:$0xff] }
 0x175   : > { %4814 = vmatmul.msk.f32.gmra.mxu0 %vm2044_vm0, %v2722_v37 }
 0x176   : > { %4826 = vmatmul.msk.f32.vlgmr.msrb.gmra.mxu1 %vm2044_vm0, %v2721_v38  ;;  %v1570_v38 = vmul.f32 %v7513_v17, %v7492_v54  ;;  %v1613_v54 = vadd.f32 %v1573_v61, %v1529_v58  ;;  %v1702_v17 = vld [vmem:[%s5269_s13 + $0x14a] sm:$0xff]  ;;  %v7749_v58 = vpop.f32.mrf.mxu1 }
 0x177   : > { %4840 = vmatmul.msk.f32.vlgmr.msra.gmra.mxu2 %vm2044_vm0, %v2952_v9  ;;  %v7681_v9 = vpop.f32.mrf.mxu0  ;;  %8714 = vst [vmem:[#allocation20_spill] sm:$0xff] %v7749_v58 }
 0x178   : > { %v1610_v18 = vadd.f32 %v1570_v38, %v1526_v47  ;;  %v4880_v47 = vld [vmem:[%s8528_s3 + $0x90] sm:$0xff] }
 0x179   : > { %3366 = vmatpush.msra.mxu1 %v4880_v47 }
 0x17a   : > { %4854 = vmatmul.msk.f32.vlgmr.msrb.gmra.mxu3 %vm2044_vm0, %v3068_v36  ;;  %v1705_v36 = vld [vmem:[%s5269_s13 + $0x162] sm:$0xff]  ;;  %v1697_v6 = vadd.f32 %v1657_v10, %v1610_v18  ;;  %v7754_v10 = vpop.f32.mrf.mxu3 }
 0x17b   : > { %v1747_v11 = vmul.f32 %v5155_v57, %v1705_v36  ;;  %8715 = vst [vmem:[#allocation21_spill] sm:$0xff] %v7754_v10 }
 0x17d   : > { %4815 = vmatmul.msk.f32.gmra.mxu0 %vm2044_vm0, %v2723_v13 }
 0x17e   : > { %4827 = vmatmul.msk.f32.gmra.mxu1 %vm2044_vm0, %v2722_v37  ;;  %v7679_v37 = vld [vmem:[#allocation3 + $0x2c] sm:$0xff] }
 0x17f   : > { %4841 = vmatmul.msk.f32.gmra.mxu2 %vm2044_vm0, %v2953_v0  ;;  %v1700_v0 = vadd.f32 %v1660_v56, %v1613_v54  ;;  %v7712_v30 = vpop.f32.mrf.mxu0  ;;  %v2958_v54 = vld [vmem:[#allocation3 + $0x3d] sm:$0xff] }
 0x181   : > { %v1787_v41 = vadd.f32 %v1747_v11, %v1700_v0  ;;  %v2959_v11 = vld [vmem:[#allocation3 + $0x45] sm:$0xff] }
 0x182   : > { %4855 = vmatmul.msk.f32.gmra.mxu3 %vm2044_vm0, %v3069_v35  ;;  %v1834_v35 = vmul.f32 %v5156_v63, %v1792_v16 }
 0x184   : > { %v1874_v39 = vadd.f32 %v1834_v35, %v1787_v41  ;;  %v2960_v35 = vld [vmem:[#allocation3 + $0x4d] sm:$0xff] }
 0x185   : > { %4816 = vmatmul.msk.f32.gmra.mxu0 %vm2044_vm0, %v2724_v60 }
 0x186   : > { %4828 = vmatmul.msk.f32.gmra.mxu1 %vm2044_vm0, %v2723_v13  ;;  %v1744_v13 = vmul.f32 %v5155_v57, %v1702_v17  ;;  %v1959_v19 = vadd.f32 %v1919_v8, %v1874_v39  ;;  %v7768_v57 = vpop.f32.mrf.mxu1 }
 0x187   : > { %4842 = vmatmul.msk.f32.gmra.mxu2 %vm2044_vm0, %v2954_v14  ;;  %v2956_v14 = vld [vmem:[#allocation3 + $0x2d] sm:$0xff]  ;;  %v7747_v61 = vpop.f32.mrf.mxu0 }
 0x188   : > { %v1784_v3 = vadd.f32 %v1744_v13, %v1697_v6  ;;  %v2003_v34 = vadd.f32 %v7560_v32, %v1959_v19  ;;  %8713 = vst [vmem:[#allocation11_spill] sm:$0xff] %v7747_v61  ;;  %v7771_v13 = vld [vmem:[#allocation3 + $0x4c] sm:$0xff] }
 0x18a   : > { %4856 = vmatmul.msk.f32.gmra.mxu3 %vm2044_vm0, %v3070_v51  ;;  %v1871_v25 = vadd.f32 %v1831_v20, %v1784_v3  ;;  %v2043_v21 = vmax.f32 %v2003_v34, 0.0  ;;  %v7741_v51 = vpop.f32.mrf.mxu2  ;;  %v7783_v3 = vld [vmem:[#allocation3 + $0x54] sm:$0xff] }
 0x18b   : > { %8712 = vst [vmem:[#allocation18_spill] sm:$0xff] %v7741_v51  ;;  %v3427_v51 = vld [vmem:[#allocation3 + $0x70] sm:$0xff] }
 0x18c   : > { %2084 = vst.msk [vmem:[#allocation2 + $0x138] sm:$0xff] %vm2044_vm0, %v2043_v21 }
 0x18d   : > { %4817 = vmatmul.msk.f32.gmra.mxu0 %vm2044_vm0, %v7679_v37 }
 0x18e   : > { %4829 = vmatmul.msk.f32.gmra.mxu1 %vm2044_vm0, %v2724_v60  ;;  %v1956_v60 = vadd.f32 %v1916_v24, %v1871_v25  ;;  %v7788_v20 = vpop.f32.mrf.mxu1  ;;  %v2961_v24 = vld [vmem:[#allocation3 + $0x55] sm:$0xff] }
 0x18f   : > { %4843 = vmatmul.msk.f32.gmra.mxu2 %vm2044_vm0, %v2955_v42  ;;  %v3074_v42 = vld [vmem:[#allocation3 + $0x3e] sm:$0xff]  ;;  %v7766_v6 = vpop.f32.mrf.mxu0 }
 0x190   : > { %v2000_v2 = vadd.f32 %v7560_v32, %v1956_v60  ;;  %v7728_v32 = vld [vmem:[#allocation3 + $0x3c] sm:$0xff] }
 0x191   : > { %v3077_v60 = vld [vmem:[#allocation3 + $0x56] sm:$0xff] }
 0x192   : > { %4857 = vmatmul.msk.f32.gmra.mxu3 %vm2044_vm0, %v3071_v12  ;;  %v2040_v46 = vmax.f32 %v2000_v2, 0.0  ;;  %v7797_v12 = vld [vmem:[#allocation3 + $0x5c] sm:$0xff] }
 0x193   : > { %v2262_v1 = vld [vmem:[#allocation2 + $0x134] sm:$0xff]  ;;  %v2962_v2 = vld [vmem:[#allocation3 + $0x5d] sm:$0xff] }
 0x194   : > { %2081 = vst.msk [vmem:[#allocation2 + $0x120] sm:$0xff] %vm2044_vm0, %v2040_v46  ;;  %v7761_v36 = vpop.f32.mrf.mxu2  ;;  %v4909_v46 = vld [vmem:[%s8528_s3 + $0xb8] sm:$0xff] }
 0x195   : > { %4818 = vmatmul.msk.f32.gmra.mxu0 %vm2044_vm0, %v7708_v27  ;;  %8716 = vst [vmem:[#allocation23_spill] sm:$0xff] %v7761_v36  ;;  %v7774_v0 = vpop.f32.mrf.mxu3  ;;  %3597 = vmatpush.msra.mxu3 %v4909_v46  ;;  %v3191_v36 = vld [vmem:[#allocation3 + $0x47] sm:$0xff] }
 0x196   : > { %4830 = vmatmul.msk.f32.gmra.mxu1 %vm2044_vm0, %v7679_v37  ;;  %8717 = vst [vmem:[#allocation30_spill] sm:$0xff] %v7774_v0  ;;  %v3189_v0 = vld [vmem:[#allocation3 + $0x37] sm:$0xff] }
 0x197   : > { %4844 = vmatmul.msk.f32.gmra.mxu2 %vm2044_vm0, %v2956_v14  ;;  %v7786_v63 = vpop.f32.mrf.mxu0  ;;  %v3184_v14 = vld [vmem:[#allocation3 + $0xf] sm:$0xff] }
 0x19a   : > { %4858 = vmatmul.msk.f32.gmra.mxu3 %vm2044_vm0, %v3072_v4 }
 0x19b   : > { %v2260_v38 = vld [vmem:[#allocation2 + $0x120] sm:$0xff] }
 0x19c   : > { %v2264_v18 = vmax.f32 %v2260_v38, %v2262_v1  ;;  %v4908_v1 = vld [vmem:[%s8528_s3 + $0xb0] sm:$0xff] }
 0x19d   : > { %4819 = vmatmul.msk.f32.gmra.mxu0 %vm2044_vm0, %v7728_v32  ;;  %3598 = vmatpush.msra.mxu3 %v4908_v1 }
 0x19e   : > { %4831 = vmatmul.msk.f32.gmra.mxu1 %vm2044_vm0, %v7708_v27  ;;  %v2274_v56 = vrot.slane %v2264_v18, 1 }
 0x19f   : > { %4845 = vmatmul.msk.f32.gmra.mxu2 %vm2044_vm0, %v2957_v44  ;;  %v3078_v44 = vld [vmem:[#allocation3 + $0x5e] sm:$0xff] }
 0x1a0   : > { %v2276_v17 = vmax.f32 %v2264_v18, %v2274_v56  ;;  %v4923_v56 = vld [vmem:[%s8528_s3 + $0xc8] sm:$0xff] }
 0x1a1   : > { %3713 = vmatpush.msrb.mxu0 %v4923_v56 }
 0x1a2   : > { %4859 = vmatmul.msk.f32.gmra.mxu3 %vm2044_vm0, %v3073_v33  ;;  %2277 = vst.msk [vmem:[#allocation3 + $0x66] sm:$0x1] %vm2111_vm1, %v2276_v17  ;;  %v4951_v33 = vld [vmem:[%s8528_s3 + $0xe8] sm:$0xff] }
 0x1a3   : > { %2278 = vst.msk [vmem:[#allocation3 + $0x65] sm:$0x4] %vm2113_vm2, %v2276_v17  ;;  %3945 = vmatpush.msra.mxu2 %v4951_v33  ;;  %v3302_v33 = vld [vmem:[#allocation3 + $0x20] sm:$0xff] }
 0x1a4   : > { %2279 = vst.msk [vmem:[#allocation3 + $0x64] sm:$0x10] %vm2115_vm3, %v2276_v17 }
 0x1a5   : > { %4820 = vmatmul.msk.f32.gmra.mxu0 %vm2044_vm0, %v7751_v59  ;;  %2280 = vst.msk [vmem:[#allocation3 + $0x63] sm:$0x40] %vm2117_vm4, %v2276_v17 }
 0x1a6   : > { %4832 = vmatmul.msk.f32.gmra.mxu1 %vm2044_vm0, %v7728_v32  ;;  %v7781_v16 = vpop.f32.mrf.mxu2 }
 0x1a7   : > { %4846 = vmatmul.msk.f32.gmra.mxu2 %vm2044_vm0, %v2958_v54  ;;  %v7795_v41 = vpop.f32.mrf.mxu3  ;;  %v4937_v54 = vld [vmem:[%s8528_s3 + $0xd8] sm:$0xff] }
 0x1a8   : > { %3829 = vmatpush.msrb.mxu1 %v4937_v54 }
 0x1aa   : > { %4860 = vmatmul.msk.f32.gmra.mxu3 %vm2044_vm0, %v3074_v42 }
 0x1ac   : > { %v7827_v62 = vld [vmem:[#allocation3 + $0x64] sm:$0xff] }
 0x1ad   : > { %4821 = vmatmul.msk.f32.gmra.mxu0 %vm2044_vm0, %v7771_v13  ;;  %v2963_v38 = vld [vmem:[#allocation3 + $0x65] sm:$0xff] }
 0x1ae   : > { %4833 = vmatmul.msk.f32.gmra.mxu1 %vm2044_vm0, %v7751_v59  ;;  %v3079_v17 = vld [vmem:[#allocation3 + $0x66] sm:$0xff] }
 0x1af   : > { %4847 = vmatmul.msk.f32.gmra.mxu2 %vm2044_vm0, %v2959_v11 }
 0x1b0   : > { %v7808_v39 = vpop.f32.mrf.mxu1 }
 0x1b1   : > { %v7800_v25 = vpop.f32.mrf.mxu2  ;;  %v7806_v8 = vpop.f32.mrf.mxu0 }
 0x1b2   : > { %4861 = vmatmul.msk.f32.gmra.mxu3 %vm2044_vm0, %v3075_v29  ;;  %v3186_v29 = vld [vmem:[#allocation3 + $0x1f] sm:$0xff] }
 0x1b4   : > { %v7811_v19 = vpop.f32.mrf.mxu3 }
 0x1b5   : > { %4822 = vmatmul.msk.f32.gmra.mxu0 %vm2044_vm0, %v7783_v3 }
 0x1b6   : > { %4834 = vmatmul.msk.f32.gmra.mxu1 %vm2044_vm0, %v7771_v13 }
 0x1b7   : > { %4848 = vmatmul.msk.f32.gmra.mxu2 %vm2044_vm0, %v2960_v35  ;;  %v3300_v35 = vld [vmem:[#allocation3 + $0x10] sm:$0xff] }
 0x1ba   : > { %4862 = vmatmul.msk.f32.gmra.mxu3 %vm2044_vm0, %v3076_v43 }
 0x1bc   : > { %v7814_v34 = vpop.f32.mrf.mxu2 }
 0x1bd   : > { %4823 = vmatmul.msk.f32.gmra.mxu0 %vm2044_vm0, %v7797_v12 }
 0x1be   : > { %4835 = vmatmul.msk.f32.gmra.mxu1 %vm2044_vm0, %v7783_v3  ;;  %v7830_v47 = vpop.f32.mrf.mxu3 }
 0x1bf   : > { %4849 = vmatmul.msk.f32.gmra.mxu2 %vm2044_vm0, %v2961_v24  ;;  %v3301_v24 = vld [vmem:[#allocation3 + $0x18] sm:$0xff] }
 0x1c2   : > { %4863 = vmatmul.msk.f32.gmra.mxu3 %vm2044_vm0, %v3077_v60 }
 0x1c4   : > { %v7825_v4 = vpop.f32.mrf.mxu1 }
 0x1c5   : > { %4868 = vmatmul.msk.f32.vlgmr.msra.gmra.mxu0 %vm2044_vm0, %v3184_v14  ;;  %v7823_v21 = vpop.f32.mrf.mxu0  ;;  %v3532_v14 = vld [vmem:[#allocation3 + $0x19] sm:$0xff] }
 0x1c6   : > { %4836 = vmatmul.msk.f32.gmra.mxu1 %vm2044_vm0, %v7797_v12 }
 0x1c7   : > { %4850 = vmatmul.msk.f32.gmra.mxu2 %vm2044_vm0, %v2962_v2 }
 0x1ca   : > { %4864 = vmatmul.msk.f32.gmra.mxu3 %vm2044_vm0, %v3078_v44 }
 0x1cc   : > { %v7842_v18 = vpop.f32.mrf.mxu2 }
 0x1cd   : > { %4869 = vmatmul.msk.f32.gmra.mxu0 %vm2044_vm0, %v3185_v48  ;;  %v3187_v48 = vld [vmem:[#allocation3 + $0x27] sm:$0xff] }
 0x1ce   : > { %4837 = vmatmul.msk.f32.gmra.mxu1 %vm2044_vm0, %v7827_v62 }
 0x1cf   : > { %4851 = vmatmul.msk.f32.gmra.mxu2 %vm2044_vm0, %v2963_v38 }
 0x1d2   : > { %v2387_v42 = vpop.f32.mrf.mxu0  ;;  %4865 = vmatmul.msk.f32.gmra.mxu3 %vm2044_vm0, %v3079_v17  ;;  %v3533_v17 = vld [vmem:[#allocation3 + $0x21] sm:$0xff] }
 0x1d3   : > { %v2476_v11 = vpop.f32.mrf.mxu1 }
 0x1d4   : > { %v2477_v60 = vadd.f32 %v2476_v11, %v2387_v42 }
 0x1d5   : > { %v7851_v43 = vpop.f32.mrf.mxu3  ;;  %4870 = vmatmul.msk.f32.gmra.mxu0 %vm2044_vm0, %v3186_v29 }
 0x1d6   : > { %4882 = vmatmul.msk.f32.vlgmr.msra.gmra.mxu1 %vm2044_vm0, %v3300_v35  ;;  %v3188_v35 = vld [vmem:[#allocation3 + $0x2f] sm:$0xff] }
 0x1d7   : > { %4896 = vmatmul.msk.f32.vlgmr.msrb.gmra.mxu2 %vm2044_vm0, %v3301_v24 }
 0x1da   : > { %v2580_v2 = vpop.f32.mrf.mxu2  ;;  %v2390_v46 = vpop.f32.mrf.mxu0  ;;  %4910 = vmatmul.msk.f32.vlgmr.msra.gmra.mxu3 %vm2044_vm0, %v3532_v14 }
 0x1db   : > { %v2479_v44 = vpop.f32.mrf.mxu1  ;;  %v2600_v38 = vadd.f32 %v2580_v2, %v2477_v60 }
 0x1dc   : > { %v2480_v56 = vadd.f32 %v2479_v44, %v2390_v46  ;;  %v3534_v46 = vld [vmem:[#allocation3 + $0x29] sm:$0xff] }
 0x1dd   : > { %4871 = vmatmul.msk.f32.gmra.mxu0 %vm2044_vm0, %v3187_v48  ;;  %v2696_v1 = vpop.f32.mrf.mxu3 }
 0x1de   : > { %4883 = vmatmul.msk.f32.gmra.mxu1 %vm2044_vm0, %v3301_v24  ;;  %v7859_v54 = vadd.f32 %v2696_v1, %v2600_v38  ;;  %v3303_v24 = vld [vmem:[#allocation3 + $0x28] sm:$0xff] }
 0x1df   : > { %4897 = vmatmul.msk.f32.gmra.mxu2 %vm2044_vm0, %v3302_v33 }
 0x1e2   : > { %v2583_v42 = vpop.f32.mrf.mxu2  ;;  %v7862_v29 = vpop.f32.mrf.mxu0  ;;  %4911 = vmatmul.msk.f32.gmra.mxu3 %vm2044_vm0, %v3533_v17 }
 0x1e3   : > { %v2482_v11 = vpop.f32.mrf.mxu1  ;;  %v2601_v60 = vadd.f32 %v2583_v42, %v2480_v56 }
 0x1e4   : > { %v2483_v44 = vadd.f32 %v2482_v11, %v7638_v15 }
 0x1e5   : > { %4872 = vmatmul.msk.f32.gmra.mxu0 %vm2044_vm0, %v3188_v35  ;;  %v2699_v14 = vpop.f32.mrf.mxu3  ;;  %v3535_v35 = vld [vmem:[#allocation3 + $0x31] sm:$0xff] }
 0x1e6   : > { %4884 = vmatmul.msk.f32.gmra.mxu1 %vm2044_vm0, %v3302_v33  ;;  %v7867_v2 = vadd.f32 %v2699_v14, %v2601_v60  ;;  %v3304_v33 = vld [vmem:[#allocation3 + $0x30] sm:$0xff] }
 0x1e7   : > { %4898 = vmatmul.msk.f32.gmra.mxu2 %vm2044_vm0, %v3303_v24 }
 0x1ea   : > { %v2586_v48 = vpop.f32.mrf.mxu2  ;;  %v7871_v1 = vpop.f32.mrf.mxu0  ;;  %4912 = vmatmul.msk.f32.gmra.mxu3 %vm2044_vm0, %v3534_v46  ;;  %v3190_v46 = vld [vmem:[#allocation3 + $0x3f] sm:$0xff] }
 0x1eb   : > { %v2485_v38 = vpop.f32.mrf.mxu1  ;;  %8718 = vst [vmem:[#allocation13_spill] sm:$0xff] %v7871_v1  ;;  %v2602_v56 = vadd.f32 %v2586_v48, %v2483_v44 }
 0x1ec   : > { %v2486_v15 = vadd.f32 %v2485_v38, %v7663_v50  ;;  %v3536_v50 = vld [vmem:[#allocation3 + $0x39] sm:$0xff] }
 0x1ed   : > { %4873 = vmatmul.msk.f32.gmra.mxu0 %vm2044_vm0, %v3189_v0  ;;  %v2702_v17 = vpop.f32.mrf.mxu3 }
 0x1ee   : > { %4885 = vmatmul.msk.f32.gmra.mxu1 %vm2044_vm0, %v3303_v24  ;;  %v7876_v42 = vadd.f32 %v2702_v17, %v2602_v56  ;;  %v3305_v24 = vld [vmem:[#allocation3 + $0x38] sm:$0xff] }
 0x1ef   : > { %4899 = vmatmul.msk.f32.gmra.mxu2 %vm2044_vm0, %v3304_v33 }
 0x1f2   : > { %v2589_v11 = vpop.f32.mrf.mxu2  ;;  %v7880_v60 = vpop.f32.mrf.mxu0  ;;  %4913 = vmatmul.msk.f32.gmra.mxu3 %vm2044_vm0, %v3535_v35  ;;  %v3421_v35 = vld [vmem:[#allocation3 + $0x40] sm:$0xff] }
 0x1f3   : > { %8719 = vst [vmem:[#allocation16_spill] sm:$0xff] %v7880_v60  ;;  %v7882_v14 = vpop.f32.mrf.mxu1  ;;  %v2603_v0 = vadd.f32 %v2589_v11, %v2486_v15  ;;  %v4922_v15 = vld [vmem:[%s8528_s3 + $0xc0] sm:$0xff]  ;;  %v4936_v11 = vld [vmem:[%s8528_s3 + $0xd0] sm:$0xff] }
 0x1f4   : > { %3714 = vmatpush.msrb.mxu0 %v4922_v15  ;;  %3830 = vmatpush.msrb.mxu1 %v4936_v11  ;;  %v3193_v15 = vld [vmem:[#allocation3 + $0x57] sm:$0xff] }
 0x1f5   : > { %4874 = vmatmul.msk.f32.gmra.mxu0 %vm2044_vm0, %v3190_v46  ;;  %v2705_v44 = vpop.f32.mrf.mxu3  ;;  %v3537_v46 = vld [vmem:[#allocation3 + $0x41] sm:$0xff] }
 0x1f6   : > { %4886 = vmatmul.msk.f32.gmra.mxu1 %vm2044_vm0, %v3304_v33  ;;  %v7887_v48 = vadd.f32 %v2705_v44, %v2603_v0  ;;  %v4950_v33 = vld [vmem:[%s8528_s3 + $0xe0] sm:$0xff]  ;;  %v3192_v44 = vld [vmem:[#allocation3 + $0x4f] sm:$0xff] }
 0x1f7   : > { %4900 = vmatmul.msk.f32.gmra.mxu2 %vm2044_vm0, %v3305_v24  ;;  %v3648_v60 = vld [vmem:[#allocation3 + $0x1a] sm:$0xff] }
 0x1f8   : > { %3946 = vmatpush.msra.mxu2 %v4950_v33 }
 0x1fa   : > { %v7890_v38 = vpop.f32.mrf.mxu2  ;;  %v7892_v56 = vpop.f32.mrf.mxu0  ;;  %4914 = vmatmul.msk.f32.gmra.mxu3 %vm2044_vm0, %v3536_v50 }
 0x1fb   : > { %8720 = vst [vmem:[#allocation19_spill] sm:$0xff] %v7892_v56  ;;  %v7894_v17 = vpop.f32.mrf.mxu1  ;;  %v3424_v56 = vld [vmem:[#allocation3 + $0x58] sm:$0xff] }
 0x1fc   : > { %8721 = vst [vmem:[#allocation7_spill] sm:$0xff] %v7894_v17 }
 0x1fd   : > { %4875 = vmatmul.msk.f32.gmra.mxu0 %vm2044_vm0, %v3191_v36  ;;  %v7959_v10 = vpop.f32.mrf.mxu3 }
 0x1fe   : > { %4887 = vmatmul.msk.f32.gmra.mxu1 %vm2044_vm0, %v3305_v24  ;;  %8727 = vst [vmem:[#allocation9_spill] sm:$0xff] %v7959_v10 }
 0x1ff   : > { %4901 = vmatmul.msk.f32.gmra.mxu2 %vm2044_vm0, %v3421_v35 }
 0x202   : > { %v7909_v36 = vpop.f32.mrf.mxu2  ;;  %v7911_v0 = vpop.f32.mrf.mxu0  ;;  %4915 = vmatmul.msk.f32.gmra.mxu3 %vm2044_vm0, %v3537_v46 }
 0x203   : > { %8722 = vst [vmem:[#allocation12_spill] sm:$0xff] %v7909_v36  ;;  %v7913_v24 = vpop.f32.mrf.mxu1 }
 0x204   : > { %8723 = vst [vmem:[#allocation15_spill] sm:$0xff] %v7913_v24 }
 0x205   : > { %4876 = vmatmul.msk.f32.gmra.mxu0 %vm2044_vm0, %v3192_v44 }
 0x206   : > { %4888 = vmatmul.msk.f32.gmra.mxu1 %vm2044_vm0, %v7567_v52  ;;  %v3539_v52 = vld [vmem:[#allocation3 + $0x51] sm:$0xff] }
 0x207   : > { %4902 = vmatmul.msk.f32.gmra.mxu2 %vm2044_vm0, %v7582_v31 }
 0x20a   : > { %v7921_v50 = vpop.f32.mrf.mxu2  ;;  %v7923_v35 = vpop.f32.mrf.mxu0  ;;  %4916 = vmatmul.msk.f32.gmra.mxu3 %vm2044_vm0, %v7580_v53  ;;  %v3540_v53 = vld [vmem:[#allocation3 + $0x59] sm:$0xff] }
 0x20b   : > { %8724 = vst [vmem:[#allocation8_spill] sm:$0xff] %v7921_v50  ;;  %v7925_v33 = vpop.f32.mrf.mxu1  ;;  %v3195_v50 = vld [vmem:[#allocation3 + $0x67] sm:$0xff] }
 0x20c   : > { %8725 = vst [vmem:[#allocation14_spill] sm:$0xff] %v7925_v33  ;;  %v3194_v33 = vld [vmem:[#allocation3 + $0x5f] sm:$0xff] }
 0x20d   : > { %4877 = vmatmul.msk.f32.gmra.mxu0 %vm2044_vm0, %v3193_v15 }
 0x20e   : > { %4889 = vmatmul.msk.f32.gmra.mxu1 %vm2044_vm0, %v7582_v31 }
 0x20f   : > { %4903 = vmatmul.msk.f32.gmra.mxu2 %vm2044_vm0, %v7589_v22 }
 0x212   : > { %v7934_v11 = vpop.f32.mrf.mxu2  ;;  %v7936_v46 = vpop.f32.mrf.mxu0  ;;  %4917 = vmatmul.msk.f32.gmra.mxu3 %vm2044_vm0, %v3539_v52 }
 0x213   : > { %8726 = vst [vmem:[#allocation31_spill] sm:$0xff] %v7934_v11  ;;  %v7938_v44 = vpop.f32.mrf.mxu1 }
 0x215   : > { %4878 = vmatmul.msk.f32.gmra.mxu0 %vm2044_vm0, %v3194_v33  ;;  %v3310_v33 = vld [vmem:[#allocation3 + $0x60] sm:$0xff] }
 0x216   : > { %4890 = vmatmul.msk.f32.gmra.mxu1 %vm2044_vm0, %v7589_v22  ;;  %v3541_v22 = vld [vmem:[#allocation3 + $0x61] sm:$0xff] }
 0x217   : > { %4904 = vmatmul.msk.f32.gmra.mxu2 %vm2044_vm0, %v3424_v56 }
 0x21a   : > { %v7945_v31 = vpop.f32.mrf.mxu2  ;;  %v2809_v15 = vpop.f32.mrf.mxu0  ;;  %4918 = vmatmul.msk.f32.gmra.mxu3 %vm2044_vm0, %v3540_v53  ;;  %v3542_v53 = vld [vmem:[#allocation3 + $0x69] sm:$0xff] }
 0x21b   : > { %v7947_v11 = vpop.f32.mrf.mxu1 }
 0x21d   : > { %4879 = vmatmul.msk.f32.gmra.mxu0 %vm2044_vm0, %v3195_v50  ;;  %v2474_v50 = vadd.f32 %v7825_v4, %v7823_v21  ;;  %v7971_v4 = vpop.f32.mrf.mxu3 }
 0x21e   : > { %4891 = vmatmul.msk.f32.gmra.mxu1 %vm2044_vm0, %v7603_v28  ;;  %v3311_v28 = vld [vmem:[#allocation3 + $0x68] sm:$0xff] }
 0x21f   : > { %4905 = vmatmul.msk.f32.gmra.mxu2 %vm2044_vm0, %v3310_v33  ;;  %v2599_v58 = vadd.f32 %v7842_v18, %v2474_v50  ;;  %v3543_v18 = vld [vmem:[#allocation3 + $0x71] sm:$0xff] }
 0x221   : > { %v2715_v21 = vadd.f32 %v7851_v43, %v2599_v58  ;;  %v3880_v58 = vld [vmem:[#allocation3 + $0x1c] sm:$0xff] }
 0x222   : > { %v7954_v52 = vpop.f32.mrf.mxu2  ;;  %v2812_v56 = vpop.f32.mrf.mxu0  ;;  %4919 = vmatmul.msk.f32.gmra.mxu3 %vm2044_vm0, %v3541_v22  ;;  %v3649_v22 = vld [vmem:[#allocation3 + $0x22] sm:$0xff] }
 0x223   : > { %v7956_v24 = vpop.f32.mrf.mxu1  ;;  %v2832_v43 = vadd.f32 %v2812_v56, %v7859_v54 }
 0x225   : > { %4924 = vmatmul.msk.f32.vlgmr.msrb.gmra.mxu0 %vm2044_vm0, %v3648_v60  ;;  %v2831_v60 = vadd.f32 %v2809_v15, %v2715_v21  ;;  %v3651_v21 = vld [vmem:[#allocation3 + $0x32] sm:$0xff] }
 0x226   : > { %4892 = vmatmul.msk.f32.gmra.mxu1 %vm2044_vm0, %v3310_v33 }
 0x227   : > { %4906 = vmatmul.msk.f32.gmra.mxu2 %vm2044_vm0, %v3311_v28 }
 0x22a   : > { %v7967_v61 = vpop.f32.mrf.mxu2  ;;  %v2815_v36 = vpop.f32.mrf.mxu0  ;;  %4920 = vmatmul.msk.f32.gmra.mxu3 %vm2044_vm0, %v3542_v53 }
 0x22b   : > { %v2925_v17 = vpop.f32.mrf.mxu1 }
 0x22c   : > { %v2947_v33 = vadd.f32 %v2925_v17, %v2831_v60  ;;  %v3765_v60 = vld [vmem:[#allocation3 + $0x23] sm:$0xff] }
 0x22d   : > { %4925 = vmatmul.msk.f32.gmra.mxu0 %vm2044_vm0, %v3649_v22 }
 0x22e   : > { %4893 = vmatmul.msk.f32.gmra.mxu1 %vm2044_vm0, %v3311_v28 }
 0x22f   : > { %4907 = vmatmul.msk.f32.gmra.mxu2 %vm2044_vm0, %v3427_v51  ;;  %v7983_v51 = vpop.f32.mrf.mxu3 }
 0x232   : > { %v3041_v50 = vpop.f32.mrf.mxu2  ;;  %v2818_v10 = vpop.f32.mrf.mxu0  ;;  %4921 = vmatmul.msk.f32.gmra.mxu3 %vm2044_vm0, %v3543_v18 }
 0x233   : > { %v2928_v1 = vpop.f32.mrf.mxu1  ;;  %v7977_v53 = vadd.f32 %v3041_v50, %v2947_v33  ;;  %v3881_v33 = vld [vmem:[#allocation3 + $0x24] sm:$0xff] }
 0x234   : > { %v2948_v17 = vadd.f32 %v2928_v1, %v2832_v43  ;;  %v3766_v43 = vld [vmem:[#allocation3 + $0x2b] sm:$0xff] }
 0x235   : > { %4926 = vmatmul.msk.f32.gmra.mxu0 %vm2044_vm0, %v3650_v40 }
 0x236   : > { %4938 = vmatmul.msk.f32.vlgmr.msrb.gmra.mxu1 %vm2044_vm0, %v3764_v5  ;;  %v2833_v5 = vadd.f32 %v2815_v36, %v7867_v2 }
 0x237   : > { %4952 = vmatmul.msk.f32.vlgmr.msra.gmra.mxu2 %vm2044_vm0, %v3880_v58  ;;  %v7991_v54 = vpop.f32.mrf.mxu3  ;;  %v3652_v58 = vld [vmem:[#allocation3 + $0x3a] sm:$0xff] }
 0x238   : > { %8728 = vst [vmem:[#allocation10_spill] sm:$0xff] %v7991_v54 }
 0x23a   : > { %v3044_v15 = vpop.f32.mrf.mxu2  ;;  %v2821_v28 = vpop.f32.mrf.mxu0 }
 0x23b   : > { %v2931_v22 = vpop.f32.mrf.mxu1  ;;  %v7985_v18 = vadd.f32 %v3044_v15, %v2948_v17  ;;  %v2834_v15 = vadd.f32 %v2818_v10, %v7876_v42 }
 0x23c   : > { %v2949_v40 = vadd.f32 %v2931_v22, %v2833_v5 }
 0x23d   : > { %4927 = vmatmul.msk.f32.gmra.mxu0 %vm2044_vm0, %v3651_v21 }
 0x23e   : > { %4939 = vmatmul.msk.f32.gmra.mxu1 %vm2044_vm0, %v3765_v60  ;;  %v3653_v60 = vld [vmem:[#allocation3 + $0x42] sm:$0xff] }
 0x23f   : > { %4953 = vmatmul.msk.f32.gmra.mxu2 %vm2044_vm0, %v3881_v33  ;;  %v3767_v33 = vld [vmem:[#allocation3 + $0x33] sm:$0xff] }
 0x242   : > { %v3047_v1 = vpop.f32.mrf.mxu2  ;;  %v7993_v50 = vpop.f32.mrf.mxu0 }
 0x243   : > { %v2934_v56 = vpop.f32.mrf.mxu1  ;;  %v7995_v17 = vadd.f32 %v3047_v1, %v2949_v40  ;;  %v3148_v40 = vpop.f32.mrf.mxu3  ;;  %v2835_v1 = vadd.f32 %v2821_v28, %v7887_v48 }
 0x244   : > { %v2950_v2 = vadd.f32 %v2934_v56, %v2834_v15 }
 0x245   : > { %4928 = vmatmul.msk.f32.gmra.mxu0 %vm2044_vm0, %v3652_v58  ;;  %v3654_v58 = vld [vmem:[#allocation3 + $0x4a] sm:$0xff] }
 0x246   : > { %4940 = vmatmul.msk.f32.gmra.mxu1 %vm2044_vm0, %v3766_v43  ;;  %v3768_v43 = vld [vmem:[#allocation3 + $0x3b] sm:$0xff] }
 0x247   : > { %4954 = vmatmul.msk.f32.gmra.mxu2 %vm2044_vm0, %v7679_v37 }
 0x24a   : > { %v3050_v36 = vpop.f32.mrf.mxu2  ;;  %v8002_v21 = vpop.f32.mrf.mxu0 }
 0x24b   : > { %v2937_v22 = vpop.f32.mrf.mxu1  ;;  %v8004_v5 = vadd.f32 %v3050_v36, %v2950_v2  ;;  %v3151_v2 = vpop.f32.mrf.mxu3  ;;  %v3655_v36 = vld [vmem:[#allocation3 + $0x52] sm:$0xff] }
 0x24c   : > { %v2951_v37 = vadd.f32 %v2937_v22, %v2835_v1  ;;  %v3769_v22 = vld [vmem:[#allocation3 + $0x43] sm:$0xff] }
 0x24d   : > { %4929 = vmatmul.msk.f32.gmra.mxu0 %vm2044_vm0, %v3653_v60 }
 0x24e   : > { %4941 = vmatmul.msk.f32.gmra.mxu1 %vm2044_vm0, %v3767_v33 }
 0x24f   : > { %4955 = vmatmul.msk.f32.gmra.mxu2 %vm2044_vm0, %v7708_v27 }
 0x252   : > { %v3053_v10 = vpop.f32.mrf.mxu2  ;;  %v8011_v42 = vpop.f32.mrf.mxu0 }
 0x253   : > { %v8013_v56 = vpop.f32.mrf.mxu1  ;;  %v8015_v15 = vadd.f32 %v3053_v10, %v2951_v37  ;;  %v8031_v60 = vpop.f32.mrf.mxu3  ;;  %v3656_v10 = vld [vmem:[#allocation3 + $0x5a] sm:$0xff] }
 0x255   : > { %4930 = vmatmul.msk.f32.gmra.mxu0 %vm2044_vm0, %v3654_v58  ;;  %v3770_v58 = vld [vmem:[#allocation3 + $0x4b] sm:$0xff] }
 0x256   : > { %4942 = vmatmul.msk.f32.gmra.mxu1 %vm2044_vm0, %v3768_v43  ;;  %v2468_v43 = vadd.f32 %v7788_v20, %v7786_v63  ;;  %v3657_v63 = vld [vmem:[#allocation3 + $0x62] sm:$0xff]  ;;  %v3771_v20 = vld [vmem:[#allocation3 + $0x53] sm:$0xff] }
 0x257   : > { %4956 = vmatmul.msk.f32.gmra.mxu2 %vm2044_vm0, %v7728_v32  ;;  %v2465_v32 = vadd.f32 %v7768_v57, %v7766_v6 }
 0x25a   : > { %v8021_v48 = vpop.f32.mrf.mxu2  ;;  %v8023_v27 = vpop.f32.mrf.mxu0 }
 0x25b   : > { %8729 = vst [vmem:[#allocation25_spill] sm:$0xff] %v8023_v27  ;;  %v8025_v28 = vpop.f32.mrf.mxu1  ;;  %v3157_v6 = vpop.f32.mrf.mxu3 }
 0x25d   : > { %4931 = vmatmul.msk.f32.gmra.mxu0 %vm2044_vm0, %v3655_v36  ;;  %v2597_v36 = vadd.f32 %v7800_v25, %v2468_v43  ;;  %v3658_v43 = vld [vmem:[#allocation3 + $0x6a] sm:$0xff] }
 0x25e   : > { %4943 = vmatmul.msk.f32.gmra.mxu1 %vm2044_vm0, %v3769_v22 }
 0x25f   : > { %4957 = vmatmul.msk.f32.gmra.mxu2 %vm2044_vm0, %v7751_v59  ;;  %v2596_v59 = vadd.f32 %v7781_v16, %v2465_v32  ;;  %v2471_v16 = vadd.f32 %v7808_v39, %v7806_v8  ;;  %v2713_v32 = vadd.f32 %v7811_v19, %v2597_v36 }
 0x261   : > { %v2712_v22 = vadd.f32 %v7795_v41, %v2596_v59  ;;  %v2829_v41 = vadd.f32 %v7923_v35, %v2713_v32  ;;  %v3772_v59 = vld [vmem:[#allocation3 + $0x5b] sm:$0xff]  ;;  %v3773_v32 = vld [vmem:[#allocation3 + $0x63] sm:$0xff] }
 0x262   : > { %v8033_v33 = vpop.f32.mrf.mxu2  ;;  %v3264_v1 = vpop.f32.mrf.mxu0 }
 0x263   : > { %v8037_v37 = vpop.f32.mrf.mxu1 }
 0x265   : > { %4932 = vmatmul.msk.f32.gmra.mxu0 %vm2044_vm0, %v3656_v10  ;;  %v2828_v10 = vadd.f32 %v7911_v0, %v2712_v22  ;;  %v2598_v0 = vadd.f32 %v7814_v34, %v2471_v16  ;;  %v3659_v16 = vld [vmem:[#allocation3 + $0x72] sm:$0xff] }
 0x266   : > { %4944 = vmatmul.msk.f32.gmra.mxu1 %vm2044_vm0, %v3770_v58  ;;  %v2945_v58 = vadd.f32 %v7947_v11, %v2829_v41 }
 0x267   : > { %4958 = vmatmul.msk.f32.gmra.mxu2 %vm2044_vm0, %v7771_v13  ;;  %v2944_v13 = vadd.f32 %v7938_v44, %v2828_v10  ;;  %v3160_v44 = vpop.f32.mrf.mxu3 }
 0x268   : > { %v3061_v36 = vadd.f32 %v7954_v52, %v2945_v58  ;;  %v3179_v52 = vadd.f32 %v3157_v6, %v7977_v53 }
 0x269   : > { %v3060_v25 = vadd.f32 %v7945_v31, %v2944_v13 }
 0x26a   : > { %v8047_v57 = vpop.f32.mrf.mxu2  ;;  %v3267_v27 = vpop.f32.mrf.mxu0  ;;  %v3177_v11 = vadd.f32 %v3151_v2, %v3061_v36 }
 0x26b   : > { %v8050_v54 = vpop.f32.mrf.mxu1  ;;  %v3176_v22 = vadd.f32 %v3148_v40, %v3060_v25 }
 0x26d   : > { %4933 = vmatmul.msk.f32.gmra.mxu0 %vm2044_vm0, %v3657_v63  ;;  %v3292_v35 = vadd.f32 %v3264_v1, %v3176_v22 }
 0x26e   : > { %4945 = vmatmul.msk.f32.gmra.mxu1 %vm2044_vm0, %v3771_v20  ;;  %v3293_v20 = vadd.f32 %v3267_v27, %v3177_v11 }
 0x26f   : > { %4959 = vmatmul.msk.f32.gmra.mxu2 %vm2044_vm0, %v7783_v3  ;;  %v2714_v3 = vadd.f32 %v7830_v47, %v2598_v0  ;;  %v3163_v25 = vpop.f32.mrf.mxu3  ;;  %v3774_v0 = vld [vmem:[#allocation3 + $0x6b] sm:$0xff] }
 0x271   : > { %v2830_v34 = vadd.f32 %v7936_v46, %v2714_v3  ;;  %v3180_v46 = vadd.f32 %v3160_v44, %v7985_v18 }
 0x272   : > { %v8065_v8 = vpop.f32.mrf.mxu2  ;;  %v3270_v39 = vpop.f32.mrf.mxu0 }
 0x273   : > { %v3380_v19 = vpop.f32.mrf.mxu1  ;;  %v2946_v63 = vadd.f32 %v7956_v24, %v2830_v34 }
 0x274   : > { %v3408_v31 = vadd.f32 %v3380_v19, %v3292_v35  ;;  %v3891_v35 = vld [vmem:[#allocation3 + $0x74] sm:$0xff] }
 0x275   : > { %4934 = vmatmul.msk.f32.gmra.mxu0 %vm2044_vm0, %v3658_v43  ;;  %v3062_v1 = vadd.f32 %v7967_v61, %v2946_v63  ;;  %v3890_v43 = vld [vmem:[#allocation3 + $0x6c] sm:$0xff] }
 0x276   : > { %4946 = vmatmul.msk.f32.gmra.mxu1 %vm2044_vm0, %v3772_v59 }
 0x277   : > { %4960 = vmatmul.msk.f32.gmra.mxu2 %vm2044_vm0, %v7797_v12  ;;  %v3178_v24 = vadd.f32 %v8031_v60, %v3062_v1  ;;  %v3166_v59 = vpop.f32.mrf.mxu3 }
 0x278   : > { %v3182_v34 = vadd.f32 %v3166_v59, %v8004_v5  ;;  %v8730_v59 = vld [vmem:[#allocation17_spill] sm:$0xff] }
 0x279   : > { %v3294_v53 = vadd.f32 %v3270_v39, %v3178_v24  ;;  %v3775_v39 = vld [vmem:[#allocation3 + $0x73] sm:$0xff] }
 0x27a   : > { %v3496_v40 = vpop.f32.mrf.mxu2  ;;  %v3273_v10 = vpop.f32.mrf.mxu0  ;;  %v4967_v24 = vld [vmem:[%s8530_s5 + $0x38] sm:$0xff] }
 0x27b   : > { %v3383_v47 = vpop.f32.mrf.mxu1  ;;  %v8076_v13 = vadd.f32 %v3496_v40, %v3408_v31  ;;  %v3295_v41 = vadd.f32 %v3273_v10, %v3179_v52  ;;  %v2453_v10 = vadd.f32 %v7651_v49, %v7647_v26  ;;  %4126 = vmatpush.msrb.mxu3 %v4967_v24  ;;  %v2456_v26 = vadd.f32 %v7686_v55, %v7681_v9  ;;  %v8731_v55 = vld [vmem:[#allocation24_spill] sm:$0xff] }
 0x27c   : > { %v3409_v12 = vadd.f32 %v3383_v47, %v3293_v20  ;;  %v2459_v9 = vadd.f32 %v8730_v59, %v7712_v30  ;;  %v8736_v30 = vmov 0.0  }
 0x27d   : > { %4935 = vmatmul.msk.f32.gmra.mxu0 %vm2044_vm0, %v3659_v16  ;;  %4037 = vst.msk [vmem:[#allocation5] sm:$0xff] %vm4024_vm5, %v8736_v30 }
 0x27e   : > { %4947 = vmatmul.msk.f32.gmra.mxu1 %vm2044_vm0, %v3773_v32  ;;  %4038 = vst.msk [vmem:[#allocation5 + $0x8] sm:$0xff] %vm4024_vm5, %v8736_v30 }
 0x27f   : > { %4961 = vmatmul.msk.f32.gmra.mxu2 %vm2044_vm0, %v7827_v62  ;;  %v3181_v62 = vadd.f32 %v3163_v25, %v7995_v17  ;;  %v3169_v11 = vpop.f32.mrf.mxu3  ;;  %4039 = vst.msk [vmem:[#allocation5 + $0x10] sm:$0xff] %vm4024_vm5, %v8736_v30 }
 0x280   : > { %v3183_v47 = vadd.f32 %v3169_v11, %v8015_v15  ;;  %4040 = vst.msk [vmem:[#allocation5 + $0x18] sm:$0xff] %vm4024_vm5, %v8736_v30 }
 0x281   : > { %4041 = vst.msk [vmem:[#allocation5 + $0x20] sm:$0xff] %vm4024_vm5, %v8736_v30 }
 0x282   : > { %v3499_v2 = vpop.f32.mrf.mxu2  ;;  %v3276_v27 = vpop.f32.mrf.mxu0 }
 0x283   : > { %v3386_v6 = vpop.f32.mrf.mxu1  ;;  %v8085_v61 = vadd.f32 %v3499_v2, %v3409_v12  ;;  %v3296_v58 = vadd.f32 %v3276_v27, %v3180_v46  ;;  %v2592_v46 = vadd.f32 %v7696_v45, %v2453_v10  ;;  %v8739_v10 = vld [vmem:[#allocation20_spill] sm:$0xff] }
 0x284   : > { %v3410_v19 = vadd.f32 %v3386_v6, %v3294_v53 }
 0x285   : > { %v2708_v49 = vadd.f32 %v7702_v23, %v2592_v46 }
 0x286   : > { %4948 = vmatmul.msk.f32.gmra.mxu1 %vm2044_vm0, %v3774_v0 }
 0x287   : > { %4962 = vmatmul.msk.f32.gmra.mxu2 %vm2044_vm0, %v3890_v43  ;;  %v3600_v12 = vpop.f32.mrf.mxu3  ;;  %v2824_v53 = vadd.f32 %v7862_v29, %v2708_v49  ;;  %v4966_v49 = vld [vmem:[%s8530_s5 + $0x30] sm:$0xff] }
 0x288   : > { %4127 = vmatpush.msrb.mxu3 %v4966_v49 }
 0x28a   : > { %v3502_v60 = vpop.f32.mrf.mxu2  ;;  %v3279_v36 = vpop.f32.mrf.mxu0 }
 0x28b   : > { %v3389_v18 = vpop.f32.mrf.mxu1  ;;  %v8090_v44 = vadd.f32 %v3502_v60, %v3410_v19  ;;  %v3297_v22 = vadd.f32 %v3279_v36, %v3181_v62  ;;  %v2940_v19 = vadd.f32 %v7882_v14, %v2824_v53  ;;  %v8732_v60 = vld [vmem:[#allocation13_spill] sm:$0xff]  ;;  %v8734_v14 = vld [vmem:[#allocation18_spill] sm:$0xff] }
 0x28c   : > { %v3411_v3 = vadd.f32 %v3389_v18, %v3295_v41  ;;  %v8733_v36 = vld [vmem:[#allocation9_spill] sm:$0xff] }
 0x28d   : > { %v3056_v45 = vadd.f32 %v7890_v38, %v2940_v19  ;;  %v8744_v19 = vld [vmem:[#allocation8_spill] sm:$0xff] }
 0x28e   : > { %4949 = vmatmul.msk.f32.gmra.mxu1 %vm2044_vm0, %v3775_v39 }
 0x28f   : > { %4963 = vmatmul.msk.f32.gmra.mxu2 %vm2044_vm0, %v3891_v35  ;;  %v3603_v43 = vpop.f32.mrf.mxu3  ;;  %v3172_v18 = vadd.f32 %v8733_v36, %v3056_v45  ;;  %v2594_v35 = vadd.f32 %v8734_v14, %v2459_v9  ;;  %v8745_v9 = vld [vmem:[#allocation30_spill] sm:$0xff] }
 0x291   : > { %v3288_v11 = vadd.f32 %v7993_v50, %v3172_v18 }
 0x292   : > { %v3505_v31 = vpop.f32.mrf.mxu2  ;;  %v3282_v63 = vpop.f32.mrf.mxu0 }
 0x293   : > { %v3392_v52 = vpop.f32.mrf.mxu1  ;;  %v8095_v17 = vadd.f32 %v3505_v31, %v3411_v3  ;;  %v3298_v20 = vadd.f32 %v3282_v63, %v3182_v34  ;;  %v8735_v34 = vld [vmem:[#allocation7_spill] sm:$0xff]  ;;  %v8737_v31 = vld [vmem:[#allocation12_spill] sm:$0xff] }
 0x294   : > { %v3412_v40 = vadd.f32 %v3392_v52, %v3296_v58  ;;  %v2593_v58 = vadd.f32 %v7721_v7, %v2456_v26  ;;  %v3404_v52 = vadd.f32 %v8013_v56, %v3288_v11 }
 0x296   : > { %v2709_v23 = vadd.f32 %v8731_v55, %v2593_v58 }
 0x298   : > { %v2825_v29 = vadd.f32 %v8732_v60, %v2709_v23  ;;  %v8158_v60 = vld [vmem:[%s8529_s4] ss:$0 sm:$0xff] }
 0x29a   : > { %v3508_v16 = vpop.f32.mrf.mxu2  ;;  %v3285_v32 = vpop.f32.mrf.mxu0  ;;  %v2941_v38 = vadd.f32 %v8735_v34, %v2825_v29 }
 0x29b   : > { %v3395_v1 = vpop.f32.mrf.mxu1  ;;  %v8100_v41 = vadd.f32 %v3508_v16, %v3412_v40  ;;  %v3299_v5 = vadd.f32 %v3285_v32, %v3183_v47  ;;  %v8738_v40 = vld [vmem:[#allocation11_spill] sm:$0xff]  ;;  %v8740_v47 = vld [vmem:[#allocation21_spill] sm:$0xff]  ;;  %v3520_v32 = vadd.f32 %v8021_v48, %v3404_v52 }
 0x29c   : > { %v3413_v25 = vadd.f32 %v3395_v1, %v3297_v22  ;;  %v3057_v63 = vadd.f32 %v8737_v31, %v2941_v38  ;;  %v2462_v50 = vadd.f32 %v8739_v10, %v8738_v40  ;;  %v2710_v16 = vadd.f32 %v8740_v47, %v2594_v35  ;;  %v8748_v38 = vld [vmem:[#allocation31_spill] sm:$0xff]  ;;  %v8749_v10 = vld [vmem:[#allocation10_spill] sm:$0xff] }
 0x29d   : > { %v3636_v58 = vadd.f32 %v3600_v12, %v3520_v32 }
 0x2a2   : > { %v3511_v15 = vpop.f32.mrf.mxu2  ;;  %v3716_v27 = vpop.f32.mrf.mxu0 }
 0x2a3   : > { %v3398_v2 = vpop.f32.mrf.mxu1  ;;  %v8110_v6 = vadd.f32 %v3511_v15, %v3413_v25  ;;  %v3173_v25 = vadd.f32 %v7971_v4, %v3057_v63  ;;  %v8742_v15 = vld [vmem:[#allocation23_spill] sm:$0xff]  ;;  %v3752_v59 = vadd.f32 %v3716_v27, %v3636_v58  ;;  %v8747_v27 = vld [vmem:[#allocation14_spill] sm:$0xff] }
 0x2a4   : > { %v3414_v0 = vadd.f32 %v3398_v2, %v3298_v20  ;;  %v3606_v20 = vpop.f32.mrf.mxu3  ;;  %v2595_v53 = vadd.f32 %v8742_v15, %v2462_v50  ;;  %v8743_v2 = vld [vmem:[#allocation15_spill] sm:$0xff] }
 0x2a6   : > { %v2711_v55 = vadd.f32 %v8745_v9, %v2595_v53 }
 0x2aa   : > { %v3514_v62 = vpop.f32.mrf.mxu2  ;;  %v3719_v22 = vpop.f32.mrf.mxu0 }
 0x2ab   : > { %v3401_v39 = vpop.f32.mrf.mxu1  ;;  %v8120_v3 = vadd.f32 %v3514_v62, %v3414_v0  ;;  %v3289_v0 = vadd.f32 %v8002_v21, %v3173_v25  ;;  %v8746_v21 = vld [vmem:[#allocation19_spill] sm:$0xff] }
 0x2ac   : > { %v3415_v7 = vadd.f32 %v3401_v39, %v3299_v5  ;;  %v8741_v5 = vld [vmem:[#allocation16_spill] sm:$0xff]  ;;  %v3609_v29 = vpop.f32.mrf.mxu3  ;;  %v2827_v12 = vadd.f32 %v8746_v21, %v2711_v55 }
 0x2ad   : > { %v2826_v56 = vadd.f32 %v8741_v5, %v2710_v16  ;;  %v3405_v4 = vadd.f32 %v8025_v28, %v3289_v0 }
 0x2ae   : > { %v2943_v14 = vadd.f32 %v8747_v27, %v2827_v12 }
 0x2af   : > { %v2942_v48 = vadd.f32 %v8743_v2, %v2826_v56  ;;  %v3521_v23 = vadd.f32 %v8033_v33, %v3405_v4  ;;  %v4965_v2 = vld [vmem:[%s8530_s5 + $0x28] sm:$0xff] }
 0x2b0   : > { %v3059_v11 = vadd.f32 %v8748_v38, %v2943_v14  ;;  %4128 = vmatpush.msrb.mxu3 %v4965_v2 }
 0x2b1   : > { %v3058_v45 = vadd.f32 %v8744_v19, %v2942_v48  ;;  %v3637_v33 = vadd.f32 %v3603_v43, %v3521_v23  ;;  %v8750_v43 = vld [vmem:[#allocation25_spill] sm:$0xff] }
 0x2b2   : > { %v3517_v1 = vpop.f32.mrf.mxu2  ;;  %v3722_v24 = vpop.f32.mrf.mxu0  ;;  %v3175_v50 = vadd.f32 %v8749_v10, %v3059_v11 }
 0x2b3   : > { %v3832_v46 = vpop.f32.mrf.mxu1  ;;  %v8143_v26 = vadd.f32 %v3517_v1, %v3415_v7  ;;  %v3174_v18 = vadd.f32 %v7983_v51, %v3058_v45  ;;  %v3753_v31 = vadd.f32 %v3719_v22, %v3637_v33 }
 0x2b4   : > { %v3868_v62 = vadd.f32 %v3832_v46, %v3752_v59  ;;  %v3291_v32 = vadd.f32 %v8750_v43, %v3175_v50 }
 0x2b5   : > { %v3290_v35 = vadd.f32 %v8011_v42, %v3174_v18  ;;  %v3612_v42 = vpop.f32.mrf.mxu3 }
 0x2b6   : > { %v3640_v59 = vadd.f32 %v3612_v42, %v8076_v13  ;;  %v4964_v13 = vld [vmem:[%s8530_s5 + $0x20] sm:$0xff] }
 0x2b7   : > { %v3406_v30 = vadd.f32 %v8037_v37, %v3290_v35  ;;  %v3407_v37 = vadd.f32 %v8050_v54, %v3291_v32  ;;  %4129 = vmatpush.msrb.mxu3 %v4964_v13 }
 0x2b9   : > { %v3522_v52 = vadd.f32 %v8047_v57, %v3406_v30  ;;  %v3523_v57 = vadd.f32 %v8065_v8, %v3407_v37 }
 0x2ba   : > { %v3948_v36 = vpop.f32.mrf.mxu2  ;;  %v3725_v28 = vpop.f32.mrf.mxu0 }
 0x2bb   : > { %v3835_v39 = vpop.f32.mrf.mxu1  ;;  %v3984_v7 = vadd.f32 %v3948_v36, %v3868_v62  ;;  %v3638_v1 = vadd.f32 %v3606_v20, %v3522_v52  ;;  %v3639_v20 = vadd.f32 %v3609_v29, %v3523_v57 }
 0x2bc   : > { %v3869_v40 = vadd.f32 %v3835_v39, %v3753_v31 }
 0x2bd   : > { %v4000_v34 = vadd.f32 %v8158_v60, %v3984_v7  ;;  %v3754_v22 = vadd.f32 %v3722_v24, %v3638_v1  ;;  %v3615_v0 = vpop.f32.mrf.mxu3  ;;  %v3755_v54 = vadd.f32 %v3725_v28, %v3639_v20 }
 0x2be   : > { %v3641_v14 = vadd.f32 %v3615_v0, %v8085_v61  ;;  %v4988_v0 = vld [vmem:[%s8530_s5 + $0x80] sm:$0xff] }
 0x2bf   : > { %v4012_v63 = vmax.f32 %v4000_v34, 0.0 }
 0x2c1   : > { %4025 = vst.msk [vmem:[#allocation4] sm:$0xff] %vm4024_vm5, %v4012_v63 }
 0x2c2   : > { %v3951_v51 = vpop.f32.mrf.mxu2  ;;  %v3728_v56 = vpop.f32.mrf.mxu0 }
 0x2c3   : > { %v3838_v47 = vpop.f32.mrf.mxu1  ;;  %v3985_v16 = vadd.f32 %v3951_v51, %v3869_v40  ;;  %v3756_v55 = vadd.f32 %v3728_v56, %v3640_v59  ;;  %v4095_v59 = vld [vmem:[%s8530_s5 + $0x10] sm:$0xff] }
 0x2c4   : > { %v3870_v46 = vadd.f32 %v3838_v47, %v3754_v22 }
 0x2c5   : > { %v4001_v5 = vadd.f32 %v8158_v60, %v3985_v16  ;;  %v3618_v62 = vpop.f32.mrf.mxu3 }
 0x2c6   : > { %v3642_v40 = vadd.f32 %v3618_v62, %v8090_v44  ;;  %v4998_v44 = vld [vmem:[%s8530_s5 + $0xb8] sm:$0xff] }
 0x2c7   : > { %v4013_v25 = vmax.f32 %v4001_v5, 0.0  ;;  %v4991_v5 = vld [vmem:[%s8530_s5 + $0x98] sm:$0xff]  ;;  %4342 = vmatpush.msra.mxu1 %v4998_v44 }
 0x2c8   : > { %v4042_v29 = vld [vmem:[#allocation4] sm:$0xff]  ;;  %4296 = vmatpush.msra.mxu0 %v4991_v5 }
 0x2c9   : > { %4026 = vst.msk [vmem:[#allocation4 + $0x8] sm:$0xff] %vm4024_vm5, %v4013_v25 }
 0x2ca   : > { %v3954_v49 = vpop.f32.mrf.mxu2  ;;  %v3731_v58 = vpop.f32.mrf.mxu0 }
 0x2cb   : > { %v3841_v15 = vpop.f32.mrf.mxu1  ;;  %v3986_v53 = vadd.f32 %v3954_v49, %v3870_v46  ;;  %v3757_v34 = vadd.f32 %v3731_v58, %v3641_v14  ;;  %v5005_v58 = vld [vmem:[%s8530_s5 + $0xd8] sm:$0xff] }
 0x2cc   : > { %v3871_v19 = vadd.f32 %v3841_v15, %v3755_v54  ;;  %v4990_v15 = vld [vmem:[%s8530_s5 + $0x90] sm:$0xff]  ;;  %4388 = vmatpush.msrb.mxu2 %v5005_v58 }
 0x2cd   : > { %v4002_v48 = vadd.f32 %v8158_v60, %v3986_v53  ;;  %v3621_v30 = vpop.f32.mrf.mxu3  ;;  %v4997_v53 = vld [vmem:[%s8530_s5 + $0xb0] sm:$0xff]  ;;  %4297 = vmatpush.msra.mxu0 %v4990_v15 }
 0x2ce   : > { %v3643_v56 = vadd.f32 %v3621_v30, %v8095_v17  ;;  %4343 = vmatpush.msra.mxu1 %v4997_v53  ;;  %v4989_v17 = vld [vmem:[%s8530_s5 + $0x88] sm:$0xff] }
 0x2cf   : > { %v4014_v24 = vmax.f32 %v4002_v48, 0.0  ;;  %v4996_v48 = vld [vmem:[%s8530_s5 + $0xa8] sm:$0xff]  ;;  %4298 = vmatpush.msra.mxu0 %v4989_v17 }
 0x2d0   : > { %4344 = vmatpush.msra.mxu1 %v4996_v48 }
 0x2d1   : > { %4027 = vst.msk [vmem:[#allocation4 + $0x10] sm:$0xff] %vm4024_vm5, %v4014_v24  ;;  %v4995_v24 = vld [vmem:[%s8530_s5 + $0xa0] sm:$0xff]  ;;  %4299 = vmatpush.msra.mxu0 %v4988_v0  ;;  %v5019_v0 = vld [vmem:[%s8530_s5 + $0x118] sm:$0xff] }
 0x2d2   : > { %v3957_v8 = vpop.f32.mrf.mxu2  ;;  %v3734_v18 = vpop.f32.mrf.mxu0  ;;  %4345 = vmatpush.msra.mxu1 %v4995_v24  ;;  %v5018_v24 = vld [vmem:[%s8530_s5 + $0x110] sm:$0xff] }
 0x2d3   : > { %v3844_v45 = vpop.f32.mrf.mxu1  ;;  %v3987_v4 = vadd.f32 %v3957_v8, %v3871_v19  ;;  %v3758_v10 = vadd.f32 %v3734_v18, %v3642_v40  ;;  %v4096_v19 = vld [vmem:[%s8530_s5 + $0x18] sm:$0xff]  ;;  %4480 = vmatpush.msrb.mxu0 %v5019_v0 }
 0x2d4   : > { %v3872_v21 = vadd.f32 %v3844_v45, %v3756_v55  ;;  %4161 = vmatpush.msra.mxu3 %v4096_v19  ;;  %v5017_v19 = vld [vmem:[%s8530_s5 + $0x108] sm:$0xff] }
 0x2d5   : > { %v4003_v9 = vadd.f32 %v8158_v60, %v3987_v4  ;;  %v3624_v1 = vpop.f32.mrf.mxu3  ;;  %4481 = vmatpush.msrb.mxu0 %v5018_v24 }
 0x2d6   : > { %4162 = vmatpush.msra.mxu3 %v4095_v59 }
 0x2d7   : > { %v4015_v23 = vmax.f32 %v4003_v9, 0.0  ;;  %v3644_v9 = vadd.f32 %v3624_v1, %v8100_v41  ;;  %v5002_v1 = vld [vmem:[%s8530_s5 + $0xc0] sm:$0xff]  ;;  %4482 = vmatpush.msrb.mxu0 %v5017_v19  ;;  %v5026_v19 = vld [vmem:[%s8532_s7 + $0x58] sm:$0xff] }
 0x2d8   : > { %v4043_v36 = vld [vmem:[#allocation4 + $0xc] sm:$0xff] }
 0x2d9   : > { %v4044_v12 = vmax.f32 %v4042_v29, %v4043_v36  ;;  %4028 = vst.msk [vmem:[#allocation4 + $0x18] sm:$0xff] %vm4024_vm5, %v4015_v23 }
 0x2da   : > { %v3960_v39 = vpop.f32.mrf.mxu2  ;;  %v3737_v52 = vpop.f32.mrf.mxu0 }
 0x2db   : > { %v3847_v7 = vpop.f32.mrf.mxu1  ;;  %v4046_v28 = vrot.slane %v4044_v12, 1  ;;  %v3988_v27 = vadd.f32 %v3960_v39, %v3872_v21  ;;  %v3759_v25 = vadd.f32 %v3737_v52, %v3643_v56  ;;  %v4093_v56 = vld [vmem:[%s8530_s5] sm:$0xff] }
 0x2dc   : > { %v3873_v11 = vadd.f32 %v3847_v7, %v3757_v34 }
 0x2dd   : > { %v4048_v35 = vmax.f32 %v4044_v12, %v4046_v28  ;;  %v4004_v33 = vadd.f32 %v8158_v60, %v3988_v27  ;;  %v3627_v62 = vpop.f32.mrf.mxu3 }
 0x2de   : > { %v3645_v7 = vadd.f32 %v3627_v62, %v8110_v6  ;;  %v4984_v62 = vld [vmem:[%s8530_s5 + $0x78] sm:$0xff] }
 0x2df   : > { %v4016_v38 = vmax.f32 %v4004_v33, 0.0  ;;  %4050 = vst.msk [vmem:[#allocation5 + $0x7] sm:$0x1] %vm4049_vm6, %v4048_v35 }
 0x2e0   : > { %4052 = vst.msk [vmem:[#allocation5 + $0x6] sm:$0x4] %vm4051_vm7, %v4048_v35  ;;  %v4057_v57 = vld [vmem:[#allocation4 + $0x18] sm:$0xff] }
 0x2e1   : > { %4029 = vst.msk [vmem:[#allocation4 + $0x20] sm:$0xff] %vm4024_vm5, %v4016_v38 }
 0x2e2   : > { %v3963_v31 = vpop.f32.mrf.mxu2  ;;  %4054 = vst.msk [vmem:[#allocation5 + $0x5] sm:$0x10] %vm4053_vm8, %v4048_v35  ;;  %v3740_v22 = vpop.f32.mrf.mxu0 }
 0x2e3   : > { %v3850_v61 = vpop.f32.mrf.mxu1  ;;  %v3989_v63 = vadd.f32 %v3963_v31, %v3873_v11  ;;  %4056 = vst.msk [vmem:[#allocation5 + $0x4] sm:$0x40] %vm4055_vm9, %v4048_v35  ;;  %v3760_v29 = vadd.f32 %v3740_v22, %v3644_v9 }
 0x2e4   : > { %v3874_v16 = vadd.f32 %v3850_v61, %v3758_v10 }
 0x2e5   : > { %v4005_v51 = vadd.f32 %v8158_v60, %v3989_v63  ;;  %v3630_v35 = vpop.f32.mrf.mxu3 }
 0x2e6   : > { %v3646_v61 = vadd.f32 %v3630_v35, %v8120_v3  ;;  %v4094_v3 = vld [vmem:[%s8530_s5 + $0x8] sm:$0xff] }
 0x2e7   : > { %v4017_v50 = vmax.f32 %v4005_v51, 0.0  ;;  %v4097_v47 = vld [vmem:[#allocation5 + $0x1] sm:$0xff]  ;;  %4163 = vmatpush.msra.mxu3 %v4094_v3 }
 0x2e8   : > { %4968 = vmatmul.msk.f32.vlgmr.msrb.gmra.mxu3 %vm4024_vm5, %v4097_v47 }
 0x2e9   : > { %4030 = vst.msk [vmem:[#allocation4 + $0x28] sm:$0xff] %vm4024_vm5, %v4017_v50  ;;  %v5004_v50 = vld [vmem:[%s8530_s5 + $0xd0] sm:$0xff]  ;;  %4164 = vmatpush.msra.mxu3 %v4093_v56  ;;  %v4175_v35 = vld [vmem:[#allocation5 + $0x2] sm:$0xff] }
 0x2ea   : > { %v3966_v42 = vpop.f32.mrf.mxu2  ;;  %v3743_v21 = vpop.f32.mrf.mxu0  ;;  %4389 = vmatpush.msrb.mxu2 %v5004_v50 }
 0x2eb   : > { %v3853_v43 = vpop.f32.mrf.mxu1  ;;  %v3990_v32 = vadd.f32 %v3966_v42, %v3874_v16  ;;  %v3761_v27 = vadd.f32 %v3743_v21, %v3645_v7  ;;  %v4983_v21 = vld [vmem:[%s8530_s5 + $0x70] sm:$0xff] }
 0x2ec   : > { %v3875_v2 = vadd.f32 %v3853_v43, %v3759_v25 }
 0x2ed   : > { %v4006_v37 = vadd.f32 %v8158_v60, %v3990_v32  ;;  %v3633_v42 = vpop.f32.mrf.mxu3  ;;  %v5003_v32 = vld [vmem:[%s8530_s5 + $0xc8] sm:$0xff] }
 0x2ee   : > { %4390 = vmatpush.msrb.mxu2 %v5003_v32  ;;  %v3647_v25 = vadd.f32 %v3633_v42, %v8143_v26 }
 0x2ef   : > { %v4018_v46 = vmax.f32 %v4006_v37, 0.0  ;;  %v4977_v37 = vld [vmem:[%s8530_s5 + $0x58] sm:$0xff] }
 0x2f0   : > { %v4058_v49 = vld [vmem:[#allocation4 + $0x24] sm:$0xff]  ;;  %4391 = vmatpush.msrb.mxu2 %v5002_v1  ;;  %4204 = vmatpush.msrb.mxu3 %v4977_v37 }
 0x2f1   : > { %v4059_v20 = vmax.f32 %v4057_v57, %v4058_v49  ;;  %4031 = vst.msk [vmem:[#allocation4 + $0x30] sm:$0xff] %vm4024_vm5, %v4018_v46  ;;  %v4976_v49 = vld [vmem:[%s8530_s5 + $0x50] sm:$0xff] }
 0x2f2   : > { %v3969_v54 = vpop.f32.mrf.mxu2  ;;  %v3746_v38 = vpop.f32.mrf.mxu0  ;;  %4205 = vmatpush.msrb.mxu3 %v4976_v49  ;;  %v4525_v49 = vld [vmem:[%s8532_s7 + $0x38] sm:$0xff] }
 0x2f3   : > { %v3856_v8 = vpop.f32.mrf.mxu1  ;;  %v4061_v45 = vrot.slane %v4059_v20, 1  ;;  %v3991_v4 = vadd.f32 %v3969_v54, %v3875_v2  ;;  %v3762_v52 = vadd.f32 %v3746_v38, %v3646_v61  ;;  %v4974_v54 = vld [vmem:[%s8530_s5 + $0x40] sm:$0xff]  ;;  %v5010_v38 = vld [vmem:[%s8530_s5 + $0xe8] sm:$0xff]  ;;  %4569 = vmatpush.msra.mxu2 %v4525_v49 }
 0x2f4   : > { %v3876_v12 = vadd.f32 %v3856_v8, %v3760_v29  ;;  %v4670_v49 = vld [vmem:[%s8534_s9 + $0x68] sm:$0xff] }
 0x2f5   : > { %v4063_v55 = vmax.f32 %v4059_v20, %v4061_v45  ;;  %v4007_v23 = vadd.f32 %v8158_v60, %v3991_v4  ;;  %v4975_v20 = vld [vmem:[%s8530_s5 + $0x48] sm:$0xff]  ;;  %v5016_v4 = vld [vmem:[%s8530_s5 + $0x100] sm:$0xff] }
 0x2f6   : > { %4206 = vmatpush.msrb.mxu3 %v4975_v20  ;;  %4483 = vmatpush.msrb.mxu0 %v5016_v4  ;;  %v5028_v20 = vld [vmem:[%s8532_s7 + $0x68] sm:$0xff]  ;;  %v5025_v4 = vld [vmem:[%s8532_s7 + $0x50] sm:$0xff] }
 0x2f7   : > { %4064 = vst.msk [vmem:[#allocation5 + $0xd] sm:$0x1] %vm4049_vm6, %v4063_v55  ;;  %v4019_v36 = vmax.f32 %v4007_v23, 0.0 }
 0x2f8   : > { %4065 = vst.msk [vmem:[#allocation5 + $0xc] sm:$0x4] %vm4051_vm7, %v4063_v55  ;;  %v4068_v51 = vld [vmem:[#allocation4 + $0x30] sm:$0xff]  ;;  %4207 = vmatpush.msrb.mxu3 %v4974_v54 }
 0x2f9   : > { %4032 = vst.msk [vmem:[#allocation4 + $0x38] sm:$0xff] %vm4024_vm5, %v4019_v36  ;;  %v4090_v36 = vld [vmem:[#allocation5] sm:$0xff] }
 0x2fa   : > { %v3972_v18 = vpop.f32.mrf.mxu2  ;;  %4066 = vst.msk [vmem:[#allocation5 + $0xb] sm:$0x10] %vm4053_vm8, %v4063_v55  ;;  %v3749_v22 = vpop.f32.mrf.mxu0 }
 0x2fb   : > { %v3859_v41 = vpop.f32.mrf.mxu1  ;;  %v3992_v39 = vadd.f32 %v3972_v18, %v3876_v12  ;;  %4067 = vst.msk [vmem:[#allocation5 + $0xa] sm:$0x40] %vm4055_vm9, %v4063_v55  ;;  %v3763_v53 = vadd.f32 %v3749_v22, %v3647_v25  ;;  %v4982_v18 = vld [vmem:[%s8530_s5 + $0x68] sm:$0xff] }
 0x2fc   : > { %v3877_v33 = vadd.f32 %v3859_v41, %v3761_v27 }
 0x2fd   : > { %v4008_v28 = vadd.f32 %v8158_v60, %v3992_v39  ;;  %v4981_v39 = vld [vmem:[%s8530_s5 + $0x60] sm:$0xff] }
 0x2fe   : > { %v4221_v61 = vld [vmem:[#allocation5 + $0x6] sm:$0xff] }
 0x2ff   : > { %v4020_v13 = vmax.f32 %v4008_v28, 0.0  ;;  %v4267_v14 = vld [vmem:[#allocation5 + $0x7] sm:$0xff] }
 0x300   : > { %4992 = vmatmul.msk.f32.vlgmr.msra.gmra.mxu0 %vm4024_vm5, %v4267_v14  ;;  %v5012_v14 = vld [vmem:[%s8530_s5 + $0xf8] sm:$0xff] }
 0x301   : > { %4033 = vst.msk [vmem:[#allocation4 + $0x40] sm:$0xff] %vm4024_vm5, %v4020_v13  ;;  %v8244_v34 = vld [vmem:[#allocation5 + $0x8] sm:$0xff] }
 0x302   : > { %v4098_v11 = vld [vmem:[#allocation5 + $0x9] sm:$0xff]  ;;  %4999 = vmatmul.msk.f32.vlgmr.msra.gmra.mxu1 %vm4024_vm5, %v8244_v34  ;;  %v3975_v30 = vpop.f32.mrf.mxu2 }
 0x303   : > { %4969 = vmatmul.msk.f32.gmra.mxu3 %vm4024_vm5, %v4098_v11  ;;  %v3993_v6 = vadd.f32 %v3975_v30, %v3877_v33  ;;  %v3862_v31 = vpop.f32.mrf.mxu1  ;;  %v4176_v11 = vld [vmem:[#allocation5 + $0xa] sm:$0xff] }
 0x304   : > { %v3878_v47 = vadd.f32 %v3862_v31, %v3762_v52 }
 0x305   : > { %v4009_v63 = vadd.f32 %v8158_v60, %v3993_v6  ;;  %v5009_v6 = vld [vmem:[%s8530_s5 + $0xe0] sm:$0xff] }
 0x307   : > { %v4021_v40 = vmax.f32 %v4009_v63, 0.0  ;;  %v4453_v63 = vld [vmem:[#allocation5 + $0x1e] sm:$0xff] }
 0x308   : > { %v4069_v10 = vld [vmem:[#allocation4 + $0x3c] sm:$0xff] }
 0x309   : > { %v4070_v16 = vmax.f32 %v4068_v51, %v4069_v10  ;;  %4034 = vst.msk [vmem:[#allocation4 + $0x48] sm:$0xff] %vm4024_vm5, %v4021_v40  ;;  %v4407_v51 = vld [vmem:[#allocation5 + $0x1d] sm:$0xff] }
 0x30a   : > { %v3978_v43 = vpop.f32.mrf.mxu2 }
 0x30b   : > { %v4072_v5 = vrot.slane %v4070_v16, 1  ;;  %v3994_v44 = vadd.f32 %v3978_v43, %v3878_v47  ;;  %v3865_v15 = vpop.f32.mrf.mxu1 }
 0x30c   : > { %v3879_v26 = vadd.f32 %v3865_v15, %v3763_v53  ;;  %v5040_v15 = vld [vmem:[%s8532_s7 + $0xb8] sm:$0xff]  ;;  %v4524_v53 = vld [vmem:[%s8532_s7 + $0x30] sm:$0xff] }
 0x30d   : > { %v4074_v57 = vmax.f32 %v4070_v16, %v4072_v5  ;;  %v4010_v46 = vadd.f32 %v8158_v60, %v3994_v44  ;;  %4570 = vmatpush.msra.mxu2 %v4524_v53 }
 0x30f   : > { %4075 = vst.msk [vmem:[#allocation5 + $0x13] sm:$0x1] %vm4049_vm6, %v4074_v57  ;;  %v4022_v2 = vmax.f32 %v4010_v46, 0.0  ;;  %v5029_v46 = vld [vmem:[%s8532_s7 + $0x70] sm:$0xff] }
 0x310   : > { %4076 = vst.msk [vmem:[#allocation5 + $0x12] sm:$0x4] %vm4051_vm7, %v4074_v57 }
 0x311   : > { %4077 = vst.msk [vmem:[#allocation5 + $0x11] sm:$0x10] %vm4053_vm8, %v4074_v57 }
 0x312   : > { %4078 = vst.msk [vmem:[#allocation5 + $0x10] sm:$0x40] %vm4055_vm9, %v4074_v57  ;;  %v3981_v17 = vpop.f32.mrf.mxu2  ;;  %v5030_v57 = vld [vmem:[%s8532_s7 + $0x78] sm:$0xff] }
 0x313   : > { %4035 = vst.msk [vmem:[#allocation4 + $0x50] sm:$0xff] %vm4024_vm5, %v4022_v2  ;;  %v3995_v48 = vadd.f32 %v3981_v17, %v3879_v26  ;;  %4547 = vmatpush.msrb.mxu1 %v5030_v57  ;;  %v5027_v17 = vld [vmem:[%s8532_s7 + $0x60] sm:$0xff] }
 0x315   : > { %v4011_v58 = vadd.f32 %v8158_v60, %v3995_v48  ;;  %v4079_v60 = vld [vmem:[#allocation4 + $0x48] sm:$0xff]  ;;  %4548 = vmatpush.msrb.mxu1 %v5029_v46 }
 0x316   : > { %v4359_v8 = vld [vmem:[#allocation5 + $0xc] sm:$0xff] }
 0x317   : > { %v4023_v45 = vmax.f32 %v4011_v58, 0.0  ;;  %5006 = vmatmul.msk.f32.vlgmr.msrb.gmra.mxu2 %vm4024_vm5, %v4359_v8  ;;  %v4405_v52 = vld [vmem:[#allocation5 + $0xd] sm:$0xff]  ;;  %4549 = vmatpush.msrb.mxu1 %v5028_v20 }
 0x318   : > { %v4451_v33 = vld [vmem:[#allocation5 + $0xe] sm:$0xff] }
 0x319   : > { %4036 = vst.msk [vmem:[#allocation4 + $0x58] sm:$0xff] %vm4024_vm5, %v4023_v45  ;;  %v4099_v59 = vld [vmem:[#allocation5 + $0x11] sm:$0xff]  ;;  %4550 = vmatpush.msrb.mxu1 %v5027_v17  ;;  %v4523_v8 = vld [vmem:[%s8532_s7 + $0x28] sm:$0xff] }
 0x31a   : > { %v4268_v9 = vld [vmem:[#allocation5 + $0xf] sm:$0xff]  ;;  %4970 = vmatmul.msk.f32.gmra.mxu3 %vm4024_vm5, %v4099_v59  ;;  %4571 = vmatpush.msra.mxu2 %v4523_v8 }
 0x31b   : > { %v4314_v55 = vld [vmem:[#allocation5 + $0x10] sm:$0xff]  ;;  %4993 = vmatmul.msk.f32.gmra.mxu0 %vm4024_vm5, %v4268_v9  ;;  %4551 = vmatpush.msrb.mxu1 %v5026_v19  ;;  %v5038_v59 = vld [vmem:[%s8532_s7 + $0xa8] sm:$0xff]  ;;  %v4522_v9 = vld [vmem:[%s8532_s7 + $0x20] sm:$0xff] }
 0x31c   : > { %5000 = vmatmul.msk.f32.gmra.mxu1 %vm4024_vm5, %v4314_v55  ;;  %v5039_v58 = vld [vmem:[%s8532_s7 + $0xb0] sm:$0xff]  ;;  %4572 = vmatpush.msra.mxu2 %v4522_v9 }
 0x31d   : > { %4552 = vmatpush.msrb.mxu1 %v5025_v4 }
 0x320   : > { %v4080_v23 = vld [vmem:[#allocation4 + $0x54] sm:$0xff] }
 0x321   : > { %v4081_v29 = vmax.f32 %v4079_v60, %v4080_v23  ;;  %v5024_v23 = vld [vmem:[%s8532_s7 + $0x48] sm:$0xff] }
 0x322   : > { %4971 = vmatmul.msk.f32.vlgmr.msra.gmra.mxu3 %vm4024_vm5, %v4090_v36  ;;  %v4521_v36 = vld [vmem:[%s8532_s7 + $0x18] sm:$0xff]  ;;  %4553 = vmatpush.msrb.mxu1 %v5024_v23 }
 0x323   : > { %v4083_v12 = vrot.slane %v4081_v29, 1  ;;  %4250 = vmatpush.msra.mxu3 %v4984_v62  ;;  %v5037_v62 = vld [vmem:[%s8532_s7 + $0xa0] sm:$0xff]  ;;  %4573 = vmatpush.msra.mxu2 %v4521_v36 }
 0x325   : > { %v4085_v41 = vmax.f32 %v4081_v29, %v4083_v12  ;;  %4251 = vmatpush.msra.mxu3 %v4983_v21  ;;  %v5023_v21 = vld [vmem:[%s8532_s7 + $0x40] sm:$0xff]  ;;  %v5036_v12 = vld [vmem:[%s8532_s7 + $0x98] sm:$0xff] }
 0x326   : > { %4554 = vmatpush.msrb.mxu1 %v5023_v21 }
 0x327   : > { %4086 = vst.msk [vmem:[#allocation5 + $0x19] sm:$0x1] %vm4049_vm6, %v4085_v41  ;;  %4252 = vmatpush.msra.mxu3 %v4982_v18 }
 0x328   : > { %4087 = vst.msk [vmem:[#allocation5 + $0x18] sm:$0x4] %vm4051_vm7, %v4085_v41 }
 0x329   : > { %4088 = vst.msk [vmem:[#allocation5 + $0x17] sm:$0x10] %vm4053_vm8, %v4085_v41  ;;  %4253 = vmatpush.msra.mxu3 %v4981_v39  ;;  %v5049_v39 = vld [vmem:[%s8532_s7 + $0xf8] sm:$0xff] }
 0x32a   : > { %4089 = vst.msk [vmem:[#allocation5 + $0x16] sm:$0x40] %vm4055_vm9, %v4085_v41  ;;  %4972 = vmatmul.msk.f32.gmra.mxu3 %vm4024_vm5, %v8244_v34  ;;  %v5011_v34 = vld [vmem:[%s8530_s5 + $0xf0] sm:$0xff]  ;;  %4641 = vmatpush.msra.mxu1 %v5049_v39  ;;  %v4665_v39 = vld [vmem:[%s8534_s9 + $0x40] sm:$0xff] }
 0x32b   : > { %v4520_v41 = vld [vmem:[%s8532_s7 + $0x10] sm:$0xff] }
 0x32c   : > { %4574 = vmatpush.msra.mxu2 %v4520_v41  ;;  %v4666_v41 = vld [vmem:[%s8534_s9 + $0x48] sm:$0xff] }
 0x32e   : > { %v4177_v31 = vld [vmem:[#allocation5 + $0x12] sm:$0xff] }
 0x330   : > { %v4360_v7 = vld [vmem:[#allocation5 + $0x14] sm:$0xff] }
 0x331   : > { %v4269_v28 = vld [vmem:[#allocation5 + $0x17] sm:$0xff]  ;;  %5007 = vmatmul.msk.f32.gmra.mxu2 %vm4024_vm5, %v4360_v7 }
 0x332   : > { %v4315_v27 = vld [vmem:[#allocation5 + $0x18] sm:$0xff]  ;;  %4973 = vmatmul.msk.f32.gmra.mxu3 %vm4024_vm5, %v4314_v55  ;;  %4994 = vmatmul.msk.f32.gmra.mxu0 %vm4024_vm5, %v4269_v28 }
 0x333   : > { %5001 = vmatmul.msk.f32.gmra.mxu1 %vm4024_vm5, %v4315_v27  ;;  %v4361_v13 = vld [vmem:[#allocation5 + $0x1c] sm:$0xff] }
 0x334   : > { %v4452_v30 = vld [vmem:[#allocation5 + $0x16] sm:$0xff] }
 0x335   : > { %v4406_v40 = vld [vmem:[#allocation5 + $0x15] sm:$0xff] }
 0x339   : > { %5008 = vmatmul.msk.f32.gmra.mxu2 %vm4024_vm5, %v4361_v13  ;;  %v5035_v13 = vld [vmem:[%s8532_s7 + $0x90] sm:$0xff] }
 0x33a   : > { %4978 = vmatmul.msk.f32.vlgmr.msrb.gmra.mxu3 %vm4024_vm5, %v4175_v35  ;;  %5020 = vmatmul.msk.f32.vlgmr.msrb.gmra.mxu0 %vm4024_vm5, %v4451_v33  ;;  %v4519_v35 = vld [vmem:[%s8532_s7 + $0x8] sm:$0xff] }
 0x33b   : > { %4434 = vmatpush.msrb.mxu3 %v5012_v14  ;;  %4575 = vmatpush.msra.mxu2 %v4519_v35  ;;  %v4659_v35 = vld [vmem:[%s8534_s9 + $0x10] sm:$0xff] }
 0x33d   : > { %4435 = vmatpush.msrb.mxu3 %v5011_v34 }
 0x33f   : > { %4436 = vmatpush.msrb.mxu3 %v5010_v38 }
 0x341   : > { %4437 = vmatpush.msrb.mxu3 %v5009_v6 }
 0x342   : > { %4979 = vmatmul.msk.f32.gmra.mxu3 %vm4024_vm5, %v4176_v11  ;;  %5021 = vmatmul.msk.f32.gmra.mxu0 %vm4024_vm5, %v4452_v30  ;;  %v5082_v11 = vld [vmem:[%s8531_s6] ss:$0 sm:$0xff] }
 0x34a   : > { %4980 = vmatmul.msk.f32.gmra.mxu3 %vm4024_vm5, %v4177_v31  ;;  %5022 = vmatmul.msk.f32.gmra.mxu0 %vm4024_vm5, %v4453_v63  ;;  %v4518_v31 = vld [vmem:[%s8532_s7] sm:$0xff] }
 0x34b   : > { %4576 = vmatpush.msra.mxu2 %v4518_v31 }
 0x352   : > { %4985 = vmatmul.msk.f32.vlgmr.msra.gmra.mxu3 %vm4024_vm5, %v4221_v61  ;;  %v5047_v61 = vld [vmem:[%s8532_s7 + $0xe8] sm:$0xff] }
 0x353   : > { %4608 = vmatpush.msra.mxu3 %v5040_v15  ;;  %v5042_v15 = vld [vmem:[%s8532_s7 + $0xc0] sm:$0xff] }
 0x355   : > { %4609 = vmatpush.msra.mxu3 %v5039_v58 }
 0x357   : > { %4610 = vmatpush.msra.mxu3 %v5038_v59 }
 0x359   : > { %4611 = vmatpush.msra.mxu3 %v5037_v62 }
 0x35a   : > { %4986 = vmatmul.msk.f32.gmra.mxu3 %vm4024_vm5, %v4451_v33  ;;  %v5048_v33 = vld [vmem:[%s8532_s7 + $0xf0] sm:$0xff] }
 0x35b   : > { %4612 = vmatpush.msra.mxu3 %v5036_v12  ;;  %4642 = vmatpush.msra.mxu1 %v5048_v33  ;;  %v4658_v33 = vld [vmem:[%s8534_s9 + $0x8] sm:$0xff] }
 0x35d   : > { %4613 = vmatpush.msra.mxu3 %v5035_v13  ;;  %4643 = vmatpush.msra.mxu1 %v5047_v61  ;;  %v4661_v13 = vld [vmem:[%s8534_s9 + $0x20] sm:$0xff] }
 0x362   : > { %4987 = vmatmul.msk.f32.gmra.mxu3 %vm4024_vm5, %v4452_v30  ;;  %v5034_v30 = vld [vmem:[%s8532_s7 + $0x88] sm:$0xff] }
 0x363   : > { %4614 = vmatpush.msra.mxu3 %v5034_v30 }
 0x36a   : > { %5013 = vmatmul.msk.f32.vlgmr.msrb.gmra.mxu3 %vm4024_vm5, %v4405_v52 }
 0x36b   : > { %v4131_v10 = vpop.f32.mrf.mxu3 }
 0x372   : > { %5014 = vmatmul.msk.f32.gmra.mxu3 %vm4024_vm5, %v4406_v40 }
 0x37a   : > { %5015 = vmatmul.msk.f32.gmra.mxu3 %vm4024_vm5, %v4407_v51  ;;  %v5033_v51 = vld [vmem:[%s8532_s7 + $0x80] sm:$0xff] }
 0x37b   : > { %4615 = vmatpush.msra.mxu3 %v5033_v51 }
 0x37d   : > { %v4301_v5 = vpop.f32.mrf.mxu0 }
 0x37f   : > { %v4347_v45 = vpop.f32.mrf.mxu1 }
 0x386   : > { %v4134_v50 = vpop.f32.mrf.mxu3 }
 0x398   : > { %v4304_v56 = vpop.f32.mrf.mxu0 }
 0x399   : > { %v4350_v6 = vpop.f32.mrf.mxu1 }
 0x39a   : > { %v4393_v29 = vpop.f32.mrf.mxu2 }
 0x39d   : > { %v4137_v47 = vpop.f32.mrf.mxu3 }
 0x3a5   : > { %v4166_v16 = vpop.f32.mrf.mxu3 }
 0x3a6   : > { %v4167_v37 = vadd.f32 %v4166_v16, %v4131_v10  ;;  %v5045_v16 = vld [vmem:[%s8532_s7 + $0xd8] sm:$0xff] }
 0x3ad   : > { %v4169_v42 = vpop.f32.mrf.mxu3 }
 0x3ae   : > { %v4170_v48 = vadd.f32 %v4169_v42, %v4134_v50  ;;  %v5046_v50 = vld [vmem:[%s8532_s7 + $0xe0] sm:$0xff] }
 0x3af   : > { %v8372_v26 = vpop.f32.mrf.mxu0  ;;  %4644 = vmatpush.msra.mxu1 %v5046_v50 }
 0x3b1   : > { %4645 = vmatpush.msra.mxu1 %v5045_v16 }
 0x3b4   : > { %v4396_v10 = vpop.f32.mrf.mxu2 }
 0x3b5   : > { %v4172_v43 = vpop.f32.mrf.mxu3 }
 0x3b6   : > { %v4173_v7 = vadd.f32 %v4172_v43, %v4137_v47 }
 0x3b7   : > { %v4485_v18 = vpop.f32.mrf.mxu0 }
 0x3bc   : > { %v4399_v20 = vpop.f32.mrf.mxu2 }
 0x3bd   : > { %v4209_v3 = vpop.f32.mrf.mxu3 }
 0x3be   : > { %v4218_v25 = vadd.f32 %v4209_v3, %v4167_v37  ;;  %v4671_v37 = vld [vmem:[%s8534_s9 + $0x70] sm:$0xff] }
 0x3c5   : > { %v4212_v32 = vpop.f32.mrf.mxu3 }
 0x3c6   : > { %v4219_v24 = vadd.f32 %v4212_v32, %v4170_v48  ;;  %v4488_v32 = vpop.f32.mrf.mxu0  ;;  %v4668_v48 = vld [vmem:[%s8534_s9 + $0x58] sm:$0xff] }
 0x3cd   : > { %v8352_v1 = vpop.f32.mrf.mxu3 }
 0x3ce   : > { %v4220_v34 = vadd.f32 %v8352_v1, %v4173_v7  ;;  %v4664_v7 = vld [vmem:[%s8534_s9 + $0x38] sm:$0xff] }
 0x3d5   : > { %v4255_v44 = vpop.f32.mrf.mxu3 }
 0x3d6   : > { %v4264_v2 = vadd.f32 %v4255_v44, %v4218_v25  ;;  %v5043_v25 = vld [vmem:[%s8532_s7 + $0xc8] sm:$0xff] }
 0x3d8   : > { %v4310_v0 = vadd.f32 %v4301_v5, %v4264_v2  ;;  %v5044_v5 = vld [vmem:[%s8532_s7 + $0xd0] sm:$0xff]  ;;  %v4669_v2 = vld [vmem:[%s8534_s9 + $0x60] sm:$0xff] }
 0x3d9   : > { %4646 = vmatpush.msra.mxu1 %v5044_v5 }
 0x3da   : > { %v4356_v60 = vadd.f32 %v4347_v45, %v4310_v0 }
 0x3db   : > { %4647 = vmatpush.msra.mxu1 %v5043_v25 }
 0x3dc   : > { %v4402_v27 = vadd.f32 %v4393_v29, %v4356_v60 }
 0x3dd   : > { %v4258_v22 = vpop.f32.mrf.mxu3  ;;  %4648 = vmatpush.msra.mxu1 %v5042_v15 }
 0x3de   : > { %v4265_v55 = vadd.f32 %v4258_v22, %v4219_v24  ;;  %v4353_v22 = vpop.f32.mrf.mxu1 }
 0x3e0   : > { %v4311_v28 = vadd.f32 %v4304_v56, %v4265_v55  ;;  %v4672_v56 = vld [vmem:[%s8534_s9 + $0x78] sm:$0xff] }
 0x3e1   : > { %4674 = vmatpush.msra.mxu0 %v4672_v56 }
 0x3e2   : > { %v4357_v40 = vadd.f32 %v4350_v6, %v4311_v28  ;;  %v4663_v28 = vld [vmem:[%s8534_s9 + $0x30] sm:$0xff] }
 0x3e3   : > { %4675 = vmatpush.msra.mxu0 %v4671_v37 }
 0x3e4   : > { %v4403_v3 = vadd.f32 %v4396_v10, %v4357_v40  ;;  %v4673_v10 = vld [vmem:[%s8535_s10] sm:$0x1] }
 0x3e5   : > { %v4261_v54 = vpop.f32.mrf.mxu3  ;;  %4676 = vmatpush.msra.mxu0 %v4670_v49 }
 0x3e6   : > { %v4266_v63 = vadd.f32 %v4261_v54, %v4220_v34  ;;  %v4491_v54 = vpop.f32.mrf.mxu0  ;;  %v4657_v34 = vld [vmem:[%s8534_s9] sm:$0xff] }
 0x3e7   : > { %4677 = vmatpush.msra.mxu0 %v4669_v2 }
 0x3e8   : > { %v4312_v42 = vadd.f32 %v8372_v26, %v4266_v63  ;;  %v4654_v63 = vld [vmem:[%s8533_s8] sm:$0x1] }
 0x3e9   : > { %4678 = vmatpush.msra.mxu0 %v4668_v48 }
 0x3ea   : > { %v4358_v46 = vadd.f32 %v4353_v22, %v4312_v42 }
 0x3ec   : > { %v4404_v17 = vadd.f32 %v4399_v20, %v4358_v46 }
 0x3ed   : > { %v4439_v14 = vpop.f32.mrf.mxu3 }
 0x3ee   : > { %v4448_v38 = vadd.f32 %v4439_v14, %v4402_v27  ;;  %v4662_v27 = vld [vmem:[%s8534_s9 + $0x28] sm:$0xff]  ;;  %v4660_v14 = vld [vmem:[%s8534_s9 + $0x18] sm:$0xff] }
 0x3f0   : > { %v4494_v52 = vadd.f32 %v4485_v18, %v4448_v38  ;;  %v4667_v18 = vld [vmem:[%s8534_s9 + $0x50] sm:$0xff] }
 0x3f1   : > { %4679 = vmatpush.msra.mxu0 %v4667_v18 }
 0x3f2   : > { %v4501_v47 = vadd.f32 %v5082_v11, %v4494_v52 }
 0x3f3   : > { %4680 = vmatpush.msra.mxu0 %v4666_v41 }
 0x3f4   : > { %v4504_v43 = vmax.f32 %v4501_v47, 0.0 }
 0x3f5   : > { %v4442_v1 = vpop.f32.mrf.mxu3  ;;  %4681 = vmatpush.msra.mxu0 %v4665_v39 }
 0x3f6   : > { %4508 = vst.msk [vmem:[#allocation6] sm:$0xff] %vm4507_vm10, %v4504_v43  ;;  %v4449_v44 = vadd.f32 %v4442_v1, %v4403_v3 }
 0x3f7   : > { %4682 = vmatpush.msra.mxu0 %v4664_v7 }
 0x3f8   : > { %v4495_v57 = vadd.f32 %v4488_v32, %v4449_v44 }
 0x3f9   : > { %4683 = vmatpush.msra.mxu0 %v4663_v28 }
 0x3fa   : > { %v4502_v53 = vadd.f32 %v5082_v11, %v4495_v57 }
 0x3fb   : > { %4684 = vmatpush.msra.mxu0 %v4662_v27 }
 0x3fc   : > { %v4505_v26 = vmax.f32 %v4502_v53, 0.0 }
 0x3fd   : > { %v4445_v0 = vpop.f32.mrf.mxu3  ;;  %v4511_v45 = vld [vmem:[#allocation6] sm:$0xf]  ;;  %4685 = vmatpush.msra.mxu0 %v4661_v13 }
 0x3fe   : > { %4509 = vst.msk [vmem:[#allocation6 + $0x8] sm:$0xff] %vm4507_vm10, %v4505_v26  ;;  %v4450_v24 = vadd.f32 %v4445_v0, %v4404_v17 }
 0x3ff   : > { %4686 = vmatpush.msra.mxu0 %v4660_v14 }
 0x400   : > { %v4496_v58 = vadd.f32 %v4491_v54, %v4450_v24 }
 0x401   : > { %4687 = vmatpush.msra.mxu0 %v4659_v35 }
 0x402   : > { %v4503_v19 = vadd.f32 %v5082_v11, %v4496_v58 }
 0x403   : > { %4688 = vmatpush.msra.mxu0 %v4658_v33 }
 0x404   : > { %v4506_v8 = vmax.f32 %v4503_v19, 0.0 }
 0x405   : > { %v4512_v4 = vld [vmem:[#allocation6 + $0x6] sm:$0xf]  ;;  %v4581_v23 = vld [vmem:[#allocation6 + $0xc] sm:$0xf]  ;;  %4689 = vmatpush.msra.mxu0 %v4657_v34 }
 0x406   : > { %4510 = vst.msk [vmem:[#allocation6 + $0x10] sm:$0xff] %vm4507_vm10, %v4506_v8  ;;  %v4513_v59 = vmax.f32 %v4511_v45, %v4512_v4 }
 0x408   : > { %v4515_v9 = vrot.slane %v4513_v59, 1 }
 0x40a   : > { %v4517_v55 = vmax.f32 %v4513_v59, %v4515_v9 }
 0x40c   : > { %5032 = vmatmul.msk.f32.vlgmr.msra.gmra.mxu2 %vm4507_vm10, %v4517_v55  ;;  %v4536_v60 = vrot.slane %v4517_v55, 2 }
 0x40d   : > { %v4582_v62 = vld [vmem:[#allocation6 + $0x12] sm:$0xf] }
 0x40e   : > { %5031 = vmatmul.msk.f32.vlgmr.msrb.gmra.mxu1 %vm4507_vm10, %v4536_v60  ;;  %v4583_v29 = vmax.f32 %v4581_v23, %v4582_v62 }
 0x410   : > { %v4585_v36 = vrot.slane %v4583_v29, 1 }
 0x412   : > { %v4587_v21 = vmax.f32 %v4583_v29, %v4585_v36 }
 0x414   : > { %5041 = vmatmul.msk.f32.vlgmr.msra.gmra.mxu3 %vm4507_vm10, %v4587_v21  ;;  %v4630_v12 = vrot.slane %v4587_v21, 2 }
 0x416   : > { %5050 = vmatmul.msk.f32.vlgmr.msra.gmra.mxu1 %vm4507_vm10, %v4630_v12 }
 0x48b   : > { %v4556_v38 = vpop.f32.mrf.mxu1 }
 0x48f   : > { %v4578_v11 = vpop.f32.mrf.mxu2 }
 0x490   : > { %v4579_v30 = vadd.f32 %v4578_v11, %v4556_v38 }
 0x493   : > { %v4650_v61 = vpop.f32.mrf.mxu1 }
 0x497   : > { %v4617_v6 = vpop.f32.mrf.mxu3 }
 0x498   : > { %v4620_v31 = vadd.f32 %v4617_v6, %v4579_v30 }
 0x49a   : > { %v4653_v52 = vadd.f32 %v4650_v61, %v4620_v31 }
 0x49c   : > { %v4655_v40 = vadd.f32 %v4654_v63, %v4653_v52 }
 0x49e   : > { %v4656_v51 = vmax.f32 %v4655_v40, 0.0 }
 0x4a0   : > { %4690 = vmatmul.f32.vlgmr.msra.gmra.mxu0 %v4656_v51 }
 0x51d   : > { %v4691_v50 = vpop.f32.mrf.mxu0 }
 0x51e   : > { %v4692_v47 = vadd.f32 %v4691_v50, %v4673_v10 }
 0x520   : > { %v4694_v16 = vperm.slane %v4692_v47, 0 }
 0x522   : > { %4695 = vst [vmem:[%s384_s15] sm:$0xff] %v4694_v16 }
 0x523 PF: > { %s21_s17 = sadd.s32 1, %s5163_s17  }
 0x524   : > { %p18_p4 = scmp.ge.s32.totalorder %s21_s17, 4  }
 0x526   :  { %20 = sbr.rel (!%p18_p4) target bundleno = 1 (0x1), region = 119 }

</bundles_post_ra>
